<compile_context>
chip_gen: v7x
topology: tpu7x:2x2x1
jax: 0.10.0
libtpu: 0.0.40
codegen_flags: <defaults>
</compile_context>

<pallas_src>
import jax
import jax.numpy as jnp
from jax.experimental import pallas as pl
from jax.experimental.pallas import tpu as pltpu


# ----------------------------------------------------------------------------
# Pallas kernel: backbone stand-ins + exact fused head (one batch tile per step)
# ----------------------------------------------------------------------------
def hybrid_kernel(x_ref, patches_ref,
                  w_stem_ref, b_stem_ref, w_patch_ref, b_patch_ref,
                  w_r_ref, b_r_ref, w_v_ref, b_v_ref,
                  w1r_ref, w1v_ref, b1_ref, w2_ref, b2_ref,
                  out_ref):
    f32 = jnp.float32
    bf16 = jnp.bfloat16

    # ---- ResNet-branch stand-in: global average pool (lane reduce) + Linear + ReLU
    # TODO(synk): pretrained ResNet50 trunk replaced by GAP -> Linear stand-in.
    gap = jnp.mean(x_ref[...].astype(f32), axis=-1)                       # [TB, C]
    resnet_feat = jnp.maximum(
        jnp.dot(gap, w_stem_ref[...], preferred_element_type=f32)
        + b_stem_ref[...], 0.0)                                           # [TB, 2048]

    # ---- ViT-branch stand-in: pool patches BEFORE the (linear) patch embedding.
    # TODO(synk): pretrained ViT-B/16 trunk replaced by patch-embed + mean "CLS".
    pmean = jnp.mean(patches_ref[...].astype(f32), axis=1)                # [TB, Pd]
    vit_cls = (jnp.dot(pmean.astype(bf16), w_patch_ref[...],
                       preferred_element_type=f32)
               + b_patch_ref[...])                                        # [TB, 768]

    # ---- Exact head semantics of the PyTorch module ----
    # resnet_features = self.resnet_fc(resnet_features)       : 2048 -> 512
    r = jnp.dot(resnet_feat.astype(bf16), w_r_ref[...],
                preferred_element_type=f32) + b_r_ref[...]                # [TB, 512]
    # vit_features = self.vit_fc(cls)                          : 768 -> 512
    v = jnp.dot(vit_cls.astype(bf16), w_v_ref[...],
                preferred_element_type=f32) + b_v_ref[...]                # [TB, 512]
    # fc = ReLU -> Linear(1024,256) -> ReLU -> Linear(256,NC)
    # ReLU(cat(r, v)) @ w1  ==  ReLU(r) @ w1[:512] + ReLU(v) @ w1[512:]  (no concat copy)
    r = jnp.maximum(r, 0.0)
    v = jnp.maximum(v, 0.0)
    h = (jnp.dot(r.astype(bf16), w1r_ref[...], preferred_element_type=f32)
         + jnp.dot(v.astype(bf16), w1v_ref[...], preferred_element_type=f32)
         + b1_ref[...])
    h = jnp.maximum(h, 0.0)
    out_ref[...] = (jnp.dot(h.astype(bf16), w2_ref[...],
                            preferred_element_type=f32)
                    + b2_ref[...]).astype(out_ref.dtype)                  # [TB, NCpad]


# ----------------------------------------------------------------------------
# Parameter construction (deterministic, in-script)
# ----------------------------------------------------------------------------
def make_params(key, patch_dim, num_classes, cin=3):
    ks = jax.random.split(key, 6)

    def lin(k, fan_in, fan_out):
        scale = 1.0 / jnp.sqrt(jnp.float32(fan_in))
        w = jax.random.normal(k, (fan_in, fan_out), jnp.float32) * scale
        b = jnp.zeros((1, fan_out), jnp.float32)
        return w, b

    p = {}
    p["w_stem"], p["b_stem"] = lin(ks[0], cin, 2048)         # resnet trunk stand-in
    p["w_patch"], p["b_patch"] = lin(ks[1], patch_dim, 768)  # vit patch-embed stand-in
    p["w_r"], p["b_r"] = lin(ks[2], 2048, 512)               # resnet_fc
    p["w_v"], p["b_v"] = lin(ks[3], 768, 512)                # vit_fc
    p["w1"], p["b1"] = lin(ks[4], 1024, 256)                 # fc[1]
    p["w2"], p["b2"] = lin(ks[5], 256, num_classes)          # fc[3]
    return p


# ----------------------------------------------------------------------------
# Wrapper: layout glue, bf16 casts, padding, grid over batch
# ----------------------------------------------------------------------------
def hybrid_vit_resnet_forward(x, params, patch_size=16, batch_tile=8):
    """x: [B, C, H, W] float32 (NCHW, PyTorch convention)."""
    B, C, H, W = x.shape
    ps = patch_size
    nh, nw = H // ps, W // ps
    n_patches = nh * nw
    patch_dim = ps * ps * C
    num_classes = params["w2"].shape[1]
    nc_pad = max(128, ((num_classes + 127) // 128) * 128)   # lane-dense output

    TB = batch_tile
    B_pad = ((B + TB - 1) // TB) * TB

    bf16, f32 = jnp.bfloat16, jnp.float32

    # lane-dense pixel slab: [B, C, H*W]  (long spatial dim on the lane axis)
    x_chw = x.reshape(B, C, H * W).astype(bf16)
    # non-overlapping patches: [B, Npatch, ps*ps*C] (channels-last within a patch)
    x_nhwc = jnp.transpose(x, (0, 2, 3, 1))
    patches = (x_nhwc.reshape(B, nh, ps, nw, ps, C)
               .transpose(0, 1, 3, 2, 4, 5)
               .reshape(B, n_patches, patch_dim)).astype(bf16)

    if B_pad != B:
        x_chw = jnp.pad(x_chw, ((0, B_pad - B), (0, 0), (0, 0)))
        patches = jnp.pad(patches, ((0, B_pad - B), (0, 0), (0, 0)))

    # Weights: bf16 for the big matmuls (f32 accumulate in-kernel); biases f32.
    w_stem = params["w_stem"].astype(f32)            # K=3, keep f32 (negligible)
    b_stem = params["b_stem"].astype(f32)
    w_patch = params["w_patch"].astype(bf16)
    b_patch = params["b_patch"].astype(f32)
    w_r = params["w_r"].astype(bf16)
    b_r = params["b_r"].astype(f32)
    w_v = params["w_v"].astype(bf16)
    b_v = params["b_v"].astype(f32)
    w1 = params["w1"]
    w1_r = w1[:512, :].astype(bf16)                  # concat eliminated: split w1
    w1_v = w1[512:, :].astype(bf16)
    b1 = params["b1"].astype(f32)
    w2 = jnp.zeros((256, nc_pad), bf16).at[:, :num_classes].set(
        params["w2"].astype(bf16))
    b2 = jnp.zeros((1, nc_pad), f32).at[:, :num_classes].set(
        params["b2"].astype(f32))

    args = (x_chw, patches, w_stem, b_stem, w_patch, b_patch,
            w_r, b_r, w_v, b_v, w1_r, w1_v, b1, w2, b2)

    def const2(shape):
        # weights / biases: resident across the batch grid (constant block index)
        return pl.BlockSpec(shape, lambda i: (0, 0))

    in_specs = [
        pl.BlockSpec((TB, C, H * W), lambda i: (i, 0, 0)),
        pl.BlockSpec((TB, n_patches, patch_dim), lambda i: (i, 0, 0)),
        const2((C, 2048)), const2((1, 2048)),
        const2((patch_dim, 768)), const2((1, 768)),
        const2((2048, 512)), const2((1, 512)),
        const2((768, 512)), const2((1, 512)),
        const2((512, 256)), const2((512, 256)), const2((1, 256)),
        const2((256, nc_pad)), const2((1, nc_pad)),
    ]
    out_specs = pl.BlockSpec((TB, nc_pad), lambda i: (i, 0))

    # Advisory cost + VMEM sizing from the real working set.
    flops = 2 * B_pad * (C * 2048 + patch_dim * 768 + 2048 * 512 + 768 * 512
                         + 512 * 256 * 2 + 256 * nc_pad)
    flops += B_pad * (C * H * W + n_patches * patch_dim)   # pooling reductions
    in_bytes = sum(int(a.size) * a.dtype.itemsize for a in args)
    out_bytes = B_pad * nc_pad * 4
    cost = pl.CostEstimate(flops=flops, transcendentals=0,
                           bytes_accessed=in_bytes + out_bytes)
    vmem_limit = min(48 * 1024 * 1024,                      # safe even on v7x (64 MiB)
                     2 * (in_bytes + out_bytes) + 8 * 1024 * 1024)

    out = pl.pallas_call(
        hybrid_kernel,
        grid=(B_pad // TB,),
        in_specs=in_specs,
        out_specs=out_specs,
        out_shape=jax.ShapeDtypeStruct((B_pad, nc_pad), jnp.float32),
        compiler_params=pltpu.CompilerParams(
            dimension_semantics=("parallel",),
            vmem_limit_bytes=vmem_limit),
        cost_estimate=cost,
    )(*args)

    return out[:B, :num_classes]


# ----------------------------------------------------------------------------
if __name__ == "__main__":
    key = jax.random.PRNGKey(0)
    k_x, k_p = jax.random.split(key)

    B, C, H, W = 2, 3, 32, 32          # small image, 16x16 patches -> 4 patches
    num_classes = 10
    patch_size = 16
    patch_dim = patch_size * patch_size * C

    x = jax.random.normal(k_x, (B, C, H, W), jnp.float32)
    params = make_params(k_p, patch_dim=patch_dim, num_classes=num_classes, cin=C)

    out = hybrid_vit_resnet_forward(x, params, patch_size=patch_size)
    out = jax.block_until_ready(out)

    assert out.shape == (B, num_classes), out.shape
    assert out.dtype == jnp.float32
    print("KERNEL_OK")
</pallas_src>

<mosaic_0001>
module attributes {stable_mosaic.version = 11 : i64} {
  func.func @hybrid_kernel(%arg0: i32, %arg1: memref<8x3x1024xbf16, #tpu.memory_space<vmem>>, %arg2: memref<8x4x768xbf16, #tpu.memory_space<vmem>>, %arg3: memref<3x2048xf32, #tpu.memory_space<vmem>>, %arg4: memref<1x2048xf32, #tpu.memory_space<vmem>>, %arg5: memref<768x768xbf16, #tpu.memory_space<vmem>>, %arg6: memref<1x768xf32, #tpu.memory_space<vmem>>, %arg7: memref<2048x512xbf16, #tpu.memory_space<vmem>>, %arg8: memref<1x512xf32, #tpu.memory_space<vmem>>, %arg9: memref<768x512xbf16, #tpu.memory_space<vmem>>, %arg10: memref<1x512xf32, #tpu.memory_space<vmem>>, %arg11: memref<512x256xbf16, #tpu.memory_space<vmem>>, %arg12: memref<512x256xbf16, #tpu.memory_space<vmem>>, %arg13: memref<1x256xf32, #tpu.memory_space<vmem>>, %arg14: memref<256x128xbf16, #tpu.memory_space<vmem>>, %arg15: memref<1x128xf32, #tpu.memory_space<vmem>>, %arg16: memref<8x128xf32, #tpu.memory_space<vmem>>) attributes {dimension_semantics = [#tpu.dimension_semantics<parallel>], iteration_bounds = array<i64: 1>, scalar_prefetch = 0 : i64, scratch_operands = 0 : i64, tpu.core_type = #tpu.core_type<tc>, window_params = [{transform_indices = @transform_0, window_bounds = array<i64: 8, 3, 1024>}, {transform_indices = @transform_1, window_bounds = array<i64: 8, 4, 768>}, {pipeline_mode = #tpu.pipeline_mode<synchronous>, transform_indices = @transform_2, window_bounds = array<i64: 3, 2048>}, {pipeline_mode = #tpu.pipeline_mode<synchronous>, transform_indices = @transform_3, window_bounds = array<i64: 1, 2048>}, {pipeline_mode = #tpu.pipeline_mode<synchronous>, transform_indices = @transform_4, window_bounds = array<i64: 768, 768>}, {pipeline_mode = #tpu.pipeline_mode<synchronous>, transform_indices = @transform_5, window_bounds = array<i64: 1, 768>}, {pipeline_mode = #tpu.pipeline_mode<synchronous>, transform_indices = @transform_6, window_bounds = array<i64: 2048, 512>}, {pipeline_mode = #tpu.pipeline_mode<synchronous>, transform_indices = @transform_7, window_bounds = array<i64: 1, 512>}, {pipeline_mode = #tpu.pipeline_mode<synchronous>, transform_indices = @transform_8, window_bounds = array<i64: 768, 512>}, {pipeline_mode = #tpu.pipeline_mode<synchronous>, transform_indices = @transform_9, window_bounds = array<i64: 1, 512>}, {pipeline_mode = #tpu.pipeline_mode<synchronous>, transform_indices = @transform_10, window_bounds = array<i64: 512, 256>}, {pipeline_mode = #tpu.pipeline_mode<synchronous>, transform_indices = @transform_11, window_bounds = array<i64: 512, 256>}, {pipeline_mode = #tpu.pipeline_mode<synchronous>, transform_indices = @transform_12, window_bounds = array<i64: 1, 256>}, {pipeline_mode = #tpu.pipeline_mode<synchronous>, transform_indices = @transform_13, window_bounds = array<i64: 256, 128>}, {pipeline_mode = #tpu.pipeline_mode<synchronous>, transform_indices = @transform_14, window_bounds = array<i64: 1, 128>}, {transform_indices = @transform_15, window_bounds = array<i64: 8, 128>}]} {
    %c0 = arith.constant 0 : index
    %c0_0 = arith.constant 0 : index
    %c0_1 = arith.constant 0 : index
    %0 = vector.load %arg1[%c0, %c0_0, %c0_1] : memref<8x3x1024xbf16, #tpu.memory_space<vmem>>, vector<8x3x1024xbf16>
    %1 = arith.extf %0 : vector<8x3x1024xbf16> to vector<8x3x1024xf32>
    %cst = arith.constant dense<0.000000e+00> : vector<8x3xf32>
    %2 = vector.multi_reduction <add>, %1, %cst [2] : vector<8x3x1024xf32> to vector<8x3xf32>
    %cst_2 = arith.constant 1.024000e+03 : f32
    %3 = vector.broadcast %cst_2 : f32 to vector<8x3xf32>
    %4 = arith.divf %2, %3 : vector<8x3xf32>
    %c0_3 = arith.constant 0 : index
    %c0_4 = arith.constant 0 : index
    %5 = vector.load %arg3[%c0_3, %c0_4] : memref<3x2048xf32, #tpu.memory_space<vmem>>, vector<3x2048xf32>
    %cst_5 = arith.constant dense<0.000000e+00> : vector<8x2048xf32>
    %6 = tpu.matmul %4, %5, %cst_5 {dimension_numbers = #tpu.dot_dimension_numbers<[1], [0], [0], [1], [0, 0, 1, 1], [], []>} : vector<8x3xf32>, vector<3x2048xf32>, vector<8x2048xf32> -> vector<8x2048xf32>
    %c0_6 = arith.constant 0 : index
    %c0_7 = arith.constant 0 : index
    %7 = vector.load %arg4[%c0_6, %c0_7] : memref<1x2048xf32, #tpu.memory_space<vmem>>, vector<1x2048xf32>
    %8 = vector.broadcast %7 : vector<1x2048xf32> to vector<8x2048xf32>
    %9 = arith.addf %6, %8 : vector<8x2048xf32>
    %cst_8 = arith.constant 0.000000e+00 : f32
    %10 = vector.broadcast %cst_8 : f32 to vector<8x2048xf32>
    %11 = arith.maximumf %9, %10 : vector<8x2048xf32>
    %c0_9 = arith.constant 0 : index
    %c0_10 = arith.constant 0 : index
    %c0_11 = arith.constant 0 : index
    %12 = vector.load %arg2[%c0_9, %c0_10, %c0_11] : memref<8x4x768xbf16, #tpu.memory_space<vmem>>, vector<8x4x768xbf16>
    %13 = arith.extf %12 : vector<8x4x768xbf16> to vector<8x4x768xf32>
    %cst_12 = arith.constant dense<0.000000e+00> : vector<8x768xf32>
    %14 = vector.multi_reduction <add>, %13, %cst_12 [1] : vector<8x4x768xf32> to vector<8x768xf32>
    %cst_13 = arith.constant 4.000000e+00 : f32
    %15 = vector.broadcast %cst_13 : f32 to vector<8x768xf32>
    %16 = arith.divf %14, %15 : vector<8x768xf32>
    %17 = arith.truncf %16 : vector<8x768xf32> to vector<8x768xbf16>
    %c0_14 = arith.constant 0 : index
    %c0_15 = arith.constant 0 : index
    %18 = vector.load %arg5[%c0_14, %c0_15] : memref<768x768xbf16, #tpu.memory_space<vmem>>, vector<768x768xbf16>
    %cst_16 = arith.constant dense<0.000000e+00> : vector<8x768xf32>
    %19 = tpu.matmul %17, %18, %cst_16 {dimension_numbers = #tpu.dot_dimension_numbers<[1], [0], [0], [1], [0, 0, 1, 1], [], []>} : vector<8x768xbf16>, vector<768x768xbf16>, vector<8x768xf32> -> vector<8x768xf32>
    %c0_17 = arith.constant 0 : index
    %c0_18 = arith.constant 0 : index
    %20 = vector.load %arg6[%c0_17, %c0_18] : memref<1x768xf32, #tpu.memory_space<vmem>>, vector<1x768xf32>
    %21 = vector.broadcast %20 : vector<1x768xf32> to vector<8x768xf32>
    %22 = arith.addf %19, %21 : vector<8x768xf32>
    %23 = arith.truncf %11 : vector<8x2048xf32> to vector<8x2048xbf16>
    %c0_19 = arith.constant 0 : index
    %c0_20 = arith.constant 0 : index
    %24 = vector.load %arg7[%c0_19, %c0_20] : memref<2048x512xbf16, #tpu.memory_space<vmem>>, vector<2048x512xbf16>
    %cst_21 = arith.constant dense<0.000000e+00> : vector<8x512xf32>
    %25 = tpu.matmul %23, %24, %cst_21 {dimension_numbers = #tpu.dot_dimension_numbers<[1], [0], [0], [1], [0, 0, 1, 1], [], []>} : vector<8x2048xbf16>, vector<2048x512xbf16>, vector<8x512xf32> -> vector<8x512xf32>
    %c0_22 = arith.constant 0 : index
    %c0_23 = arith.constant 0 : index
    %26 = vector.load %arg8[%c0_22, %c0_23] : memref<1x512xf32, #tpu.memory_space<vmem>>, vector<1x512xf32>
    %27 = vector.broadcast %26 : vector<1x512xf32> to vector<8x512xf32>
    %28 = arith.addf %25, %27 : vector<8x512xf32>
    %29 = arith.truncf %22 : vector<8x768xf32> to vector<8x768xbf16>
    %c0_24 = arith.constant 0 : index
    %c0_25 = arith.constant 0 : index
    %30 = vector.load %arg9[%c0_24, %c0_25] : memref<768x512xbf16, #tpu.memory_space<vmem>>, vector<768x512xbf16>
    %cst_26 = arith.constant dense<0.000000e+00> : vector<8x512xf32>
    %31 = tpu.matmul %29, %30, %cst_26 {dimension_numbers = #tpu.dot_dimension_numbers<[1], [0], [0], [1], [0, 0, 1, 1], [], []>} : vector<8x768xbf16>, vector<768x512xbf16>, vector<8x512xf32> -> vector<8x512xf32>
    %c0_27 = arith.constant 0 : index
    %c0_28 = arith.constant 0 : index
    %32 = vector.load %arg10[%c0_27, %c0_28] : memref<1x512xf32, #tpu.memory_space<vmem>>, vector<1x512xf32>
    %33 = vector.broadcast %32 : vector<1x512xf32> to vector<8x512xf32>
    %34 = arith.addf %31, %33 : vector<8x512xf32>
    %cst_29 = arith.constant 0.000000e+00 : f32
    %35 = vector.broadcast %cst_29 : f32 to vector<8x512xf32>
    %36 = arith.maximumf %28, %35 : vector<8x512xf32>
    %cst_30 = arith.constant 0.000000e+00 : f32
    %37 = vector.broadcast %cst_30 : f32 to vector<8x512xf32>
    %38 = arith.maximumf %34, %37 : vector<8x512xf32>
    %39 = arith.truncf %36 : vector<8x512xf32> to vector<8x512xbf16>
    %c0_31 = arith.constant 0 : index
    %c0_32 = arith.constant 0 : index
    %40 = vector.load %arg11[%c0_31, %c0_32] : memref<512x256xbf16, #tpu.memory_space<vmem>>, vector<512x256xbf16>
    %cst_33 = arith.constant dense<0.000000e+00> : vector<8x256xf32>
    %41 = tpu.matmul %39, %40, %cst_33 {dimension_numbers = #tpu.dot_dimension_numbers<[1], [0], [0], [1], [0, 0, 1, 1], [], []>} : vector<8x512xbf16>, vector<512x256xbf16>, vector<8x256xf32> -> vector<8x256xf32>
    %42 = arith.truncf %38 : vector<8x512xf32> to vector<8x512xbf16>
    %c0_34 = arith.constant 0 : index
    %c0_35 = arith.constant 0 : index
    %43 = vector.load %arg12[%c0_34, %c0_35] : memref<512x256xbf16, #tpu.memory_space<vmem>>, vector<512x256xbf16>
    %cst_36 = arith.constant dense<0.000000e+00> : vector<8x256xf32>
    %44 = tpu.matmul %42, %43, %cst_36 {dimension_numbers = #tpu.dot_dimension_numbers<[1], [0], [0], [1], [0, 0, 1, 1], [], []>} : vector<8x512xbf16>, vector<512x256xbf16>, vector<8x256xf32> -> vector<8x256xf32>
    %45 = arith.addf %41, %44 : vector<8x256xf32>
    %c0_37 = arith.constant 0 : index
    %c0_38 = arith.constant 0 : index
    %46 = vector.load %arg13[%c0_37, %c0_38] : memref<1x256xf32, #tpu.memory_space<vmem>>, vector<1x256xf32>
    %47 = vector.broadcast %46 : vector<1x256xf32> to vector<8x256xf32>
    %48 = arith.addf %45, %47 : vector<8x256xf32>
    %cst_39 = arith.constant 0.000000e+00 : f32
    %49 = vector.broadcast %cst_39 : f32 to vector<8x256xf32>
    %50 = arith.maximumf %48, %49 : vector<8x256xf32>
    %51 = arith.truncf %50 : vector<8x256xf32> to vector<8x256xbf16>
    %c0_40 = arith.constant 0 : index
    %c0_41 = arith.constant 0 : index
    %52 = vector.load %arg14[%c0_40, %c0_41] : memref<256x128xbf16, #tpu.memory_space<vmem>>, vector<256x128xbf16>
    %cst_42 = arith.constant dense<0.000000e+00> : vector<8x128xf32>
    %53 = tpu.matmul %51, %52, %cst_42 {dimension_numbers = #tpu.dot_dimension_numbers<[1], [0], [0], [1], [0, 0, 1, 1], [], []>} : vector<8x256xbf16>, vector<256x128xbf16>, vector<8x128xf32> -> vector<8x128xf32>
    %c0_43 = arith.constant 0 : index
    %c0_44 = arith.constant 0 : index
    %54 = vector.load %arg15[%c0_43, %c0_44] : memref<1x128xf32, #tpu.memory_space<vmem>>, vector<1x128xf32>
    %55 = vector.broadcast %54 : vector<1x128xf32> to vector<8x128xf32>
    %56 = arith.addf %53, %55 : vector<8x128xf32>
    %c0_45 = arith.constant 0 : index
    %c0_46 = arith.constant 0 : index
    %57 = vector.load %arg16[%c0_45, %c0_46] : memref<8x128xf32, #tpu.memory_space<vmem>>, vector<8x128xf32>
    tpu.vector_store %arg16[%c0_45, %c0_46], %56 {strides = array<i32>} : memref<8x128xf32, #tpu.memory_space<vmem>>, vector<8x128xf32>,
    return
  }
  func.func @transform_0(%arg0: i32) -> (i32, i32, i32) {
    %c0_i32 = arith.constant 0 : i32
    %c0_i32_0 = arith.constant 0 : i32
    %c0_i32_1 = arith.constant 0 : i32
    return %arg0, %c0_i32, %c0_i32_0 : i32, i32, i32
  }
  func.func @transform_1(%arg0: i32) -> (i32, i32, i32) {
    %c0_i32 = arith.constant 0 : i32
    %c0_i32_0 = arith.constant 0 : i32
    %c0_i32_1 = arith.constant 0 : i32
    return %arg0, %c0_i32, %c0_i32_0 : i32, i32, i32
  }
  func.func @transform_2(%arg0: i32) -> (i32, i32) {
    %c0_i32 = arith.constant 0 : i32
    %c0_i32_0 = arith.constant 0 : i32
    %c0_i32_1 = arith.constant 0 : i32
    return %c0_i32, %c0_i32_0 : i32, i32
  }
  func.func @transform_3(%arg0: i32) -> (i32, i32) {
    %c0_i32 = arith.constant 0 : i32
    %c0_i32_0 = arith.constant 0 : i32
    %c0_i32_1 = arith.constant 0 : i32
    return %c0_i32, %c0_i32_0 : i32, i32
  }
  func.func @transform_4(%arg0: i32) -> (i32, i32) {
    %c0_i32 = arith.constant 0 : i32
    %c0_i32_0 = arith.constant 0 : i32
    %c0_i32_1 = arith.constant 0 : i32
    return %c0_i32, %c0_i32_0 : i32, i32
  }
  func.func @transform_5(%arg0: i32) -> (i32, i32) {
    %c0_i32 = arith.constant 0 : i32
    %c0_i32_0 = arith.constant 0 : i32
    %c0_i32_1 = arith.constant 0 : i32
    return %c0_i32, %c0_i32_0 : i32, i32
  }
  func.func @transform_6(%arg0: i32) -> (i32, i32) {
    %c0_i32 = arith.constant 0 : i32
    %c0_i32_0 = arith.constant 0 : i32
    %c0_i32_1 = arith.constant 0 : i32
    return %c0_i32, %c0_i32_0 : i32, i32
  }
  func.func @transform_7(%arg0: i32) -> (i32, i32) {
    %c0_i32 = arith.constant 0 : i32
    %c0_i32_0 = arith.constant 0 : i32
    %c0_i32_1 = arith.constant 0 : i32
    return %c0_i32, %c0_i32_0 : i32, i32
  }
  func.func @transform_8(%arg0: i32) -> (i32, i32) {
    %c0_i32 = arith.constant 0 : i32
    %c0_i32_0 = arith.constant 0 : i32
    %c0_i32_1 = arith.constant 0 : i32
    return %c0_i32, %c0_i32_0 : i32, i32
  }
  func.func @transform_9(%arg0: i32) -> (i32, i32) {
    %c0_i32 = arith.constant 0 : i32
    %c0_i32_0 = arith.constant 0 : i32
    %c0_i32_1 = arith.constant 0 : i32
    return %c0_i32, %c0_i32_0 : i32, i32
  }
  func.func @transform_10(%arg0: i32) -> (i32, i32) {
    %c0_i32 = arith.constant 0 : i32
    %c0_i32_0 = arith.constant 0 : i32
    %c0_i32_1 = arith.constant 0 : i32
    return %c0_i32, %c0_i32_0 : i32, i32
  }
  func.func @transform_11(%arg0: i32) -> (i32, i32) {
    %c0_i32 = arith.constant 0 : i32
    %c0_i32_0 = arith.constant 0 : i32
    %c0_i32_1 = arith.constant 0 : i32
    return %c0_i32, %c0_i32_0 : i32, i32
  }
  func.func @transform_12(%arg0: i32) -> (i32, i32) {
    %c0_i32 = arith.constant 0 : i32
    %c0_i32_0 = arith.constant 0 : i32
    %c0_i32_1 = arith.constant 0 : i32
    return %c0_i32, %c0_i32_0 : i32, i32
  }
  func.func @transform_13(%arg0: i32) -> (i32, i32) {
    %c0_i32 = arith.constant 0 : i32
    %c0_i32_0 = arith.constant 0 : i32
    %c0_i32_1 = arith.constant 0 : i32
    return %c0_i32, %c0_i32_0 : i32, i32
  }
  func.func @transform_14(%arg0: i32) -> (i32, i32) {
    %c0_i32 = arith.constant 0 : i32
    %c0_i32_0 = arith.constant 0 : i32
    %c0_i32_1 = arith.constant 0 : i32
    return %c0_i32, %c0_i32_0 : i32, i32
  }
  func.func @transform_15(%arg0: i32) -> (i32, i32) {
    %c0_i32 = arith.constant 0 : i32
    %c0_i32_0 = arith.constant 0 : i32
    return %arg0, %c0_i32 : i32, i32
  }
}

</mosaic_0001>

<bundles_post_ra>
// kernel: tpu_custom_call.1
= control target key start
LH: loop header
LB: loop body
LE: loop exit
PB: predicated region body
PF: predicated region fallthrough
CT: control target
= control target key end

     0   :  { %20 = vsyncpa [#allocation3], 0  ;;  %s14799_s0 = inlined_call_operand.vmem [shape: bf16[8,3,1024], index: 0, kind: input, shape index: {}]   ;;  %s14800_s1 = inlined_call_operand.hbm [shape: bf16[8,4,768], index: 1, kind: input, shape index: {}]   ;;  %s14801_s2 = inlined_call_operand.hbm [shape: f32[3,2048], index: 2, kind: input, shape index: {}]   ;;  %s14802_s3 = inlined_call_operand.hbm [shape: f32[1,2048], index: 3, kind: input, shape index: {}]   ;;  %s14803_s4 = inlined_call_operand.hbm [shape: bf16[768,768], index: 4, kind: input, shape index: {}]   ;;  %s14804_s5 = inlined_call_operand.hbm [shape: f32[1,768], index: 5, kind: input, shape index: {}]   ;;  %s14805_s6 = inlined_call_operand.hbm [shape: bf16[2048,512], index: 6, kind: input, shape index: {}]   ;;  %s14806_s7 = inlined_call_operand.hbm [shape: f32[1,512], index: 7, kind: input, shape index: {}]   ;;  %s14807_s8 = inlined_call_operand.hbm [shape: bf16[768,512], index: 8, kind: input, shape index: {}]   ;;  %s14808_s9 = inlined_call_operand.hbm [shape: f32[1,512], index: 9, kind: input, shape index: {}]   ;;  %s14809_s10 = inlined_call_operand.hbm [shape: bf16[512,256], index: 10, kind: input, shape index: {}]   ;;  %s14810_s11 = inlined_call_operand.hbm [shape: bf16[512,256], index: 11, kind: input, shape index: {}]   ;;  %s14811_s12 = inlined_call_operand.hbm [shape: f32[1,256], index: 12, kind: input, shape index: {}]   ;;  %s14812_s13 = inlined_call_operand.hbm [shape: bf16[256,128], index: 13, kind: input, shape index: {}]   ;;  %s14813_s14 = inlined_call_operand.hbm [shape: f32[1,128], index: 14, kind: input, shape index: {}]   ;;  %s14814_s15 = inlined_call_operand.hbm [shape: f32[8,128], index: 15, kind: output, shape index: {}]  }
   0x1   :  { %21 = vsyncpa [#allocation6], 0 }
   0x2   :  { %22 = vsyncpa [#allocation9], 0 }
   0x3   :  { %23 = vsyncpa [#allocation12], 0 }
   0x4   :  { %24 = vsyncpa [#allocation15], 0 }
   0x5   :  { %25 = vsyncpa [#allocation18], 0 }
   0x6   :  { %26 = vsyncpa [#allocation21], 0 }
   0x7   :  { %27 = vsyncpa [#allocation24], 0 }
   0x8   :  { %28 = vsyncpa [#allocation4], 0  ;;  %s13855_s18 = smov [#allocation5]   ;;  %s13856_s20 = smov [#allocation8]  }
   0x9   :  { %s49_s19 = sshll.u32 %s13855_s18, 4  ;;  %s68_s21 = sshll.u32 %s13856_s20, 4  ;;  %s50_s19 = int_to_ptr.vmem [resolvable:$true] %s49_s19  ;;  %s13961_s21 = int_to_ptr.vmem [resolvable:$true] %s68_s21 }
   0xa   :  { %s13507_s24 = scalar_lea.hbm %s14801_s2, 1024 }
   0xb   :  { %p13508_p0 = scmp.ne.s32.totalorder %s14801_s2, %s13507_s24  ;;  %p13511_p1 = scmp.lt.u32.totalorder %s13507_s24, %s14801_s2 }
   0xd   :  { %p13513_p2 = pnand %p13511_p1, %p13508_p0 }
   0xf   :  { %13516 = shalt.err (!%p13513_p2)
}
  0x10   :  { %s13517_s29 = scalar_lea.vmem %s50_s19, 1024  ;;  %p13522_p4 = scmp.lt.s32.totalorder %s50_s19, %s50_s19 }
  0x11   :  { %p13518_p3 = scmp.ne.s32.totalorder %s50_s19, %s13517_s29  ;;  %p13523_p5 = scmp.lt.s32.totalorder %s13517_s29, %s13517_s29 }
  0x13   :  { %p13524_p6 = por %p13523_p5, %p13522_p4 }
  0x15   :  { %p13525_p7 = pnand %p13524_p6, %p13518_p3 }
  0x17   :  { %13528 = shalt.err (!%p13525_p7)
}
  0x18   :  { %52 = dma.hbm_to_vmem [thread:$0]  %s14801_s2, 1024, %s50_s19, [#allocation6]  }
  0x19   :  { %s13529_s20 = scalar_lea.hbm %s14803_s4, 36864 }
  0x1a   :  { %p13530_p8 = scmp.ne.s32.totalorder %s14803_s4, %s13529_s20  ;;  %p13533_p9 = scmp.lt.u32.totalorder %s13529_s20, %s14803_s4 }
  0x1c   :  { %p13535_p10 = pnand %p13533_p9, %p13530_p8 }
  0x1e   :  { %13538 = shalt.err (!%p13535_p10)
}
  0x1f   :  { %s13539_s26 = scalar_lea.vmem %s13961_s21, 36864  ;;  %p13544_p12 = scmp.lt.s32.totalorder %s13961_s21, %s13961_s21 }
  0x20   :  { %p13540_p11 = scmp.ne.s32.totalorder %s13961_s21, %s13539_s26  ;;  %p13545_p13 = scmp.lt.s32.totalorder %s13539_s26, %s13539_s26 }
  0x22   :  { %p13546_p0 = por %p13545_p13, %p13544_p12 }
  0x24   :  { %p13547_p1 = pnand %p13546_p0, %p13540_p11 }
  0x26   :  { %13550 = shalt.err (!%p13547_p1)
}
  0x27   :  { %s13857_s2 = smov 384   ;;  %s13858_s19 = smov 24  }
  0x28   :  { %74 = dma.hbm_to_vmem [thread:$0]  %s14803_s4, 36864, %s13961_s21, [#allocation9], %s13857_s2, %s13857_s2, %s13858_s19  }
  0x29   :  { %s13859_s29 = smov [#allocation11]   ;;  %s13551_s18 = scalar_lea.hbm %s14805_s6, 65536 }
  0x2a   :  { %s90_s30 = sshll.u32 %s13859_s29, 4  ;;  %p13552_p2 = scmp.ne.s32.totalorder %s14805_s6, %s13551_s18  ;;  %s91_s30 = int_to_ptr.vmem [resolvable:$true] %s90_s30 }
  0x2b   :  { %p13555_p3 = scmp.lt.u32.totalorder %s13551_s18, %s14805_s6 }
  0x2d   :  { %p13557_p4 = pnand %p13555_p3, %p13552_p2 }
  0x2f   :  { %13560 = shalt.err (!%p13557_p4)
}
  0x30   :  { %s13561_s25 = scalar_lea.vmem %s91_s30, 65536  ;;  %p13566_p6 = scmp.lt.s32.totalorder %s91_s30, %s91_s30 }
  0x31   :  { %p13562_p5 = scmp.ne.s32.totalorder %s91_s30, %s13561_s25  ;;  %p13567_p7 = scmp.lt.s32.totalorder %s13561_s25, %s13561_s25 }
  0x33   :  { %p13568_p8 = por %p13567_p7, %p13566_p6 }
  0x35   :  { %p13569_p9 = pnand %p13568_p8, %p13562_p5 }
  0x37   :  { %13572 = shalt.err (!%p13569_p9)
}
  0x38   :  { %s13860_s4 = smov 256   ;;  %s13861_s21 = smov 16  }
  0x39   :  { %96 = dma.hbm_to_vmem [thread:$0]  %s14805_s6, 65536, %s91_s30, [#allocation12], %s13860_s4, %s13860_s4, %s13861_s21  }
  0x3a   :  { %s13862_s19 = smov [#allocation14]   ;;  %s13863_s28 = smov [#allocation17]  }
  0x3b   :  { %s112_s27 = sshll.u32 %s13862_s19, 4  ;;  %s134_s29 = sshll.u32 %s13863_s28, 4  ;;  %s113_s27 = int_to_ptr.vmem [resolvable:$true] %s112_s27  ;;  %s135_s29 = int_to_ptr.vmem [resolvable:$true] %s134_s29 }
  0x3c   :  { %s13573_s18 = scalar_lea.hbm %s14807_s8, 24576 }
  0x3d   :  { %p13574_p10 = scmp.ne.s32.totalorder %s14807_s8, %s13573_s18  ;;  %p13577_p11 = scmp.lt.u32.totalorder %s13573_s18, %s14807_s8 }
  0x3f   :  { %p13579_p12 = pnand %p13577_p11, %p13574_p10 }
  0x41   :  { %13582 = shalt.err (!%p13579_p12)
}
  0x42   :  { %s13583_s6 = scalar_lea.vmem %s113_s27, 24576  ;;  %p13588_p0 = scmp.lt.s32.totalorder %s113_s27, %s113_s27 }
  0x43   :  { %p13584_p13 = scmp.ne.s32.totalorder %s113_s27, %s13583_s6  ;;  %p13589_p1 = scmp.lt.s32.totalorder %s13583_s6, %s13583_s6 }
  0x45   :  { %p13590_p2 = por %p13589_p1, %p13588_p0 }
  0x47   :  { %p13591_p3 = pnand %p13590_p2, %p13584_p13 }
  0x49   :  { %13594 = shalt.err (!%p13591_p3)
}
  0x4a   :  { %118 = dma.hbm_to_vmem [thread:$0]  %s14807_s8, 24576, %s113_s27, [#allocation15], %s13860_s4, %s13860_s4, %s13861_s21  }
  0x4b   :  { %s13595_s19 = scalar_lea.hbm %s14809_s10, 8192 }
  0x4c   :  { %p13596_p4 = scmp.ne.s32.totalorder %s14809_s10, %s13595_s19  ;;  %p13599_p5 = scmp.lt.u32.totalorder %s13595_s19, %s14809_s10 }
  0x4e   :  { %p13601_p6 = pnand %p13599_p5, %p13596_p4 }
  0x50   :  { %13604 = shalt.err (!%p13601_p6)
}
  0x51   :  { %s13605_s20 = scalar_lea.vmem %s135_s29, 8192  ;;  %p13610_p8 = scmp.lt.s32.totalorder %s135_s29, %s135_s29 }
  0x52   :  { %p13606_p7 = scmp.ne.s32.totalorder %s135_s29, %s13605_s20  ;;  %p13611_p9 = scmp.lt.s32.totalorder %s13605_s20, %s13605_s20 }
  0x54   :  { %p13612_p10 = por %p13611_p9, %p13610_p8 }
  0x56   :  { %p13613_p11 = pnand %p13612_p10, %p13606_p7 }
  0x58   :  { %13616 = shalt.err (!%p13613_p11)
}
  0x59   :  { %s13864_s8 = smov 128   ;;  %s13865_s4 = smov 8  }
  0x5a   :  { %140 = dma.hbm_to_vmem [thread:$0]  %s14809_s10, 8192, %s135_s29, [#allocation18], %s13864_s8, %s13864_s8, %s13865_s4  }
  0x5b   :  { %s13866_s22 = smov [#allocation20]   ;;  %s13867_s24 = smov [#allocation2]  }
  0x5c   :  { %s159_s23 = sshll.u32 %s13866_s22, 4  ;;  %s36_s6 = sshll.u32 %s13867_s24, 4  ;;  %s160_s23 = int_to_ptr.vmem [resolvable:$true] %s159_s23  ;;  %s37_s6 = int_to_ptr.vmem [resolvable:$true] %s36_s6 }
  0x5d   :  { %s13617_s26 = scalar_lea.hbm %s14811_s12, 32 }
  0x5e   :  { %p13618_p12 = scmp.ne.s32.totalorder %s14811_s12, %s13617_s26  ;;  %p13621_p13 = scmp.lt.u32.totalorder %s13617_s26, %s14811_s12 }
  0x60   :  { %p13623_p0 = pnand %p13621_p13, %p13618_p12 }
  0x62   :  { %13626 = shalt.err (!%p13623_p0)
}
  0x63   :  { %s13627_s10 = scalar_lea.vmem %s160_s23, 32  ;;  %p13632_p2 = scmp.lt.s32.totalorder %s160_s23, %s160_s23 }
  0x64   :  { %p13628_p1 = scmp.ne.s32.totalorder %s160_s23, %s13627_s10  ;;  %p13633_p3 = scmp.lt.s32.totalorder %s13627_s10, %s13627_s10 }
  0x66   :  { %p13634_p4 = por %p13633_p3, %p13632_p2 }
  0x68   :  { %p13635_p5 = pnand %p13634_p4, %p13628_p1 }
  0x6a   :  { %13638 = shalt.err (!%p13635_p5)
}
  0x6b   :  { %162 = dma.hbm_to_vmem [thread:$0]  %s14811_s12, 32, %s160_s23, [#allocation21]  }
  0x6c   :  { %s13639_s21 = scalar_lea.hbm %s14800_s1, 1536 }
  0x6d   :  { %p13640_p6 = scmp.ne.s32.totalorder %s14800_s1, %s13639_s21  ;;  %p13643_p7 = scmp.lt.u32.totalorder %s13639_s21, %s14800_s1 }
  0x6f   :  { %p13645_p8 = pnand %p13643_p7, %p13640_p6 }
  0x71   :  { %13648 = shalt.err (!%p13645_p8)
}
  0x72   :  { %s13649_s25 = scalar_lea.vmem %s37_s6, 1536  ;;  %p13654_p10 = scmp.lt.s32.totalorder %s37_s6, %s37_s6 }
  0x73   :  { %p13650_p9 = scmp.ne.s32.totalorder %s37_s6, %s13649_s25  ;;  %p13655_p11 = scmp.lt.s32.totalorder %s13649_s25, %s13649_s25 }
  0x75   :  { %p13656_p12 = por %p13655_p11, %p13654_p10 }
  0x77   :  { %p13657_p13 = pnand %p13656_p12, %p13650_p9 }
  0x79   :  { %13660 = shalt.err (!%p13657_p13)
}
  0x7a   :  { %s13868_s12 = smov 192   ;;  %s13869_s23 = smov 12  }
  0x7b   :  { %42 = dma.hbm_to_vmem [thread:$0]  %s14800_s1, 1536, %s37_s6, [#allocation3], %s13868_s12, %s13868_s12, %s13869_s23  }
  0x7c   :  { %s13870_s19 = smov [#allocation7]   ;;  %s13871_s16 = smov [#allocation10]  }
  0x7d   :  { %s59_s28 = sshll.u32 %s13870_s19, 4  ;;  %s81_s10 = sshll.u32 %s13871_s16, 4  ;;  %s60_s28 = int_to_ptr.vmem [resolvable:$true] %s59_s28  ;;  %s82_s10 = int_to_ptr.vmem [resolvable:$true] %s81_s10 }
  0x7e   :  { %s13661_s18 = scalar_lea.hbm %s14802_s3, 256 }
  0x7f   :  { %p13662_p0 = scmp.ne.s32.totalorder %s14802_s3, %s13661_s18  ;;  %p13665_p1 = scmp.lt.u32.totalorder %s13661_s18, %s14802_s3 }
  0x81   :  { %p13667_p2 = pnand %p13665_p1, %p13662_p0 }
  0x83   :  { %13670 = shalt.err (!%p13667_p2)
}
  0x84   :  { %s13671_s1 = scalar_lea.vmem %s60_s28, 256  ;;  %p13676_p4 = scmp.lt.s32.totalorder %s60_s28, %s60_s28 }
  0x85   :  { %p13672_p3 = scmp.ne.s32.totalorder %s60_s28, %s13671_s1  ;;  %p13677_p5 = scmp.lt.s32.totalorder %s13671_s1, %s13671_s1 }
  0x87   :  { %p13678_p6 = por %p13677_p5, %p13676_p4 }
  0x89   :  { %p13679_p7 = pnand %p13678_p6, %p13672_p3 }
  0x8b   :  { %13682 = shalt.err (!%p13679_p7)
}
  0x8c   :  { %62 = dma.hbm_to_vmem [thread:$0]  %s14802_s3, 256, %s60_s28, [#allocation6]  }
  0x8d   :  { %s13683_s12 = scalar_lea.hbm %s14804_s5, 96 }
  0x8e   :  { %p13684_p8 = scmp.ne.s32.totalorder %s14804_s5, %s13683_s12  ;;  %p13687_p9 = scmp.lt.u32.totalorder %s13683_s12, %s14804_s5 }
  0x90   :  { %p13689_p10 = pnand %p13687_p9, %p13684_p8 }
  0x92   :  { %13692 = shalt.err (!%p13689_p10)
}
  0x93   :  { %s13693_s16 = scalar_lea.vmem %s82_s10, 96  ;;  %p13698_p12 = scmp.lt.s32.totalorder %s82_s10, %s82_s10 }
  0x94   :  { %p13694_p11 = scmp.ne.s32.totalorder %s82_s10, %s13693_s16  ;;  %p13699_p13 = scmp.lt.s32.totalorder %s13693_s16, %s13693_s16 }
  0x96   :  { %p13700_p0 = por %p13699_p13, %p13698_p12 }
  0x98   :  { %p13701_p1 = pnand %p13700_p0, %p13694_p11 }
  0x9a   :  { %13704 = shalt.err (!%p13701_p1)
}
  0x9b   :  { %84 = dma.hbm_to_vmem [thread:$0]  %s14804_s5, 96, %s82_s10, [#allocation9]  }
  0x9c   :  { %s13872_s29 = smov [#allocation13]   ;;  %s13873_s18 = smov [#allocation16]  }
  0x9d   :  { %s103_s17 = sshll.u32 %s13872_s29, 4  ;;  %s125_s20 = sshll.u32 %s13873_s18, 4  ;;  %s104_s17 = int_to_ptr.vmem [resolvable:$true] %s103_s17  ;;  %s126_s20 = int_to_ptr.vmem [resolvable:$true] %s125_s20 }
  0x9e   :  { %s13705_s22 = scalar_lea.hbm %s14806_s7, 64 }
  0x9f   :  { %p13706_p2 = scmp.ne.s32.totalorder %s14806_s7, %s13705_s22  ;;  %p13709_p3 = scmp.lt.u32.totalorder %s13705_s22, %s14806_s7 }
  0xa1   :  { %p13711_p4 = pnand %p13709_p3, %p13706_p2 }
  0xa3   :  { %13714 = shalt.err (!%p13711_p4)
}
  0xa4   :  { %s13715_s5 = scalar_lea.vmem %s104_s17, 64  ;;  %p13720_p6 = scmp.lt.s32.totalorder %s104_s17, %s104_s17 }
  0xa5   :  { %p13716_p5 = scmp.ne.s32.totalorder %s104_s17, %s13715_s5  ;;  %p13721_p7 = scmp.lt.s32.totalorder %s13715_s5, %s13715_s5 }
  0xa7   :  { %p13722_p8 = por %p13721_p7, %p13720_p6 }
  0xa9   :  { %p13723_p9 = pnand %p13722_p8, %p13716_p5 }
  0xab   :  { %13726 = shalt.err (!%p13723_p9)
}
  0xac   :  { %106 = dma.hbm_to_vmem [thread:$0]  %s14806_s7, 64, %s104_s17, [#allocation12]  }
  0xad   :  { %s13727_s26 = scalar_lea.hbm %s14808_s9, 64 }
  0xae   :  { %p13728_p10 = scmp.ne.s32.totalorder %s14808_s9, %s13727_s26  ;;  %p13731_p11 = scmp.lt.u32.totalorder %s13727_s26, %s14808_s9 }
  0xb0   :  { %p13733_p12 = pnand %p13731_p11, %p13728_p10 }
  0xb2   :  { %13736 = shalt.err (!%p13733_p12)
}
  0xb3   :  { %s13737_s28 = scalar_lea.vmem %s126_s20, 64  ;;  %p13742_p0 = scmp.lt.s32.totalorder %s126_s20, %s126_s20 }
  0xb4   :  { %p13738_p13 = scmp.ne.s32.totalorder %s126_s20, %s13737_s28  ;;  %p13743_p1 = scmp.lt.s32.totalorder %s13737_s28, %s13737_s28 }
  0xb6   :  { %p13744_p2 = por %p13743_p1, %p13742_p0 }
  0xb8   :  { %p13745_p3 = pnand %p13744_p2, %p13738_p13 }
  0xba   :  { %13748 = shalt.err (!%p13745_p3)
}
  0xbb   :  { %128 = dma.hbm_to_vmem [thread:$0]  %s14808_s9, 64, %s126_s20, [#allocation15]  }
  0xbc   :  { %s13874_s17 = smov [#allocation19]   ;;  %s13875_s21 = smov [#allocation22]  }
  0xbd   :  { %s146_s18 = sshll.u32 %s13874_s17, 4  ;;  %s168_s27 = sshll.u32 %s13875_s21, 4  ;;  %s147_s18 = int_to_ptr.vmem [resolvable:$true] %s146_s18  ;;  %s169_s27 = int_to_ptr.vmem [resolvable:$true] %s168_s27 }
  0xbe   :  { %s13749_s6 = scalar_lea.hbm %s14810_s11, 8192 }
  0xbf   :  { %p13750_p4 = scmp.ne.s32.totalorder %s14810_s11, %s13749_s6  ;;  %p13753_p5 = scmp.lt.u32.totalorder %s13749_s6, %s14810_s11 }
  0xc1   :  { %p13755_p6 = pnand %p13753_p5, %p13750_p4 }
  0xc3   :  { %13758 = shalt.err (!%p13755_p6)
}
  0xc4   :  { %s13759_s9 = scalar_lea.vmem %s147_s18, 8192  ;;  %p13764_p8 = scmp.lt.s32.totalorder %s147_s18, %s147_s18 }
  0xc5   :  { %p13760_p7 = scmp.ne.s32.totalorder %s147_s18, %s13759_s9  ;;  %p13765_p9 = scmp.lt.s32.totalorder %s13759_s9, %s13759_s9 }
  0xc7   :  { %p13766_p10 = por %p13765_p9, %p13764_p8 }
  0xc9   :  { %p13767_p11 = pnand %p13766_p10, %p13760_p7 }
  0xcb   :  { %13770 = shalt.err (!%p13767_p11)
}
  0xcc   :  { %152 = dma.hbm_to_vmem [thread:$0]  %s14810_s11, 8192, %s147_s18, [#allocation18], %s13864_s8, %s13864_s8, %s13865_s4  }
  0xcd   :  { %s13771_s26 = scalar_lea.hbm %s14812_s13, 2048 }
  0xce   :  { %p13772_p12 = scmp.ne.s32.totalorder %s14812_s13, %s13771_s26  ;;  %p13775_p13 = scmp.lt.u32.totalorder %s13771_s26, %s14812_s13 }
  0xd0   :  { %p13777_p0 = pnand %p13775_p13, %p13772_p12 }
  0xd2   :  { %13780 = shalt.err (!%p13777_p0)
}
  0xd3   :  { %s13781_s28 = scalar_lea.vmem %s169_s27, 2048  ;;  %p13786_p2 = scmp.lt.s32.totalorder %s169_s27, %s169_s27 }
  0xd4   :  { %p13782_p1 = scmp.ne.s32.totalorder %s169_s27, %s13781_s28  ;;  %p13787_p3 = scmp.lt.s32.totalorder %s13781_s28, %s13781_s28 }
  0xd6   :  { %p13788_p4 = por %p13787_p3, %p13786_p2 }
  0xd8   :  { %p13789_p5 = pnand %p13788_p4, %p13782_p1 }
  0xda   :  { %13792 = shalt.err (!%p13789_p5)
}
  0xdb   :  { %s13876_s11 = smov 64   ;;  %s13877_s8 = smov 4  }
  0xdc   :  { %174 = dma.hbm_to_vmem [thread:$0]  %s14812_s13, 2048, %s169_s27, [#allocation21], %s13876_s11, %s13876_s11, %s13877_s8  }
  0xdd   :  { %s13878_s29 = smov [#allocation23]   ;;  %s13793_s22 = scalar_lea.hbm %s14813_s14, 16 }
  0xde   :  { %s181_s17 = sshll.u32 %s13878_s29, 4  ;;  %p13794_p6 = scmp.ne.s32.totalorder %s14813_s14, %s13793_s22  ;;  %s182_s17 = int_to_ptr.vmem [resolvable:$true] %s181_s17 }
  0xdf   :  { %p13797_p7 = scmp.lt.u32.totalorder %s13793_s22, %s14813_s14 }
  0xe1   :  { %p13799_p8 = pnand %p13797_p7, %p13794_p6 }
  0xe3   :  { %13802 = shalt.err (!%p13799_p8)
}
  0xe4   :  { %s13803_s5 = scalar_lea.vmem %s182_s17, 16  ;;  %s13807_s13 = scalar_lea.vmem %s182_s17, 32 }
  0xe5   :  { %p13804_p9 = scmp.ne.s32.totalorder %s182_s17, %s13803_s5  ;;  %p13808_p10 = scmp.lt.s32.totalorder %s182_s17, %s182_s17 }
  0xe6   :  { %p13809_p11 = scmp.lt.s32.totalorder %s13807_s13, %s13803_s5 }
  0xe8   :  { %p13810_p12 = por %p13809_p11, %p13808_p10 }
  0xea   :  { %p13811_p13 = pnand %p13810_p12, %p13804_p9 }
  0xec   :  { %13814 = shalt.err (!%p13811_p13)
}
  0xed   :  { %184 = dma.hbm_to_vmem [thread:$0]  %s14813_s14, 16, %s182_s17, [#allocation24]  }
  0xee   :  { %13837 = dma.done.wait [#allocation3], 1536  }
  0xef   :  { %13838 = vsyncadd [#allocation3], 4294965760 }
  0xf0   :  { %13839 = dma.done.wait [#allocation6], 1280  }
  0xf1   :  { %13840 = vsyncadd [#allocation6], 4294966016 }
  0xf2   :  { %13841 = dma.done.wait [#allocation9], 36960  }
  0xf3   :  { %13842 = vsyncadd [#allocation9], 4294930336 }
  0xf4   :  { %13843 = dma.done.wait [#allocation12], 65600  }
  0xf5   :  { %13844 = vsyncadd [#allocation12], 4294901696 }
  0xf6   :  { %13845 = dma.done.wait [#allocation15], 24640  }
  0xf7   :  { %13846 = vsyncadd [#allocation15], 4294942656 }
  0xf8   :  { %13847 = dma.done.wait [#allocation18], 16384  }
  0xf9   :  { %13848 = vsyncadd [#allocation18], 4294950912 }
  0xfa   :  { %13849 = dma.done.wait [#allocation21], 2080  }
  0xfb   :  { %13850 = vsyncadd [#allocation21], 4294965216 }
  0xfc   :  { %13851 = dma.done.wait [#allocation24], 16  }
  0xfd   :  { %13852 = vsyncadd [#allocation24], 4294967280  ;;  %v11801_v0 = vld [vmem:[#allocation8 + $0x4] ss:$24 sps:$4 sm:$0xff]   ;;  %v11803_v1 = vld [vmem:[#allocation8] ss:$24 sps:$4 sm:$0xff]  }
  0xfe   :  { %3757 = vmatprep.subr.bf16.mxu0 %v11801_v0  ;;  %v11804_v2 = vld [vmem:[#allocation8 + $0x34] ss:$24 sps:$4 sm:$0xff]   ;;  %v11806_v3 = vld [vmem:[#allocation8 + $0x30] ss:$24 sps:$4 sm:$0xff]   ;;  %v11807_v4 = vld [vmem:[#allocation8 + $0x64] ss:$24 sps:$4 sm:$0xff]  }
  0xff   :  { %3758 = vmatpush1.bf16.msra.mxu0 %v11803_v1  ;;  %v11809_v5 = vld [vmem:[#allocation8 + $0x60] ss:$24 sps:$4 sm:$0xff]   ;;  %v228_v6 = vld [vmem:[%s14799_s0] sm:$0xff]  ;;  %vm372_vm0 = vcmask 1042432   ;;  %v11813_v30 = vld [vmem:[#allocation8 + $0xc4] ss:$24 sps:$4 sm:$0xff]  }
 0x100   :  { %3759 = vmatprep.subr.bf16.mxu0 %v11804_v2  ;;  %v11810_v7 = vld [vmem:[#allocation8 + $0x94] ss:$24 sps:$4 sm:$0xff]   ;;  %v229_v8 = vld [vmem:[%s14799_s0 + $0x8] sm:$0xff]  ;;  %v244_v9 = vunpack.c.l.bf16 %v228_v6  ;;  %v245_v10 = vunpack.c.h.bf16 %v228_v6  ;;  %v11812_v25 = vld [vmem:[#allocation8 + $0x90] ss:$24 sps:$4 sm:$0xff]   ;;  %vm1413_vm1 = vcmask 1043456  }
 0x101   :  { %v232_v11 = vld [vmem:[%s14799_s0 + $0x20] sm:$0xff]  ;;  %v246_v12 = vunpack.c.l.bf16 %v229_v8  ;;  %v247_v13 = vunpack.c.h.bf16 %v229_v8  ;;  %v233_v14 = vld [vmem:[%s14799_s0 + $0x28] sm:$0xff]  ;;  %v230_v39 = vld [vmem:[%s14799_s0 + $0x10] sm:$0xff]  ;;  %vm652_vm2 = vcmask 1041409   ;;  %vm654_vm3 = vcmask 1042434  }
 0x102   :  { %v252_v15 = vunpack.c.l.bf16 %v232_v11  ;;  %v253_v16 = vunpack.c.h.bf16 %v232_v11  ;;  %v308_v17 = vcombine.high %v244_v9, %v244_v9  ;;  %v309_v18 = vcombine.high %v245_v10, %v245_v10  ;;  %v231_v44 = vld [vmem:[%s14799_s0 + $0x18] sm:$0xff]  ;;  %v234_v45 = vld [vmem:[%s14799_s0 + $0x30] sm:$0xff] }
 0x103   :  { %3760 = vmatpush1.bf16.msra.mxu0 %v11806_v3  ;;  %v373_v19 = vsel %vm372_vm0, %v244_v9, 0.0  ;;  %v376_v20 = vsel %vm372_vm0, %v245_v10, 0.0  ;;  %v310_v21 = vcombine.high %v246_v12, %v246_v12  ;;  %v311_v22 = vcombine.high %v247_v13, %v247_v13  ;;  %v11815_v46 = vld [vmem:[#allocation8 + $0xc0] ss:$24 sps:$4 sm:$0xff]   ;;  %v11816_v53 = vld [vmem:[#allocation8 + $0xf4] ss:$24 sps:$4 sm:$0xff]  }
 0x104   :  { %3761 = vmatprep.subr.bf16.mxu0 %v11807_v4  ;;  %v380_v23 = vsel %vm372_vm0, %v246_v12, 0.0  ;;  %v384_v24 = vsel %vm372_vm0, %v247_v13, 0.0  ;;  %v374_v26 = vsel %vm372_vm0, %v308_v17, 0.0  ;;  %v378_v27 = vsel %vm372_vm0, %v309_v18, 0.0  ;;  %v11818_v61 = vld [vmem:[#allocation8 + $0xf0] ss:$24 sps:$4 sm:$0xff]  }
 0x105   :  { %v254_v28 = vunpack.c.l.bf16 %v233_v14  ;;  %v255_v29 = vunpack.c.h.bf16 %v233_v14  ;;  %v375_v31 = vadd.f32 %v374_v26, %v373_v19  ;;  %v382_v32 = vsel %vm372_vm0, %v310_v21, 0.0  ;;  %v11819_v10 = vld [vmem:[#allocation8 + $0x124] ss:$24 sps:$4 sm:$0xff]  }
 0x106   :  { %v386_v33 = vsel %vm372_vm0, %v311_v22, 0.0  ;;  %v316_v34 = vcombine.high %v252_v15, %v252_v15  ;;  %v317_v35 = vcombine.high %v253_v16, %v253_v16  ;;  %v407_v38 = vsel %vm372_vm0, %v252_v15, 0.0 }
 0x107   :  { %3762 = vmatpush1.bf16.msra.mxu0 %v11809_v5  ;;  %v318_v36 = vcombine.high %v254_v28, %v254_v28  ;;  %v319_v37 = vcombine.high %v255_v29, %v255_v29  ;;  %v377_v40 = vadd.f32 %v376_v20, %v375_v31  ;;  %v410_v42 = vsel %vm372_vm0, %v253_v16, 0.0  ;;  %v235_v5 = vld [vmem:[%s14799_s0 + $0x38] sm:$0xff] }
 0x108   :  { %3763 = vmatprep.subr.bf16.mxu0 %v11810_v7  ;;  %v408_v41 = vsel %vm372_vm0, %v316_v34, 0.0  ;;  %v414_v43 = vsel %vm372_vm0, %v254_v28, 0.0  ;;  %v412_v48 = vsel %vm372_vm0, %v317_v35, 0.0  ;;  %v418_v50 = vsel %vm372_vm0, %v255_v29, 0.0  ;;  %v11822_v29 = vld [vmem:[#allocation8 + $0x154] ss:$24 sps:$4 sm:$0xff]  }
 0x109   :  { %v409_v47 = vadd.f32 %v408_v41, %v407_v38  ;;  %v416_v49 = vsel %vm372_vm0, %v318_v36, 0.0  ;;  %v379_v51 = vadd.f32 %v378_v27, %v377_v40  ;;  %v420_v52 = vsel %vm372_vm0, %v319_v37, 0.0  ;;  %v236_v34 = vld [vmem:[%s14799_s0 + $0x40] sm:$0xff]  ;;  %v237_v38 = vld [vmem:[%s14799_s0 + $0x48] sm:$0xff] }
 0x10a   :  { %v248_v54 = vunpack.c.l.bf16 %v230_v39  ;;  %v249_v55 = vunpack.c.h.bf16 %v230_v39  ;;  %v250_v57 = vunpack.c.l.bf16 %v231_v44  ;;  %v251_v58 = vunpack.c.h.bf16 %v231_v44  ;;  %v238_v39 = vld [vmem:[%s14799_s0 + $0x50] sm:$0xff]  ;;  %v11824_v44 = vld [vmem:[#allocation8 + $0x150] ss:$24 sps:$4 sm:$0xff]  }
 0x10b   :  { %3764 = vmatpush1.bf16.msra.mxu0 %v11812_v25  ;;  %v411_v56 = vadd.f32 %v410_v42, %v409_v47  ;;  %v256_v59 = vunpack.c.l.bf16 %v234_v45  ;;  %v381_v60 = vadd.f32 %v380_v23, %v379_v51  ;;  %v257_v17 = vunpack.c.h.bf16 %v234_v45  ;;  %v11821_v23 = vld [vmem:[#allocation8 + $0x120] ss:$24 sps:$4 sm:$0xff]  }
 0x10c   :  { %3765 = vmatprep.subr.bf16.mxu0 %v11813_v30  ;;  %v312_v62 = vcombine.high %v248_v54, %v248_v54  ;;  %v313_v63 = vcombine.high %v249_v55, %v249_v55  ;;  %v390_v0 = vsel %vm372_vm0, %v248_v54, 0.0  ;;  %v314_v2 = vcombine.high %v250_v57, %v250_v57 }
 0x10d   :  { %v413_v1 = vadd.f32 %v412_v48, %v411_v56  ;;  %v315_v3 = vcombine.high %v251_v58, %v251_v58  ;;  %v393_v4 = vsel %vm372_vm0, %v249_v55, 0.0  ;;  %v383_v6 = vadd.f32 %v382_v32, %v381_v60 }
 0x10e   :  { %v391_v7 = vsel %vm372_vm0, %v312_v62, 0.0  ;;  %v395_v8 = vsel %vm372_vm0, %v313_v63, 0.0  ;;  %v397_v9 = vsel %vm372_vm0, %v250_v57, 0.0  ;;  %v399_v13 = vsel %vm372_vm0, %v314_v2, 0.0  ;;  %v11827_v63 = vld [vmem:[#allocation8 + $0x180] ss:$24 sps:$4 sm:$0xff]  }
 0x10f   :  { %3766 = vmatpush1.bf16.msra.mxu0 %v11815_v46  ;;  %v415_v11 = vadd.f32 %v414_v43, %v413_v1  ;;  %v392_v12 = vadd.f32 %v391_v7, %v390_v0  ;;  %v401_v14 = vsel %vm372_vm0, %v251_v58, 0.0  ;;  %v385_v15 = vadd.f32 %v384_v24, %v383_v6  ;;  %v239_v58 = vld [vmem:[%s14799_s0 + $0x58] sm:$0xff] }
 0x110   :  { %3767 = vmatprep.subr.bf16.mxu0 %v11816_v53  ;;  %v403_v16 = vsel %vm372_vm0, %v315_v3, 0.0  ;;  %v258_v18 = vunpack.c.l.bf16 %v235_v5  ;;  %v259_v21 = vunpack.c.h.bf16 %v235_v5  ;;  %v320_v22 = vcombine.high %v256_v59, %v256_v59  ;;  %v11828_v0 = vld [vmem:[#allocation8 + $0x1b4] ss:$24 sps:$4 sm:$0xff]  }
 0x111   :  { %v417_v19 = vadd.f32 %v416_v49, %v415_v11  ;;  %v394_v20 = vadd.f32 %v393_v4, %v392_v12  ;;  %v387_v25 = vadd.f32 %v386_v33, %v385_v15  ;;  %v321_v26 = vcombine.high %v257_v17, %v257_v17  ;;  %v11825_v49 = vld [vmem:[#allocation8 + $0x184] ss:$24 sps:$4 sm:$0xff]  }
 0x112   :  { %v322_v27 = vcombine.high %v258_v18, %v258_v18  ;;  %v424_v28 = vsel %vm372_vm0, %v256_v59, 0.0  ;;  %v323_v24 = vcombine.high %v259_v21, %v259_v21  ;;  %v425_v32 = vsel %vm372_vm0, %v320_v22, 0.0 }
 0x113   :  { %3768 = vmatpush1.bf16.msra.mxu0 %v11818_v61  ;;  %v419_v30 = vadd.f32 %v418_v50, %v417_v19  ;;  %v396_v31 = vadd.f32 %v395_v8, %v394_v20  ;;  %388 = vadd.xlane.f32.xlu0 %v387_v25  ;;  %v426_v35 = vadd.f32 %v425_v32, %v424_v28  ;;  %v427_v36 = vsel %vm372_vm0, %v257_v17, 0.0 }
 0x114   :  { %3769 = vmatprep.subr.bf16.mxu0 %v11819_v10  ;;  %v429_v33 = vsel %vm372_vm0, %v321_v26, 0.0  ;;  %v431_v37 = vsel %vm372_vm0, %v258_v18, 0.0  ;;  %v433_v42 = vsel %vm372_vm0, %v322_v27, 0.0  ;;  %v435_v43 = vsel %vm372_vm0, %v259_v21, 0.0  ;;  %v11830_v18 = vld [vmem:[#allocation8 + $0x1b0] ss:$24 sps:$4 sm:$0xff]  }
 0x115   :  { %v421_v40 = vadd.f32 %v420_v52, %v419_v30  ;;  %v398_v41 = vadd.f32 %v397_v9, %v396_v31  ;;  %v428_v45 = vadd.f32 %v427_v36, %v426_v35  ;;  %v437_v46 = vsel %vm372_vm0, %v323_v24, 0.0 }
 0x116   :  { %v260_v47 = vunpack.c.l.bf16 %v236_v34  ;;  %v261_v48 = vunpack.c.h.bf16 %v236_v34  ;;  %v262_v51 = vunpack.c.l.bf16 %v237_v38  ;;  %v263_v53 = vunpack.c.h.bf16 %v237_v38  ;;  %v242_v34 = vld [vmem:[%s14799_s0 + $0x70] sm:$0xff] }
 0x117   :  { %3770 = vmatpush1.bf16.msra.mxu0 %v11821_v23  ;;  %422 = vadd.xlane.f32.xlu1 %v421_v40  ;;  %v400_v50 = vadd.f32 %v399_v13, %v398_v41  ;;  %v264_v54 = vunpack.c.l.bf16 %v238_v39  ;;  %v430_v52 = vadd.f32 %v429_v33, %v428_v45  ;;  %v265_v11 = vunpack.c.h.bf16 %v238_v39  ;;  %v240_v13 = vld [vmem:[%s14799_s0 + $0x60] sm:$0xff]  ;;  %v11831_v23 = vld [vmem:[#allocation8 + $0x1e4] ss:$24 sps:$4 sm:$0xff]   ;;  %v11833_v38 = vld [vmem:[#allocation8 + $0x1e0] ss:$24 sps:$4 sm:$0xff]  }
 0x118   :  { %3771 = vmatprep.subr.bf16.mxu0 %v11822_v29  ;;  %v324_v55 = vcombine.high %v260_v47, %v260_v47  ;;  %v325_v56 = vcombine.high %v261_v48, %v261_v48  ;;  %v441_v57 = vsel %vm372_vm0, %v260_v47, 0.0  ;;  %v326_v60 = vcombine.high %v262_v51, %v262_v51  ;;  %v241_v29 = vld [vmem:[%s14799_s0 + $0x68] sm:$0xff] }
 0x119   :  { %v402_v59 = vadd.f32 %v401_v14, %v400_v50  ;;  %v327_v61 = vcombine.high %v263_v53, %v263_v53  ;;  %v444_v62 = vsel %vm372_vm0, %v261_v48, 0.0  ;;  %v432_v1 = vadd.f32 %v431_v37, %v430_v52 }
 0x11a   :  { %v442_v2 = vsel %vm372_vm0, %v324_v55, 0.0  ;;  %v446_v3 = vsel %vm372_vm0, %v325_v56, 0.0  ;;  %v448_v4 = vsel %vm372_vm0, %v262_v51, 0.0  ;;  %v450_v7 = vsel %vm372_vm0, %v326_v60, 0.0 }
 0x11b   :  { %3772 = vmatpush1.bf16.msra.mxu0 %v11824_v44  ;;  %v404_v5 = vadd.f32 %v403_v16, %v402_v59  ;;  %v443_v6 = vadd.f32 %v442_v2, %v441_v57  ;;  %v452_v8 = vsel %vm372_vm0, %v263_v53, 0.0  ;;  %v434_v9 = vadd.f32 %v433_v42, %v432_v1  ;;  %v243_v53 = vld [vmem:[%s14799_s0 + $0x78] sm:$0xff]  ;;  %s13880_s0 = smov [#allocation25]  }
 0x11c   :  { %3773 = vmatprep.subr.bf16.mxu0 %v11825_v49  ;;  %v454_v10 = vsel %vm372_vm0, %v327_v61, 0.0  ;;  %v266_v12 = vunpack.c.l.bf16 %v239_v58  ;;  %v267_v15 = vunpack.c.h.bf16 %v239_v58  ;;  %v328_v17 = vcombine.high %v264_v54, %v264_v54  ;;  %v11836_v57 = vld [vmem:[#allocation8 + $0x210] ss:$24 sps:$4 sm:$0xff]   ;;  %s10466_s25 = sshll.u32 %s13880_s0, 4  ;;  %s10467_s25 = int_to_ptr.vmem [resolvable:$true] %s10466_s25 }
 0x11d   :  { %405 = vadd.xlane.f32.xlu0 %v404_v5  ;;  %v445_v14 = vadd.f32 %v444_v62, %v443_v6  ;;  %v458_v16 = vsel %vm372_vm0, %v264_v54, 0.0  ;;  %v436_v19 = vadd.f32 %v435_v43, %v434_v9  ;;  %v329_v20 = vcombine.high %v265_v11, %v265_v11  ;;  %v11834_v43 = vld [vmem:[#allocation8 + $0x214] ss:$24 sps:$4 sm:$0xff]   ;;  %v11837_v62 = vld [vmem:[#allocation8 + $0x244] ss:$24 sps:$4 sm:$0xff]   ;;  %s13815_s12 = scalar_lea.vmem %s10467_s25, 128  ;;  %p13820_p1 = scmp.lt.s32.totalorder %s10467_s25, %s10467_s25 }
 0x11e   :  { %v330_v21 = vcombine.high %v266_v12, %v266_v12  ;;  %v461_v22 = vsel %vm372_vm0, %v265_v11, 0.0  ;;  %v331_v26 = vcombine.high %v267_v15, %v267_v15  ;;  %v459_v27 = vsel %vm372_vm0, %v328_v17, 0.0  ;;  %v14250_v9 = vld [vmem:[#allocation2] sm:$0xff]  ;;  %p13816_p0 = scmp.ne.s32.totalorder %s10467_s25, %s13815_s12  ;;  %p13821_p2 = scmp.lt.s32.totalorder %s13815_s12, %s13815_s12 }
 0x11f   :  { %3774 = vmatpush1.bf16.msra.mxu0 %v11827_v63  ;;  %v447_v25 = vadd.f32 %v446_v3, %v445_v14  ;;  %v465_v28 = vsel %vm372_vm0, %v266_v12, 0.0  ;;  %v438_v30 = vadd.f32 %v437_v46, %v436_v19  ;;  %v460_v31 = vadd.f32 %v459_v27, %v458_v16  ;;  %v11839_v3 = vld [vmem:[#allocation8 + $0x240] ss:$24 sps:$4 sm:$0xff]   ;;  %v14266_v27 = vld [vmem:[#allocation2 + $0x3c] sm:$0xff] }
 0x120   :  { %3775 = vmatprep.subr.bf16.mxu0 %v11828_v0  ;;  %v463_v24 = vsel %vm372_vm0, %v329_v20, 0.0  ;;  %v467_v32 = vsel %vm372_vm0, %v330_v21, 0.0  ;;  %v469_v36 = vsel %vm372_vm0, %v267_v15, 0.0  ;;  %v14235_v33 = vsel %vm372_vm0, %v331_v26, 0.0  ;;  %v14254_v14 = vld [vmem:[#allocation2 + $0xc] sm:$0xff]  ;;  %v14256_v15 = vld [vmem:[#allocation2 + $0x18] sm:$0xff]  ;;  %p13822_p3 = por %p13821_p2, %p13820_p1 }
 0x121   :  { %v449_v35 = vadd.f32 %v448_v4, %v447_v25  ;;  %v268_v37 = vunpack.c.l.bf16 %v240_v13  ;;  %439 = vadd.xlane.f32.xlu1 %v438_v30  ;;  %v462_v39 = vadd.f32 %v461_v22, %v460_v31  ;;  %v269_v40 = vunpack.c.h.bf16 %v240_v13  ;;  %v14258_v17 = vld [vmem:[#allocation2 + $0x24] sm:$0xff]  ;;  %v14260_v21 = vld [vmem:[#allocation2 + $0x30] sm:$0xff] }
 0x122   :  { %v270_v41 = vunpack.c.l.bf16 %v241_v29  ;;  %v271_v42 = vunpack.c.h.bf16 %v241_v29  ;;  %v272_v47 = vunpack.c.l.bf16 %v242_v34  ;;  %v273_v2 = vunpack.c.h.bf16 %v242_v34  ;;  %p13823_p4 = pnand %p13822_p3, %p13816_p0 }
 0x123   :  { %3776 = vmatpush1.bf16.msra.mxu0 %v11830_v18  ;;  %v451_v44 = vadd.f32 %v450_v7, %v449_v35  ;;  %v332_v45 = vcombine.high %v268_v37, %v268_v37  ;;  %v475_v46 = vsel %vm372_vm0, %v268_v37, 0.0  ;;  %v464_v48 = vadd.f32 %v463_v24, %v462_v39  ;;  %v11842_v35 = vld [vmem:[#allocation8 + $0x270] ss:$24 sps:$4 sm:$0xff]  }
 0x124   :  { %3777 = vmatprep.subr.bf16.mxu0 %v11831_v23  ;;  %v333_v49 = vcombine.high %v269_v40, %v269_v40  ;;  %v334_v50 = vcombine.high %v270_v41, %v270_v41  ;;  %v335_v51 = vcombine.high %v271_v42, %v271_v42  ;;  %v478_v55 = vsel %vm372_vm0, %v269_v40, 0.0  ;;  %v11843_v40 = vld [vmem:[#allocation8 + $0x2a4] ss:$24 sps:$4 sm:$0xff]  }
 0x125   :  { %v453_v54 = vadd.f32 %v452_v8, %v451_v44  ;;  %v476_v52 = vsel %vm372_vm0, %v332_v45, 0.0  ;;  %v482_v56 = vsel %vm372_vm0, %v270_v41, 0.0  ;;  %v466_v58 = vadd.f32 %v465_v28, %v464_v48  ;;  %v11840_v8 = vld [vmem:[#allocation8 + $0x274] ss:$24 sps:$4 sm:$0xff]   ;;  %v14268_v28 = vld [vmem:[#allocation2 + $0x48] sm:$0xff] }
 0x126   :  { %v477_v59 = vadd.f32 %v476_v52, %v475_v46  ;;  %v480_v60 = vsel %vm372_vm0, %v333_v49, 0.0  ;;  %v484_v61 = vsel %vm372_vm0, %v334_v50, 0.0  ;;  %v486_v0 = vsel %vm372_vm0, %v271_v42, 0.0 }
 0x127   :  { %3778 = vmatpush1.bf16.msra.mxu0 %v11833_v38  ;;  %v455_v63 = vadd.f32 %v454_v10, %v453_v54  ;;  %v14248_v1 = vsel %vm372_vm0, %v335_v51, 0.0  ;;  %v468_v4 = vadd.f32 %v467_v32, %v466_v58  ;;  %v274_v6 = vunpack.c.l.bf16 %v243_v53  ;;  %v14272_v32 = vld [vmem:[#allocation2 + $0x54] sm:$0xff]  ;;  %v11845_v51 = vld [vmem:[#allocation8 + $0x2a0] ss:$24 sps:$4 sm:$0xff]   ;;  %v11846_v58 = vld [vmem:[#allocation8 + $0x2d4] ss:$24 sps:$4 sm:$0xff]  }
 0x128   :  { %3779 = vmatprep.subr.bf16.mxu0 %v11834_v43  ;;  %v479_v5 = vadd.f32 %v478_v55, %v477_v59  ;;  %v275_v7 = vunpack.c.h.bf16 %v243_v53  ;;  %v336_v11 = vcombine.high %v272_v47, %v272_v47  ;;  %v337_v12 = vcombine.high %v273_v2, %v273_v2 }
 0x129   :  { %456 = vadd.xlane.f32.xlu0 %v455_v63  ;;  %v492_v10 = vsel %vm372_vm0, %v272_v47, 0.0  ;;  %v495_v13 = vsel %vm372_vm0, %v273_v2, 0.0  ;;  %v470_v16 = vadd.f32 %v469_v36, %v468_v4  ;;  %v338_v19 = vcombine.high %v274_v6, %v274_v6 }
 0x12a   :  { %v481_v18 = vadd.f32 %v480_v60, %v479_v5  ;;  %v339_v20 = vcombine.high %v275_v7, %v275_v7  ;;  %v493_v22 = vsel %vm372_vm0, %v336_v11, 0.0  ;;  %v497_v23 = vsel %vm372_vm0, %v337_v12, 0.0  ;;  %v11848_v5 = vld [vmem:[#allocation8 + $0x2d0] ss:$24 sps:$4 sm:$0xff]  }
 0x12b   :  { %3780 = vmatpush1.bf16.msra.mxu0 %v11836_v57  ;;  %v499_v25 = vsel %vm372_vm0, %v274_v6, 0.0  ;;  %v503_v26 = vsel %vm372_vm0, %v275_v7, 0.0  ;;  %v472_v29 = vadd.f32 %v14235_v33, %v470_v16  ;;  %v494_v31 = vadd.f32 %v493_v22, %v492_v10 }
 0x12c   :  { %3781 = vmatprep.subr.bf16.mxu0 %v11837_v62  ;;  %v483_v30 = vadd.f32 %v482_v56, %v481_v18  ;;  %v501_v24 = vsel %vm372_vm0, %v338_v19, 0.0  ;;  %v505_v34 = vsel %vm372_vm0, %v339_v20, 0.0  ;;  %v14276_v36 = vunpack.c.l.bf16 %v14250_v9  ;;  %v11851_v18 = vld [vmem:[#allocation8 + $0x304] ss:$24 sps:$4 sm:$0xff]  }
 0x12d   :  { %v14279_v37 = vunpack.c.l.bf16 %v14254_v14  ;;  %v14282_v38 = vunpack.c.l.bf16 %v14256_v15  ;;  %473 = vadd.xlane.f32.xlu1 %v472_v29  ;;  %v496_v39 = vadd.f32 %v495_v13, %v494_v31  ;;  %v14285_v41 = vunpack.c.l.bf16 %v14258_v17 }
 0x12e   :  { %v485_v33 = vadd.f32 %v484_v61, %v483_v30  ;;  %v14288_v42 = vunpack.c.l.bf16 %v14260_v21  ;;  %v14291_v43 = vunpack.c.l.bf16 %v14266_v27  ;;  %v14294_v44 = vunpack.c.l.bf16 %v14268_v28 }
 0x12f   :  { %3782 = vmatpush1.bf16.msra.mxu0 %v11839_v3  ;;  %v14297_v45 = vunpack.c.l.bf16 %v14272_v32  ;;  %v1365_v46 = vcombine.high %v14276_v36, %v14276_v36  ;;  %v498_v48 = vadd.f32 %v497_v23, %v496_v39  ;;  %v1368_v49 = vcombine.high %v14279_v37, %v14279_v37 }
 0x130   :  { %3783 = vmatprep.subr.bf16.mxu0 %v11840_v8  ;;  %v487_v47 = vadd.f32 %v486_v0, %v485_v33  ;;  %v1371_v50 = vcombine.high %v14282_v38, %v14282_v38  ;;  %v1374_v53 = vcombine.high %v14285_v41, %v14285_v41  ;;  %v1377_v54 = vcombine.high %v14288_v42, %v14288_v42 }
 0x131   :  { %v1380_v52 = vcombine.high %v14291_v43, %v14291_v43  ;;  %v1383_v55 = vcombine.high %v14294_v44, %v14294_v44  ;;  %v500_v57 = vadd.f32 %v499_v25, %v498_v48  ;;  %v1386_v59 = vcombine.high %v14297_v45, %v14297_v45 }
 0x132   :  { %v489_v56 = vadd.f32 %v14248_v1, %v487_v47  ;;  %v1421_v60 = vsel %vm1413_vm1, %v1365_v46, 0.0  ;;  %v1463_v62 = vsel %vm1413_vm1, %v1368_v49, 0.0  ;;  %v1505_v63 = vsel %vm1413_vm1, %v1371_v50, 0.0 }
 0x133   :  { %3784 = vmatpush1.bf16.msra.mxu0 %v11842_v35  ;;  %v1422_v61 = vrot.slane %v1421_v60, 4  ;;  %v1547_v0 = vsel %vm1413_vm1, %v1374_v53, 0.0  ;;  %v502_v2 = vadd.f32 %v501_v24, %v500_v57  ;;  %v1464_v3 = vrot.slane %v1463_v62, 4 }
 0x134   :  { %3785 = vmatprep.subr.bf16.mxu0 %v11843_v40  ;;  %490 = vadd.xlane.f32.xlu0 %v489_v56  ;;  %v1506_v4 = vrot.slane %v1505_v63, 4  ;;  %v1548_v1 = vrot.slane %v1547_v0, 4  ;;  %v1589_v7 = vsel %vm1413_vm1, %v1377_v54, 0.0  ;;  %v1631_v8 = vsel %vm1413_vm1, %v1380_v52, 0.0 }
 0x135   :  { %v1423_v6 = vadd.f32 %v1422_v61, %v1421_v60  ;;  %v1673_v11 = vsel %vm1413_vm1, %v1383_v55, 0.0  ;;  %v504_v12 = vadd.f32 %v503_v26, %v502_v2  ;;  %v1465_v10 = vadd.f32 %v1464_v3, %v1463_v62 }
 0x136   :  { %v1507_v13 = vadd.f32 %v1506_v4, %v1505_v63  ;;  %v1549_v16 = vadd.f32 %v1548_v1, %v1547_v0  ;;  %v1590_v20 = vrot.slane %v1589_v7, 4  ;;  %v1632_v22 = vrot.slane %v1631_v8, 4 }
 0x137   :  { %3786 = vmatpush1.bf16.msra.mxu0 %v11845_v51  ;;  %v1424_v19 = vrot.slane %v1423_v6, 2  ;;  %v1674_v23 = vrot.slane %v1673_v11, 4  ;;  %v506_v25 = vadd.f32 %v505_v34, %v504_v12  ;;  %v1466_v29 = vrot.slane %v1465_v10, 2 }
 0x138   :  { %3787 = vmatprep.subr.bf16.mxu0 %v11846_v58  ;;  %v1508_v30 = vrot.slane %v1507_v13, 2  ;;  %v1550_v31 = vrot.slane %v1549_v16, 2  ;;  %v1591_v35 = vadd.f32 %v1590_v20, %v1589_v7  ;;  %v1633_v33 = vadd.f32 %v1632_v22, %v1631_v8 }
 0x139   :  { %v1425_v24 = vadd.f32 %v1424_v19, %v1423_v6  ;;  %v1675_v39 = vadd.f32 %v1674_v23, %v1673_v11  ;;  %507 = vadd.xlane.f32.xlu1 %v506_v25  ;;  %v1467_v26 = vadd.f32 %v1466_v29, %v1465_v10  ;;  %v1715_v47 = vsel %vm1413_vm1, %v1386_v59, 0.0 }
 0x13a   :  { %v1509_v40 = vadd.f32 %v1508_v30, %v1507_v13  ;;  %v1551_v46 = vadd.f32 %v1550_v31, %v1549_v16  ;;  %v1592_v49 = vrot.slane %v1591_v35, 2  ;;  %v1634_v50 = vrot.slane %v1633_v33, 2 }
 0x13b   :  { %3788 = vmatpush1.bf16.msra.mxu0 %v11848_v5  ;;  %v1426_v48 = vrot.slane %v1425_v24, 1  ;;  %v1676_v34 = vrot.slane %v1675_v39, 2  ;;  %v1468_v51 = vrot.slane %v1467_v26, 1  ;;  %v1716_v52 = vrot.slane %v1715_v47, 4 }
 0x13c   :  { %3798 = vmatprep.subr.bf16.mxu0 %v11851_v18  ;;  %v1510_v53 = vrot.slane %v1509_v40, 1  ;;  %v1552_v54 = vrot.slane %v1551_v46, 1  ;;  %vm656_vm4 = vcmask 1043459   ;;  %v1593_v56 = vadd.f32 %v1592_v49, %v1591_v35 }
 0x13d   :  { %v1427_v55 = vadd.f32 %v1426_v48, %v1425_v24  ;;  %v1635_v57 = vadd.f32 %v1634_v50, %v1633_v33  ;;  %v1677_v58 = vadd.f32 %v1676_v34, %v1675_v39  ;;  %vm658_vm5 = vcmask 1044484  }
 0x13e   :  { %v1469_v60 = vadd.f32 %v1468_v51, %v1467_v26  ;;  %v1511_v61 = vadd.f32 %v1510_v53, %v1509_v40  ;;  %v1553_v59 = vadd.f32 %v1552_v54, %v1551_v46  ;;  %v1717_v62 = vadd.f32 %v1716_v52, %v1715_v47 }
 0x13f   :  { %vm660_vm6 = vcmask 1045509   ;;  %v1594_v63 = vrot.slane %v1593_v56, 1  ;;  %v1636_v0 = vrot.slane %v1635_v57, 1  ;;  %v1678_v2 = vrot.slane %v1677_v58, 1 }
 0x140   :  { %v1752_v3 = vmul.f32 0.25, %v1427_v55  ;;  %vm662_vm7 = vcmask 1046534   ;;  %v1718_v4 = vrot.slane %v1717_v62, 2  ;;  %v1758_v1 = vmul.f32 0.25, %v1469_v60 }
 0x141   :  { %v1764_v5 = vmul.f32 0.25, %v1511_v61  ;;  %v1770_v6 = vmul.f32 0.25, %v1553_v59  ;;  %v1595_v7 = vadd.f32 %v1594_v63, %v1593_v56  ;;  %v1637_v8 = vadd.f32 %v1636_v0, %v1635_v57 }
 0x142   :  { %v1679_v11 = vadd.f32 %v1678_v2, %v1677_v58  ;;  %v1800_v12 = vpack.c.bf16 %v1752_v3, %v1752_v3  ;;  %v1719_v10 = vadd.f32 %v1718_v4, %v1717_v62  ;;  %v1806_v13 = vpack.c.bf16 %v1758_v1, %v1758_v1 }
 0x143   :  { %v1812_v16 = vpack.c.bf16 %v1764_v5, %v1764_v5  ;;  %v1818_v18 = vpack.c.bf16 %v1770_v6, %v1770_v6  ;;  %vm664_vm8 = vcmask 1047559   ;;  %v1776_v19 = vmul.f32 0.25, %v1595_v7 }
 0x144   :  { %v1782_v20 = vmul.f32 0.25, %v1637_v8  ;;  %v1788_v22 = vmul.f32 0.25, %v1679_v11  ;;  %v2216_v23 = vunpack.c.l.b16 %v1800_v12  ;;  %v1720_v25 = vrot.slane %v1719_v10, 1 }
 0x145   :  { %v2222_v29 = vunpack.c.l.b16 %v1806_v13  ;;  %v2228_v30 = vunpack.c.l.b16 %v1812_v16  ;;  %v2234_v31 = vunpack.c.l.b16 %v1818_v18  ;;  %v1824_v24 = vpack.c.bf16 %v1776_v19, %v1776_v19 }
 0x146   :  { %v1830_v35 = vpack.c.bf16 %v1782_v20, %v1782_v20  ;;  %v1836_v33 = vpack.c.bf16 %v1788_v22, %v1788_v22  ;;  %v1414_v39 = vsel %vm1413_vm1, %v14276_v36, 0.0  ;;  %v1721_v26 = vadd.f32 %v1720_v25, %v1719_v10 }
 0x147   :  { %v2270_v40 = vsel %vm652_vm2, %v2222_v29, %v2216_v23  ;;  %v1415_v46 = vrot.slane %v1414_v39, 4  ;;  %v1456_v47 = vsel %vm1413_vm1, %v14279_v37, 0.0  ;;  %v2240_v48 = vunpack.c.l.b16 %v1824_v24 }
 0x148   :  { %v2246_v49 = vunpack.c.l.b16 %v1830_v35  ;;  %v2252_v50 = vunpack.c.l.b16 %v1836_v33  ;;  %v2271_v34 = vsel %vm654_vm3, %v2228_v30, %v2270_v40  ;;  %v1794_v51 = vmul.f32 0.25, %v1721_v26 }
 0x149   :  { %v2272_v53 = vsel %vm656_vm4, %v2234_v31, %v2271_v34  ;;  %v1416_v54 = vadd.f32 %v1415_v46, %v1414_v39  ;;  %v1457_v52 = vrot.slane %v1456_v47, 4  ;;  %v1498_v36 = vsel %vm1413_vm1, %v14282_v38, 0.0 }
 0x14a   :  { %v2273_v55 = vsel %vm658_vm5, %v2240_v48, %v2272_v53  ;;  %v1540_v56 = vsel %vm1413_vm1, %v14285_v41, 0.0  ;;  %v1582_v37 = vsel %vm1413_vm1, %v14288_v42, 0.0  ;;  %v1842_v57 = vpack.c.bf16 %v1794_v51, %v1794_v51 }
 0x14b   :  { %v2274_v58 = vsel %vm660_vm6, %v2246_v49, %v2273_v55  ;;  %v1417_v60 = vrot.slane %v1416_v54, 2  ;;  %v1458_v61 = vadd.f32 %v1457_v52, %v1456_v47  ;;  %v1499_v62 = vrot.slane %v1498_v36, 4 }
 0x14c   :  { %v2275_v59 = vsel %vm662_vm7, %v2252_v50, %v2274_v58  ;;  %v1541_v63 = vrot.slane %v1540_v56, 4  ;;  %v1583_v0 = vrot.slane %v1582_v37, 4  ;;  %v2258_v2 = vunpack.c.l.b16 %v1842_v57 }
 0x14d   :  { %v1418_v3 = vadd.f32 %v1417_v60, %v1416_v54  ;;  %v1459_v4 = vrot.slane %v1458_v61, 2  ;;  %v1624_v38 = vsel %vm1413_vm1, %v14291_v43, 0.0  ;;  %v1500_v41 = vadd.f32 %v1499_v62, %v1498_v36 }
 0x14e   :  { %v1542_v1 = vadd.f32 %v1541_v63, %v1540_v56  ;;  %v1584_v5 = vadd.f32 %v1583_v0, %v1582_v37  ;;  %v1625_v42 = vrot.slane %v1624_v38, 4  ;;  %v2276_v6 = vsel %vm664_vm8, %v2258_v2, %v2275_v59 }
 0x14f   :  { %v1419_v7 = vrot.slane %v1418_v3, 1  ;;  %v1460_v8 = vadd.f32 %v1459_v4, %v1458_v61  ;;  %v1666_v11 = vsel %vm1413_vm1, %v14294_v44, 0.0  ;;  %v14345_v12 = vpack.c.b16 %v2276_v6, %v2276_v6 }
 0x150   :  { %v1501_v10 = vrot.slane %v1500_v41, 2  ;;  %v1543_v13 = vrot.slane %v1542_v1, 2  ;;  %v1585_v16 = vrot.slane %v1584_v5, 2  ;;  %v1626_v20 = vadd.f32 %v1625_v42, %v1624_v38 }
 0x151   :  { %v1420_v18 = vadd.f32 %v1419_v7, %v1418_v3  ;;  %v1461_v19 = vrot.slane %v1460_v8, 1  ;;  %v1667_v43 = vrot.slane %v1666_v11, 4  ;;  %3789 = vmatprep.mubr.bf16.mxu0 %v14345_v12  ;;  %v1708_v29 = vsel %vm1413_vm1, %v14297_v45, 0.0 }
 0x152   :  { %v1502_v22 = vadd.f32 %v1501_v10, %v1500_v41  ;;  %v1544_v23 = vadd.f32 %v1543_v13, %v1542_v1  ;;  %v1586_v25 = vadd.f32 %v1585_v16, %v1584_v5  ;;  %v1627_v31 = vrot.slane %v1626_v20, 2 }
 0x153   :  { %v1462_v30 = vadd.f32 %v1461_v19, %v1460_v8  ;;  %v1668_v44 = vadd.f32 %v1667_v43, %v1666_v11  ;;  %v1709_v24 = vrot.slane %v1708_v29, 4  ;;  %v1751_v26 = vmul.f32 0.25, %v1420_v18 }
 0x154   :  { %v1503_v35 = vrot.slane %v1502_v22, 1  ;;  %v1545_v33 = vrot.slane %v1544_v23, 1  ;;  %v1587_v39 = vrot.slane %v1586_v25, 1  ;;  %v1628_v40 = vadd.f32 %v1627_v31, %v1626_v20 }
 0x155   :  { %v1669_v46 = vrot.slane %v1668_v44, 2  ;;  %v1710_v47 = vadd.f32 %v1709_v24, %v1708_v29  ;;  %v1757_v48 = vmul.f32 0.25, %v1462_v30  ;;  %v1799_v51 = vpack.c.bf16 %v1751_v26, %v1751_v26 }
 0x156   :  { %v1504_v49 = vadd.f32 %v1503_v35, %v1502_v22  ;;  %v1546_v50 = vadd.f32 %v1545_v33, %v1544_v23  ;;  %v1588_v34 = vadd.f32 %v1587_v39, %v1586_v25  ;;  %v1629_v53 = vrot.slane %v1628_v40, 1 }
 0x157   :  { %v1670_v54 = vadd.f32 %v1669_v46, %v1668_v44  ;;  %v1711_v52 = vrot.slane %v1710_v47, 2  ;;  %v1805_v45 = vpack.c.bf16 %v1757_v48, %v1757_v48  ;;  %v2215_v37 = vunpack.c.l.b16 %v1799_v51  ;;  %v11849_v46 = vld [vmem:[#allocation8 + $0x300] ss:$24 sps:$4 sm:$0xff]   ;;  %v11854_v51 = vld [vmem:[#allocation8 + $0x334] ss:$24 sps:$4 sm:$0xff]  }
 0x158   :  { %v1763_v55 = vmul.f32 0.25, %v1504_v49  ;;  %v1769_v36 = vmul.f32 0.25, %v1546_v50  ;;  %v1775_v56 = vmul.f32 0.25, %v1588_v34  ;;  %v1630_v57 = vadd.f32 %v1629_v53, %v1628_v40 }
 0x159   :  { %v1671_v58 = vrot.slane %v1670_v54, 1  ;;  %v1712_v60 = vadd.f32 %v1711_v52, %v1710_v47  ;;  %v2221_v61 = vunpack.c.l.b16 %v1805_v45  ;;  %v14351_v0 = vunpack.c.h.bf16 %v14250_v9 }
 0x15a   :  { %v1811_v59 = vpack.c.bf16 %v1763_v55, %v1763_v55  ;;  %v1817_v62 = vpack.c.bf16 %v1769_v36, %v1769_v36  ;;  %v1823_v63 = vpack.c.bf16 %v1775_v56, %v1775_v56  ;;  %v1781_v4 = vmul.f32 0.25, %v1630_v57 }
 0x15b   :  { %v1672_v2 = vadd.f32 %v1671_v58, %v1670_v54  ;;  %v1713_v3 = vrot.slane %v1712_v60, 1  ;;  %v2263_v38 = vsel %vm652_vm2, %v2221_v61, %v2215_v37  ;;  %v14355_v42 = vunpack.c.h.bf16 %v14254_v14  ;;  %v11852_v61 = vld [vmem:[#allocation8 + $0x330] ss:$24 sps:$4 sm:$0xff]  }
 0x15c   :  { %v2227_v41 = vunpack.c.l.b16 %v1811_v59  ;;  %v2233_v1 = vunpack.c.l.b16 %v1817_v62  ;;  %v2239_v5 = vunpack.c.l.b16 %v1823_v63  ;;  %v1829_v8 = vpack.c.bf16 %v1781_v4, %v1781_v4 }
 0x15d   :  { %v1714_v6 = vadd.f32 %v1713_v3, %v1712_v60  ;;  %v1787_v7 = vmul.f32 0.25, %v1672_v2  ;;  %v14358_v11 = vunpack.c.h.bf16 %v14256_v15  ;;  %v14362_v10 = vunpack.c.h.bf16 %v14258_v17  ;;  %v11857_v3 = vld [vmem:[#allocation8 + $0x364] ss:$24 sps:$4 sm:$0xff]  }
 0x15e   :  { %v2264_v9 = vsel %vm654_vm3, %v2227_v41, %v2263_v38  ;;  %v14365_v13 = vunpack.c.h.bf16 %v14260_v21  ;;  %v14368_v16 = vunpack.c.h.bf16 %v14266_v27  ;;  %v2245_v19 = vunpack.c.l.b16 %v1829_v8 }
 0x15f   :  { %v1793_v18 = vmul.f32 0.25, %v1714_v6  ;;  %v1835_v14 = vpack.c.bf16 %v1787_v7, %v1787_v7  ;;  %v2265_v20 = vsel %vm656_vm4, %v2233_v1, %v2264_v9  ;;  %v14373_v15 = vunpack.c.h.bf16 %v14268_v28 }
 0x160   :  { %v2266_v43 = vsel %vm658_vm5, %v2239_v5, %v2265_v20  ;;  %v14376_v22 = vunpack.c.h.bf16 %v14272_v32  ;;  %v1366_v17 = vcombine.high %v14351_v0, %v14351_v0  ;;  %v1369_v25 = vcombine.high %v14355_v42, %v14355_v42  ;;  %v11855_v20 = vld [vmem:[#allocation8 + $0x360] ss:$24 sps:$4 sm:$0xff]  }
 0x161   :  { %v1841_v21 = vpack.c.bf16 %v1793_v18, %v1793_v18  ;;  %v2251_v23 = vunpack.c.l.b16 %v1835_v14  ;;  %v2267_v27 = vsel %vm660_vm6, %v2245_v19, %v2266_v43  ;;  %v1372_v29 = vcombine.high %v14358_v11, %v14358_v11 }
 0x162   :  { %v1375_v28 = vcombine.high %v14362_v10, %v14362_v10  ;;  %v1378_v32 = vcombine.high %v14365_v13, %v14365_v13  ;;  %v1381_v30 = vcombine.high %v14368_v16, %v14368_v16  ;;  %v1384_v24 = vcombine.high %v14373_v15, %v14373_v15 }
 0x163   :  { %v2257_v31 = vunpack.c.l.b16 %v1841_v21  ;;  %v2268_v44 = vsel %vm662_vm7, %v2251_v23, %v2267_v27  ;;  %v1387_v35 = vcombine.high %v14376_v22, %v14376_v22  ;;  %v1435_v33 = vsel %vm1413_vm1, %v1366_v17, 0.0  ;;  %v11860_v27 = vld [vmem:[#allocation8 + $0x394] ss:$24 sps:$4 sm:$0xff]  }
 0x164   :  { %v1477_v39 = vsel %vm1413_vm1, %v1369_v25, 0.0  ;;  %v1519_v26 = vsel %vm1413_vm1, %v1372_v29, 0.0  ;;  %v1561_v40 = vsel %vm1413_vm1, %v1375_v28, 0.0  ;;  %v1436_v48 = vrot.slane %v1435_v33, 4 }
 0x165   :  { %v2269_v47 = vsel %vm664_vm8, %v2257_v31, %v2268_v44  ;;  %v1478_v49 = vrot.slane %v1477_v39, 4  ;;  %v1520_v50 = vrot.slane %v1519_v26, 4  ;;  %v1562_v53 = vrot.slane %v1561_v40, 4 }
 0x166   :  { %v14401_v34 = vpack.c.b16 %v2269_v47, %v2269_v47  ;;  %v1603_v54 = vsel %vm1413_vm1, %v1378_v32, 0.0  ;;  %v1645_v52 = vsel %vm1413_vm1, %v1381_v30, 0.0  ;;  %v1437_v45 = vadd.f32 %v1436_v48, %v1435_v33 }
 0x167   :  { %v1479_v55 = vadd.f32 %v1478_v49, %v1477_v39  ;;  %v1521_v36 = vadd.f32 %v1520_v50, %v1519_v26  ;;  %v1604_v56 = vrot.slane %v1603_v54, 4  ;;  %v1563_v37 = vadd.f32 %v1562_v53, %v1561_v40  ;;  %v11858_v40 = vld [vmem:[#allocation8 + $0x390] ss:$24 sps:$4 sm:$0xff]   ;;  %v11863_v50 = vld [vmem:[#allocation8 + $0x3c4] ss:$24 sps:$4 sm:$0xff]  }
 0x168   :  { %3790 = vmatmul.mubr.bf16.vlgmr.msra.gmra.mrb[0].mxu0 %v14401_v34  ;;  %v1646_v57 = vrot.slane %v1645_v52, 4  ;;  %v1687_v58 = vsel %vm1413_vm1, %v1384_v24, 0.0  ;;  %v1729_v60 = vsel %vm1413_vm1, %v1387_v35, 0.0  ;;  %v1438_v59 = vrot.slane %v1437_v45, 2 }
 0x169   :  { %3799 = vmatpush1.bf16.msra.mxu0 %v11849_v46  ;;  %v1480_v62 = vrot.slane %v1479_v55, 2  ;;  %v1522_v63 = vrot.slane %v1521_v36, 2  ;;  %v1605_v2 = vadd.f32 %v1604_v56, %v1603_v54  ;;  %v1564_v4 = vrot.slane %v1563_v37, 2 }
 0x16a   :  { %3800 = vmatprep.subr.bf16.mxu0 %v11854_v51  ;;  %v1647_v38 = vadd.f32 %v1646_v57, %v1645_v52  ;;  %v1688_v41 = vrot.slane %v1687_v58, 4  ;;  %v1730_v1 = vrot.slane %v1729_v60, 4  ;;  %v1439_v5 = vadd.f32 %v1438_v59, %v1437_v45 }
 0x16b   :  { %v1481_v6 = vadd.f32 %v1480_v62, %v1479_v55  ;;  %v1523_v7 = vadd.f32 %v1522_v63, %v1521_v36  ;;  %v1606_v8 = vrot.slane %v1605_v2, 2  ;;  %v1565_v9 = vadd.f32 %v1564_v4, %v1563_v37 }
 0x16c   :  { %v1648_v18 = vrot.slane %v1647_v38, 2  ;;  %v1689_v14 = vadd.f32 %v1688_v41, %v1687_v58  ;;  %v1731_v19 = vadd.f32 %v1730_v1, %v1729_v60  ;;  %v1440_v43 = vrot.slane %v1439_v5, 1 }
 0x16d   :  { %3801 = vmatpush1.bf16.msra.mxu0 %v11852_v61  ;;  %v1482_v17 = vrot.slane %v1481_v6, 1  ;;  %v1524_v21 = vrot.slane %v1523_v7, 1  ;;  %v1607_v23 = vadd.f32 %v1606_v8, %v1605_v2  ;;  %v1566_v25 = vrot.slane %v1565_v9, 1  ;;  %v11861_v61 = vld [vmem:[#allocation8 + $0x3c0] ss:$24 sps:$4 sm:$0xff]  }
 0x16e   :  { %3802 = vmatprep.subr.bf16.mxu0 %v11857_v3  ;;  %v1649_v29 = vadd.f32 %v1648_v18, %v1647_v38  ;;  %v1690_v28 = vrot.slane %v1689_v14, 2  ;;  %v1732_v32 = vrot.slane %v1731_v19, 2  ;;  %v1441_v30 = vadd.f32 %v1440_v43, %v1439_v5  ;;  %v11866_v3 = vld [vmem:[#allocation8 + $0x3f4] ss:$24 sps:$4 sm:$0xff]  }
 0x16f   :  { %v1483_v31 = vadd.f32 %v1482_v17, %v1481_v6  ;;  %v1525_v44 = vadd.f32 %v1524_v21, %v1523_v7  ;;  %v1608_v24 = vrot.slane %v1607_v23, 1  ;;  %v1567_v35 = vadd.f32 %v1566_v25, %v1565_v9 }
 0x170   :  { %v1650_v33 = vrot.slane %v1649_v29, 1  ;;  %v1691_v39 = vadd.f32 %v1690_v28, %v1689_v14  ;;  %v1733_v26 = vadd.f32 %v1732_v32, %v1731_v19  ;;  %v1754_v47 = vmul.f32 0.25, %v1441_v30 }
 0x171   :  { %3803 = vmatpush1.bf16.msra.mxu0 %v11855_v20  ;;  %v1609_v46 = vadd.f32 %v1608_v24, %v1607_v23  ;;  %v1760_v48 = vmul.f32 0.25, %v1483_v31  ;;  %v1766_v49 = vmul.f32 0.25, %v1525_v44  ;;  %v1772_v52 = vmul.f32 0.25, %v1567_v35  ;;  %v11864_v20 = vld [vmem:[#allocation8 + $0x3f0] ss:$24 sps:$4 sm:$0xff]  }
 0x172   :  { %3804 = vmatprep.subr.bf16.mxu0 %v11860_v27  ;;  %v1651_v51 = vadd.f32 %v1650_v33, %v1649_v29  ;;  %v1692_v53 = vrot.slane %v1691_v39, 1  ;;  %v1734_v54 = vrot.slane %v1733_v26, 1  ;;  %v1802_v55 = vpack.c.bf16 %v1754_v47, %v1754_v47  ;;  %v11869_v27 = vld [vmem:[#allocation8 + $0x424] ss:$24 sps:$4 sm:$0xff]   ;;  %v11867_v33 = vld [vmem:[#allocation8 + $0x420] ss:$24 sps:$4 sm:$0xff]  }
 0x173   :  { %v1778_v45 = vmul.f32 0.25, %v1609_v46  ;;  %v1808_v36 = vpack.c.bf16 %v1760_v48, %v1760_v48  ;;  %v1814_v56 = vpack.c.bf16 %v1766_v49, %v1766_v49  ;;  %v1820_v60 = vpack.c.bf16 %v1772_v52, %v1772_v52  ;;  %v11872_v47 = vld [vmem:[#allocation8 + $0x454] ss:$24 sps:$4 sm:$0xff]  }
 0x174   :  { %v1693_v37 = vadd.f32 %v1692_v53, %v1691_v39  ;;  %v1735_v57 = vadd.f32 %v1734_v54, %v1733_v26  ;;  %v1784_v58 = vmul.f32 0.25, %v1651_v51  ;;  %v2218_v62 = vunpack.c.l.b16 %v1802_v55 }
 0x175   :  { %3805 = vmatpush1.bf16.msra.mxu0 %v11858_v40  ;;  %v1826_v59 = vpack.c.bf16 %v1778_v45, %v1778_v45  ;;  %v2224_v63 = vunpack.c.l.b16 %v1808_v36  ;;  %v2230_v2 = vunpack.c.l.b16 %v1814_v56  ;;  %v2236_v1 = vunpack.c.l.b16 %v1820_v60  ;;  %v11870_v56 = vld [vmem:[#allocation8 + $0x450] ss:$24 sps:$4 sm:$0xff]   ;;  %v11875_v60 = vld [vmem:[#allocation8 + $0x484] ss:$24 sps:$4 sm:$0xff]  }
 0x176   :  { %3806 = vmatprep.subr.bf16.mxu0 %v11863_v50  ;;  %v1790_v4 = vmul.f32 0.25, %v1693_v37  ;;  %v1796_v38 = vmul.f32 0.25, %v1735_v57  ;;  %v1832_v41 = vpack.c.bf16 %v1784_v58, %v1784_v58  ;;  %v1428_v7 = vsel %vm1413_vm1, %v14351_v0, 0.0 }
 0x177   :  { %v2242_v5 = vunpack.c.l.b16 %v1826_v59  ;;  %v2284_v6 = vsel %vm652_vm2, %v2224_v63, %v2218_v62  ;;  %v1470_v8 = vsel %vm1413_vm1, %v14355_v42, 0.0  ;;  %v1429_v17 = vrot.slane %v1428_v7, 4 }
 0x178   :  { %v1838_v9 = vpack.c.bf16 %v1790_v4, %v1790_v4  ;;  %v1844_v18 = vpack.c.bf16 %v1796_v38, %v1796_v38  ;;  %v2248_v14 = vunpack.c.l.b16 %v1832_v41  ;;  %v2285_v19 = vsel %vm654_vm3, %v2230_v2, %v2284_v6 }
 0x179   :  { %3807 = vmatpush1.bf16.msra.mxu0 %v11861_v61  ;;  %v2286_v43 = vsel %vm656_vm4, %v2236_v1, %v2285_v19  ;;  %v1471_v21 = vrot.slane %v1470_v8, 4  ;;  %v1512_v23 = vsel %vm1413_vm1, %v14358_v11, 0.0  ;;  %v1430_v32 = vadd.f32 %v1429_v17, %v1428_v7 }
 0x17a   :  { %3808 = vmatprep.subr.bf16.mxu0 %v11866_v3  ;;  %v2254_v0 = vunpack.c.l.b16 %v1838_v9  ;;  %v2260_v25 = vunpack.c.l.b16 %v1844_v18  ;;  %v2287_v42 = vsel %vm658_vm5, %v2242_v5, %v2286_v43  ;;  %v1513_v29 = vrot.slane %v1512_v23, 4  ;;  %v11873_v5 = vld [vmem:[#allocation8 + $0x480] ss:$24 sps:$4 sm:$0xff]   ;;  %v11878_v18 = vld [vmem:[#allocation8 + $0x4b4] ss:$24 sps:$4 sm:$0xff]  }
 0x17b   :  { %v2288_v28 = vsel %vm660_vm6, %v2248_v14, %v2287_v42  ;;  %v1472_v30 = vadd.f32 %v1471_v21, %v1470_v8  ;;  %v1554_v31 = vsel %vm1413_vm1, %v14362_v10, 0.0  ;;  %v1596_v11 = vsel %vm1413_vm1, %v14365_v13, 0.0 }
 0x17c   :  { %v2289_v44 = vsel %vm662_vm7, %v2254_v0, %v2288_v28  ;;  %v1514_v24 = vadd.f32 %v1513_v29, %v1512_v23  ;;  %v1555_v35 = vrot.slane %v1554_v31, 4  ;;  %v1431_v26 = vrot.slane %v1430_v32, 2  ;;  %v11876_v28 = vld [vmem:[#allocation8 + $0x4b0] ss:$24 sps:$4 sm:$0xff]  }
 0x17d   :  { %3809 = vmatpush1.bf16.msra.mxu0 %v11864_v20  ;;  %v2290_v39 = vsel %vm664_vm8, %v2260_v25, %v2289_v44  ;;  %v1473_v40 = vrot.slane %v1472_v30, 2  ;;  %v1597_v46 = vrot.slane %v1596_v11, 4  ;;  %v1638_v50 = vsel %vm1413_vm1, %v14368_v16, 0.0 }
 0x17e   :  { %3810 = vmatprep.subr.bf16.mxu0 %v11869_v27  ;;  %v14425_v48 = vpack.c.b16 %v2290_v39, %v2290_v39  ;;  %v1515_v49 = vrot.slane %v1514_v24, 2  ;;  %v1556_v10 = vadd.f32 %v1555_v35, %v1554_v31  ;;  %v1432_v51 = vadd.f32 %v1431_v26, %v1430_v32  ;;  %v518_v26 = vld [vmem:[#allocation5] sm:$0x77] }
 0x17f   :  { %v1474_v53 = vadd.f32 %v1473_v40, %v1472_v30  ;;  %v1598_v54 = vadd.f32 %v1597_v46, %v1596_v11  ;;  %v1639_v13 = vrot.slane %v1638_v50, 4  ;;  %v1680_v55 = vsel %vm1413_vm1, %v14373_v15, 0.0  ;;  %v11879_v40 = vld [vmem:[#allocation8 + $0x4e0] ss:$24 sps:$4 sm:$0xff]  }
 0x180   :  { %3830 = vmatprep.mubr.bf16.mxu0 %v14425_v48  ;;  %v1516_v52 = vadd.f32 %v1515_v49, %v1514_v24  ;;  %v1557_v45 = vrot.slane %v1556_v10, 2  ;;  %v1722_v36 = vsel %vm1413_vm1, %v14376_v22, 0.0  ;;  %v1433_v37 = vrot.slane %v1432_v51, 1  ;;  %v11881_v24 = vld [vmem:[#allocation8 + $0x4e4] ss:$24 sps:$4 sm:$0xff]  }
 0x181   :  { %3811 = vmatpush1.bf16.msra.mxu0 %v11867_v33  ;;  %v1475_v57 = vrot.slane %v1474_v53, 1  ;;  %v1599_v58 = vrot.slane %v1598_v54, 2  ;;  %v1640_v16 = vadd.f32 %v1639_v13, %v1638_v50  ;;  %v1681_v62 = vrot.slane %v1680_v55, 4 }
 0x182   :  { %3812 = vmatprep.subr.bf16.mxu0 %v11872_v47  ;;  %v1517_v61 = vrot.slane %v1516_v52, 1  ;;  %v1558_v59 = vadd.f32 %v1557_v45, %v1556_v10  ;;  %v1723_v63 = vrot.slane %v1722_v36, 4  ;;  %v1434_v2 = vadd.f32 %v1433_v37, %v1432_v51  ;;  %v14436_v45 = vld [vmem:[#allocation5 + $0x8] sm:$0x77] }
 0x183   :  { %v1476_v3 = vadd.f32 %v1475_v57, %v1474_v53  ;;  %v1600_v4 = vadd.f32 %v1599_v58, %v1598_v54  ;;  %v1641_v38 = vrot.slane %v1640_v16, 2  ;;  %v1682_v1 = vadd.f32 %v1681_v62, %v1680_v55  ;;  %v11884_v54 = vld [vmem:[#allocation8 + $0x514] ss:$24 sps:$4 sm:$0xff]   ;;  %v1302_v55 = vld [vmem:[#allocation2 + $0x8] ss:$12 sps:$4 sm:$0xff]  }
 0x184   :  { %v1518_v15 = vadd.f32 %v1517_v61, %v1516_v52  ;;  %v1559_v41 = vrot.slane %v1558_v59, 1  ;;  %v1724_v22 = vadd.f32 %v1723_v63, %v1722_v36  ;;  %v1753_v8 = vmul.f32 0.25, %v1434_v2  ;;  %v1306_v58 = vld [vmem:[#allocation2 + $0x20] ss:$12 sps:$4 sm:$0xff]  }
 0x185   :  { %3813 = vmatpush1.bf16.msra.mxu0 %v11870_v56  ;;  %v1601_v6 = vrot.slane %v1600_v4, 1  ;;  %v1642_v7 = vadd.f32 %v1641_v38, %v1640_v16  ;;  %v1759_v9 = vmul.f32 0.25, %v1476_v3  ;;  %v1683_v19 = vrot.slane %v1682_v1, 2  ;;  %v1310_v16 = vld [vmem:[#allocation2 + $0x38] ss:$12 sps:$4 sm:$0xff]  }
 0x186   :  { %3814 = vmatprep.subr.bf16.mxu0 %v11875_v60  ;;  %v1560_v14 = vadd.f32 %v1559_v41, %v1558_v59  ;;  %v1725_v20 = vrot.slane %v1724_v22, 2  ;;  %v1765_v43 = vmul.f32 0.25, %v1518_v15  ;;  %v1801_v23 = vpack.c.bf16 %v1753_v8, %v1753_v8  ;;  %v11882_v3 = vld [vmem:[#allocation8 + $0x510] ss:$24 sps:$4 sm:$0xff]   ;;  %v1314_v38 = vld [vmem:[#allocation2 + $0x50] ss:$12 sps:$4 sm:$0xff]  }
 0x187   :  { %v1602_v17 = vadd.f32 %v1601_v6, %v1600_v4  ;;  %v1643_v21 = vrot.slane %v1642_v7, 1  ;;  %v1807_v27 = vpack.c.bf16 %v1759_v9, %v1759_v9  ;;  %v1684_v0 = vadd.f32 %v1683_v19, %v1682_v1  ;;  %v11887_v41 = vld [vmem:[#allocation8 + $0x544] ss:$24 sps:$4 sm:$0xff]  }
 0x188   :  { %v1726_v25 = vadd.f32 %v1725_v20, %v1724_v22  ;;  %v1771_v42 = vmul.f32 0.25, %v1560_v14  ;;  %v1813_v29 = vpack.c.bf16 %v1765_v43, %v1765_v43  ;;  %v2217_v31 = vunpack.c.l.b16 %v1801_v23  ;;  %v11885_v43 = vld [vmem:[#allocation8 + $0x540] ss:$24 sps:$4 sm:$0xff]  }
 0x189   :  { %3815 = vmatpush1.bf16.msra.mxu0 %v11873_v5  ;;  %v1644_v32 = vadd.f32 %v1643_v21, %v1642_v7  ;;  %v1777_v30 = vmul.f32 0.25, %v1602_v17  ;;  %v2223_v44 = vunpack.c.l.b16 %v1807_v27  ;;  %v1685_v35 = vrot.slane %v1684_v0, 1  ;;  %v11890_v27 = vld [vmem:[#allocation8 + $0x574] ss:$24 sps:$4 sm:$0xff]  }
 0x18a   :  { %3816 = vmatprep.subr.bf16.mxu0 %v11878_v18  ;;  %v1727_v11 = vrot.slane %v1726_v25, 1  ;;  %v1819_v33 = vpack.c.bf16 %v1771_v42, %v1771_v42  ;;  %v2229_v39 = vunpack.c.l.b16 %v1813_v29  ;;  %v674_v57 = vcombine.high %v518_v26, %v518_v26 }
 0x18b   :  { %v1783_v46 = vmul.f32 0.25, %v1644_v32  ;;  %v1825_v47 = vpack.c.bf16 %v1777_v30, %v1777_v30  ;;  %v2277_v49 = vsel %vm652_vm2, %v2223_v44, %v2217_v31  ;;  %v1686_v10 = vadd.f32 %v1685_v35, %v1684_v0 }
 0x18c   :  { %v1728_v50 = vadd.f32 %v1727_v11, %v1726_v25  ;;  %v2235_v51 = vunpack.c.l.b16 %v1819_v33  ;;  %v2278_v53 = vsel %vm654_vm3, %v2229_v39, %v2277_v49  ;;  %10482 = vmatprep.subr.msk.mxu1 %vm372_vm0, %v674_v57  ;;  %v13879_v63 = vmov 0.0   ;;  %v11888_v33 = vld [vmem:[#allocation8 + $0x570] ss:$24 sps:$4 sm:$0xff]   ;;  %v11891_v57 = vld [vmem:[#allocation8 + $0x5a0] ss:$24 sps:$4 sm:$0xff]  }
 0x18d   :  { %3817 = vmatpush1.bf16.msra.mxu0 %v11876_v28  ;;  %v1831_v13 = vpack.c.bf16 %v1783_v46, %v1783_v46  ;;  %v2241_v52 = vunpack.c.l.b16 %v1825_v47  ;;  %v1789_v36 = vmul.f32 0.25, %v1686_v10  ;;  %781 = vmatprep.mubr.f32.mxu1 %v13879_v63  ;;  %v675_v2 = vcombine.high %v14436_v45, %v14436_v45  ;;  %v11893_v47 = vld [vmem:[#allocation8 + $0x5a4] ss:$24 sps:$4 sm:$0xff]  }
 0x18e   :  { %3818 = vmatprep.subr.bf16.mxu0 %v11881_v24  ;;  %v1795_v56 = vmul.f32 0.25, %v1728_v50  ;;  %v2279_v37 = vsel %vm656_vm4, %v2235_v51, %v2278_v53  ;;  %10483 = vmatpush1.msk.msra.mxu1 %vm372_vm0, %v518_v26  ;;  %v14446_v15 = vunpack.c.l.bf16 %v1302_v55  ;;  %v14449_v5 = vunpack.c.h.bf16 %v1302_v55 }
 0x18f   :  { %v2247_v60 = vunpack.c.l.b16 %v1831_v13  ;;  %v2280_v61 = vsel %vm658_vm5, %v2241_v52, %v2279_v37  ;;  %v1837_v59 = vpack.c.bf16 %v1789_v36, %v1789_v36  ;;  %10485 = vmatprep.subr.msk.mxu1 %vm372_vm0, %v675_v2  ;;  %v14451_v6 = vunpack.c.l.bf16 %v1306_v58 }
 0x190   :  { %v1843_v62 = vpack.c.bf16 %v1795_v56, %v1795_v56  ;;  %v14453_v7 = vunpack.c.h.bf16 %v1306_v58  ;;  %v14455_v8 = vunpack.c.l.bf16 %v1310_v16  ;;  %v14457_v9 = vunpack.c.h.bf16 %v1310_v16 }
 0x191   :  { %3819 = vmatpush1.bf16.msra.mxu0 %v11879_v40  ;;  %v2281_v4 = vsel %vm660_vm6, %v2247_v60, %v2280_v61  ;;  %v2253_v1 = vunpack.c.l.b16 %v1837_v59  ;;  %v14460_v14 = vunpack.c.l.bf16 %v1314_v38  ;;  %v14462_v19 = vunpack.c.h.bf16 %v1314_v38  ;;  %v11896_v59 = vld [vmem:[#allocation8 + $0x5d4] ss:$24 sps:$4 sm:$0xff]  }
 0x192   :  { %3820 = vmatprep.subr.bf16.mxu0 %v11884_v54  ;;  %v2259_v22 = vunpack.c.l.b16 %v1843_v62  ;;  %v1367_v20 = vcombine.high %v14446_v15, %v14446_v15  ;;  %v1370_v17 = vcombine.high %v14449_v5, %v14449_v5  ;;  %v1373_v21 = vcombine.high %v14451_v6, %v14451_v6 }
 0x193   :  { %v2282_v18 = vsel %vm662_vm7, %v2253_v1, %v2281_v4  ;;  %v1376_v23 = vcombine.high %v14453_v7, %v14453_v7  ;;  %v1379_v25 = vcombine.high %v14455_v8, %v14455_v8  ;;  %v1382_v42 = vcombine.high %v14457_v9, %v14457_v9 }
 0x194   :  { %v14473_v0 = vsel %vm664_vm8, %v2259_v22, %v2282_v18  ;;  %v1385_v29 = vcombine.high %v14460_v14, %v14460_v14  ;;  %v1388_v28 = vcombine.high %v14462_v19, %v14462_v19  ;;  %v1449_v32 = vsel %vm1413_vm1, %v1367_v20, 0.0 }
 0x195   :  { %3821 = vmatpush1.bf16.msra.mxu0 %v11882_v3  ;;  %v1491_v30 = vsel %vm1413_vm1, %v1370_v17, 0.0  ;;  %v1533_v31 = vsel %vm1413_vm1, %v1373_v21, 0.0  ;;  %v1450_v44 = vrot.slane %v1449_v32, 4  ;;  %v1575_v11 = vsel %vm1413_vm1, %v1376_v23, 0.0  ;;  %v11894_v21 = vld [vmem:[#allocation8 + $0x5d0] ss:$24 sps:$4 sm:$0xff]  }
 0x196   :  { %3822 = vmatprep.subr.bf16.mxu0 %v11887_v41  ;;  %v1492_v24 = vrot.slane %v1491_v30, 4  ;;  %v1534_v35 = vrot.slane %v1533_v31, 4  ;;  %v1576_v39 = vrot.slane %v1575_v11, 4  ;;  %v1617_v26 = vsel %vm1413_vm1, %v1379_v25, 0.0 }
 0x197   :  { %v1659_v40 = vsel %vm1413_vm1, %v1382_v42, 0.0  ;;  %v1701_v46 = vsel %vm1413_vm1, %v1385_v29, 0.0  ;;  %v1451_v49 = vadd.f32 %v1450_v44, %v1449_v32  ;;  %v1618_v51 = vrot.slane %v1617_v26, 4  ;;  %v11899_v29 = vld [vmem:[#allocation8 + $0x604] ss:$24 sps:$4 sm:$0xff]  }
 0x198   :  { %v1493_v10 = vadd.f32 %v1492_v24, %v1491_v30  ;;  %v1535_v50 = vadd.f32 %v1534_v35, %v1533_v31  ;;  %v1577_v53 = vadd.f32 %v1576_v39, %v1575_v11  ;;  %v1660_v54 = vrot.slane %v1659_v40, 4 }
 0x199   :  { %3823 = vmatpush1.bf16.msra.mxu0 %v11885_v43  ;;  %v1702_v13 = vrot.slane %v1701_v46, 4  ;;  %v1743_v52 = vsel %vm1413_vm1, %v1388_v28, 0.0  ;;  %v1452_v55 = vrot.slane %v1451_v49, 2  ;;  %v1619_v37 = vadd.f32 %v1618_v51, %v1617_v26 }
 0x19a   :  { %3824 = vmatprep.subr.bf16.mxu0 %v11890_v27  ;;  %v1494_v36 = vrot.slane %v1493_v10, 2  ;;  %v1536_v56 = vrot.slane %v1535_v50, 2  ;;  %v1578_v58 = vrot.slane %v1577_v53, 2  ;;  %v1661_v16 = vadd.f32 %v1660_v54, %v1659_v40 }
 0x19b   :  { %v1703_v60 = vadd.f32 %v1702_v13, %v1701_v46  ;;  %v1744_v61 = vrot.slane %v1743_v52, 4  ;;  %v1453_v62 = vadd.f32 %v1452_v55, %v1451_v49  ;;  %v1620_v4 = vrot.slane %v1619_v37, 2  ;;  %v11897_v46 = vld [vmem:[#allocation8 + $0x600] ss:$24 sps:$4 sm:$0xff]  }
 0x19c   :  { %v1495_v2 = vadd.f32 %v1494_v36, %v1493_v10  ;;  %v1537_v3 = vadd.f32 %v1536_v56, %v1535_v50  ;;  %v1579_v38 = vadd.f32 %v1578_v58, %v1577_v53  ;;  %v1662_v41 = vrot.slane %v1661_v16, 2  ;;  %v11902_v50 = vld [vmem:[#allocation8 + $0x634] ss:$24 sps:$4 sm:$0xff]  }
 0x19d   :  { %3825 = vmatpush1.bf16.msra.mxu0 %v11888_v33  ;;  %v1704_v1 = vrot.slane %v1703_v60, 2  ;;  %v1745_v22 = vadd.f32 %v1744_v61, %v1743_v52  ;;  %v1454_v18 = vrot.slane %v1453_v62, 1  ;;  %v1621_v17 = vadd.f32 %v1620_v4, %v1619_v37 }
 0x19e   :  { %3826 = vmatprep.subr.bf16.mxu0 %v11893_v47  ;;  %v1496_v20 = vrot.slane %v1495_v2, 1  ;;  %v1538_v43 = vrot.slane %v1537_v3, 1  ;;  %v1580_v23 = vrot.slane %v1579_v38, 1  ;;  %v1663_v27 = vadd.f32 %v1662_v41, %v1661_v16 }
 0x19f   :  { %v1705_v25 = vadd.f32 %v1704_v1, %v1703_v60  ;;  %v1746_v42 = vrot.slane %v1745_v22, 2  ;;  %v1455_v28 = vadd.f32 %v1454_v18, %v1453_v62  ;;  %v1622_v31 = vrot.slane %v1621_v17, 1 }
 0x1a0   :  { %v1497_v32 = vadd.f32 %v1496_v20, %v1495_v2  ;;  %v1539_v30 = vadd.f32 %v1538_v43, %v1537_v3  ;;  %v14493_v44 = vpack.c.b16 %v14473_v0, %v14473_v0  ;;  %v1581_v24 = vadd.f32 %v1580_v23, %v1579_v38  ;;  %v389_v41 = vpop.xlane.xlu0 %388 }
 0x1a1   :  { %3827 = vmatpush1.bf16.msra.mxu0 %v11891_v57  ;;  %v1664_v35 = vrot.slane %v1663_v27, 1  ;;  %v1706_v11 = vrot.slane %v1705_v25, 1  ;;  %v1623_v33 = vadd.f32 %v1622_v31, %v1621_v17  ;;  %v1747_v39 = vadd.f32 %v1746_v42, %v1745_v22  ;;  %v11900_v57 = vld [vmem:[#allocation8 + $0x630] ss:$24 sps:$4 sm:$0xff]  }
 0x1a2   :  { %3828 = vmatprep.subr.bf16.mxu0 %v11896_v59  ;;  %v1756_v26 = vmul.f32 0.25, %v1455_v28  ;;  %v1762_v40 = vmul.f32 0.25, %v1497_v32  ;;  %v1768_v10 = vmul.f32 0.25, %v1539_v30  ;;  %v1774_v53 = vmul.f32 0.25, %v1581_v24  ;;  %v11905_v59 = vld [vmem:[#allocation8 + $0x664] ss:$24 sps:$4 sm:$0xff]  }
 0x1a3   :  { %v1665_v47 = vadd.f32 %v1664_v35, %v1663_v27  ;;  %v1707_v49 = vadd.f32 %v1706_v11, %v1705_v25  ;;  %v1748_v51 = vrot.slane %v1747_v39, 1  ;;  %v1780_v54 = vmul.f32 0.25, %v1623_v33 }
 0x1a4   :  { %v1804_v52 = vpack.c.bf16 %v1756_v26, %v1756_v26  ;;  %v1810_v55 = vpack.c.bf16 %v1762_v40, %v1762_v40  ;;  %v1816_v56 = vpack.c.bf16 %v1768_v10, %v1768_v10  ;;  %v1822_v37 = vpack.c.bf16 %v1774_v53, %v1774_v53  ;;  %v423_v26 = vpop.xlane.xlu1 %422 }
 0x1a5   :  { %3829 = vmatpush1.bf16.msra.mxu0 %v11894_v21  ;;  %v1786_v13 = vmul.f32 0.25, %v1665_v47  ;;  %v1792_v0 = vmul.f32 0.25, %v1707_v49  ;;  %v1749_v36 = vadd.f32 %v1748_v51, %v1747_v39  ;;  %v1828_v58 = vpack.c.bf16 %v1780_v54, %v1780_v54  ;;  %v11903_v21 = vld [vmem:[#allocation8 + $0x660] ss:$24 sps:$4 sm:$0xff]   ;;  %v11911_v49 = vld [vmem:[#allocation8 + $0x6c4] ss:$24 sps:$4 sm:$0xff]  }
 0x1a6   :  { %3839 = vmatprep.subr.bf16.mxu0 %v11899_v29  ;;  %v2220_v61 = vunpack.c.l.b16 %v1804_v52  ;;  %v2226_v2 = vunpack.c.l.b16 %v1810_v55  ;;  %v2232_v3 = vunpack.c.l.b16 %v1816_v56  ;;  %v2238_v4 = vunpack.c.l.b16 %v1822_v37  ;;  %v11908_v29 = vld [vmem:[#allocation8 + $0x694] ss:$24 sps:$4 sm:$0xff]   ;;  %v11909_v52 = vld [vmem:[#allocation8 + $0x6c0] ss:$24 sps:$4 sm:$0xff]  }
 0x1a7   :  { %v1834_v16 = vpack.c.bf16 %v1786_v13, %v1786_v13  ;;  %v1840_v60 = vpack.c.bf16 %v1792_v0, %v1792_v0  ;;  %v1798_v62 = vmul.f32 0.25, %v1749_v36  ;;  %v530_v38 = vlaneseq }
 0x1a8   :  { %3831 = vmatmul.mubr.bf16.vlgmr.msra.gmra.mrb[0].mxu0 %v14493_v44  ;;  %v2244_v1 = vunpack.c.l.b16 %v1828_v58  ;;  %v2298_v43 = vsel %vm652_vm2, %v2226_v2, %v2220_v61  ;;  %v1442_v17 = vsel %vm1413_vm1, %v14446_v15, 0.0  ;;  %v1484_v25 = vsel %vm1413_vm1, %v14449_v5, 0.0  ;;  %v11906_v5 = vld [vmem:[#allocation8 + $0x690] ss:$24 sps:$4 sm:$0xff]  }
 0x1a9   :  { %3840 = vmatpush1.bf16.msra.mxu0 %v11897_v46  ;;  %v2250_v22 = vunpack.c.l.b16 %v1834_v16  ;;  %v1846_v18 = vpack.c.bf16 %v1798_v62, %v1798_v62  ;;  %v2256_v20 = vunpack.c.l.b16 %v1840_v60  ;;  %v2299_v23 = vsel %vm654_vm3, %v2232_v3, %v2298_v43  ;;  %v11912_v3 = vld [vmem:[#allocation8 + $0x6f0] ss:$24 sps:$4 sm:$0xff]  }
 0x1aa   :  { %3841 = vmatprep.subr.bf16.mxu0 %v11902_v50  ;;  %v1443_v27 = vrot.slane %v1442_v17, 4  ;;  %v1526_v42 = vsel %vm1413_vm1, %v14451_v6, 0.0  ;;  %v2300_v32 = vsel %vm656_vm4, %v2238_v4, %v2299_v23  ;;  %v1485_v30 = vrot.slane %v1484_v25, 4  ;;  %v406_v40 = vpop.xlane.xlu0 %405 }
 0x1ab   :  { %v2262_v28 = vunpack.c.l.b16 %v1846_v18  ;;  %v2301_v31 = vsel %vm658_vm5, %v2244_v1, %v2300_v32  ;;  %v1527_v24 = vrot.slane %v1526_v42, 4  ;;  %v1568_v35 = vsel %vm1413_vm1, %v14453_v7, 0.0  ;;  %v11920_v32 = vld [vmem:[#allocation8 + $0x754] ss:$24 sps:$4 sm:$0xff]  }
 0x1ac   :  { %v1444_v15 = vadd.f32 %v1443_v27, %v1442_v17  ;;  %v2302_v11 = vsel %vm660_vm6, %v2250_v22, %v2301_v31  ;;  %v1486_v33 = vadd.f32 %v1485_v30, %v1484_v25  ;;  %v14509_v39 = vshrl.u32 %v530_v38, 7  ;;  %v11915_v25 = vld [vmem:[#allocation8 + $0x720] ss:$24 sps:$4 sm:$0xff]  }
 0x1ad   :  { %3842 = vmatpush1.bf16.msra.mxu0 %v11900_v57  ;;  %v619_v6 = vand.u32 127, %v530_v38  ;;  %v2303_v46 = vsel %vm662_vm7, %v2256_v20, %v2302_v11  ;;  %v1569_v47 = vrot.slane %v1568_v35, 4  ;;  %v1528_v50 = vadd.f32 %v1527_v24, %v1526_v42  ;;  %v11914_v57 = vld [vmem:[#allocation8 + $0x6f4] ss:$24 sps:$4 sm:$0xff]  }
 0x1ae   :  { %3843 = vmatprep.subr.bf16.mxu0 %v11905_v59  ;;  %v2304_v10 = vsel %vm664_vm8, %v2262_v28, %v2303_v46  ;;  %v1445_v7 = vrot.slane %v1444_v15, 2  ;;  %v1487_v53 = vrot.slane %v1486_v33, 2  ;;  %v1610_v54 = vsel %vm1413_vm1, %v14455_v8, 0.0  ;;  %v440_v16 = vpop.xlane.xlu1 %439 }
 0x1af   :  { %v14513_v51 = vpack.c.b16 %v2304_v10, %v2304_v10  ;;  %v511_v13 = vmul.f32 0.0009765625, %v406_v40  ;;  %v1611_v0 = vrot.slane %v1610_v54, 4  ;;  %v14518_v55 = vsub.s32 %v619_v6, %v14509_v39 }
 0x1b0   :  { %v510_v36 = vmul.f32 0.0009765625, %v389_v41  ;;  %v1570_v56 = vadd.f32 %v1569_v47, %v1568_v35  ;;  %v1652_v37 = vsel %vm1413_vm1, %v14457_v9, 0.0  ;;  %v1529_v58 = vrot.slane %v1528_v50, 2  ;;  %v11917_v9 = vld [vmem:[#allocation8 + $0x724] ss:$24 sps:$4 sm:$0xff]  }
 0x1b1   :  { %3844 = vmatpush1.bf16.msra.mxu0 %v11903_v21  ;;  %3871 = vmatprep.mubr.bf16.mxu0 %v14513_v51  ;;  %v1446_v60 = vadd.f32 %v1445_v7, %v1444_v15  ;;  %v1488_v8 = vadd.f32 %v1487_v53, %v1486_v33  ;;  %v1653_v61 = vrot.slane %v1652_v37, 4  ;;  %v1694_v59 = vsel %vm1413_vm1, %v14460_v14, 0.0 }
 0x1b2   :  { %3845 = vmatprep.subr.bf16.mxu0 %v11908_v29  ;;  %v627_v62 = vrot.slane %v511_v13, %v14518_v55  ;;  %v1612_v2 = vadd.f32 %v1611_v0, %v1610_v54  ;;  %v623_v4 = vrot.slane %v510_v36, %v14518_v55  ;;  %v512_v38 = vmul.f32 0.0009765625, %v423_v26  ;;  %v11918_v26 = vld [vmem:[#allocation8 + $0x750] ss:$24 sps:$4 sm:$0xff]  }
 0x1b3   :  { %v1571_v41 = vrot.slane %v1570_v56, 2  ;;  %v513_v1 = vmul.f32 0.0009765625, %v440_v16  ;;  %v1530_v22 = vadd.f32 %v1529_v58, %v1528_v50  ;;  %v1695_v18 = vrot.slane %v1694_v59, 4 }
 0x1b4   :  { %v1736_v20 = vsel %vm1413_vm1, %v14462_v19, 0.0  ;;  %v1447_v17 = vrot.slane %v1446_v60, 1  ;;  %v1489_v14 = vrot.slane %v1488_v8, 1  ;;  %v1654_v21 = vadd.f32 %v1653_v61, %v1652_v37  ;;  %v11921_v37 = vld [vmem:[#allocation8 + $0x780] ss:$24 sps:$4 sm:$0xff]  }
 0x1b5   :  { %3846 = vmatpush1.bf16.msra.mxu0 %v11906_v5  ;;  %v653_v23 = vsel %vm652_vm2, %v627_v62, %v623_v4  ;;  %v1613_v27 = vrot.slane %v1612_v2, 2  ;;  %v631_v42 = vrot.slane %v512_v38, %v14518_v55  ;;  %v1572_v29 = vadd.f32 %v1571_v41, %v1570_v56 }
 0x1b6   :  { %3847 = vmatprep.subr.bf16.mxu0 %v11911_v49  ;;  %v457_v43 = vpop.xlane.xlu0 %456  ;;  %v1737_v28 = vrot.slane %v1736_v20, 4  ;;  %v635_v30 = vrot.slane %v513_v1, %v14518_v55  ;;  %v1531_v19 = vrot.slane %v1530_v22, 1  ;;  %v1696_v24 = vadd.f32 %v1695_v18, %v1694_v59  ;;  %v11923_v49 = vld [vmem:[#allocation8 + $0x784] ss:$24 sps:$4 sm:$0xff]  }
 0x1b7   :  { %v514_v31 = vmul.f32 0.0009765625, %v457_v43  ;;  %v655_v35 = vsel %vm654_vm3, %v631_v42, %v653_v23  ;;  %v1448_v11 = vadd.f32 %v1447_v17, %v1446_v60  ;;  %v1490_v33 = vadd.f32 %v1489_v14, %v1488_v8  ;;  %v11926_v60 = vld [vmem:[#allocation8 + $0x7b4] ss:$24 sps:$4 sm:$0xff]   ;;  %v520_v18 = vld [vmem:[#allocation5 + $0x10] sm:$0x77] }
 0x1b8   :  { %v1655_v5 = vrot.slane %v1654_v21, 2  ;;  %v1614_v6 = vadd.f32 %v1613_v27, %v1612_v2  ;;  %v1573_v46 = vrot.slane %v1572_v29, 1  ;;  %v1738_v47 = vadd.f32 %v1737_v28, %v1736_v20  ;;  %v11924_v2 = vld [vmem:[#allocation8 + $0x7b0] ss:$24 sps:$4 sm:$0xff]   ;;  %v11929_v17 = vld [vmem:[#allocation8 + $0x7e4] ss:$24 sps:$4 sm:$0xff]  }
 0x1b9   :  { %3848 = vmatpush1.bf16.msra.mxu0 %v11909_v52  ;;  %v657_v10 = vsel %vm656_vm4, %v635_v30, %v655_v35  ;;  %v639_v50 = vrot.slane %v514_v31, %v14518_v55  ;;  %v1532_v53 = vadd.f32 %v1531_v19, %v1530_v22  ;;  %v1697_v54 = vrot.slane %v1696_v24, 2  ;;  %v11927_v30 = vld [vmem:[#allocation8 + $0x7e0] ss:$24 sps:$4 sm:$0xff]   ;;  %v11932_v35 = vld [vmem:[#allocation8 + $0x814] ss:$24 sps:$4 sm:$0xff]  }
 0x1ba   :  { %3849 = vmatprep.subr.bf16.mxu0 %v11914_v57  ;;  %v474_v15 = vpop.xlane.xlu1 %473  ;;  %v1656_v0 = vadd.f32 %v1655_v5, %v1654_v21  ;;  %v1755_v52 = vmul.f32 0.25, %v1448_v11  ;;  %v1761_v36 = vmul.f32 0.25, %v1490_v33  ;;  %v1615_v56 = vrot.slane %v1614_v6, 1 }
 0x1bb   :  { %v515_v40 = vmul.f32 0.0009765625, %v474_v15  ;;  %v1574_v58 = vadd.f32 %v1573_v46, %v1572_v29  ;;  %v1739_v16 = vrot.slane %v1738_v47, 2  ;;  %v659_v8 = vsel %vm658_vm5, %v639_v50, %v657_v10  ;;  %v521_v15 = vld [vmem:[#allocation5 + $0x18] sm:$0x77]  ;;  %v522_v46 = vld [vmem:[#allocation5 + $0x20] sm:$0x77] }
 0x1bc   :  { %v1698_v59 = vadd.f32 %v1697_v54, %v1696_v24  ;;  %v1767_v62 = vmul.f32 0.25, %v1532_v53  ;;  %v1803_v4 = vpack.c.bf16 %v1755_v52, %v1755_v52  ;;  %v1809_v38 = vpack.c.bf16 %v1761_v36, %v1761_v36  ;;  %v11937_v10 = vld [vmem:[#allocation8 + $0x844] ss:$24 sps:$4 sm:$0xff]  }
 0x1bd   :  { %3850 = vmatpush1.bf16.msra.mxu0 %v11912_v3  ;;  %v643_v57 = vrot.slane %v515_v40, %v14518_v55  ;;  %v1657_v3 = vrot.slane %v1656_v0, 1  ;;  %v1740_v20 = vadd.f32 %v1739_v16, %v1738_v47  ;;  %v1773_v43 = vmul.f32 0.25, %v1574_v58  ;;  %v11930_v40 = vld [vmem:[#allocation8 + $0x810] ss:$24 sps:$4 sm:$0xff]  }
 0x1be   :  { %3851 = vmatprep.subr.bf16.mxu0 %v11917_v9  ;;  %v1616_v9 = vadd.f32 %v1615_v56, %v1614_v6  ;;  %vm682_vm9 = vcmask 23552   ;;  %v1699_v21 = vrot.slane %v1698_v59, 1  ;;  %v1815_v23 = vpack.c.bf16 %v1767_v62, %v1767_v62  ;;  %v11941_v56 = vld [vmem:[#allocation8 + $0x874] ss:$24 sps:$4 sm:$0xff]  }
 0x1bf   :  { %v661_v1 = vsel %vm660_vm6, %v643_v57, %v659_v8  ;;  %v2219_v42 = vunpack.c.l.b16 %v1803_v4  ;;  %v2225_v29 = vunpack.c.l.b16 %v1809_v38  ;;  %v676_v28 = vcombine.high %v520_v18, %v520_v18  ;;  %v11943_v4 = vld [vmem:[#allocation8 + $0x8a0] ss:$24 sps:$4 sm:$0xff]  }
 0x1c0   :  { %v1741_v19 = vrot.slane %v1740_v20, 1  ;;  %v1821_v24 = vpack.c.bf16 %v1773_v43, %v1773_v43  ;;  %v1700_v11 = vadd.f32 %v1699_v21, %v1698_v59  ;;  %v677_v6 = vcombine.high %v521_v15, %v521_v15  ;;  %v11945_v59 = vld [vmem:[#allocation8 + $0x8a4] ss:$24 sps:$4 sm:$0xff]   ;;  %v11953_v43 = vld [vmem:[#allocation8 + $0x14] ss:$24 sps:$4 sm:$0xff]  }
 0x1c1   :  { %3852 = vmatpush1.bf16.msra.mxu0 %v11915_v25  ;;  %v491_v7 = vpop.xlane.xlu0 %490  ;;  %v1658_v25 = vadd.f32 %v1657_v3, %v1656_v0  ;;  %v2291_v5 = vsel %vm652_vm2, %v2225_v29, %v2219_v42  ;;  %v678_v53 = vcombine.high %v522_v46, %v522_v46  ;;  %v523_v0 = vld [vmem:[#allocation5 + $0x28] sm:$0x77]  ;;  %v11951_v21 = vld [vmem:[#allocation8 + $0x10] ss:$24 sps:$4 sm:$0xff]   ;;  %v11961_v29 = vld [vmem:[#allocation8 + $0x74] ss:$24 sps:$4 sm:$0xff]  }
 0x1c2   :  { %3853 = vmatprep.subr.bf16.mxu0 %v11920_v32  ;;  %v516_v13 = vmul.f32 0.0009765625, %v491_v7  ;;  %v1779_v32 = vmul.f32 0.25, %v1616_v9  ;;  %v1742_v47 = vadd.f32 %v1741_v19, %v1740_v20  ;;  %v679_v58 = vcombine.high %v523_v0, %v523_v0  ;;  %v11949_v9 = vld [vmem:[#allocation8 + $0x8d4] ss:$24 sps:$4 sm:$0xff]   ;;  %v11955_v42 = vld [vmem:[#allocation8 + $0x40] ss:$24 sps:$4 sm:$0xff]  }
 0x1c3   :  { %v1785_v33 = vmul.f32 0.25, %v1658_v25  ;;  %v11970_v25 = vld [vmem:[#allocation8 + $0x3c] ss:$24 sps:$4 sm:$0xff]  }
 0x1c4   :  { %v647_v61 = vrot.slane %v516_v13, %v14518_v55  ;;  %v11935_v13 = vld [vmem:[#allocation8 + $0x840] ss:$24 sps:$4 sm:$0xff]   ;;  %v1797_v52 = vmul.f32 0.25, %v1742_v47  ;;  %v11982_v19 = vld [vmem:[#allocation8 + $0x9c] ss:$24 sps:$4 sm:$0xff]  }
 0x1c5   :  { %3854 = vmatpush1.bf16.msra.mxu0 %v11918_v26  ;;  %v1827_v26 = vpack.c.bf16 %v1779_v32, %v1779_v32  ;;  %v1833_v7 = vpack.c.bf16 %v1785_v33, %v1785_v33  ;;  %v11976_v32 = vld [vmem:[#allocation8 + $0x6c] ss:$24 sps:$4 sm:$0xff]   ;;  %v11986_v33 = vld [vmem:[#allocation8 + $0xc8] ss:$24 sps:$4 sm:$0xff]  }
 0x1c6   :  { %3855 = vmatprep.subr.bf16.mxu0 %v11923_v49  ;;  %v508_v41 = vpop.xlane.xlu1 %507  ;;  %v663_v14 = vsel %vm662_vm7, %v647_v61, %v661_v1  ;;  %v2237_v49 = vunpack.c.l.b16 %v1821_v24  ;;  %v1845_v8 = vpack.c.bf16 %v1797_v52, %v1797_v52  ;;  %v524_v61 = vld [vmem:[#allocation5 + $0x30] sm:$0x77]  ;;  %v11983_v47 = vld [vmem:[#allocation8 + $0x130] ss:$24 sps:$4 sm:$0xff]  }
 0x1c7   :  { %v517_v22 = vmul.f32 0.0009765625, %v508_v41  ;;  %v2243_v54 = vunpack.c.l.b16 %v1827_v26  ;;  %v2249_v57 = vunpack.c.l.b16 %v1833_v7  ;;  %v680_v3 = vcombine.high %v524_v61, %v524_v61  ;;  %v525_v41 = vld [vmem:[#allocation5 + $0x38] sm:$0x77]  ;;  %v11965_v24 = vld [vmem:[#allocation8 + $0xa0] ss:$24 sps:$4 sm:$0xff]  }
 0x1c8   :  { %v2261_v38 = vunpack.c.l.b16 %v1845_v8  ;;  %v11985_v26 = vld [vmem:[#allocation8 + $0x134] ss:$24 sps:$4 sm:$0xff]   ;;  %v12010_v52 = vld [vmem:[#allocation8 + $0x188] ss:$24 sps:$4 sm:$0xff]  }
 0x1c9   :  { %3856 = vmatpush1.bf16.msra.mxu0 %v11921_v37  ;;  %v651_v27 = vrot.slane %v517_v22, %v14518_v55  ;;  %v2231_v55 = vunpack.c.l.b16 %v1815_v23  ;;  %v681_v22 = vcombine.high %v525_v41, %v525_v41  ;;  %v11957_v23 = vld [vmem:[#allocation8 + $0x44] ss:$24 sps:$4 sm:$0xff]   ;;  %v11997_v7 = vld [vmem:[#allocation8 + $0x194] ss:$24 sps:$4 sm:$0xff]   ;;  %v12022_v8 = vld [vmem:[#allocation8 + $0x1e8] ss:$24 sps:$4 sm:$0xff]  }
 0x1ca   :  { %3857 = vmatprep.subr.bf16.mxu0 %v11926_v60  ;;  %v11939_v60 = vld [vmem:[#allocation8 + $0x870] ss:$24 sps:$4 sm:$0xff]  }
 0x1cb   :  { %v14542_v31 = vsel %vm664_vm8, %v651_v27, %v663_v14  ;;  %v2292_v50 = vsel %vm654_vm3, %v2231_v55, %v2291_v5  ;;  %v11962_v27 = vld [vmem:[#allocation8 + $0x8] ss:$24 sps:$4 sm:$0xff]   ;;  %v11988_v55 = vld [vmem:[#allocation8 + $0xcc] ss:$24 sps:$4 sm:$0xff]   ;;  %v11994_v5 = vld [vmem:[#allocation8 + $0xfc] ss:$24 sps:$4 sm:$0xff]  }
 0x1cc   :  { %10484 = vmatmul.mubr.msk.f32.vlgmr.msra.gmra.mrb[0].mxu1 %vm682_vm9, %v14542_v31  ;;  %v2293_v36 = vsel %vm656_vm4, %v2237_v49, %v2292_v50  ;;  %v11991_v49 = vld [vmem:[#allocation8 + $0x164] ss:$24 sps:$4 sm:$0xff]   ;;  %v11989_v50 = vld [vmem:[#allocation8 + $0x160] ss:$24 sps:$4 sm:$0xff]  }
 0x1cd   :  { %3858 = vmatpush1.bf16.msra.mxu0 %v11924_v2  ;;  %10486 = vmatpush1.msk.msra.mxu1 %vm372_vm0, %v14436_v45  ;;  %v1791_v45 = vmul.f32 0.25, %v1700_v11  ;;  %v2294_v16 = vsel %vm658_vm5, %v2243_v54, %v2293_v36  ;;  %v11980_v11 = vld [vmem:[#allocation8 + $0x98] ss:$24 sps:$4 sm:$0xff]   ;;  %v12012_v54 = vld [vmem:[#allocation8 + $0x18c] ss:$24 sps:$4 sm:$0xff]  }
 0x1ce   :  { %3859 = vmatprep.subr.bf16.mxu0 %v11929_v17  ;;  %852 = vmatprep.mubr.f32.mxu1 %v13879_v63  ;;  %v2295_v2 = vsel %vm660_vm6, %v2249_v57, %v2294_v16  ;;  %v11964_v17 = vld [vmem:[#allocation8 + $0xc] ss:$24 sps:$4 sm:$0xff]   ;;  %v12018_v36 = vld [vmem:[#allocation8 + $0x1bc] ss:$24 sps:$4 sm:$0xff]   ;;  %v12016_v57 = vld [vmem:[#allocation8 + $0x1b8] ss:$24 sps:$4 sm:$0xff]  }
 0x1cf   :  { %10488 = vmatprep.subr.msk.mxu1 %vm372_vm0, %v676_v28  ;;  %v1839_v37 = vpack.c.bf16 %v1791_v45, %v1791_v45  ;;  %v11968_v28 = vld [vmem:[#allocation8 + $0x38] ss:$24 sps:$4 sm:$0xff]   ;;  %v12006_v45 = vld [vmem:[#allocation8 + $0x15c] ss:$24 sps:$4 sm:$0xff]  }
 0x1d0   :  { %10487 = vmatmul.mubr.msk.f32.vlgmr.msra.gmra.mrb[2].mxu1 %vm682_vm9, %v14542_v31  ;;  %v12007_v16 = vld [vmem:[#allocation8 + $0x1f0] ss:$24 sps:$4 sm:$0xff]  }
 0x1d1   :  { %3860 = vmatpush1.bf16.msra.mxu0 %v11927_v30  ;;  %10489 = vmatpush1.msk.msra.mxu1 %vm372_vm0, %v520_v18  ;;  %v2255_v62 = vunpack.c.l.b16 %v1839_v37  ;;  %v11947_v18 = vld [vmem:[#allocation8 + $0x8d0] ss:$24 sps:$4 sm:$0xff]   ;;  %v11967_v30 = vld [vmem:[#allocation8 + $0xa4] ss:$24 sps:$4 sm:$0xff]   ;;  %v12009_v37 = vld [vmem:[#allocation8 + $0x1f4] ss:$24 sps:$4 sm:$0xff]  }
 0x1d2   :  { %3861 = vmatprep.subr.bf16.mxu0 %v11932_v35  ;;  %923 = vmatprep.mubr.f32.mxu1 %v13879_v63  ;;  %v11973_v35 = vld [vmem:[#allocation8 + $0xd4] ss:$24 sps:$4 sm:$0xff]  }
 0x1d3   :  { %10491 = vmatprep.subr.msk.mxu1 %vm372_vm0, %v677_v6  ;;  %v2296_v1 = vsel %vm662_vm7, %v2255_v62, %v2295_v2  ;;  %v11977_v6 = vld [vmem:[#allocation8 + $0x100] ss:$24 sps:$4 sm:$0xff]   ;;  %v12021_v62 = vld [vmem:[#allocation8 + $0x254] ss:$24 sps:$4 sm:$0xff]  }
 0x1d4   :  { %10490 = vmatmul.mubr.msk.f32.vlgmr.msra.gmra.mrb[4].mxu1 %vm682_vm9, %v14542_v31  ;;  %v2297_v20 = vsel %vm664_vm8, %v2261_v38, %v2296_v1  ;;  %v12028_v2 = vld [vmem:[#allocation8 + $0x218] ss:$24 sps:$4 sm:$0xff]   ;;  %v12027_v38 = vld [vmem:[#allocation8 + $0x284] ss:$24 sps:$4 sm:$0xff]  }
 0x1d5   :  { %3862 = vmatpush1.bf16.msra.mxu0 %v11930_v40  ;;  %10492 = vmatpush1.msk.msra.mxu1 %vm372_vm0, %v521_v15  ;;  %v14581_v14 = vpack.c.b16 %v2297_v20, %v2297_v20  ;;  %v11974_v15 = vld [vmem:[#allocation8 + $0x68] ss:$24 sps:$4 sm:$0xff]   ;;  %v11992_v40 = vld [vmem:[#allocation8 + $0xf8] ss:$24 sps:$4 sm:$0xff]   ;;  %v12048_v20 = vld [vmem:[#allocation8 + $0x2ac] ss:$24 sps:$4 sm:$0xff]  }
 0x1d6   :  { %3863 = vmatprep.subr.bf16.mxu0 %v11937_v10  ;;  %994 = vmatprep.mubr.f32.mxu1 %v13879_v63  ;;  %v11998_v10 = vld [vmem:[#allocation8 + $0x128] ss:$24 sps:$4 sm:$0xff]  }
 0x1d7   :  { %10494 = vmatprep.subr.msk.mxu1 %vm372_vm0, %v678_v53  ;;  %v12004_v53 = vld [vmem:[#allocation8 + $0x158] ss:$24 sps:$4 sm:$0xff]  }
 0x1d8   :  { %10493 = vmatmul.mubr.msk.f32.vlgmr.msra.gmra.mrb[6].mxu1 %vm682_vm9, %v14542_v31  ;;  %v12025_v1 = vld [vmem:[#allocation8 + $0x280] ss:$24 sps:$4 sm:$0xff]  }
 0x1d9   :  { %3864 = vmatpush1.bf16.msra.mxu0 %v11935_v13  ;;  %10495 = vmatpush1.msk.msra.mxu1 %vm372_vm0, %v522_v46  ;;  %v12000_v46 = vld [vmem:[#allocation8 + $0x12c] ss:$24 sps:$4 sm:$0xff]   ;;  %v11995_v13 = vld [vmem:[#allocation8 + $0x190] ss:$24 sps:$4 sm:$0xff]  }
 0x1da   :  { %3865 = vmatprep.subr.bf16.mxu0 %v11941_v56  ;;  %1065 = vmatprep.mubr.f32.mxu1 %v13879_v63  ;;  %v12001_v56 = vld [vmem:[#allocation8 + $0x1c0] ss:$24 sps:$4 sm:$0xff]  }
 0x1db   :  { %10497 = vmatprep.subr.msk.mxu1 %vm372_vm0, %v679_v58  ;;  %v12024_v58 = vld [vmem:[#allocation8 + $0x1ec] ss:$24 sps:$4 sm:$0xff]  }
 0x1dc   :  { %10496 = vmatmul.mubr.msk.f32.vlgmr.msra.gmra.mrb[8].mxu1 %vm682_vm9, %v14542_v31 }
 0x1dd   :  { %3866 = vmatpush1.bf16.msra.mxu0 %v11939_v60  ;;  %10498 = vmatpush1.msk.msra.mxu1 %vm372_vm0, %v523_v0  ;;  %v12003_v0 = vld [vmem:[#allocation8 + $0x1c4] ss:$24 sps:$4 sm:$0xff]  }
 0x1de   :  { %3867 = vmatprep.subr.bf16.mxu0 %v11945_v59  ;;  %1136 = vmatprep.mubr.f32.mxu1 %v13879_v63  ;;  %v12015_v60 = vld [vmem:[#allocation8 + $0x224] ss:$24 sps:$4 sm:$0xff]   ;;  %v12013_v59 = vld [vmem:[#allocation8 + $0x220] ss:$24 sps:$4 sm:$0xff]  }
 0x1df   :  { %10500 = vmatprep.subr.msk.mxu1 %vm372_vm0, %v680_v3  ;;  %v12036_v3 = vld [vmem:[#allocation8 + $0x24c] ss:$24 sps:$4 sm:$0xff]  }
 0x1e0   :  { %10499 = vmatmul.mubr.msk.f32.vlgmr.msra.gmra.mrb[10].mxu1 %vm682_vm9, %v14542_v31 }
 0x1e1   :  { %3868 = vmatpush1.bf16.msra.mxu0 %v11943_v4  ;;  %10501 = vmatpush1.msk.msra.mxu1 %vm372_vm0, %v524_v61  ;;  %v12030_v61 = vld [vmem:[#allocation8 + $0x21c] ss:$24 sps:$4 sm:$0xff]   ;;  %v12019_v4 = vld [vmem:[#allocation8 + $0x250] ss:$24 sps:$4 sm:$0xff]  }
 0x1e2   :  { %3869 = vmatprep.subr.bf16.mxu0 %v11949_v9  ;;  %1207 = vmatprep.mubr.f32.mxu1 %v13879_v63  ;;  %v12042_v9 = vld [vmem:[#allocation8 + $0x27c] ss:$24 sps:$4 sm:$0xff]  }
 0x1e3   :  { %10503 = vmatprep.subr.msk.mxu1 %vm372_vm0, %v681_v22  ;;  %v12033_v22 = vld [vmem:[#allocation8 + $0x2b4] ss:$24 sps:$4 sm:$0xff]  }
 0x1e4   :  { %10502 = vmatmul.mubr.msk.f32.vlgmr.msra.gmra.mrb[12].mxu1 %vm682_vm9, %v14542_v31 }
 0x1e5   :  { %3870 = vmatpush1.bf16.msra.mxu0 %v11947_v18  ;;  %10504 = vmatpush1.msk.msra.mxu1 %vm372_vm0, %v525_v41  ;;  %v12034_v41 = vld [vmem:[#allocation8 + $0x248] ss:$24 sps:$4 sm:$0xff]   ;;  %v12040_v18 = vld [vmem:[#allocation8 + $0x278] ss:$24 sps:$4 sm:$0xff]  }
 0x1e6   :  { %4003 = vmatprep.subr.bf16.mxu0 %v11953_v43  ;;  %1278 = vmatprep.mubr.f32.mxu1 %v13879_v63  ;;  %v11959_v63 = vld [vmem:[#allocation8 + $0x70] ss:$24 sps:$4 sm:$0xff]  }
 0x1e7   :  { %3880 = vmatprep.subr.bf16.mxu1 %v11964_v17  ;;  %v12031_v43 = vld [vmem:[#allocation8 + $0x2b0] ss:$24 sps:$4 sm:$0xff]   ;;  %v12039_v17 = vld [vmem:[#allocation8 + $0x2e4] ss:$24 sps:$4 sm:$0xff]  }
 0x1e8   :  { %3872 = vmatmul.mubr.bf16.vlgmr.msra.gmra.mrb[0].mxu0 %v14581_v14  ;;  %10505 = vmatmul.mubr.msk.f32.vlgmr.msra.gmra.mrb[14].mxu1 %vm682_vm9, %v14542_v31  ;;  %v11971_v31 = vld [vmem:[#allocation8 + $0xd0] ss:$24 sps:$4 sm:$0xff]  }
 0x1e9   :  { %4004 = vmatpush1.bf16.msra.mxu0 %v11951_v21  ;;  %4035 = vmatprep.mubr.bf16.mxu0 %v14345_v12  ;;  %v12046_v21 = vld [vmem:[#allocation8 + $0x2a8] ss:$24 sps:$4 sm:$0xff]  }
 0x1ea   :  { %4005 = vmatprep.subr.bf16.mxu0 %v11957_v23  ;;  %3881 = vmatpush1.bf16.msra.mxu1 %v11962_v27  ;;  %v12054_v23 = vld [vmem:[#allocation8 + $0x2dc] ss:$24 sps:$4 sm:$0xff]   ;;  %v12037_v27 = vld [vmem:[#allocation8 + $0x2e0] ss:$24 sps:$4 sm:$0xff]  }
 0x1eb   :  { %3912 = vmatprep.mubr.bf16.mxu1 %v14345_v12  ;;  %3882 = vmatprep.subr.bf16.mxu1 %v11970_v25  ;;  %v11979_v12 = vld [vmem:[#allocation8 + $0x104] ss:$24 sps:$4 sm:$0xff]   ;;  %v12045_v25 = vld [vmem:[#allocation8 + $0x314] ss:$24 sps:$4 sm:$0xff]  }
 0x1ed   :  { %4006 = vmatpush1.bf16.msra.mxu0 %v11955_v42  ;;  %v12052_v42 = vld [vmem:[#allocation8 + $0x2d8] ss:$24 sps:$4 sm:$0xff]  }
 0x1ee   :  { %4007 = vmatprep.subr.bf16.mxu0 %v11961_v29  ;;  %3883 = vmatpush1.bf16.msra.mxu1 %v11968_v28  ;;  %v12060_v29 = vld [vmem:[#allocation8 + $0x30c] ss:$24 sps:$4 sm:$0xff]   ;;  %v12043_v28 = vld [vmem:[#allocation8 + $0x310] ss:$24 sps:$4 sm:$0xff]  }
 0x1ef   :  { %3884 = vmatprep.subr.bf16.mxu1 %v11976_v32  ;;  %v12051_v32 = vld [vmem:[#allocation8 + $0x344] ss:$24 sps:$4 sm:$0xff]  }
 0x1f1   :  { %4008 = vmatpush1.bf16.msra.mxu0 %v11959_v63  ;;  %v12058_v63 = vld [vmem:[#allocation8 + $0x308] ss:$24 sps:$4 sm:$0xff]  }
 0x1f2   :  { %4009 = vmatprep.subr.bf16.mxu0 %v11967_v30  ;;  %3885 = vmatpush1.bf16.msra.mxu1 %v11974_v15  ;;  %v12066_v30 = vld [vmem:[#allocation8 + $0x33c] ss:$24 sps:$4 sm:$0xff]   ;;  %v12049_v15 = vld [vmem:[#allocation8 + $0x340] ss:$24 sps:$4 sm:$0xff]  }
 0x1f3   :  { %3886 = vmatprep.subr.bf16.mxu1 %v11982_v19  ;;  %v12057_v19 = vld [vmem:[#allocation8 + $0x374] ss:$24 sps:$4 sm:$0xff]  }
 0x1f5   :  { %4010 = vmatpush1.bf16.msra.mxu0 %v11965_v24  ;;  %v12064_v24 = vld [vmem:[#allocation8 + $0x338] ss:$24 sps:$4 sm:$0xff]  }
 0x1f6   :  { %4011 = vmatprep.subr.bf16.mxu0 %v11973_v35  ;;  %3887 = vmatpush1.bf16.msra.mxu1 %v11980_v11  ;;  %v12072_v35 = vld [vmem:[#allocation8 + $0x36c] ss:$24 sps:$4 sm:$0xff]   ;;  %v12055_v11 = vld [vmem:[#allocation8 + $0x370] ss:$24 sps:$4 sm:$0xff]  }
 0x1f7   :  { %3888 = vmatprep.subr.bf16.mxu1 %v11988_v55  ;;  %v12063_v55 = vld [vmem:[#allocation8 + $0x3a4] ss:$24 sps:$4 sm:$0xff]  }
 0x1f9   :  { %4012 = vmatpush1.bf16.msra.mxu0 %v11971_v31  ;;  %v12070_v31 = vld [vmem:[#allocation8 + $0x368] ss:$24 sps:$4 sm:$0xff]  }
 0x1fa   :  { %4013 = vmatprep.subr.bf16.mxu0 %v11979_v12  ;;  %3889 = vmatpush1.bf16.msra.mxu1 %v11986_v33  ;;  %v12078_v12 = vld [vmem:[#allocation8 + $0x39c] ss:$24 sps:$4 sm:$0xff]   ;;  %v12061_v33 = vld [vmem:[#allocation8 + $0x3a0] ss:$24 sps:$4 sm:$0xff]  }
 0x1fb   :  { %3890 = vmatprep.subr.bf16.mxu1 %v11994_v5  ;;  %v12069_v5 = vld [vmem:[#allocation8 + $0x3d4] ss:$24 sps:$4 sm:$0xff]  }
 0x1fd   :  { %4014 = vmatpush1.bf16.msra.mxu0 %v11977_v6  ;;  %v12076_v6 = vld [vmem:[#allocation8 + $0x398] ss:$24 sps:$4 sm:$0xff]  }
 0x1fe   :  { %4015 = vmatprep.subr.bf16.mxu0 %v11985_v26  ;;  %3891 = vmatpush1.bf16.msra.mxu1 %v11992_v40  ;;  %v12067_v26 = vld [vmem:[#allocation8 + $0x3d0] ss:$24 sps:$4 sm:$0xff]  }
 0x1ff   :  { %3892 = vmatprep.subr.bf16.mxu1 %v12000_v46  ;;  %v12082_v40 = vld [vmem:[#allocation8 + $0x3c8] ss:$24 sps:$4 sm:$0xff]   ;;  %v12090_v46 = vld [vmem:[#allocation8 + $0x3fc] ss:$24 sps:$4 sm:$0xff]  }
 0x201   :  { %4016 = vmatpush1.bf16.msra.mxu0 %v11983_v47  ;;  %v12073_v47 = vld [vmem:[#allocation8 + $0x400] ss:$24 sps:$4 sm:$0xff]  }
 0x202   :  { %4017 = vmatprep.subr.bf16.mxu0 %v11991_v49  ;;  %3893 = vmatpush1.bf16.msra.mxu1 %v11998_v10  ;;  %v12081_v49 = vld [vmem:[#allocation8 + $0x434] ss:$24 sps:$4 sm:$0xff]   ;;  %v12079_v10 = vld [vmem:[#allocation8 + $0x430] ss:$24 sps:$4 sm:$0xff]  }
 0x203   :  { %3894 = vmatprep.subr.bf16.mxu1 %v12006_v45  ;;  %v12088_v45 = vld [vmem:[#allocation8 + $0x3f8] ss:$24 sps:$4 sm:$0xff]  }
 0x205   :  { %4018 = vmatpush1.bf16.msra.mxu0 %v11989_v50  ;;  %v12096_v50 = vld [vmem:[#allocation8 + $0x42c] ss:$24 sps:$4 sm:$0xff]  }
 0x206   :  { %4019 = vmatprep.subr.bf16.mxu0 %v11997_v7  ;;  %3895 = vmatpush1.bf16.msra.mxu1 %v12004_v53  ;;  %v12087_v7 = vld [vmem:[#allocation8 + $0x464] ss:$24 sps:$4 sm:$0xff]   ;;  %v12094_v53 = vld [vmem:[#allocation8 + $0x428] ss:$24 sps:$4 sm:$0xff]  }
 0x207   :  { %3896 = vmatprep.subr.bf16.mxu1 %v12012_v54  ;;  %v12102_v54 = vld [vmem:[#allocation8 + $0x45c] ss:$24 sps:$4 sm:$0xff]  }
 0x209   :  { %4020 = vmatpush1.bf16.msra.mxu0 %v11995_v13  ;;  %v12085_v13 = vld [vmem:[#allocation8 + $0x460] ss:$24 sps:$4 sm:$0xff]  }
 0x20a   :  { %4021 = vmatprep.subr.bf16.mxu0 %v12003_v0  ;;  %3897 = vmatpush1.bf16.msra.mxu1 %v12010_v52  ;;  %v12093_v0 = vld [vmem:[#allocation8 + $0x494] ss:$24 sps:$4 sm:$0xff]   ;;  %v12100_v52 = vld [vmem:[#allocation8 + $0x458] ss:$24 sps:$4 sm:$0xff]  }
 0x20b   :  { %3898 = vmatprep.subr.bf16.mxu1 %v12018_v36  ;;  %v12108_v36 = vld [vmem:[#allocation8 + $0x48c] ss:$24 sps:$4 sm:$0xff]  }
 0x20d   :  { %4022 = vmatpush1.bf16.msra.mxu0 %v12001_v56  ;;  %v14597_v56 = vld [vmem:[#allocation7 + $0x8] sm:$0xff] }
 0x20e   :  { %4023 = vmatprep.subr.bf16.mxu0 %v12009_v37  ;;  %3899 = vmatpush1.bf16.msra.mxu1 %v12016_v57  ;;  %v556_v37 = vsub.s32 6, %v14509_v39  ;;  %v560_v57 = vsub.s32 7, %v14509_v39 }
 0x20f   :  { %3900 = vmatprep.subr.bf16.mxu1 %v12024_v58  ;;  %v12091_v58 = vld [vmem:[#allocation8 + $0x490] ss:$24 sps:$4 sm:$0xff]  }
 0x211   :  { %4024 = vmatpush1.bf16.msra.mxu0 %v12007_v16  ;;  %v12099_v16 = vld [vmem:[#allocation8 + $0x4c4] ss:$24 sps:$4 sm:$0xff]  }
 0x212   :  { %4025 = vmatprep.subr.bf16.mxu0 %v12015_v60  ;;  %3901 = vmatpush1.bf16.msra.mxu1 %v12022_v8  ;;  %v12106_v60 = vld [vmem:[#allocation8 + $0x488] ss:$24 sps:$4 sm:$0xff]   ;;  %v14604_v8 = vrot.slane %v14597_v56, %v556_v37 }
 0x213   :  { %3902 = vmatprep.subr.bf16.mxu1 %v12030_v61  ;;  %v12114_v61 = vld [vmem:[#allocation8 + $0x4bc] ss:$24 sps:$4 sm:$0xff]  }
 0x215   :  { %4026 = vmatpush1.bf16.msra.mxu0 %v12013_v59  ;;  %v14609_v59 = vrot.slane %v14597_v56, %v560_v57 }
 0x216   :  { %4027 = vmatprep.subr.bf16.mxu0 %v12021_v62  ;;  %3903 = vmatpush1.bf16.msra.mxu1 %v12028_v2  ;;  %v12097_v62 = vld [vmem:[#allocation8 + $0x4c0] ss:$24 sps:$4 sm:$0xff]   ;;  %v12105_v2 = vld [vmem:[#allocation8 + $0x4f4] ss:$24 sps:$4 sm:$0xff]  }
 0x217   :  { %3904 = vmatprep.subr.bf16.mxu1 %v12036_v3  ;;  %v12112_v3 = vld [vmem:[#allocation8 + $0x4b8] ss:$24 sps:$4 sm:$0xff]  }
 0x219   :  { %4028 = vmatpush1.bf16.msra.mxu0 %v12019_v4  ;;  %v12120_v4 = vld [vmem:[#allocation8 + $0x4ec] ss:$24 sps:$4 sm:$0xff]  }
 0x21a   :  { %4029 = vmatprep.subr.bf16.mxu0 %v12027_v38  ;;  %3905 = vmatpush1.bf16.msra.mxu1 %v12034_v41  ;;  %v12103_v38 = vld [vmem:[#allocation8 + $0x4f0] ss:$24 sps:$4 sm:$0xff]   ;;  %v12111_v41 = vld [vmem:[#allocation8 + $0x524] ss:$24 sps:$4 sm:$0xff]  }
 0x21b   :  { %3906 = vmatprep.subr.bf16.mxu1 %v12042_v9  ;;  %v12118_v9 = vld [vmem:[#allocation8 + $0x4e8] ss:$24 sps:$4 sm:$0xff]  }
 0x21d   :  { %4030 = vmatpush1.bf16.msra.mxu0 %v12025_v1  ;;  %v12126_v1 = vld [vmem:[#allocation8 + $0x51c] ss:$24 sps:$4 sm:$0xff]  }
 0x21e   :  { %4031 = vmatprep.subr.bf16.mxu0 %v12033_v22  ;;  %3907 = vmatpush1.bf16.msra.mxu1 %v12040_v18  ;;  %v12109_v22 = vld [vmem:[#allocation8 + $0x520] ss:$24 sps:$4 sm:$0xff]   ;;  %v12117_v18 = vld [vmem:[#allocation8 + $0x554] ss:$24 sps:$4 sm:$0xff]  }
 0x21f   :  { %3908 = vmatprep.subr.bf16.mxu1 %v12048_v20  ;;  %v12124_v20 = vld [vmem:[#allocation8 + $0x518] ss:$24 sps:$4 sm:$0xff]  }
 0x221   :  { %4032 = vmatpush1.bf16.msra.mxu0 %v12031_v43  ;;  %v12132_v43 = vld [vmem:[#allocation8 + $0x54c] ss:$24 sps:$4 sm:$0xff]  }
 0x222   :  { %4033 = vmatprep.subr.bf16.mxu0 %v12039_v17  ;;  %3909 = vmatpush1.bf16.msra.mxu1 %v12046_v21  ;;  %v12115_v17 = vld [vmem:[#allocation8 + $0x550] ss:$24 sps:$4 sm:$0xff]   ;;  %v12123_v21 = vld [vmem:[#allocation8 + $0x584] ss:$24 sps:$4 sm:$0xff]  }
 0x223   :  { %3910 = vmatprep.subr.bf16.mxu1 %v12054_v23  ;;  %v12130_v23 = vld [vmem:[#allocation8 + $0x548] ss:$24 sps:$4 sm:$0xff]  }
 0x225   :  { %4034 = vmatpush1.bf16.msra.mxu0 %v12037_v27  ;;  %v12138_v27 = vld [vmem:[#allocation8 + $0x57c] ss:$24 sps:$4 sm:$0xff]  }
 0x226   :  { %4044 = vmatprep.subr.bf16.mxu0 %v12045_v25  ;;  %3911 = vmatpush1.bf16.msra.mxu1 %v12052_v42  ;;  %v12121_v25 = vld [vmem:[#allocation8 + $0x580] ss:$24 sps:$4 sm:$0xff]   ;;  %v12129_v42 = vld [vmem:[#allocation8 + $0x5b4] ss:$24 sps:$4 sm:$0xff]  }
 0x227   :  { %3921 = vmatprep.subr.bf16.mxu1 %v12060_v29  ;;  %v12136_v29 = vld [vmem:[#allocation8 + $0x578] ss:$24 sps:$4 sm:$0xff]  }
 0x228   :  { %4036 = vmatmul.mubr.bf16.vlgmr.msra.gmra.mrb[4].mxu0 %v14401_v34 }
 0x229   :  { %4045 = vmatpush1.bf16.msra.mxu0 %v12043_v28  ;;  %4076 = vmatprep.mubr.bf16.mxu0 %v14425_v48  ;;  %v12144_v28 = vld [vmem:[#allocation8 + $0x5ac] ss:$24 sps:$4 sm:$0xff]  }
 0x22a   :  { %4046 = vmatprep.subr.bf16.mxu0 %v12051_v32  ;;  %3913 = vmatmul.mubr.bf16.vlgmr.msra.gmra.mrb[16].mxu1 %v14401_v34  ;;  %v12084_v34 = vld [vmem:[#allocation8 + $0x3cc] ss:$24 sps:$4 sm:$0xff]   ;;  %v12127_v32 = vld [vmem:[#allocation8 + $0x5b0] ss:$24 sps:$4 sm:$0xff]  }
 0x22b   :  { %3922 = vmatpush1.bf16.msra.mxu1 %v12058_v63  ;;  %3953 = vmatprep.mubr.bf16.mxu1 %v14425_v48  ;;  %v12075_v48 = vld [vmem:[#allocation8 + $0x404] ss:$24 sps:$4 sm:$0xff]  }
 0x22c   :  { %3923 = vmatprep.subr.bf16.mxu1 %v12066_v30  ;;  %v12135_v63 = vld [vmem:[#allocation8 + $0x5e4] ss:$24 sps:$4 sm:$0xff]   ;;  %v12142_v30 = vld [vmem:[#allocation8 + $0x5a8] ss:$24 sps:$4 sm:$0xff]  }
 0x22d   :  { %4047 = vmatpush1.bf16.msra.mxu0 %v12049_v15  ;;  %v12150_v15 = vld [vmem:[#allocation8 + $0x5dc] ss:$24 sps:$4 sm:$0xff]  }
 0x22e   :  { %4048 = vmatprep.subr.bf16.mxu0 %v12057_v19  ;;  %v12133_v19 = vld [vmem:[#allocation8 + $0x5e0] ss:$24 sps:$4 sm:$0xff]  }
 0x22f   :  { %3924 = vmatpush1.bf16.msra.mxu1 %v12064_v24  ;;  %v12141_v24 = vld [vmem:[#allocation8 + $0x614] ss:$24 sps:$4 sm:$0xff]  }
 0x230   :  { %3925 = vmatprep.subr.bf16.mxu1 %v12072_v35  ;;  %v12148_v35 = vld [vmem:[#allocation8 + $0x5d8] ss:$24 sps:$4 sm:$0xff]  }
 0x231   :  { %4049 = vmatpush1.bf16.msra.mxu0 %v12055_v11  ;;  %v12156_v11 = vld [vmem:[#allocation8 + $0x60c] ss:$24 sps:$4 sm:$0xff]  }
 0x232   :  { %4050 = vmatprep.subr.bf16.mxu0 %v12063_v55  ;;  %v12139_v55 = vld [vmem:[#allocation8 + $0x610] ss:$24 sps:$4 sm:$0xff]  }
 0x233   :  { %3926 = vmatpush1.bf16.msra.mxu1 %v12070_v31  ;;  %v12147_v31 = vld [vmem:[#allocation8 + $0x644] ss:$24 sps:$4 sm:$0xff]  }
 0x234   :  { %3927 = vmatprep.subr.bf16.mxu1 %v12078_v12  ;;  %v12154_v12 = vld [vmem:[#allocation8 + $0x608] ss:$24 sps:$4 sm:$0xff]  }
 0x235   :  { %4051 = vmatpush1.bf16.msra.mxu0 %v12061_v33  ;;  %v12162_v33 = vld [vmem:[#allocation8 + $0x63c] ss:$24 sps:$4 sm:$0xff]  }
 0x236   :  { %4052 = vmatprep.subr.bf16.mxu0 %v12069_v5  ;;  %v12145_v5 = vld [vmem:[#allocation8 + $0x640] ss:$24 sps:$4 sm:$0xff]  }
 0x237   :  { %3928 = vmatpush1.bf16.msra.mxu1 %v12076_v6  ;;  %v12153_v6 = vld [vmem:[#allocation8 + $0x674] ss:$24 sps:$4 sm:$0xff]  }
 0x238   :  { %3929 = vmatprep.subr.bf16.mxu1 %v12084_v34  ;;  %v12160_v34 = vld [vmem:[#allocation8 + $0x638] ss:$24 sps:$4 sm:$0xff]  }
 0x239   :  { %4053 = vmatpush1.bf16.msra.mxu0 %v12067_v26  ;;  %v12168_v26 = vld [vmem:[#allocation8 + $0x66c] ss:$24 sps:$4 sm:$0xff]  }
 0x23a   :  { %4054 = vmatprep.subr.bf16.mxu0 %v12075_v48  ;;  %v12151_v48 = vld [vmem:[#allocation8 + $0x670] ss:$24 sps:$4 sm:$0xff]  }
 0x23b   :  { %3930 = vmatpush1.bf16.msra.mxu1 %v12082_v40  ;;  %v12159_v40 = vld [vmem:[#allocation8 + $0x6a4] ss:$24 sps:$4 sm:$0xff]  }
 0x23c   :  { %3931 = vmatprep.subr.bf16.mxu1 %v12090_v46  ;;  %v12166_v46 = vld [vmem:[#allocation8 + $0x668] ss:$24 sps:$4 sm:$0xff]  }
 0x23d   :  { %4055 = vmatpush1.bf16.msra.mxu0 %v12073_v47  ;;  %v12174_v47 = vld [vmem:[#allocation8 + $0x69c] ss:$24 sps:$4 sm:$0xff]  }
 0x23e   :  { %4056 = vmatprep.subr.bf16.mxu0 %v12081_v49  ;;  %v12157_v49 = vld [vmem:[#allocation8 + $0x6a0] ss:$24 sps:$4 sm:$0xff]  }
 0x23f   :  { %3932 = vmatpush1.bf16.msra.mxu1 %v12088_v45  ;;  %v12172_v45 = vld [vmem:[#allocation8 + $0x698] ss:$24 sps:$4 sm:$0xff]  }
 0x240   :  { %3933 = vmatprep.subr.bf16.mxu1 %v12096_v50  ;;  %v12180_v50 = vld [vmem:[#allocation8 + $0x6cc] ss:$24 sps:$4 sm:$0xff]  }
 0x241   :  { %4057 = vmatpush1.bf16.msra.mxu0 %v12079_v10  ;;  %v12165_v10 = vld [vmem:[#allocation8 + $0x6d4] ss:$24 sps:$4 sm:$0xff]  }
 0x242   :  { %4058 = vmatprep.subr.bf16.mxu0 %v12087_v7  ;;  %v12178_v7 = vld [vmem:[#allocation8 + $0x6c8] ss:$24 sps:$4 sm:$0xff]  }
 0x243   :  { %3934 = vmatpush1.bf16.msra.mxu1 %v12094_v53  ;;  %v12186_v53 = vld [vmem:[#allocation8 + $0x6fc] ss:$24 sps:$4 sm:$0xff]  }
 0x244   :  { %3935 = vmatprep.subr.bf16.mxu1 %v12102_v54  ;;  %v12169_v54 = vld [vmem:[#allocation8 + $0x700] ss:$24 sps:$4 sm:$0xff]  }
 0x245   :  { %4059 = vmatpush1.bf16.msra.mxu0 %v12085_v13  ;;  %v12177_v13 = vld [vmem:[#allocation8 + $0x734] ss:$24 sps:$4 sm:$0xff]  }
 0x246   :  { %4060 = vmatprep.subr.bf16.mxu0 %v12093_v0  ;;  %v12184_v0 = vld [vmem:[#allocation8 + $0x6f8] ss:$24 sps:$4 sm:$0xff]  }
 0x247   :  { %3936 = vmatpush1.bf16.msra.mxu1 %v12100_v52  ;;  %v12192_v52 = vld [vmem:[#allocation8 + $0x72c] ss:$24 sps:$4 sm:$0xff]  }
 0x248   :  { %3937 = vmatprep.subr.bf16.mxu1 %v12108_v36  ;;  %v12175_v36 = vld [vmem:[#allocation8 + $0x730] ss:$24 sps:$4 sm:$0xff]  }
 0x249   :  { %4061 = vmatpush1.bf16.msra.mxu0 %v12091_v58  ;;  %v12183_v58 = vld [vmem:[#allocation8 + $0x764] ss:$24 sps:$4 sm:$0xff]  }
 0x24a   :  { %4062 = vmatprep.subr.bf16.mxu0 %v12099_v16  ;;  %v12190_v16 = vld [vmem:[#allocation8 + $0x728] ss:$24 sps:$4 sm:$0xff]  }
 0x24b   :  { %3938 = vmatpush1.bf16.msra.mxu1 %v12106_v60  ;;  %v12198_v60 = vld [vmem:[#allocation8 + $0x75c] ss:$24 sps:$4 sm:$0xff]  }
 0x24c   :  { %3939 = vmatprep.subr.bf16.mxu1 %v12114_v61  ;;  %v12181_v61 = vld [vmem:[#allocation8 + $0x760] ss:$24 sps:$4 sm:$0xff]  }
 0x24d   :  { %4063 = vmatpush1.bf16.msra.mxu0 %v12097_v62  ;;  %v12189_v62 = vld [vmem:[#allocation8 + $0x794] ss:$24 sps:$4 sm:$0xff]  }
 0x24e   :  { %4064 = vmatprep.subr.bf16.mxu0 %v12105_v2  ;;  %v12196_v2 = vld [vmem:[#allocation8 + $0x758] ss:$24 sps:$4 sm:$0xff]  }
 0x24f   :  { %3940 = vmatpush1.bf16.msra.mxu1 %v12112_v3  ;;  %v12204_v3 = vld [vmem:[#allocation8 + $0x78c] ss:$24 sps:$4 sm:$0xff]  }
 0x250   :  { %3941 = vmatprep.subr.bf16.mxu1 %v12120_v4  ;;  %v12187_v4 = vld [vmem:[#allocation8 + $0x790] ss:$24 sps:$4 sm:$0xff]  }
 0x251   :  { %4065 = vmatpush1.bf16.msra.mxu0 %v12103_v38  ;;  %v12195_v38 = vld [vmem:[#allocation8 + $0x7c4] ss:$24 sps:$4 sm:$0xff]  }
 0x252   :  { %4066 = vmatprep.subr.bf16.mxu0 %v12111_v41  ;;  %v12202_v41 = vld [vmem:[#allocation8 + $0x788] ss:$24 sps:$4 sm:$0xff]  }
 0x253   :  { %3942 = vmatpush1.bf16.msra.mxu1 %v12118_v9  ;;  %v12210_v9 = vld [vmem:[#allocation8 + $0x7bc] ss:$24 sps:$4 sm:$0xff]  }
 0x254   :  { %3943 = vmatprep.subr.bf16.mxu1 %v12126_v1  ;;  %v12193_v1 = vld [vmem:[#allocation8 + $0x7c0] ss:$24 sps:$4 sm:$0xff]  }
 0x255   :  { %4067 = vmatpush1.bf16.msra.mxu0 %v12109_v22  ;;  %v12201_v22 = vld [vmem:[#allocation8 + $0x7f4] ss:$24 sps:$4 sm:$0xff]  }
 0x256   :  { %4068 = vmatprep.subr.bf16.mxu0 %v12117_v18  ;;  %v12208_v18 = vld [vmem:[#allocation8 + $0x7b8] ss:$24 sps:$4 sm:$0xff]  }
 0x257   :  { %3944 = vmatpush1.bf16.msra.mxu1 %v12124_v20  ;;  %v12216_v20 = vld [vmem:[#allocation8 + $0x7ec] ss:$24 sps:$4 sm:$0xff]  }
 0x258   :  { %3945 = vmatprep.subr.bf16.mxu1 %v12132_v43  ;;  %v12199_v43 = vld [vmem:[#allocation8 + $0x7f0] ss:$24 sps:$4 sm:$0xff]  }
 0x259   :  { %4069 = vmatpush1.bf16.msra.mxu0 %v12115_v17  ;;  %v12207_v17 = vld [vmem:[#allocation8 + $0x824] ss:$24 sps:$4 sm:$0xff]  }
 0x25a   :  { %4070 = vmatprep.subr.bf16.mxu0 %v12123_v21  ;;  %v12214_v21 = vld [vmem:[#allocation8 + $0x7e8] ss:$24 sps:$4 sm:$0xff]  }
 0x25b   :  { %3946 = vmatpush1.bf16.msra.mxu1 %v12130_v23  ;;  %v12222_v23 = vld [vmem:[#allocation8 + $0x81c] ss:$24 sps:$4 sm:$0xff]  }
 0x25c   :  { %3947 = vmatprep.subr.bf16.mxu1 %v12138_v27  ;;  %v12205_v27 = vld [vmem:[#allocation8 + $0x820] ss:$24 sps:$4 sm:$0xff]  }
 0x25d   :  { %4071 = vmatpush1.bf16.msra.mxu0 %v12121_v25  ;;  %v12213_v25 = vld [vmem:[#allocation8 + $0x854] ss:$24 sps:$4 sm:$0xff]  }
 0x25e   :  { %4072 = vmatprep.subr.bf16.mxu0 %v12129_v42  ;;  %v12220_v42 = vld [vmem:[#allocation8 + $0x818] ss:$24 sps:$4 sm:$0xff]  }
 0x25f   :  { %3948 = vmatpush1.bf16.msra.mxu1 %v12136_v29  ;;  %v12228_v29 = vld [vmem:[#allocation8 + $0x84c] ss:$24 sps:$4 sm:$0xff]  }
 0x260   :  { %3949 = vmatprep.subr.bf16.mxu1 %v12144_v28  ;;  %v12211_v28 = vld [vmem:[#allocation8 + $0x850] ss:$24 sps:$4 sm:$0xff]  }
 0x261   :  { %4073 = vmatpush1.bf16.msra.mxu0 %v12127_v32  ;;  %v12219_v32 = vld [vmem:[#allocation8 + $0x884] ss:$24 sps:$4 sm:$0xff]  }
 0x262   :  { %4074 = vmatprep.subr.bf16.mxu0 %v12135_v63  ;;  %v12226_v63 = vld [vmem:[#allocation8 + $0x848] ss:$24 sps:$4 sm:$0xff]  }
 0x263   :  { %3950 = vmatpush1.bf16.msra.mxu1 %v12142_v30  ;;  %v12234_v30 = vld [vmem:[#allocation8 + $0x87c] ss:$24 sps:$4 sm:$0xff]  }
 0x264   :  { %3951 = vmatprep.subr.bf16.mxu1 %v12150_v15  ;;  %v12217_v15 = vld [vmem:[#allocation8 + $0x880] ss:$24 sps:$4 sm:$0xff]  }
 0x265   :  { %4075 = vmatpush1.bf16.msra.mxu0 %v12133_v19  ;;  %v12225_v19 = vld [vmem:[#allocation8 + $0x8b4] ss:$24 sps:$4 sm:$0xff]  }
 0x266   :  { %4085 = vmatprep.subr.bf16.mxu0 %v12141_v24  ;;  %v12232_v24 = vld [vmem:[#allocation8 + $0x878] ss:$24 sps:$4 sm:$0xff]  }
 0x267   :  { %3952 = vmatpush1.bf16.msra.mxu1 %v12148_v35  ;;  %v14615_v35 = vld [vmem:[#allocation7] sm:$0xff] }
 0x268   :  { %4077 = vmatmul.mubr.bf16.vlgmr.msra.gmra.mrb[4].mxu0 %v14493_v44  ;;  %3962 = vmatprep.subr.bf16.mxu1 %v12156_v11  ;;  %v12240_v11 = vld [vmem:[#allocation8 + $0x8ac] ss:$24 sps:$4 sm:$0xff]  }
 0x269   :  { %4086 = vmatpush1.bf16.msra.mxu0 %v12139_v55  ;;  %4117 = vmatprep.mubr.bf16.mxu0 %v14513_v51  ;;  %v14618_v55 = vsub.s32 1, %v14509_v39 }
 0x26a   :  { %4087 = vmatprep.subr.bf16.mxu0 %v12147_v31  ;;  %3954 = vmatmul.mubr.bf16.vlgmr.msra.gmra.mrb[16].mxu1 %v14493_v44  ;;  %v12163_v44 = vld [vmem:[#allocation8 + $0x6d0] ss:$24 sps:$4 sm:$0xff]  }
 0x26b   :  { %3963 = vmatpush1.bf16.msra.mxu1 %v12154_v12  ;;  %3994 = vmatprep.mubr.bf16.mxu1 %v14513_v51  ;;  %v12171_v51 = vld [vmem:[#allocation8 + $0x704] ss:$24 sps:$4 sm:$0xff]   ;;  %v12223_v31 = vld [vmem:[#allocation8 + $0x8b0] ss:$24 sps:$4 sm:$0xff]  }
 0x26c   :  { %3964 = vmatprep.subr.bf16.mxu1 %v12162_v33  ;;  %v12231_v12 = vld [vmem:[#allocation8 + $0x8e4] ss:$24 sps:$4 sm:$0xff]   ;;  %v12238_v33 = vld [vmem:[#allocation8 + $0x8a8] ss:$24 sps:$4 sm:$0xff]  }
 0x26d   :  { %4088 = vmatpush1.bf16.msra.mxu0 %v12145_v5  ;;  %v14621_v5 = vsub.s32 2, %v14509_v39 }
 0x26e   :  { %4089 = vmatprep.subr.bf16.mxu0 %v12153_v6  ;;  %v12246_v6 = vld [vmem:[#allocation8 + $0x8dc] ss:$24 sps:$4 sm:$0xff]  }
 0x26f   :  { %3965 = vmatpush1.bf16.msra.mxu1 %v12160_v34  ;;  %v12229_v34 = vld [vmem:[#allocation8 + $0x8e0] ss:$24 sps:$4 sm:$0xff]  }
 0x270   :  { %3966 = vmatprep.subr.bf16.mxu1 %v12168_v26  ;;  %v537_v26 = vrot.slane %v14615_v35, %v14618_v55 }
 0x271   :  { %4090 = vmatpush1.bf16.msra.mxu0 %v12151_v48  ;;  %v14626_v48 = vsub.s32 3, %v14509_v39 }
 0x272   :  { %4091 = vmatprep.subr.bf16.mxu0 %v12159_v40  ;;  %v12237_v40 = vld [vmem:[#allocation11 + $0xc] ss:$16 sps:$4 sm:$0xff]  }
 0x273   :  { %3967 = vmatpush1.bf16.msra.mxu1 %v12166_v46 }
 0x274   :  { %3968 = vmatprep.subr.bf16.mxu1 %v12174_v47  ;;  %v12244_v47 = vld [vmem:[#allocation8 + $0x8d8] ss:$24 sps:$4 sm:$0xff]  }
 0x275   :  { %4092 = vmatpush1.bf16.msra.mxu0 %v12157_v49 }
 0x276   :  { %4093 = vmatprep.subr.bf16.mxu0 %v12165_v10  ;;  %v541_v10 = vrot.slane %v14615_v35, %v14621_v5 }
 0x277   :  { %3969 = vmatpush1.bf16.msra.mxu1 %v12172_v45  ;;  %v14633_v45 = vsub.s32 4, %v14509_v39 }
 0x278   :  { %3970 = vmatprep.subr.bf16.mxu1 %v12180_v50  ;;  %v12252_v50 = vld [vmem:[#allocation11 + $0x4] ss:$16 sps:$4 sm:$0xff]  }
 0x279   :  { %4094 = vmatpush1.bf16.msra.mxu0 %v12163_v44 }
 0x27a   :  { %4095 = vmatprep.subr.bf16.mxu0 %v12171_v51  ;;  %v545_v51 = vrot.slane %v14615_v35, %v14626_v48 }
 0x27b   :  { %3971 = vmatpush1.bf16.msra.mxu1 %v12178_v7  ;;  %v14638_v7 = vsub.s32 5, %v14509_v39 }
 0x27c   :  { %3972 = vmatprep.subr.bf16.mxu1 %v12186_v53  ;;  %v12235_v53 = vld [vmem:[#allocation11 + $0x8] ss:$16 sps:$4 sm:$0xff]  }
 0x27d   :  { %4096 = vmatpush1.bf16.msra.mxu0 %v12169_v54  ;;  %v12243_v54 = vld [vmem:[#allocation11 + $0x2c] ss:$16 sps:$4 sm:$0xff]  }
 0x27e   :  { %4097 = vmatprep.subr.bf16.mxu0 %v12177_v13 }
 0x27f   :  { %3973 = vmatpush1.bf16.msra.mxu1 %v12184_v0 }
 0x280   :  { %3974 = vmatprep.subr.bf16.mxu1 %v12192_v52 }
 0x281   :  { %4098 = vmatpush1.bf16.msra.mxu0 %v12175_v36 }
 0x282   :  { %4099 = vmatprep.subr.bf16.mxu0 %v12183_v58  ;;  %v549_v58 = vrot.slane %v14615_v35, %v14633_v45 }
 0x283   :  { %3975 = vmatpush1.bf16.msra.mxu1 %v12190_v16  ;;  %v12250_v16 = vld [vmem:[#allocation11] ss:$16 sps:$4 sm:$0xff]  }
 0x284   :  { %3976 = vmatprep.subr.bf16.mxu1 %v12198_v60 }
 0x285   :  { %4100 = vmatpush1.bf16.msra.mxu0 %v12181_v61 }
 0x286   :  { %4101 = vmatprep.subr.bf16.mxu0 %v12189_v62  ;;  %v553_v62 = vrot.slane %v14615_v35, %v14638_v7 }
 0x287   :  { %3977 = vmatpush1.bf16.msra.mxu1 %v12196_v2  ;;  %v12258_v2 = vld [vmem:[#allocation11 + $0x24] ss:$16 sps:$4 sm:$0xff]  }
 0x288   :  { %3978 = vmatprep.subr.bf16.mxu1 %v12204_v3  ;;  %v12241_v3 = vld [vmem:[#allocation11 + $0x28] ss:$16 sps:$4 sm:$0xff]  }
 0x289   :  { %4102 = vmatpush1.bf16.msra.mxu0 %v12187_v4  ;;  %v12249_v4 = vld [vmem:[#allocation11 + $0x4c] ss:$16 sps:$4 sm:$0xff]  }
 0x28a   :  { %4103 = vmatprep.subr.bf16.mxu0 %v12195_v38 }
 0x28b   :  { %3979 = vmatpush1.bf16.msra.mxu1 %v12202_v41 }
 0x28c   :  { %3980 = vmatprep.subr.bf16.mxu1 %v12210_v9 }
 0x28d   :  { %4104 = vmatpush1.bf16.msra.mxu0 %v12193_v1  ;;  %v557_v1 = vrot.slane %v14615_v35, %v556_v37  ;;  %v12262_v37 = vld [vmem:[#allocation11 + $0x40] ss:$16 sps:$4 sm:$0xff]  }
 0x28e   :  { %4105 = vmatprep.subr.bf16.mxu0 %v12201_v22  ;;  %v12256_v22 = vld [vmem:[#allocation11 + $0x20] ss:$16 sps:$4 sm:$0xff]  }
 0x28f   :  { %3981 = vmatpush1.bf16.msra.mxu1 %v12208_v18  ;;  %v12264_v18 = vld [vmem:[#allocation11 + $0x44] ss:$16 sps:$4 sm:$0xff]  }
 0x290   :  { %3982 = vmatprep.subr.bf16.mxu1 %v12216_v20 }
 0x291   :  { %4106 = vmatpush1.bf16.msra.mxu0 %v12199_v43  ;;  %v561_v43 = vrot.slane %v14615_v35, %v560_v57 }
 0x292   :  { %4107 = vmatprep.subr.bf16.mxu0 %v12207_v17  ;;  %v12247_v17 = vld [vmem:[#allocation11 + $0x48] ss:$16 sps:$4 sm:$0xff]  }
 0x293   :  { %3983 = vmatpush1.bf16.msra.mxu1 %v12214_v21  ;;  %v12255_v21 = vld [vmem:[#allocation11 + $0x6c] ss:$16 sps:$4 sm:$0xff]  }
 0x294   :  { %3984 = vmatprep.subr.bf16.mxu1 %v12222_v23 }
 0x295   :  { %4108 = vmatpush1.bf16.msra.mxu0 %v12205_v27 }
 0x296   :  { %4109 = vmatprep.subr.bf16.mxu0 %v12213_v25  ;;  %v12270_v25 = vld [vmem:[#allocation11 + $0x64] ss:$16 sps:$4 sm:$0xff]  }
 0x297   :  { %3985 = vmatpush1.bf16.msra.mxu1 %v12220_v42 }
 0x298   :  { %3986 = vmatprep.subr.bf16.mxu1 %v12228_v29  ;;  %v12253_v29 = vld [vmem:[#allocation11 + $0x68] ss:$16 sps:$4 sm:$0xff]  }
 0x299   :  { %4110 = vmatpush1.bf16.msra.mxu0 %v12211_v28  ;;  %v12261_v28 = vld [vmem:[#allocation11 + $0x8c] ss:$16 sps:$4 sm:$0xff]  }
 0x29a   :  { %4111 = vmatprep.subr.bf16.mxu0 %v12219_v32 }
 0x29b   :  { %3987 = vmatpush1.bf16.msra.mxu1 %v12226_v63  ;;  %v573_v63 = vrot.slane %v14597_v56, %v14621_v5 }
 0x29c   :  { %3988 = vmatprep.subr.bf16.mxu1 %v12234_v30  ;;  %v12268_v30 = vld [vmem:[#allocation11 + $0x60] ss:$16 sps:$4 sm:$0xff]  }
 0x29d   :  { %4112 = vmatpush1.bf16.msra.mxu0 %v12217_v15  ;;  %v12276_v15 = vld [vmem:[#allocation11 + $0x84] ss:$16 sps:$4 sm:$0xff]  }
 0x29e   :  { %4113 = vmatprep.subr.bf16.mxu0 %v12225_v19  ;;  %v577_v19 = vrot.slane %v14597_v56, %v14626_v48 }
 0x29f   :  { %3989 = vmatpush1.bf16.msra.mxu1 %v12232_v24  ;;  %v14628_v46 = vpop.f32.mrb[0].mxu1  ;;  %v12259_v24 = vld [vmem:[#allocation11 + $0x88] ss:$16 sps:$4 sm:$0xff]  }
 0x2a0   :  { %3990 = vmatprep.subr.bf16.mxu1 %v12240_v11  ;;  %v785_v49 = vpop.f32.mrb[1].mxu1  ;;  %v12267_v11 = vld [vmem:[#allocation11 + $0xac] ss:$16 sps:$4 sm:$0xff]  }
 0x2a1   :  { %4114 = vmatpush1.bf16.msra.mxu0 %v12223_v31  ;;  %v786_v44 = vadd.f32 %v785_v49, %v537_v26  ;;  %v12282_v26 = vld [vmem:[#allocation11 + $0xa4] ss:$16 sps:$4 sm:$0xff]  }
 0x2a2   :  { %4115 = vmatprep.subr.bf16.mxu0 %v12231_v12 }
 0x2a3   :  { %3991 = vmatpush1.bf16.msra.mxu1 %v12238_v33  ;;  %v1286_v13 = vmax.f32 %v786_v44, 0.0  ;;  %v854_v0 = vpop.f32.mrb[2].mxu1 }
 0x2a4   :  { %3992 = vmatprep.subr.bf16.mxu1 %v12246_v6  ;;  %v14640_v52 = vadd.f32 %v854_v0, %v541_v10  ;;  %v856_v36 = vpop.f32.mrb[3].mxu1  ;;  %v581_v6 = vrot.slane %v14597_v56, %v14633_v45  ;;  %v12265_v10 = vld [vmem:[#allocation11 + $0xa8] ss:$16 sps:$4 sm:$0xff]  }
 0x2a5   :  { %4116 = vmatpush1.bf16.msra.mxu0 %v12229_v34  ;;  %v4127_v60 = vpack.c.bf16 %v1286_v13, %v1286_v13  ;;  %v14644_v61 = vadd.f32 %v856_v36, %v545_v51  ;;  %v12274_v34 = vld [vmem:[#allocation11 + $0x80] ss:$16 sps:$4 sm:$0xff]   ;;  %v12288_v13 = vld [vmem:[#allocation11 + $0xc4] ss:$16 sps:$4 sm:$0xff]  }
 0x2a6   :  { %7564 = vmatprep.subr.bf16.mxu0 %v12237_v40 }
 0x2a7   :  { %3993 = vmatpush1.bf16.msra.mxu1 %v12244_v47  ;;  %v925_v38 = vpop.f32.mrb[4].mxu1  ;;  %v13505_v47 = vld [vmem:[#allocation7 + $0x8] sm:$0xff] }
 0x2a8   :  { %4118 = vmatmul.mubr.bf16.vlgmr.msra.gmra.mrb[4].mxu0 %v14581_v14  ;;  %7236 = vmatprep.subr.bf16.mxu1 %v12252_v50  ;;  %v14649_v41 = vadd.f32 %v925_v38, %v549_v58  ;;  %v927_v9 = vpop.f32.mrb[5].mxu1  ;;  %v585_v49 = vrot.slane %v13505_v47, %v14638_v7  ;;  %v12273_v50 = vld [vmem:[#allocation11 + $0xcc] ss:$16 sps:$4 sm:$0xff]   ;;  %v12286_v38 = vld [vmem:[#allocation11 + $0xc0] ss:$16 sps:$4 sm:$0xff]  }
 0x2a9   :  { %7565 = vmatpush1.bf16.msra.mxu0 %v12235_v53  ;;  %7596 = vmatprep.mubr.bf16.mxu0 %v4127_v60  ;;  %v14655_v20 = vadd.f32 %v927_v9, %v553_v62  ;;  %v12330_v47 = vld [vmem:[#allocation11 + $0x1a4] ss:$16 sps:$4 sm:$0xff]  }
 0x2aa   :  { %7566 = vmatprep.subr.bf16.mxu0 %v12243_v54  ;;  %3995 = vmatmul.mubr.bf16.vlgmr.msra.gmra.mrb[16].mxu1 %v14581_v14  ;;  %v12280_v54 = vld [vmem:[#allocation11 + $0xa0] ss:$16 sps:$4 sm:$0xff]  }
 0x2ab   :  { %7237 = vmatpush1.bf16.msra.mxu1 %v12250_v16  ;;  %7268 = vmatprep.mubr.bf16.mxu1 %v4127_v60  ;;  %v996_v14 = vpop.f32.mrb[6].mxu1  ;;  %v12271_v16 = vld [vmem:[#allocation11 + $0xc8] ss:$16 sps:$4 sm:$0xff]  }
 0x2ac   :  { %7238 = vmatprep.subr.bf16.mxu1 %v12258_v2  ;;  %v14660_v23 = vadd.f32 %v996_v14, %v557_v1  ;;  %v998_v27 = vpop.f32.mrb[7].mxu1  ;;  %v12279_v2 = vld [vmem:[#allocation11 + $0xec] ss:$16 sps:$4 sm:$0xff]   ;;  %v12294_v1 = vld [vmem:[#allocation11 + $0xe4] ss:$16 sps:$4 sm:$0xff]  }
 0x2ad   :  { %7567 = vmatpush1.bf16.msra.mxu0 %v12241_v3  ;;  %v14662_v42 = vadd.f32 %v998_v27, %v561_v43  ;;  %v12292_v43 = vld [vmem:[#allocation11 + $0xe0] ss:$16 sps:$4 sm:$0xff]   ;;  %v12306_v27 = vld [vmem:[#allocation11 + $0x124] ss:$16 sps:$4 sm:$0xff]  }
 0x2ae   :  { %7568 = vmatprep.subr.bf16.mxu0 %v12249_v4  ;;  %v12298_v14 = vld [vmem:[#allocation11 + $0x100] ss:$16 sps:$4 sm:$0xff]  }
 0x2af   :  { %7239 = vmatpush1.bf16.msra.mxu1 %v12256_v22  ;;  %v14664_v32 = vpop.f32.mrb[8].mxu1  ;;  %v12277_v22 = vld [vmem:[#allocation11 + $0xe8] ss:$16 sps:$4 sm:$0xff]  }
 0x2b0   :  { %7240 = vmatprep.subr.bf16.mxu1 %v12264_v18  ;;  %v14666_v57 = vpop.f32.mrb[9].mxu1  ;;  %v12285_v18 = vld [vmem:[#allocation11 + $0x10c] ss:$16 sps:$4 sm:$0xff]  }
 0x2b1   :  { %7569 = vmatpush1.bf16.msra.mxu0 %v12247_v17  ;;  %v12300_v17 = vld [vmem:[#allocation11 + $0x104] ss:$16 sps:$4 sm:$0xff]  }
 0x2b2   :  { %7570 = vmatprep.subr.bf16.mxu0 %v12255_v21  ;;  %v12283_v21 = vld [vmem:[#allocation11 + $0x108] ss:$16 sps:$4 sm:$0xff]  }
 0x2b3   :  { %7241 = vmatpush1.bf16.msra.mxu1 %v12262_v37  ;;  %v1138_v31 = vpop.f32.mrb[10].mxu1  ;;  %v12297_v37 = vld [vmem:[#allocation11 + $0x14c] ss:$16 sps:$4 sm:$0xff]  }
 0x2b4   :  { %7242 = vmatprep.subr.bf16.mxu1 %v12270_v25  ;;  %v14672_v12 = vadd.f32 %v1138_v31, %v573_v63  ;;  %v1140_v33 = vpop.f32.mrb[11].mxu1  ;;  %v12304_v25 = vld [vmem:[#allocation11 + $0x120] ss:$16 sps:$4 sm:$0xff]   ;;  %v12303_v63 = vld [vmem:[#allocation11 + $0x16c] ss:$16 sps:$4 sm:$0xff]  }
 0x2b5   :  { %7571 = vmatpush1.bf16.msra.mxu0 %v12253_v29  ;;  %v14676_v40 = vadd.f32 %v1140_v33, %v577_v19  ;;  %v12312_v29 = vld [vmem:[#allocation11 + $0x144] ss:$16 sps:$4 sm:$0xff]   ;;  %v12301_v19 = vld [vmem:[#allocation11 + $0x168] ss:$16 sps:$4 sm:$0xff]  }
 0x2b6   :  { %7572 = vmatprep.subr.bf16.mxu0 %v12261_v28  ;;  %v12295_v28 = vld [vmem:[#allocation11 + $0x148] ss:$16 sps:$4 sm:$0xff]   ;;  %v12324_v31 = vld [vmem:[#allocation11 + $0x184] ss:$16 sps:$4 sm:$0xff]  }
 0x2b7   :  { %7243 = vmatpush1.bf16.msra.mxu1 %v12268_v30  ;;  %v1209_v44 = vpop.f32.mrb[12].mxu1  ;;  %v12310_v30 = vld [vmem:[#allocation11 + $0x140] ss:$16 sps:$4 sm:$0xff]   ;;  %v12307_v33 = vld [vmem:[#allocation11 + $0x188] ss:$16 sps:$4 sm:$0xff]  }
 0x2b8   :  { %7244 = vmatprep.subr.bf16.mxu1 %v12276_v15  ;;  %v14679_v51 = vadd.f32 %v1209_v44, %v581_v6  ;;  %v1211_v53 = vpop.f32.mrb[13].mxu1  ;;  %v12318_v15 = vld [vmem:[#allocation11 + $0x164] ss:$16 sps:$4 sm:$0xff]   ;;  %v12315_v6 = vld [vmem:[#allocation11 + $0x1ac] ss:$16 sps:$4 sm:$0xff]  }
 0x2b9   :  { %7573 = vmatpush1.bf16.msra.mxu0 %v12259_v24  ;;  %v14683_v0 = vadd.f32 %v1211_v53, %v585_v49  ;;  %v12309_v24 = vld [vmem:[#allocation11 + $0x18c] ss:$16 sps:$4 sm:$0xff]   ;;  %v12313_v49 = vld [vmem:[#allocation11 + $0x1a8] ss:$16 sps:$4 sm:$0xff]   ;;  %v12336_v53 = vld [vmem:[#allocation11 + $0x1c4] ss:$16 sps:$4 sm:$0xff]  }
 0x2ba   :  { %7574 = vmatprep.subr.bf16.mxu0 %v12267_v11  ;;  %v12316_v11 = vld [vmem:[#allocation11 + $0x160] ss:$16 sps:$4 sm:$0xff]  }
 0x2bb   :  { %v14681_v56 = vpop.f32.mrb[0].mxu0  ;;  %7245 = vmatpush1.bf16.msra.mxu1 %v12274_v34  ;;  %v1280_v60 = vpop.f32.mrb[14].mxu1  ;;  %v12322_v34 = vld [vmem:[#allocation11 + $0x180] ss:$16 sps:$4 sm:$0xff]  }
 0x2bc   :  { %v14685_v36 = vpop.f32.mrb[1].mxu0  ;;  %7246 = vmatprep.subr.bf16.mxu1 %v12282_v26  ;;  %v14688_v3 = vadd.f32 %v1280_v60, %v14604_v8  ;;  %v1282_v4 = vpop.f32.mrb[15].mxu1  ;;  %v12291_v8 = vld [vmem:[#allocation11 + $0x12c] ss:$16 sps:$4 sm:$0xff]   ;;  %v14694_v26 = vsub.s32 0, %v14509_v39 }
 0x2bd   :  { %v3877_v58 = vpop.f32.mrb[2].mxu0  ;;  %7575 = vmatpush1.bf16.msra.mxu0 %v12265_v10  ;;  %v14691_v9 = vadd.f32 %v1282_v4, %v14609_v59  ;;  %v12289_v59 = vld [vmem:[#allocation11 + $0x128] ss:$16 sps:$4 sm:$0xff]   ;;  %v12321_v10 = vld [vmem:[#allocation11 + $0x1cc] ss:$16 sps:$4 sm:$0xff]  }
 0x2be   :  { %v3878_v62 = vpop.f32.mrb[3].mxu0  ;;  %7576 = vmatprep.subr.bf16.mxu0 %v12273_v50  ;;  %v12328_v50 = vld [vmem:[#allocation11 + $0x1a0] ss:$16 sps:$4 sm:$0xff]   ;;  %v533_v44 = vrot.slane %v14615_v35, %v14694_v26  ;;  %v12325_v60 = vld [vmem:[#allocation11 + $0x1e8] ss:$16 sps:$4 sm:$0xff]  }
 0x2bf   :  { %7247 = vmatpush1.bf16.msra.mxu1 %v12280_v54  ;;  %v12319_v54 = vld [vmem:[#allocation11 + $0x1c8] ss:$16 sps:$4 sm:$0xff]   ;;  %v12334_v39 = vld [vmem:[#allocation11 + $0x1c0] ss:$16 sps:$4 sm:$0xff]   ;;  %v12333_v62 = vld [vmem:[#allocation11 + $0x20c] ss:$16 sps:$4 sm:$0xff]  }
 0x2c0   :  { %7248 = vmatprep.subr.bf16.mxu1 %v12288_v13  ;;  %v12327_v13 = vld [vmem:[#allocation11 + $0x1ec] ss:$16 sps:$4 sm:$0xff]   ;;  %v784_v58 = vadd.f32 %v14628_v46, %v533_v44  ;;  %v12348_v35 = vld [vmem:[#allocation11 + $0x204] ss:$16 sps:$4 sm:$0xff]   ;;  %v12346_v46 = vld [vmem:[#allocation11 + $0x200] ss:$16 sps:$4 sm:$0xff]  }
 0x2c1   :  { %7577 = vmatpush1.bf16.msra.mxu0 %v12271_v16  ;;  %v12342_v16 = vld [vmem:[#allocation11 + $0x1e4] ss:$16 sps:$4 sm:$0xff]   ;;  %v12373_v44 = vld [vmem:[#allocation11 + $0x2e8] ss:$16 sps:$4 sm:$0xff]  }
 0x2c2   :  { %7578 = vmatprep.subr.bf16.mxu0 %v12279_v2  ;;  %v12340_v2 = vld [vmem:[#allocation11 + $0x1e0] ss:$16 sps:$4 sm:$0xff]   ;;  %v1285_v4 = vmax.f32 %v784_v58, 0.0  ;;  %v12387_v58 = vld [vmem:[#allocation11 + $0x32c] ss:$16 sps:$4 sm:$0xff]  }
 0x2c3   :  { %7249 = vmatpush1.bf16.msra.mxu1 %v12286_v38  ;;  %v1288_v38 = vmax.f32 %v14644_v61, 0.0  ;;  %v12360_v61 = vld [vmem:[#allocation11 + $0x244] ss:$16 sps:$4 sm:$0xff]  }
 0x2c4   :  { %7250 = vmatprep.subr.bf16.mxu1 %v12294_v1  ;;  %v12331_v1 = vld [vmem:[#allocation11 + $0x208] ss:$16 sps:$4 sm:$0xff]  }
 0x2c5   :  { %7579 = vmatpush1.bf16.msra.mxu0 %v12277_v22  ;;  %v12339_v22 = vld [vmem:[#allocation11 + $0x22c] ss:$16 sps:$4 sm:$0xff]  }
 0x2c6   :  { %7580 = vmatprep.subr.bf16.mxu0 %v12285_v18  ;;  %v4126_v18 = vpack.c.bf16 %v1285_v4, %v1285_v4  ;;  %v12400_v4 = vld [vmem:[#allocation11 + $0x320] ss:$16 sps:$4 sm:$0xff]  }
 0x2c7   :  { %7251 = vmatpush1.bf16.msra.mxu1 %v12292_v43  ;;  %v4129_v43 = vpack.c.bf16 %v1288_v38, %v1288_v38  ;;  %v12391_v38 = vld [vmem:[#allocation11 + $0x348] ss:$16 sps:$4 sm:$0xff]  }
 0x2c8   :  { %7252 = vmatprep.subr.bf16.mxu1 %v12300_v17  ;;  %v12354_v17 = vld [vmem:[#allocation11 + $0x224] ss:$16 sps:$4 sm:$0xff]  }
 0x2c9   :  { %7581 = vmatpush1.bf16.msra.mxu0 %v12283_v21  ;;  %v12337_v21 = vld [vmem:[#allocation11 + $0x228] ss:$16 sps:$4 sm:$0xff]  }
 0x2ca   :  { %7582 = vmatprep.subr.bf16.mxu0 %v12291_v8  ;;  %v12345_v8 = vld [vmem:[#allocation11 + $0x24c] ss:$16 sps:$4 sm:$0xff]  }
 0x2cb   :  { %7253 = vmatpush1.bf16.msra.mxu1 %v12298_v14  ;;  %v12352_v14 = vld [vmem:[#allocation11 + $0x220] ss:$16 sps:$4 sm:$0xff]  }
 0x2cc   :  { %7254 = vmatprep.subr.bf16.mxu1 %v12306_v27  ;;  %v12343_v27 = vld [vmem:[#allocation11 + $0x248] ss:$16 sps:$4 sm:$0xff]  }
 0x2cd   :  { %7583 = vmatpush1.bf16.msra.mxu0 %v12289_v59  ;;  %v12351_v59 = vld [vmem:[#allocation11 + $0x26c] ss:$16 sps:$4 sm:$0xff]  }
 0x2ce   :  { %7584 = vmatprep.subr.bf16.mxu0 %v12297_v37  ;;  %v12358_v37 = vld [vmem:[#allocation11 + $0x240] ss:$16 sps:$4 sm:$0xff]  }
 0x2cf   :  { %7255 = vmatpush1.bf16.msra.mxu1 %v12304_v25  ;;  %v12366_v25 = vld [vmem:[#allocation11 + $0x264] ss:$16 sps:$4 sm:$0xff]  }
 0x2d0   :  { %7256 = vmatprep.subr.bf16.mxu1 %v12312_v29  ;;  %v12349_v29 = vld [vmem:[#allocation11 + $0x268] ss:$16 sps:$4 sm:$0xff]  }
 0x2d1   :  { %7585 = vmatpush1.bf16.msra.mxu0 %v12295_v28  ;;  %v12357_v28 = vld [vmem:[#allocation11 + $0x28c] ss:$16 sps:$4 sm:$0xff]  }
 0x2d2   :  { %7586 = vmatprep.subr.bf16.mxu0 %v12303_v63  ;;  %v12364_v63 = vld [vmem:[#allocation11 + $0x260] ss:$16 sps:$4 sm:$0xff]  }
 0x2d3   :  { %7257 = vmatpush1.bf16.msra.mxu1 %v12310_v30  ;;  %v12372_v30 = vld [vmem:[#allocation11 + $0x284] ss:$16 sps:$4 sm:$0xff]  }
 0x2d4   :  { %7258 = vmatprep.subr.bf16.mxu1 %v12318_v15  ;;  %v12355_v15 = vld [vmem:[#allocation11 + $0x288] ss:$16 sps:$4 sm:$0xff]  }
 0x2d5   :  { %7587 = vmatpush1.bf16.msra.mxu0 %v12301_v19  ;;  %v12363_v19 = vld [vmem:[#allocation11 + $0x2ac] ss:$16 sps:$4 sm:$0xff]  }
 0x2d6   :  { %7588 = vmatprep.subr.bf16.mxu0 %v12309_v24  ;;  %v12370_v24 = vld [vmem:[#allocation11 + $0x280] ss:$16 sps:$4 sm:$0xff]  }
 0x2d7   :  { %7259 = vmatpush1.bf16.msra.mxu1 %v12316_v11  ;;  %v12378_v11 = vld [vmem:[#allocation11 + $0x2a4] ss:$16 sps:$4 sm:$0xff]  }
 0x2d8   :  { %7260 = vmatprep.subr.bf16.mxu1 %v12324_v31  ;;  %v12361_v31 = vld [vmem:[#allocation11 + $0x2a8] ss:$16 sps:$4 sm:$0xff]  }
 0x2d9   :  { %7589 = vmatpush1.bf16.msra.mxu0 %v12307_v33  ;;  %v12369_v33 = vld [vmem:[#allocation11 + $0x2cc] ss:$16 sps:$4 sm:$0xff]  }
 0x2da   :  { %7590 = vmatprep.subr.bf16.mxu0 %v12315_v6  ;;  %v12367_v6 = vld [vmem:[#allocation11 + $0x2c8] ss:$16 sps:$4 sm:$0xff]  }
 0x2db   :  { %7261 = vmatpush1.bf16.msra.mxu1 %v12322_v34  ;;  %v12376_v34 = vld [vmem:[#allocation11 + $0x2a0] ss:$16 sps:$4 sm:$0xff]  }
 0x2dc   :  { %7262 = vmatprep.subr.bf16.mxu1 %v12330_v47  ;;  %v12384_v47 = vld [vmem:[#allocation11 + $0x2c4] ss:$16 sps:$4 sm:$0xff]  }
 0x2dd   :  { %7591 = vmatpush1.bf16.msra.mxu0 %v12313_v49  ;;  %v12375_v49 = vld [vmem:[#allocation11 + $0x2ec] ss:$16 sps:$4 sm:$0xff]  }
 0x2de   :  { %7592 = vmatprep.subr.bf16.mxu0 %v12321_v10  ;;  %v12382_v10 = vld [vmem:[#allocation11 + $0x2c0] ss:$16 sps:$4 sm:$0xff]  }
 0x2df   :  { %7263 = vmatpush1.bf16.msra.mxu1 %v12328_v50  ;;  %v12390_v50 = vld [vmem:[#allocation11 + $0x2e4] ss:$16 sps:$4 sm:$0xff]  }
 0x2e0   :  { %7264 = vmatprep.subr.bf16.mxu1 %v12336_v53  ;;  %v12381_v53 = vld [vmem:[#allocation11 + $0x30c] ss:$16 sps:$4 sm:$0xff]  }
 0x2e1   :  { %7593 = vmatpush1.bf16.msra.mxu0 %v12319_v54  ;;  %v12388_v54 = vld [vmem:[#allocation11 + $0x2e0] ss:$16 sps:$4 sm:$0xff]  }
 0x2e2   :  { %7594 = vmatprep.subr.bf16.mxu0 %v12327_v13  ;;  %v12396_v13 = vld [vmem:[#allocation11 + $0x304] ss:$16 sps:$4 sm:$0xff]  }
 0x2e3   :  { %7265 = vmatpush1.bf16.msra.mxu1 %v12334_v39  ;;  %v12379_v39 = vld [vmem:[#allocation11 + $0x308] ss:$16 sps:$4 sm:$0xff]  }
 0x2e4   :  { %7266 = vmatprep.subr.bf16.mxu1 %v12342_v16  ;;  %v12394_v16 = vld [vmem:[#allocation11 + $0x300] ss:$16 sps:$4 sm:$0xff]  }
 0x2e5   :  { %7595 = vmatpush1.bf16.msra.mxu0 %v12325_v60  ;;  %v12402_v60 = vld [vmem:[#allocation11 + $0x324] ss:$16 sps:$4 sm:$0xff]  }
 0x2e6   :  { %7605 = vmatprep.subr.bf16.mxu0 %v12333_v62  ;;  %v12385_v62 = vld [vmem:[#allocation11 + $0x328] ss:$16 sps:$4 sm:$0xff]  }
 0x2e7   :  { %7267 = vmatpush1.bf16.msra.mxu1 %v12340_v2  ;;  %v12393_v2 = vld [vmem:[#allocation11 + $0x34c] ss:$16 sps:$4 sm:$0xff]  }
 0x2e8   :  { %7597 = vmatmul.mubr.bf16.vlgmr.msra.gmra.mrb[8].mxu0 %v4126_v18  ;;  %7277 = vmatprep.subr.bf16.mxu1 %v12348_v35  ;;  %v12408_v35 = vld [vmem:[#allocation11 + $0x344] ss:$16 sps:$4 sm:$0xff]  }
 0x2e9   :  { %7606 = vmatpush1.bf16.msra.mxu0 %v12331_v1  ;;  %7637 = vmatprep.mubr.bf16.mxu0 %v4129_v43  ;;  %v12399_v1 = vld [vmem:[#allocation11 + $0x36c] ss:$16 sps:$4 sm:$0xff]  }
 0x2ea   :  { %7607 = vmatprep.subr.bf16.mxu0 %v12339_v22  ;;  %7269 = vmatmul.mubr.bf16.vlgmr.msra.gmra.mrb[20].mxu1 %v4126_v18  ;;  %v12406_v22 = vld [vmem:[#allocation11 + $0x340] ss:$16 sps:$4 sm:$0xff]   ;;  %v12414_v18 = vld [vmem:[#allocation11 + $0x364] ss:$16 sps:$4 sm:$0xff]  }
 0x2eb   :  { %7278 = vmatpush1.bf16.msra.mxu1 %v12346_v46  ;;  %7309 = vmatprep.mubr.bf16.mxu1 %v4129_v43  ;;  %v12397_v46 = vld [vmem:[#allocation11 + $0x368] ss:$16 sps:$4 sm:$0xff]   ;;  %v12405_v43 = vld [vmem:[#allocation11 + $0x38c] ss:$16 sps:$4 sm:$0xff]  }
 0x2ec   :  { %7279 = vmatprep.subr.bf16.mxu1 %v12354_v17  ;;  %v12412_v17 = vld [vmem:[#allocation11 + $0x360] ss:$16 sps:$4 sm:$0xff]  }
 0x2ed   :  { %7608 = vmatpush1.bf16.msra.mxu0 %v12337_v21  ;;  %v12420_v21 = vld [vmem:[#allocation11 + $0x384] ss:$16 sps:$4 sm:$0xff]  }
 0x2ee   :  { %7609 = vmatprep.subr.bf16.mxu0 %v12345_v8  ;;  %v12403_v8 = vld [vmem:[#allocation11 + $0x388] ss:$16 sps:$4 sm:$0xff]  }
 0x2ef   :  { %7280 = vmatpush1.bf16.msra.mxu1 %v12352_v14  ;;  %v12411_v14 = vld [vmem:[#allocation11 + $0x3ac] ss:$16 sps:$4 sm:$0xff]  }
 0x2f0   :  { %7281 = vmatprep.subr.bf16.mxu1 %v12360_v61  ;;  %v12418_v61 = vld [vmem:[#allocation11 + $0x380] ss:$16 sps:$4 sm:$0xff]  }
 0x2f1   :  { %7610 = vmatpush1.bf16.msra.mxu0 %v12343_v27  ;;  %v12426_v27 = vld [vmem:[#allocation11 + $0x3a4] ss:$16 sps:$4 sm:$0xff]  }
 0x2f2   :  { %7611 = vmatprep.subr.bf16.mxu0 %v12351_v59  ;;  %v12409_v59 = vld [vmem:[#allocation11 + $0x3a8] ss:$16 sps:$4 sm:$0xff]  }
 0x2f3   :  { %7282 = vmatpush1.bf16.msra.mxu1 %v12358_v37  ;;  %v12417_v37 = vld [vmem:[#allocation11 + $0x3cc] ss:$16 sps:$4 sm:$0xff]  }
 0x2f4   :  { %7283 = vmatprep.subr.bf16.mxu1 %v12366_v25  ;;  %v12424_v25 = vld [vmem:[#allocation11 + $0x3a0] ss:$16 sps:$4 sm:$0xff]  }
 0x2f5   :  { %7612 = vmatpush1.bf16.msra.mxu0 %v12349_v29  ;;  %v12432_v29 = vld [vmem:[#allocation11 + $0x3c4] ss:$16 sps:$4 sm:$0xff]  }
 0x2f6   :  { %7613 = vmatprep.subr.bf16.mxu0 %v12357_v28  ;;  %v12415_v28 = vld [vmem:[#allocation11 + $0x3c8] ss:$16 sps:$4 sm:$0xff]  }
 0x2f7   :  { %7284 = vmatpush1.bf16.msra.mxu1 %v12364_v63  ;;  %v12423_v63 = vld [vmem:[#allocation11 + $0x3ec] ss:$16 sps:$4 sm:$0xff]  }
 0x2f8   :  { %7285 = vmatprep.subr.bf16.mxu1 %v12372_v30  ;;  %v12430_v30 = vld [vmem:[#allocation11 + $0x3c0] ss:$16 sps:$4 sm:$0xff]  }
 0x2f9   :  { %7614 = vmatpush1.bf16.msra.mxu0 %v12355_v15  ;;  %v12438_v15 = vld [vmem:[#allocation11 + $0x3e4] ss:$16 sps:$4 sm:$0xff]  }
 0x2fa   :  { %7615 = vmatprep.subr.bf16.mxu0 %v12363_v19  ;;  %v12421_v19 = vld [vmem:[#allocation11 + $0x3e8] ss:$16 sps:$4 sm:$0xff]  }
 0x2fb   :  { %7286 = vmatpush1.bf16.msra.mxu1 %v12370_v24  ;;  %v12429_v24 = vld [vmem:[#allocation11 + $0x40c] ss:$16 sps:$4 sm:$0xff]  }
 0x2fc   :  { %7287 = vmatprep.subr.bf16.mxu1 %v12378_v11  ;;  %v12436_v11 = vld [vmem:[#allocation11 + $0x3e0] ss:$16 sps:$4 sm:$0xff]  }
 0x2fd   :  { %7616 = vmatpush1.bf16.msra.mxu0 %v12361_v31  ;;  %v1287_v31 = vmax.f32 %v14640_v52, 0.0  ;;  %v12433_v52 = vld [vmem:[#allocation11 + $0x428] ss:$16 sps:$4 sm:$0xff]  }
 0x2fe   :  { %7617 = vmatprep.subr.bf16.mxu0 %v12369_v33  ;;  %v12444_v33 = vld [vmem:[#allocation11 + $0x404] ss:$16 sps:$4 sm:$0xff]  }
 0x2ff   :  { %7288 = vmatpush1.bf16.msra.mxu1 %v12376_v34  ;;  %v12427_v34 = vld [vmem:[#allocation11 + $0x408] ss:$16 sps:$4 sm:$0xff]  }
 0x300   :  { %7289 = vmatprep.subr.bf16.mxu1 %v12384_v47  ;;  %v12435_v47 = vld [vmem:[#allocation11 + $0x42c] ss:$16 sps:$4 sm:$0xff]  }
 0x301   :  { %7618 = vmatpush1.bf16.msra.mxu0 %v12367_v6  ;;  %v1290_v6 = vmax.f32 %v14655_v20, 0.0  ;;  %v12456_v20 = vld [vmem:[#allocation11 + $0x444] ss:$16 sps:$4 sm:$0xff]  }
 0x302   :  { %7619 = vmatprep.subr.bf16.mxu0 %v12375_v49  ;;  %v4128_v49 = vpack.c.bf16 %v1287_v31, %v1287_v31  ;;  %v12487_v31 = vld [vmem:[#allocation11 + $0x548] ss:$16 sps:$4 sm:$0xff]  }
 0x303   :  { %7290 = vmatpush1.bf16.msra.mxu1 %v12382_v10  ;;  %v12442_v10 = vld [vmem:[#allocation11 + $0x400] ss:$16 sps:$4 sm:$0xff]  }
 0x304   :  { %7291 = vmatprep.subr.bf16.mxu1 %v12390_v50  ;;  %v4131_v50 = vpack.c.bf16 %v1290_v6, %v1290_v6  ;;  %v12502_v6 = vld [vmem:[#allocation11 + $0x540] ss:$16 sps:$4 sm:$0xff]  }
 0x305   :  { %7620 = vmatpush1.bf16.msra.mxu0 %v12373_v44  ;;  %v12450_v44 = vld [vmem:[#allocation11 + $0x424] ss:$16 sps:$4 sm:$0xff]  }
 0x306   :  { %7621 = vmatprep.subr.bf16.mxu0 %v12381_v53  ;;  %v12441_v53 = vld [vmem:[#allocation11 + $0x44c] ss:$16 sps:$4 sm:$0xff]  }
 0x307   :  { %7292 = vmatpush1.bf16.msra.mxu1 %v12388_v54  ;;  %v12448_v54 = vld [vmem:[#allocation11 + $0x420] ss:$16 sps:$4 sm:$0xff]  }
 0x308   :  { %7293 = vmatprep.subr.bf16.mxu1 %v12396_v13  ;;  %v12439_v13 = vld [vmem:[#allocation11 + $0x448] ss:$16 sps:$4 sm:$0xff]  }
 0x309   :  { %7622 = vmatpush1.bf16.msra.mxu0 %v12379_v39  ;;  %v12447_v39 = vld [vmem:[#allocation11 + $0x46c] ss:$16 sps:$4 sm:$0xff]  }
 0x30a   :  { %7623 = vmatprep.subr.bf16.mxu0 %v12387_v58  ;;  %v12454_v58 = vld [vmem:[#allocation11 + $0x440] ss:$16 sps:$4 sm:$0xff]  }
 0x30b   :  { %7294 = vmatpush1.bf16.msra.mxu1 %v12394_v16  ;;  %v12462_v16 = vld [vmem:[#allocation11 + $0x464] ss:$16 sps:$4 sm:$0xff]  }
 0x30c   :  { %7295 = vmatprep.subr.bf16.mxu1 %v12402_v60  ;;  %v12445_v60 = vld [vmem:[#allocation11 + $0x468] ss:$16 sps:$4 sm:$0xff]  }
 0x30d   :  { %7624 = vmatpush1.bf16.msra.mxu0 %v12385_v62  ;;  %v12453_v62 = vld [vmem:[#allocation11 + $0x48c] ss:$16 sps:$4 sm:$0xff]  }
 0x30e   :  { %7625 = vmatprep.subr.bf16.mxu0 %v12393_v2  ;;  %v12460_v2 = vld [vmem:[#allocation11 + $0x460] ss:$16 sps:$4 sm:$0xff]  }
 0x30f   :  { %7296 = vmatpush1.bf16.msra.mxu1 %v12400_v4  ;;  %v12468_v4 = vld [vmem:[#allocation11 + $0x484] ss:$16 sps:$4 sm:$0xff]  }
 0x310   :  { %7297 = vmatprep.subr.bf16.mxu1 %v12408_v35  ;;  %v12451_v35 = vld [vmem:[#allocation11 + $0x488] ss:$16 sps:$4 sm:$0xff]  }
 0x311   :  { %7626 = vmatpush1.bf16.msra.mxu0 %v12391_v38  ;;  %v12459_v38 = vld [vmem:[#allocation11 + $0x4ac] ss:$16 sps:$4 sm:$0xff]  }
 0x312   :  { %7627 = vmatprep.subr.bf16.mxu0 %v12399_v1  ;;  %v12466_v1 = vld [vmem:[#allocation11 + $0x480] ss:$16 sps:$4 sm:$0xff]  }
 0x313   :  { %7298 = vmatpush1.bf16.msra.mxu1 %v12406_v22  ;;  %v12474_v22 = vld [vmem:[#allocation11 + $0x4a4] ss:$16 sps:$4 sm:$0xff]  }
 0x314   :  { %7299 = vmatprep.subr.bf16.mxu1 %v12414_v18  ;;  %v12457_v18 = vld [vmem:[#allocation11 + $0x4a8] ss:$16 sps:$4 sm:$0xff]  }
 0x315   :  { %7628 = vmatpush1.bf16.msra.mxu0 %v12397_v46  ;;  %v12465_v46 = vld [vmem:[#allocation11 + $0x4cc] ss:$16 sps:$4 sm:$0xff]  }
 0x316   :  { %7629 = vmatprep.subr.bf16.mxu0 %v12405_v43  ;;  %v12472_v43 = vld [vmem:[#allocation11 + $0x4a0] ss:$16 sps:$4 sm:$0xff]  }
 0x317   :  { %7300 = vmatpush1.bf16.msra.mxu1 %v12412_v17  ;;  %v12480_v17 = vld [vmem:[#allocation11 + $0x4c4] ss:$16 sps:$4 sm:$0xff]  }
 0x318   :  { %7301 = vmatprep.subr.bf16.mxu1 %v12420_v21  ;;  %v12463_v21 = vld [vmem:[#allocation11 + $0x4c8] ss:$16 sps:$4 sm:$0xff]  }
 0x319   :  { %7630 = vmatpush1.bf16.msra.mxu0 %v12403_v8  ;;  %v12471_v8 = vld [vmem:[#allocation11 + $0x4ec] ss:$16 sps:$4 sm:$0xff]  }
 0x31a   :  { %7631 = vmatprep.subr.bf16.mxu0 %v12411_v14  ;;  %v12478_v14 = vld [vmem:[#allocation11 + $0x4c0] ss:$16 sps:$4 sm:$0xff]  }
 0x31b   :  { %7302 = vmatpush1.bf16.msra.mxu1 %v12418_v61  ;;  %v12486_v61 = vld [vmem:[#allocation11 + $0x4e4] ss:$16 sps:$4 sm:$0xff]  }
 0x31c   :  { %7303 = vmatprep.subr.bf16.mxu1 %v12426_v27  ;;  %v12469_v27 = vld [vmem:[#allocation11 + $0x4e8] ss:$16 sps:$4 sm:$0xff]  }
 0x31d   :  { %7632 = vmatpush1.bf16.msra.mxu0 %v12409_v59  ;;  %v12477_v59 = vld [vmem:[#allocation11 + $0x50c] ss:$16 sps:$4 sm:$0xff]  }
 0x31e   :  { %7633 = vmatprep.subr.bf16.mxu0 %v12417_v37  ;;  %v12484_v37 = vld [vmem:[#allocation11 + $0x4e0] ss:$16 sps:$4 sm:$0xff]  }
 0x31f   :  { %7304 = vmatpush1.bf16.msra.mxu1 %v12424_v25  ;;  %v12492_v25 = vld [vmem:[#allocation11 + $0x504] ss:$16 sps:$4 sm:$0xff]  }
 0x320   :  { %7305 = vmatprep.subr.bf16.mxu1 %v12432_v29  ;;  %v12475_v29 = vld [vmem:[#allocation11 + $0x508] ss:$16 sps:$4 sm:$0xff]  }
 0x321   :  { %7634 = vmatpush1.bf16.msra.mxu0 %v12415_v28  ;;  %v12483_v28 = vld [vmem:[#allocation11 + $0x52c] ss:$16 sps:$4 sm:$0xff]  }
 0x322   :  { %7635 = vmatprep.subr.bf16.mxu0 %v12423_v63  ;;  %v12490_v63 = vld [vmem:[#allocation11 + $0x500] ss:$16 sps:$4 sm:$0xff]  }
 0x323   :  { %7306 = vmatpush1.bf16.msra.mxu1 %v12430_v30  ;;  %v12498_v30 = vld [vmem:[#allocation11 + $0x524] ss:$16 sps:$4 sm:$0xff]  }
 0x324   :  { %7307 = vmatprep.subr.bf16.mxu1 %v12438_v15  ;;  %v12481_v15 = vld [vmem:[#allocation11 + $0x528] ss:$16 sps:$4 sm:$0xff]  }
 0x325   :  { %7636 = vmatpush1.bf16.msra.mxu0 %v12421_v19  ;;  %v12489_v19 = vld [vmem:[#allocation11 + $0x54c] ss:$16 sps:$4 sm:$0xff]  }
 0x326   :  { %7646 = vmatprep.subr.bf16.mxu0 %v12429_v24  ;;  %v12496_v24 = vld [vmem:[#allocation11 + $0x520] ss:$16 sps:$4 sm:$0xff]  }
 0x327   :  { %7308 = vmatpush1.bf16.msra.mxu1 %v12436_v11  ;;  %v12504_v11 = vld [vmem:[#allocation11 + $0x544] ss:$16 sps:$4 sm:$0xff]  }
 0x328   :  { %7638 = vmatmul.mubr.bf16.vlgmr.msra.gmra.mrb[8].mxu0 %v4128_v49  ;;  %7318 = vmatprep.subr.bf16.mxu1 %v12444_v33  ;;  %v12495_v33 = vld [vmem:[#allocation11 + $0x56c] ss:$16 sps:$4 sm:$0xff]  }
 0x329   :  { %7647 = vmatpush1.bf16.msra.mxu0 %v12427_v34  ;;  %7678 = vmatprep.mubr.bf16.mxu0 %v4131_v50  ;;  %v12510_v34 = vld [vmem:[#allocation11 + $0x564] ss:$16 sps:$4 sm:$0xff]  }
 0x32a   :  { %7648 = vmatprep.subr.bf16.mxu0 %v12435_v47  ;;  %7310 = vmatmul.mubr.bf16.vlgmr.msra.gmra.mrb[20].mxu1 %v4128_v49  ;;  %v12493_v47 = vld [vmem:[#allocation11 + $0x568] ss:$16 sps:$4 sm:$0xff]   ;;  %v12501_v49 = vld [vmem:[#allocation11 + $0x58c] ss:$16 sps:$4 sm:$0xff]  }
 0x32b   :  { %7319 = vmatpush1.bf16.msra.mxu1 %v12442_v10  ;;  %7350 = vmatprep.mubr.bf16.mxu1 %v4131_v50  ;;  %v12508_v10 = vld [vmem:[#allocation11 + $0x560] ss:$16 sps:$4 sm:$0xff]   ;;  %v12516_v50 = vld [vmem:[#allocation11 + $0x584] ss:$16 sps:$4 sm:$0xff]  }
 0x32c   :  { %7320 = vmatprep.subr.bf16.mxu1 %v12450_v44  ;;  %v12499_v44 = vld [vmem:[#allocation11 + $0x588] ss:$16 sps:$4 sm:$0xff]  }
 0x32d   :  { %7649 = vmatpush1.bf16.msra.mxu0 %v12433_v52  ;;  %v12507_v52 = vld [vmem:[#allocation11 + $0x5ac] ss:$16 sps:$4 sm:$0xff]  }
 0x32e   :  { %7650 = vmatprep.subr.bf16.mxu0 %v12441_v53  ;;  %v12514_v53 = vld [vmem:[#allocation11 + $0x580] ss:$16 sps:$4 sm:$0xff]  }
 0x32f   :  { %7321 = vmatpush1.bf16.msra.mxu1 %v12448_v54  ;;  %v12522_v54 = vld [vmem:[#allocation11 + $0x5a4] ss:$16 sps:$4 sm:$0xff]  }
 0x330   :  { %7322 = vmatprep.subr.bf16.mxu1 %v12456_v20  ;;  %v1289_v20 = vmax.f32 %v14649_v41, 0.0  ;;  %v12517_v41 = vld [vmem:[#allocation11 + $0x5e8] ss:$16 sps:$4 sm:$0xff]  }
 0x331   :  { %7651 = vmatpush1.bf16.msra.mxu0 %v12439_v13  ;;  %v1292_v13 = vmax.f32 %v14662_v42, 0.0  ;;  %v12525_v42 = vld [vmem:[#allocation11 + $0x60c] ss:$16 sps:$4 sm:$0xff]  }
 0x332   :  { %7652 = vmatprep.subr.bf16.mxu0 %v12447_v39  ;;  %v12505_v39 = vld [vmem:[#allocation11 + $0x5a8] ss:$16 sps:$4 sm:$0xff]  }
 0x333   :  { %7323 = vmatpush1.bf16.msra.mxu1 %v12454_v58  ;;  %v12513_v58 = vld [vmem:[#allocation11 + $0x5cc] ss:$16 sps:$4 sm:$0xff]  }
 0x334   :  { %7324 = vmatprep.subr.bf16.mxu1 %v12462_v16  ;;  %v12520_v16 = vld [vmem:[#allocation11 + $0x5a0] ss:$16 sps:$4 sm:$0xff]  }
 0x335   :  { %7653 = vmatpush1.bf16.msra.mxu0 %v12445_v60  ;;  %v12528_v60 = vld [vmem:[#allocation11 + $0x5c4] ss:$16 sps:$4 sm:$0xff]  }
 0x336   :  { %7654 = vmatprep.subr.bf16.mxu0 %v12453_v62  ;;  %v12511_v62 = vld [vmem:[#allocation11 + $0x5c8] ss:$16 sps:$4 sm:$0xff]  }
 0x337   :  { %7325 = vmatpush1.bf16.msra.mxu1 %v12460_v2  ;;  %v12519_v2 = vld [vmem:[#allocation11 + $0x5ec] ss:$16 sps:$4 sm:$0xff]  }
 0x338   :  { %7326 = vmatprep.subr.bf16.mxu1 %v12468_v4  ;;  %v12526_v4 = vld [vmem:[#allocation11 + $0x5c0] ss:$16 sps:$4 sm:$0xff]  }
 0x339   :  { %7655 = vmatpush1.bf16.msra.mxu0 %v12451_v35  ;;  %v12534_v35 = vld [vmem:[#allocation11 + $0x5e4] ss:$16 sps:$4 sm:$0xff]  }
 0x33a   :  { %7656 = vmatprep.subr.bf16.mxu0 %v12459_v38  ;;  %v12532_v38 = vld [vmem:[#allocation11 + $0x5e0] ss:$16 sps:$4 sm:$0xff]  }
 0x33b   :  { %7327 = vmatpush1.bf16.msra.mxu1 %v12466_v1  ;;  %v12540_v1 = vld [vmem:[#allocation11 + $0x604] ss:$16 sps:$4 sm:$0xff]  }
 0x33c   :  { %7328 = vmatprep.subr.bf16.mxu1 %v12474_v22  ;;  %v12523_v22 = vld [vmem:[#allocation11 + $0x608] ss:$16 sps:$4 sm:$0xff]  }
 0x33d   :  { %7657 = vmatpush1.bf16.msra.mxu0 %v12457_v18  ;;  %v12531_v18 = vld [vmem:[#allocation11 + $0x62c] ss:$16 sps:$4 sm:$0xff]  }
 0x33e   :  { %7658 = vmatprep.subr.bf16.mxu0 %v12465_v46  ;;  %v4130_v46 = vpack.c.bf16 %v1289_v20, %v1289_v20 }
 0x33f   :  { %7329 = vmatpush1.bf16.msra.mxu1 %v12472_v43  ;;  %v12538_v43 = vld [vmem:[#allocation11 + $0x600] ss:$16 sps:$4 sm:$0xff]  }
 0x340   :  { %7330 = vmatprep.subr.bf16.mxu1 %v12480_v17  ;;  %v4133_v17 = vpack.c.bf16 %v1292_v13, %v1292_v13 }
 0x341   :  { %7659 = vmatpush1.bf16.msra.mxu0 %v12463_v21  ;;  %v12546_v21 = vld [vmem:[#allocation11 + $0x624] ss:$16 sps:$4 sm:$0xff]  }
 0x342   :  { %7660 = vmatprep.subr.bf16.mxu0 %v12471_v8  ;;  %v12529_v8 = vld [vmem:[#allocation11 + $0x628] ss:$16 sps:$4 sm:$0xff]  }
 0x343   :  { %7331 = vmatpush1.bf16.msra.mxu1 %v12478_v14  ;;  %v12537_v14 = vld [vmem:[#allocation11 + $0x64c] ss:$16 sps:$4 sm:$0xff]  }
 0x344   :  { %7332 = vmatprep.subr.bf16.mxu1 %v12486_v61  ;;  %v12544_v61 = vld [vmem:[#allocation11 + $0x620] ss:$16 sps:$4 sm:$0xff]  }
 0x345   :  { %7661 = vmatpush1.bf16.msra.mxu0 %v12469_v27  ;;  %v12552_v27 = vld [vmem:[#allocation11 + $0x644] ss:$16 sps:$4 sm:$0xff]  }
 0x346   :  { %7662 = vmatprep.subr.bf16.mxu0 %v12477_v59  ;;  %v12535_v59 = vld [vmem:[#allocation11 + $0x648] ss:$16 sps:$4 sm:$0xff]  }
 0x347   :  { %7333 = vmatpush1.bf16.msra.mxu1 %v12484_v37  ;;  %v12543_v37 = vld [vmem:[#allocation11 + $0x66c] ss:$16 sps:$4 sm:$0xff]  }
 0x348   :  { %7334 = vmatprep.subr.bf16.mxu1 %v12492_v25  ;;  %v12550_v25 = vld [vmem:[#allocation11 + $0x640] ss:$16 sps:$4 sm:$0xff]  }
 0x349   :  { %7663 = vmatpush1.bf16.msra.mxu0 %v12475_v29  ;;  %v12558_v29 = vld [vmem:[#allocation11 + $0x664] ss:$16 sps:$4 sm:$0xff]  }
 0x34a   :  { %7664 = vmatprep.subr.bf16.mxu0 %v12483_v28  ;;  %v12541_v28 = vld [vmem:[#allocation11 + $0x668] ss:$16 sps:$4 sm:$0xff]  }
 0x34b   :  { %7335 = vmatpush1.bf16.msra.mxu1 %v12490_v63  ;;  %v12549_v63 = vld [vmem:[#allocation11 + $0x68c] ss:$16 sps:$4 sm:$0xff]  }
 0x34c   :  { %7336 = vmatprep.subr.bf16.mxu1 %v12498_v30  ;;  %v12556_v30 = vld [vmem:[#allocation11 + $0x660] ss:$16 sps:$4 sm:$0xff]  }
 0x34d   :  { %7665 = vmatpush1.bf16.msra.mxu0 %v12481_v15  ;;  %v12564_v15 = vld [vmem:[#allocation11 + $0x684] ss:$16 sps:$4 sm:$0xff]  }
 0x34e   :  { %7666 = vmatprep.subr.bf16.mxu0 %v12489_v19  ;;  %v12547_v19 = vld [vmem:[#allocation11 + $0x688] ss:$16 sps:$4 sm:$0xff]  }
 0x34f   :  { %7337 = vmatpush1.bf16.msra.mxu1 %v12496_v24  ;;  %v12555_v24 = vld [vmem:[#allocation11 + $0x6ac] ss:$16 sps:$4 sm:$0xff]  }
 0x350   :  { %7338 = vmatprep.subr.bf16.mxu1 %v12504_v11  ;;  %v12562_v11 = vld [vmem:[#allocation11 + $0x680] ss:$16 sps:$4 sm:$0xff]  }
 0x351   :  { %7667 = vmatpush1.bf16.msra.mxu0 %v12487_v31  ;;  %v12570_v31 = vld [vmem:[#allocation11 + $0x6a4] ss:$16 sps:$4 sm:$0xff]  }
 0x352   :  { %7668 = vmatprep.subr.bf16.mxu0 %v12495_v33  ;;  %v12553_v33 = vld [vmem:[#allocation11 + $0x6a8] ss:$16 sps:$4 sm:$0xff]  }
 0x353   :  { %7339 = vmatpush1.bf16.msra.mxu1 %v12502_v6  ;;  %v12561_v6 = vld [vmem:[#allocation11 + $0x6cc] ss:$16 sps:$4 sm:$0xff]  }
 0x354   :  { %7340 = vmatprep.subr.bf16.mxu1 %v12510_v34 }
 0x355   :  { %7669 = vmatpush1.bf16.msra.mxu0 %v12493_v47  ;;  %v12568_v47 = vld [vmem:[#allocation11 + $0x6a0] ss:$16 sps:$4 sm:$0xff]  }
 0x356   :  { %7670 = vmatprep.subr.bf16.mxu0 %v12501_v49 }
 0x357   :  { %7341 = vmatpush1.bf16.msra.mxu1 %v12508_v10  ;;  %v12576_v10 = vld [vmem:[#allocation11 + $0x6c4] ss:$16 sps:$4 sm:$0xff]  }
 0x358   :  { %7342 = vmatprep.subr.bf16.mxu1 %v12516_v50 }
 0x359   :  { %7671 = vmatpush1.bf16.msra.mxu0 %v12499_v44  ;;  %v12559_v44 = vld [vmem:[#allocation11 + $0x6c8] ss:$16 sps:$4 sm:$0xff]  }
 0x35a   :  { %7672 = vmatprep.subr.bf16.mxu0 %v12507_v52 }
 0x35b   :  { %7343 = vmatpush1.bf16.msra.mxu1 %v12514_v53 }
 0x35c   :  { %7344 = vmatprep.subr.bf16.mxu1 %v12522_v54  ;;  %v12567_v54 = vld [vmem:[#allocation11 + $0x6ec] ss:$16 sps:$4 sm:$0xff]  }
 0x35d   :  { %7673 = vmatpush1.bf16.msra.mxu0 %v12505_v39  ;;  %v12574_v39 = vld [vmem:[#allocation11 + $0x6c0] ss:$16 sps:$4 sm:$0xff]  }
 0x35e   :  { %7674 = vmatprep.subr.bf16.mxu0 %v12513_v58 }
 0x35f   :  { %7345 = vmatpush1.bf16.msra.mxu1 %v12520_v16  ;;  %v12582_v16 = vld [vmem:[#allocation11 + $0x6e4] ss:$16 sps:$4 sm:$0xff]  }
 0x360   :  { %7346 = vmatprep.subr.bf16.mxu1 %v12528_v60  ;;  %v12565_v60 = vld [vmem:[#allocation11 + $0x6e8] ss:$16 sps:$4 sm:$0xff]  }
 0x361   :  { %7675 = vmatpush1.bf16.msra.mxu0 %v12511_v62  ;;  %v12573_v62 = vld [vmem:[#allocation11 + $0x70c] ss:$16 sps:$4 sm:$0xff]  }
 0x362   :  { %7676 = vmatprep.subr.bf16.mxu0 %v12519_v2  ;;  %v12580_v2 = vld [vmem:[#allocation11 + $0x6e0] ss:$16 sps:$4 sm:$0xff]  }
 0x363   :  { %7347 = vmatpush1.bf16.msra.mxu1 %v12526_v4  ;;  %v12588_v4 = vld [vmem:[#allocation11 + $0x704] ss:$16 sps:$4 sm:$0xff]  }
 0x364   :  { %7348 = vmatprep.subr.bf16.mxu1 %v12534_v35  ;;  %v12571_v35 = vld [vmem:[#allocation11 + $0x708] ss:$16 sps:$4 sm:$0xff]  }
 0x365   :  { %7677 = vmatpush1.bf16.msra.mxu0 %v12517_v41  ;;  %v12579_v41 = vld [vmem:[#allocation11 + $0x72c] ss:$16 sps:$4 sm:$0xff]  }
 0x366   :  { %7687 = vmatprep.subr.bf16.mxu0 %v12525_v42  ;;  %v12586_v42 = vld [vmem:[#allocation11 + $0x700] ss:$16 sps:$4 sm:$0xff]  }
 0x367   :  { %7349 = vmatpush1.bf16.msra.mxu1 %v12532_v38  ;;  %v12594_v38 = vld [vmem:[#allocation11 + $0x724] ss:$16 sps:$4 sm:$0xff]  }
 0x368   :  { %7679 = vmatmul.mubr.bf16.vlgmr.msra.gmra.mrb[8].mxu0 %v4130_v46  ;;  %7359 = vmatprep.subr.bf16.mxu1 %v12540_v1  ;;  %v12577_v1 = vld [vmem:[#allocation11 + $0x728] ss:$16 sps:$4 sm:$0xff]  }
 0x369   :  { %7688 = vmatpush1.bf16.msra.mxu0 %v12523_v22  ;;  %7719 = vmatprep.mubr.bf16.mxu0 %v4133_v17  ;;  %v12585_v22 = vld [vmem:[#allocation11 + $0x74c] ss:$16 sps:$4 sm:$0xff]  }
 0x36a   :  { %7689 = vmatprep.subr.bf16.mxu0 %v12531_v18  ;;  %7351 = vmatmul.mubr.bf16.vlgmr.msra.gmra.mrb[20].mxu1 %v4130_v46  ;;  %v12592_v18 = vld [vmem:[#allocation11 + $0x720] ss:$16 sps:$4 sm:$0xff]   ;;  %v12600_v46 = vld [vmem:[#allocation11 + $0x744] ss:$16 sps:$4 sm:$0xff]  }
 0x36b   :  { %7360 = vmatpush1.bf16.msra.mxu1 %v12538_v43  ;;  %7391 = vmatprep.mubr.bf16.mxu1 %v4133_v17  ;;  %v12583_v43 = vld [vmem:[#allocation11 + $0x748] ss:$16 sps:$4 sm:$0xff]   ;;  %v12591_v17 = vld [vmem:[#allocation11 + $0x76c] ss:$16 sps:$4 sm:$0xff]  }
 0x36c   :  { %7361 = vmatprep.subr.bf16.mxu1 %v12546_v21  ;;  %v12598_v21 = vld [vmem:[#allocation11 + $0x740] ss:$16 sps:$4 sm:$0xff]  }
 0x36d   :  { %7690 = vmatpush1.bf16.msra.mxu0 %v12529_v8  ;;  %v12606_v8 = vld [vmem:[#allocation11 + $0x764] ss:$16 sps:$4 sm:$0xff]  }
 0x36e   :  { %7691 = vmatprep.subr.bf16.mxu0 %v12537_v14  ;;  %v12589_v14 = vld [vmem:[#allocation11 + $0x768] ss:$16 sps:$4 sm:$0xff]  }
 0x36f   :  { %7362 = vmatpush1.bf16.msra.mxu1 %v12544_v61  ;;  %v12597_v61 = vld [vmem:[#allocation11 + $0x78c] ss:$16 sps:$4 sm:$0xff]  }
 0x370   :  { %7363 = vmatprep.subr.bf16.mxu1 %v12552_v27  ;;  %v12604_v27 = vld [vmem:[#allocation11 + $0x760] ss:$16 sps:$4 sm:$0xff]  }
 0x371   :  { %7692 = vmatpush1.bf16.msra.mxu0 %v12535_v59  ;;  %v12612_v59 = vld [vmem:[#allocation11 + $0x784] ss:$16 sps:$4 sm:$0xff]  }
 0x372   :  { %7693 = vmatprep.subr.bf16.mxu0 %v12543_v37  ;;  %v12595_v37 = vld [vmem:[#allocation11 + $0x788] ss:$16 sps:$4 sm:$0xff]  }
 0x373   :  { %7364 = vmatpush1.bf16.msra.mxu1 %v12550_v25  ;;  %v12603_v25 = vld [vmem:[#allocation11 + $0x7ac] ss:$16 sps:$4 sm:$0xff]  }
 0x374   :  { %7365 = vmatprep.subr.bf16.mxu1 %v12558_v29  ;;  %v12610_v29 = vld [vmem:[#allocation11 + $0x780] ss:$16 sps:$4 sm:$0xff]  }
 0x375   :  { %7694 = vmatpush1.bf16.msra.mxu0 %v12541_v28  ;;  %v12618_v28 = vld [vmem:[#allocation11 + $0x7a4] ss:$16 sps:$4 sm:$0xff]  }
 0x376   :  { %7695 = vmatprep.subr.bf16.mxu0 %v12549_v63  ;;  %v12601_v63 = vld [vmem:[#allocation11 + $0x7a8] ss:$16 sps:$4 sm:$0xff]  }
 0x377   :  { %7366 = vmatpush1.bf16.msra.mxu1 %v12556_v30  ;;  %v12609_v30 = vld [vmem:[#allocation11 + $0x7cc] ss:$16 sps:$4 sm:$0xff]  }
 0x378   :  { %7367 = vmatprep.subr.bf16.mxu1 %v12564_v15  ;;  %v14712_v15 = vld [vmem:[#allocation7 + $0x8] sm:$0xff] }
 0x379   :  { %7696 = vmatpush1.bf16.msra.mxu0 %v12547_v19  ;;  %v569_v19 = vrot.slane %v14712_v15, %v14618_v55 }
 0x37a   :  { %7697 = vmatprep.subr.bf16.mxu0 %v12555_v24  ;;  %v12616_v24 = vld [vmem:[#allocation11 + $0x7a0] ss:$16 sps:$4 sm:$0xff]  }
 0x37b   :  { %v14704_v34 = vpop.f32.mrb[4].mxu0  ;;  %7368 = vmatpush1.bf16.msra.mxu1 %v12562_v11  ;;  %v12624_v11 = vld [vmem:[#allocation11 + $0x7c4] ss:$16 sps:$4 sm:$0xff]  }
 0x37c   :  { %v14706_v49 = vpop.f32.mrb[5].mxu0  ;;  %7369 = vmatprep.subr.bf16.mxu1 %v12570_v31  ;;  %v12607_v31 = vld [vmem:[#allocation11 + $0x7c8] ss:$16 sps:$4 sm:$0xff]  }
 0x37d   :  { %v4123_v50 = vpop.f32.mrb[6].mxu0  ;;  %7698 = vmatpush1.bf16.msra.mxu0 %v12553_v33  ;;  %v14708_v52 = vpop.f32.mrb[16].mxu1  ;;  %v12615_v33 = vld [vmem:[#allocation11 + $0x7ec] ss:$16 sps:$4 sm:$0xff]  }
 0x37e   :  { %v4124_v53 = vpop.f32.mrb[7].mxu0  ;;  %7699 = vmatprep.subr.bf16.mxu0 %v12561_v6  ;;  %v14710_v20 = vpop.f32.mrb[17].mxu1  ;;  %v1070_v6 = vadd.f32 %v14666_v57, %v569_v19  ;;  %v12613_v50 = vld [vmem:[#allocation11 + $0x7e8] ss:$16 sps:$4 sm:$0xff]   ;;  %v12627_v57 = vld [vmem:[#allocation11 + $0x82c] ss:$16 sps:$4 sm:$0xff]  }
 0x37f   :  { %v4000_v13 = vpop.f32.mrb[18].mxu1  ;;  %7370 = vmatpush1.bf16.msra.mxu1 %v12568_v47  ;;  %v12622_v47 = vld [vmem:[#allocation11 + $0x7c0] ss:$16 sps:$4 sm:$0xff]   ;;  %v12621_v53 = vld [vmem:[#allocation11 + $0x80c] ss:$16 sps:$4 sm:$0xff]  }
 0x380   :  { %v4001_v58 = vpop.f32.mrb[19].mxu1  ;;  %7371 = vmatprep.subr.bf16.mxu1 %v12576_v10  ;;  %v12630_v10 = vld [vmem:[#allocation11 + $0x7e4] ss:$16 sps:$4 sm:$0xff]   ;;  %v12628_v13 = vld [vmem:[#allocation11 + $0x7e0] ss:$16 sps:$4 sm:$0xff]  }
 0x381   :  { %7700 = vmatpush1.bf16.msra.mxu0 %v12559_v44  ;;  %v1291_v44 = vmax.f32 %v14660_v23, 0.0  ;;  %v12619_v58 = vld [vmem:[#allocation11 + $0x808] ss:$16 sps:$4 sm:$0xff]  }
 0x382   :  { %7701 = vmatprep.subr.bf16.mxu0 %v12567_v54  ;;  %v1294_v54 = vmax.f32 %v1070_v6, 0.0  ;;  %v12625_v23 = vld [vmem:[#allocation11 + $0x828] ss:$16 sps:$4 sm:$0xff]   ;;  %v12675_v6 = vld [vmem:[#allocation11 + $0x92c] ss:$16 sps:$4 sm:$0xff]  }
 0x383   :  { %7372 = vmatpush1.bf16.msra.mxu1 %v12574_v39  ;;  %v12636_v39 = vld [vmem:[#allocation11 + $0x804] ss:$16 sps:$4 sm:$0xff]   ;;  %v12661_v19 = vld [vmem:[#allocation11 + $0x8e8] ss:$16 sps:$4 sm:$0xff]  }
 0x384   :  { %7373 = vmatprep.subr.bf16.mxu1 %v12582_v16  ;;  %v4132_v16 = vpack.c.bf16 %v1291_v44, %v1291_v44  ;;  %v12681_v44 = vld [vmem:[#allocation11 + $0x94c] ss:$16 sps:$4 sm:$0xff]  }
 0x385   :  { %7702 = vmatpush1.bf16.msra.mxu0 %v12565_v60  ;;  %v4135_v60 = vpack.c.bf16 %v1294_v54, %v1294_v54  ;;  %v12696_v54 = vld [vmem:[#allocation11 + $0x944] ss:$16 sps:$4 sm:$0xff]  }
 0x386   :  { %7703 = vmatprep.subr.bf16.mxu0 %v12573_v62  ;;  %v12634_v62 = vld [vmem:[#allocation11 + $0x800] ss:$16 sps:$4 sm:$0xff]  }
 0x387   :  { %7374 = vmatpush1.bf16.msra.mxu1 %v12580_v2  ;;  %v12642_v2 = vld [vmem:[#allocation11 + $0x824] ss:$16 sps:$4 sm:$0xff]  }
 0x388   :  { %7375 = vmatprep.subr.bf16.mxu1 %v12588_v4  ;;  %v12633_v4 = vld [vmem:[#allocation11 + $0x84c] ss:$16 sps:$4 sm:$0xff]  }
 0x389   :  { %7704 = vmatpush1.bf16.msra.mxu0 %v12571_v35  ;;  %v12640_v35 = vld [vmem:[#allocation11 + $0x820] ss:$16 sps:$4 sm:$0xff]  }
 0x38a   :  { %7705 = vmatprep.subr.bf16.mxu0 %v12579_v41  ;;  %v12648_v41 = vld [vmem:[#allocation11 + $0x844] ss:$16 sps:$4 sm:$0xff]  }
 0x38b   :  { %7376 = vmatpush1.bf16.msra.mxu1 %v12586_v42  ;;  %v12631_v42 = vld [vmem:[#allocation11 + $0x848] ss:$16 sps:$4 sm:$0xff]  }
 0x38c   :  { %7377 = vmatprep.subr.bf16.mxu1 %v12594_v38  ;;  %v12639_v38 = vld [vmem:[#allocation11 + $0x86c] ss:$16 sps:$4 sm:$0xff]  }
 0x38d   :  { %7706 = vmatpush1.bf16.msra.mxu0 %v12577_v1  ;;  %v12646_v1 = vld [vmem:[#allocation11 + $0x840] ss:$16 sps:$4 sm:$0xff]  }
 0x38e   :  { %7707 = vmatprep.subr.bf16.mxu0 %v12585_v22  ;;  %v12654_v22 = vld [vmem:[#allocation11 + $0x864] ss:$16 sps:$4 sm:$0xff]  }
 0x38f   :  { %7378 = vmatpush1.bf16.msra.mxu1 %v12592_v18  ;;  %v12637_v18 = vld [vmem:[#allocation11 + $0x868] ss:$16 sps:$4 sm:$0xff]  }
 0x390   :  { %7379 = vmatprep.subr.bf16.mxu1 %v12600_v46  ;;  %v12645_v46 = vld [vmem:[#allocation11 + $0x88c] ss:$16 sps:$4 sm:$0xff]  }
 0x391   :  { %7708 = vmatpush1.bf16.msra.mxu0 %v12583_v43  ;;  %v12652_v43 = vld [vmem:[#allocation11 + $0x860] ss:$16 sps:$4 sm:$0xff]  }
 0x392   :  { %7709 = vmatprep.subr.bf16.mxu0 %v12591_v17  ;;  %v12660_v17 = vld [vmem:[#allocation11 + $0x884] ss:$16 sps:$4 sm:$0xff]  }
 0x393   :  { %7380 = vmatpush1.bf16.msra.mxu1 %v12598_v21  ;;  %v12643_v21 = vld [vmem:[#allocation11 + $0x888] ss:$16 sps:$4 sm:$0xff]  }
 0x394   :  { %7381 = vmatprep.subr.bf16.mxu1 %v12606_v8  ;;  %v12651_v8 = vld [vmem:[#allocation11 + $0x8ac] ss:$16 sps:$4 sm:$0xff]  }
 0x395   :  { %7710 = vmatpush1.bf16.msra.mxu0 %v12589_v14  ;;  %v12658_v14 = vld [vmem:[#allocation11 + $0x880] ss:$16 sps:$4 sm:$0xff]  }
 0x396   :  { %7711 = vmatprep.subr.bf16.mxu0 %v12597_v61  ;;  %v12666_v61 = vld [vmem:[#allocation11 + $0x8a4] ss:$16 sps:$4 sm:$0xff]  }
 0x397   :  { %7382 = vmatpush1.bf16.msra.mxu1 %v12604_v27  ;;  %v12649_v27 = vld [vmem:[#allocation11 + $0x8a8] ss:$16 sps:$4 sm:$0xff]  }
 0x398   :  { %7383 = vmatprep.subr.bf16.mxu1 %v12612_v59  ;;  %v12657_v59 = vld [vmem:[#allocation11 + $0x8cc] ss:$16 sps:$4 sm:$0xff]  }
 0x399   :  { %7712 = vmatpush1.bf16.msra.mxu0 %v12595_v37  ;;  %v12664_v37 = vld [vmem:[#allocation11 + $0x8a0] ss:$16 sps:$4 sm:$0xff]  }
 0x39a   :  { %7713 = vmatprep.subr.bf16.mxu0 %v12603_v25  ;;  %v12672_v25 = vld [vmem:[#allocation11 + $0x8c4] ss:$16 sps:$4 sm:$0xff]  }
 0x39b   :  { %7384 = vmatpush1.bf16.msra.mxu1 %v12610_v29  ;;  %v12655_v29 = vld [vmem:[#allocation11 + $0x8c8] ss:$16 sps:$4 sm:$0xff]  }
 0x39c   :  { %7385 = vmatprep.subr.bf16.mxu1 %v12618_v28  ;;  %v12663_v28 = vld [vmem:[#allocation11 + $0x8ec] ss:$16 sps:$4 sm:$0xff]  }
 0x39d   :  { %7714 = vmatpush1.bf16.msra.mxu0 %v12601_v63  ;;  %v12670_v63 = vld [vmem:[#allocation11 + $0x8c0] ss:$16 sps:$4 sm:$0xff]  }
 0x39e   :  { %7715 = vmatprep.subr.bf16.mxu0 %v12609_v30  ;;  %v12678_v30 = vld [vmem:[#allocation11 + $0x8e4] ss:$16 sps:$4 sm:$0xff]  }
 0x39f   :  { %7386 = vmatpush1.bf16.msra.mxu1 %v12616_v24  ;;  %v12669_v24 = vld [vmem:[#allocation11 + $0x90c] ss:$16 sps:$4 sm:$0xff]  }
 0x3a0   :  { %7387 = vmatprep.subr.bf16.mxu1 %v12624_v11  ;;  %v12676_v11 = vld [vmem:[#allocation11 + $0x8e0] ss:$16 sps:$4 sm:$0xff]  }
 0x3a1   :  { %7716 = vmatpush1.bf16.msra.mxu0 %v12607_v31  ;;  %v12684_v31 = vld [vmem:[#allocation11 + $0x904] ss:$16 sps:$4 sm:$0xff]  }
 0x3a2   :  { %7717 = vmatprep.subr.bf16.mxu0 %v12615_v33  ;;  %v12667_v33 = vld [vmem:[#allocation11 + $0x908] ss:$16 sps:$4 sm:$0xff]  }
 0x3a3   :  { %7388 = vmatpush1.bf16.msra.mxu1 %v12622_v47  ;;  %v12682_v47 = vld [vmem:[#allocation11 + $0x900] ss:$16 sps:$4 sm:$0xff]  }
 0x3a4   :  { %7389 = vmatprep.subr.bf16.mxu1 %v12630_v10  ;;  %v12690_v10 = vld [vmem:[#allocation11 + $0x924] ss:$16 sps:$4 sm:$0xff]  }
 0x3a5   :  { %7718 = vmatpush1.bf16.msra.mxu0 %v12613_v50  ;;  %v12673_v50 = vld [vmem:[#allocation11 + $0x928] ss:$16 sps:$4 sm:$0xff]  }
 0x3a6   :  { %7728 = vmatprep.subr.bf16.mxu0 %v12621_v53  ;;  %v12688_v53 = vld [vmem:[#allocation11 + $0x920] ss:$16 sps:$4 sm:$0xff]  }
 0x3a7   :  { %7390 = vmatpush1.bf16.msra.mxu1 %v12628_v13  ;;  %v12679_v13 = vld [vmem:[#allocation11 + $0x948] ss:$16 sps:$4 sm:$0xff]  }
 0x3a8   :  { %7720 = vmatmul.mubr.bf16.vlgmr.msra.gmra.mrb[8].mxu0 %v4132_v16  ;;  %7400 = vmatprep.subr.bf16.mxu1 %v12636_v39  ;;  %v12687_v39 = vld [vmem:[#allocation11 + $0x96c] ss:$16 sps:$4 sm:$0xff]  }
 0x3a9   :  { %7729 = vmatpush1.bf16.msra.mxu0 %v12619_v58  ;;  %7760 = vmatprep.mubr.bf16.mxu0 %v4135_v60  ;;  %v12694_v58 = vld [vmem:[#allocation11 + $0x940] ss:$16 sps:$4 sm:$0xff]  }
 0x3aa   :  { %7730 = vmatprep.subr.bf16.mxu0 %v12627_v57  ;;  %7392 = vmatmul.mubr.bf16.vlgmr.msra.gmra.mrb[20].mxu1 %v4132_v16  ;;  %v12702_v16 = vld [vmem:[#allocation11 + $0x964] ss:$16 sps:$4 sm:$0xff]   ;;  %v12685_v57 = vld [vmem:[#allocation11 + $0x968] ss:$16 sps:$4 sm:$0xff]  }
 0x3ab   :  { %7401 = vmatpush1.bf16.msra.mxu1 %v12634_v62  ;;  %7432 = vmatprep.mubr.bf16.mxu1 %v4135_v60  ;;  %v12693_v60 = vld [vmem:[#allocation11 + $0x98c] ss:$16 sps:$4 sm:$0xff]   ;;  %v12700_v62 = vld [vmem:[#allocation11 + $0x960] ss:$16 sps:$4 sm:$0xff]  }
 0x3ac   :  { %7402 = vmatprep.subr.bf16.mxu1 %v12642_v2  ;;  %v12708_v2 = vld [vmem:[#allocation11 + $0x984] ss:$16 sps:$4 sm:$0xff]  }
 0x3ad   :  { %7731 = vmatpush1.bf16.msra.mxu0 %v12625_v23  ;;  %v12691_v23 = vld [vmem:[#allocation11 + $0x988] ss:$16 sps:$4 sm:$0xff]  }
 0x3ae   :  { %7732 = vmatprep.subr.bf16.mxu0 %v12633_v4  ;;  %v12699_v4 = vld [vmem:[#allocation11 + $0x9ac] ss:$16 sps:$4 sm:$0xff]  }
 0x3af   :  { %7403 = vmatpush1.bf16.msra.mxu1 %v12640_v35  ;;  %v12706_v35 = vld [vmem:[#allocation11 + $0x980] ss:$16 sps:$4 sm:$0xff]  }
 0x3b0   :  { %7404 = vmatprep.subr.bf16.mxu1 %v12648_v41  ;;  %v12714_v41 = vld [vmem:[#allocation11 + $0x9a4] ss:$16 sps:$4 sm:$0xff]  }
 0x3b1   :  { %7733 = vmatpush1.bf16.msra.mxu0 %v12631_v42  ;;  %v12697_v42 = vld [vmem:[#allocation11 + $0x9a8] ss:$16 sps:$4 sm:$0xff]  }
 0x3b2   :  { %7734 = vmatprep.subr.bf16.mxu0 %v12639_v38  ;;  %v565_v38 = vrot.slane %v14712_v15, %v14694_v26  ;;  %v12717_v15 = vld [vmem:[#allocation11 + $0xa0c] ss:$16 sps:$4 sm:$0xff]  }
 0x3b3   :  { %7405 = vmatpush1.bf16.msra.mxu1 %v12646_v1  ;;  %v12705_v1 = vld [vmem:[#allocation11 + $0x9cc] ss:$16 sps:$4 sm:$0xff]  }
 0x3b4   :  { %7406 = vmatprep.subr.bf16.mxu1 %v12654_v22  ;;  %v12712_v22 = vld [vmem:[#allocation11 + $0x9a0] ss:$16 sps:$4 sm:$0xff]  }
 0x3b5   :  { %7735 = vmatpush1.bf16.msra.mxu0 %v12637_v18  ;;  %v12720_v18 = vld [vmem:[#allocation11 + $0x9c4] ss:$16 sps:$4 sm:$0xff]  }
 0x3b6   :  { %7736 = vmatprep.subr.bf16.mxu0 %v12645_v46  ;;  %v12703_v46 = vld [vmem:[#allocation11 + $0x9c8] ss:$16 sps:$4 sm:$0xff]  }
 0x3b7   :  { %7407 = vmatpush1.bf16.msra.mxu1 %v12652_v43  ;;  %v1068_v43 = vadd.f32 %v14664_v32, %v565_v38  ;;  %v12772_v38 = vld [vmem:[#allocation11 + $0xae0] ss:$16 sps:$4 sm:$0xff]  }
 0x3b8   :  { %7408 = vmatprep.subr.bf16.mxu1 %v12660_v17  ;;  %v12711_v17 = vld [vmem:[#allocation11 + $0x9ec] ss:$16 sps:$4 sm:$0xff]  }
 0x3b9   :  { %7737 = vmatpush1.bf16.msra.mxu0 %v12643_v21  ;;  %v12718_v21 = vld [vmem:[#allocation11 + $0x9c0] ss:$16 sps:$4 sm:$0xff]  }
 0x3ba   :  { %7738 = vmatprep.subr.bf16.mxu0 %v12651_v8  ;;  %v12726_v8 = vld [vmem:[#allocation11 + $0x9e4] ss:$16 sps:$4 sm:$0xff]  }
 0x3bb   :  { %7409 = vmatpush1.bf16.msra.mxu1 %v12658_v14  ;;  %v12709_v14 = vld [vmem:[#allocation11 + $0x9e8] ss:$16 sps:$4 sm:$0xff]  }
 0x3bc   :  { %7410 = vmatprep.subr.bf16.mxu1 %v12666_v61  ;;  %v1293_v61 = vmax.f32 %v1068_v43, 0.0  ;;  %v12786_v43 = vld [vmem:[#allocation11 + $0xb24] ss:$16 sps:$4 sm:$0xff]  }
 0x3bd   :  { %7739 = vmatpush1.bf16.msra.mxu0 %v12649_v27  ;;  %v1296_v27 = vmax.f32 %v14676_v40, 0.0  ;;  %v12729_v40 = vld [vmem:[#allocation11 + $0xa4c] ss:$16 sps:$4 sm:$0xff]  }
 0x3be   :  { %7740 = vmatprep.subr.bf16.mxu0 %v12657_v59  ;;  %v12724_v59 = vld [vmem:[#allocation11 + $0x9e0] ss:$16 sps:$4 sm:$0xff]   ;;  %v4134_v32 = vpack.c.bf16 %v1293_v61, %v1293_v61  ;;  %v12775_v61 = vld [vmem:[#allocation11 + $0xb48] ss:$16 sps:$4 sm:$0xff]  }
 0x3bf   :  { %7411 = vmatpush1.bf16.msra.mxu1 %v12664_v37  ;;  %v12732_v37 = vld [vmem:[#allocation11 + $0xa04] ss:$16 sps:$4 sm:$0xff]  }
 0x3c0   :  { %7412 = vmatprep.subr.bf16.mxu1 %v12672_v25  ;;  %v12715_v25 = vld [vmem:[#allocation11 + $0xa08] ss:$16 sps:$4 sm:$0xff]  }
 0x3c1   :  { %7741 = vmatpush1.bf16.msra.mxu0 %v12655_v29  ;;  %v12723_v29 = vld [vmem:[#allocation11 + $0xa2c] ss:$16 sps:$4 sm:$0xff]  }
 0x3c2   :  { %7742 = vmatprep.subr.bf16.mxu0 %v12663_v28  ;;  %v4137_v28 = vpack.c.bf16 %v1296_v27, %v1296_v27  ;;  %v12790_v27 = vld [vmem:[#allocation11 + $0xb40] ss:$16 sps:$4 sm:$0xff]  }
 0x3c3   :  { %7413 = vmatpush1.bf16.msra.mxu1 %v12670_v63  ;;  %v12730_v63 = vld [vmem:[#allocation11 + $0xa00] ss:$16 sps:$4 sm:$0xff]  }
 0x3c4   :  { %7414 = vmatprep.subr.bf16.mxu1 %v12678_v30  ;;  %v12738_v30 = vld [vmem:[#allocation11 + $0xa24] ss:$16 sps:$4 sm:$0xff]  }
 0x3c5   :  { %7743 = vmatpush1.bf16.msra.mxu0 %v12661_v19  ;;  %v12721_v19 = vld [vmem:[#allocation11 + $0xa28] ss:$16 sps:$4 sm:$0xff]  }
 0x3c6   :  { %7744 = vmatprep.subr.bf16.mxu0 %v12669_v24  ;;  %v12736_v24 = vld [vmem:[#allocation11 + $0xa20] ss:$16 sps:$4 sm:$0xff]  }
 0x3c7   :  { %7415 = vmatpush1.bf16.msra.mxu1 %v12676_v11  ;;  %v12744_v11 = vld [vmem:[#allocation11 + $0xa44] ss:$16 sps:$4 sm:$0xff]  }
 0x3c8   :  { %7416 = vmatprep.subr.bf16.mxu1 %v12684_v31  ;;  %v12727_v31 = vld [vmem:[#allocation11 + $0xa48] ss:$16 sps:$4 sm:$0xff]  }
 0x3c9   :  { %7745 = vmatpush1.bf16.msra.mxu0 %v12667_v33  ;;  %v12735_v33 = vld [vmem:[#allocation11 + $0xa6c] ss:$16 sps:$4 sm:$0xff]  }
 0x3ca   :  { %7746 = vmatprep.subr.bf16.mxu0 %v12675_v6  ;;  %v12742_v6 = vld [vmem:[#allocation11 + $0xa40] ss:$16 sps:$4 sm:$0xff]  }
 0x3cb   :  { %7417 = vmatpush1.bf16.msra.mxu1 %v12682_v47  ;;  %v12750_v47 = vld [vmem:[#allocation11 + $0xa64] ss:$16 sps:$4 sm:$0xff]  }
 0x3cc   :  { %7418 = vmatprep.subr.bf16.mxu1 %v12690_v10  ;;  %v12733_v10 = vld [vmem:[#allocation11 + $0xa68] ss:$16 sps:$4 sm:$0xff]  }
 0x3cd   :  { %7747 = vmatpush1.bf16.msra.mxu0 %v12673_v50  ;;  %v12741_v50 = vld [vmem:[#allocation11 + $0xa8c] ss:$16 sps:$4 sm:$0xff]  }
 0x3ce   :  { %7748 = vmatprep.subr.bf16.mxu0 %v12681_v44  ;;  %v12748_v44 = vld [vmem:[#allocation11 + $0xa60] ss:$16 sps:$4 sm:$0xff]  }
 0x3cf   :  { %7419 = vmatpush1.bf16.msra.mxu1 %v12688_v53  ;;  %v12756_v53 = vld [vmem:[#allocation11 + $0xa84] ss:$16 sps:$4 sm:$0xff]  }
 0x3d0   :  { %7420 = vmatprep.subr.bf16.mxu1 %v12696_v54  ;;  %v12739_v54 = vld [vmem:[#allocation11 + $0xa88] ss:$16 sps:$4 sm:$0xff]  }
 0x3d1   :  { %7749 = vmatpush1.bf16.msra.mxu0 %v12679_v13  ;;  %v12747_v13 = vld [vmem:[#allocation11 + $0xaac] ss:$16 sps:$4 sm:$0xff]  }
 0x3d2   :  { %7750 = vmatprep.subr.bf16.mxu0 %v12687_v39  ;;  %v12754_v39 = vld [vmem:[#allocation11 + $0xa80] ss:$16 sps:$4 sm:$0xff]  }
 0x3d3   :  { %7421 = vmatpush1.bf16.msra.mxu1 %v12694_v58  ;;  %v12762_v58 = vld [vmem:[#allocation11 + $0xaa4] ss:$16 sps:$4 sm:$0xff]  }
 0x3d4   :  { %7422 = vmatprep.subr.bf16.mxu1 %v12702_v16  ;;  %v12745_v16 = vld [vmem:[#allocation11 + $0xaa8] ss:$16 sps:$4 sm:$0xff]  }
 0x3d5   :  { %7751 = vmatpush1.bf16.msra.mxu0 %v12685_v57  ;;  %v12753_v57 = vld [vmem:[#allocation11 + $0xacc] ss:$16 sps:$4 sm:$0xff]  }
 0x3d6   :  { %7752 = vmatprep.subr.bf16.mxu0 %v12693_v60  ;;  %v12760_v60 = vld [vmem:[#allocation11 + $0xaa0] ss:$16 sps:$4 sm:$0xff]  }
 0x3d7   :  { %7423 = vmatpush1.bf16.msra.mxu1 %v12700_v62  ;;  %v12768_v62 = vld [vmem:[#allocation11 + $0xac4] ss:$16 sps:$4 sm:$0xff]  }
 0x3d8   :  { %7424 = vmatprep.subr.bf16.mxu1 %v12708_v2  ;;  %v12751_v2 = vld [vmem:[#allocation11 + $0xac8] ss:$16 sps:$4 sm:$0xff]  }
 0x3d9   :  { %7753 = vmatpush1.bf16.msra.mxu0 %v12691_v23  ;;  %v12759_v23 = vld [vmem:[#allocation11 + $0xaec] ss:$16 sps:$4 sm:$0xff]  }
 0x3da   :  { %7754 = vmatprep.subr.bf16.mxu0 %v12699_v4  ;;  %v12766_v4 = vld [vmem:[#allocation11 + $0xac0] ss:$16 sps:$4 sm:$0xff]  }
 0x3db   :  { %7425 = vmatpush1.bf16.msra.mxu1 %v12706_v35  ;;  %v12774_v35 = vld [vmem:[#allocation11 + $0xae4] ss:$16 sps:$4 sm:$0xff]  }
 0x3dc   :  { %7426 = vmatprep.subr.bf16.mxu1 %v12714_v41  ;;  %v12757_v41 = vld [vmem:[#allocation11 + $0xae8] ss:$16 sps:$4 sm:$0xff]  }
 0x3dd   :  { %7755 = vmatpush1.bf16.msra.mxu0 %v12697_v42  ;;  %v12765_v42 = vld [vmem:[#allocation11 + $0xb0c] ss:$16 sps:$4 sm:$0xff]  }
 0x3de   :  { %7756 = vmatprep.subr.bf16.mxu0 %v12705_v1  ;;  %v12780_v1 = vld [vmem:[#allocation11 + $0xb04] ss:$16 sps:$4 sm:$0xff]  }
 0x3df   :  { %7427 = vmatpush1.bf16.msra.mxu1 %v12712_v22  ;;  %v12763_v22 = vld [vmem:[#allocation11 + $0xb08] ss:$16 sps:$4 sm:$0xff]  }
 0x3e0   :  { %7428 = vmatprep.subr.bf16.mxu1 %v12720_v18  ;;  %v12771_v18 = vld [vmem:[#allocation11 + $0xb2c] ss:$16 sps:$4 sm:$0xff]  }
 0x3e1   :  { %7757 = vmatpush1.bf16.msra.mxu0 %v12703_v46  ;;  %v12778_v46 = vld [vmem:[#allocation11 + $0xb00] ss:$16 sps:$4 sm:$0xff]  }
 0x3e2   :  { %7758 = vmatprep.subr.bf16.mxu0 %v12711_v17  ;;  %v12769_v17 = vld [vmem:[#allocation11 + $0xb28] ss:$16 sps:$4 sm:$0xff]  }
 0x3e3   :  { %7429 = vmatpush1.bf16.msra.mxu1 %v12718_v21  ;;  %v12777_v21 = vld [vmem:[#allocation11 + $0xb4c] ss:$16 sps:$4 sm:$0xff]  }
 0x3e4   :  { %7430 = vmatprep.subr.bf16.mxu1 %v12726_v8  ;;  %v12784_v8 = vld [vmem:[#allocation11 + $0xb20] ss:$16 sps:$4 sm:$0xff]  }
 0x3e5   :  { %7759 = vmatpush1.bf16.msra.mxu0 %v12709_v14  ;;  %v12792_v14 = vld [vmem:[#allocation11 + $0xb44] ss:$16 sps:$4 sm:$0xff]  }
 0x3e6   :  { %7769 = vmatprep.subr.bf16.mxu0 %v12717_v15  ;;  %v12783_v15 = vld [vmem:[#allocation11 + $0xb6c] ss:$16 sps:$4 sm:$0xff]  }
 0x3e7   :  { %7431 = vmatpush1.bf16.msra.mxu1 %v12724_v59  ;;  %v12798_v59 = vld [vmem:[#allocation11 + $0xb64] ss:$16 sps:$4 sm:$0xff]  }
 0x3e8   :  { %7761 = vmatmul.mubr.bf16.vlgmr.msra.gmra.mrb[8].mxu0 %v4134_v32  ;;  %7441 = vmatprep.subr.bf16.mxu1 %v12732_v37  ;;  %v12781_v37 = vld [vmem:[#allocation11 + $0xb68] ss:$16 sps:$4 sm:$0xff]  }
 0x3e9   :  { %7770 = vmatpush1.bf16.msra.mxu0 %v12715_v25  ;;  %7801 = vmatprep.mubr.bf16.mxu0 %v4137_v28  ;;  %v12789_v25 = vld [vmem:[#allocation11 + $0xb8c] ss:$16 sps:$4 sm:$0xff]  }
 0x3ea   :  { %7771 = vmatprep.subr.bf16.mxu0 %v12723_v29  ;;  %7433 = vmatmul.mubr.bf16.vlgmr.msra.gmra.mrb[20].mxu1 %v4134_v32  ;;  %v12796_v32 = vld [vmem:[#allocation11 + $0xb60] ss:$16 sps:$4 sm:$0xff]   ;;  %v12804_v29 = vld [vmem:[#allocation11 + $0xb84] ss:$16 sps:$4 sm:$0xff]  }
 0x3eb   :  { %7442 = vmatpush1.bf16.msra.mxu1 %v12730_v63  ;;  %7473 = vmatprep.mubr.bf16.mxu1 %v4137_v28  ;;  %v12787_v28 = vld [vmem:[#allocation11 + $0xb88] ss:$16 sps:$4 sm:$0xff]   ;;  %v12795_v63 = vld [vmem:[#allocation11 + $0xbac] ss:$16 sps:$4 sm:$0xff]  }
 0x3ec   :  { %7443 = vmatprep.subr.bf16.mxu1 %v12738_v30  ;;  %v12802_v30 = vld [vmem:[#allocation11 + $0xb80] ss:$16 sps:$4 sm:$0xff]  }
 0x3ed   :  { %7772 = vmatpush1.bf16.msra.mxu0 %v12721_v19  ;;  %v12810_v19 = vld [vmem:[#allocation11 + $0xba4] ss:$16 sps:$4 sm:$0xff]  }
 0x3ee   :  { %7773 = vmatprep.subr.bf16.mxu0 %v12729_v40  ;;  %v12793_v40 = vld [vmem:[#allocation11 + $0xba8] ss:$16 sps:$4 sm:$0xff]  }
 0x3ef   :  { %7444 = vmatpush1.bf16.msra.mxu1 %v12736_v24  ;;  %v12801_v24 = vld [vmem:[#allocation11 + $0xbcc] ss:$16 sps:$4 sm:$0xff]  }
 0x3f0   :  { %7445 = vmatprep.subr.bf16.mxu1 %v12744_v11  ;;  %v12808_v11 = vld [vmem:[#allocation11 + $0xba0] ss:$16 sps:$4 sm:$0xff]  }
 0x3f1   :  { %7774 = vmatpush1.bf16.msra.mxu0 %v12727_v31  ;;  %v12816_v31 = vld [vmem:[#allocation11 + $0xbc4] ss:$16 sps:$4 sm:$0xff]  }
 0x3f2   :  { %7775 = vmatprep.subr.bf16.mxu0 %v12735_v33  ;;  %v12799_v33 = vld [vmem:[#allocation11 + $0xbc8] ss:$16 sps:$4 sm:$0xff]  }
 0x3f3   :  { %7446 = vmatpush1.bf16.msra.mxu1 %v12742_v6  ;;  %v12807_v6 = vld [vmem:[#allocation11 + $0xbec] ss:$16 sps:$4 sm:$0xff]  }
 0x3f4   :  { %7447 = vmatprep.subr.bf16.mxu1 %v12750_v47  ;;  %v12814_v47 = vld [vmem:[#allocation11 + $0xbc0] ss:$16 sps:$4 sm:$0xff]  }
 0x3f5   :  { %7776 = vmatpush1.bf16.msra.mxu0 %v12733_v10  ;;  %v12822_v10 = vld [vmem:[#allocation11 + $0xbe4] ss:$16 sps:$4 sm:$0xff]  }
 0x3f6   :  { %7777 = vmatprep.subr.bf16.mxu0 %v12741_v50  ;;  %v12805_v50 = vld [vmem:[#allocation11 + $0xbe8] ss:$16 sps:$4 sm:$0xff]  }
 0x3f7   :  { %7448 = vmatpush1.bf16.msra.mxu1 %v12748_v44  ;;  %v1295_v44 = vmax.f32 %v14672_v12, 0.0  ;;  %v12817_v12 = vld [vmem:[#allocation11 + $0xc28] ss:$16 sps:$4 sm:$0xff]  }
 0x3f8   :  { %7449 = vmatprep.subr.bf16.mxu1 %v12756_v53  ;;  %v12813_v53 = vld [vmem:[#allocation11 + $0xc0c] ss:$16 sps:$4 sm:$0xff]  }
 0x3f9   :  { %7778 = vmatpush1.bf16.msra.mxu0 %v12739_v54  ;;  %v1298_v54 = vmax.f32 %v14683_v0, 0.0  ;;  %v12825_v0 = vld [vmem:[#allocation11 + $0xc4c] ss:$16 sps:$4 sm:$0xff]  }
 0x3fa   :  { %7779 = vmatprep.subr.bf16.mxu0 %v12747_v13  ;;  %v12820_v13 = vld [vmem:[#allocation11 + $0xbe0] ss:$16 sps:$4 sm:$0xff]  }
 0x3fb   :  { %7450 = vmatpush1.bf16.msra.mxu1 %v12754_v39  ;;  %v12828_v39 = vld [vmem:[#allocation11 + $0xc04] ss:$16 sps:$4 sm:$0xff]  }
 0x3fc   :  { %7451 = vmatprep.subr.bf16.mxu1 %v12762_v58  ;;  %v12811_v58 = vld [vmem:[#allocation11 + $0xc08] ss:$16 sps:$4 sm:$0xff]  }
 0x3fd   :  { %7780 = vmatpush1.bf16.msra.mxu0 %v12745_v16  ;;  %v4136_v16 = vpack.c.bf16 %v1295_v44, %v1295_v44  ;;  %v12886_v44 = vld [vmem:[#allocation11 + $0xd40] ss:$16 sps:$4 sm:$0xff]  }
 0x3fe   :  { %7781 = vmatprep.subr.bf16.mxu0 %v12753_v57  ;;  %v12819_v57 = vld [vmem:[#allocation11 + $0xc2c] ss:$16 sps:$4 sm:$0xff]  }
 0x3ff   :  { %7452 = vmatpush1.bf16.msra.mxu1 %v12760_v60  ;;  %v4139_v60 = vpack.c.bf16 %v1298_v54, %v1298_v54  ;;  %v12877_v54 = vld [vmem:[#allocation11 + $0xd68] ss:$16 sps:$4 sm:$0xff]  }
 0x400   :  { %7453 = vmatprep.subr.bf16.mxu1 %v12768_v62  ;;  %v12826_v62 = vld [vmem:[#allocation11 + $0xc00] ss:$16 sps:$4 sm:$0xff]  }
 0x401   :  { %7782 = vmatpush1.bf16.msra.mxu0 %v12751_v2  ;;  %v12834_v2 = vld [vmem:[#allocation11 + $0xc24] ss:$16 sps:$4 sm:$0xff]  }
 0x402   :  { %7783 = vmatprep.subr.bf16.mxu0 %v12759_v23  ;;  %v12832_v23 = vld [vmem:[#allocation11 + $0xc20] ss:$16 sps:$4 sm:$0xff]  }
 0x403   :  { %7454 = vmatpush1.bf16.msra.mxu1 %v12766_v4  ;;  %v12840_v4 = vld [vmem:[#allocation11 + $0xc44] ss:$16 sps:$4 sm:$0xff]  }
 0x404   :  { %7455 = vmatprep.subr.bf16.mxu1 %v12774_v35  ;;  %v12823_v35 = vld [vmem:[#allocation11 + $0xc48] ss:$16 sps:$4 sm:$0xff]  }
 0x405   :  { %7784 = vmatpush1.bf16.msra.mxu0 %v12757_v41  ;;  %v12831_v41 = vld [vmem:[#allocation11 + $0xc6c] ss:$16 sps:$4 sm:$0xff]  }
 0x406   :  { %7785 = vmatprep.subr.bf16.mxu0 %v12765_v42  ;;  %v12838_v42 = vld [vmem:[#allocation11 + $0xc40] ss:$16 sps:$4 sm:$0xff]  }
 0x407   :  { %7456 = vmatpush1.bf16.msra.mxu1 %v12772_v38  ;;  %v12846_v38 = vld [vmem:[#allocation11 + $0xc64] ss:$16 sps:$4 sm:$0xff]  }
 0x408   :  { %7457 = vmatprep.subr.bf16.mxu1 %v12780_v1  ;;  %v12829_v1 = vld [vmem:[#allocation11 + $0xc68] ss:$16 sps:$4 sm:$0xff]  }
 0x409   :  { %7786 = vmatpush1.bf16.msra.mxu0 %v12763_v22  ;;  %v12837_v22 = vld [vmem:[#allocation11 + $0xc8c] ss:$16 sps:$4 sm:$0xff]  }
 0x40a   :  { %7787 = vmatprep.subr.bf16.mxu0 %v12771_v18  ;;  %v12844_v18 = vld [vmem:[#allocation11 + $0xc60] ss:$16 sps:$4 sm:$0xff]  }
 0x40b   :  { %7458 = vmatpush1.bf16.msra.mxu1 %v12778_v46  ;;  %v12852_v46 = vld [vmem:[#allocation11 + $0xc84] ss:$16 sps:$4 sm:$0xff]  }
 0x40c   :  { %7459 = vmatprep.subr.bf16.mxu1 %v12786_v43  ;;  %v12835_v43 = vld [vmem:[#allocation11 + $0xc88] ss:$16 sps:$4 sm:$0xff]  }
 0x40d   :  { %7788 = vmatpush1.bf16.msra.mxu0 %v12769_v17  ;;  %v12843_v17 = vld [vmem:[#allocation11 + $0xcac] ss:$16 sps:$4 sm:$0xff]  }
 0x40e   :  { %7789 = vmatprep.subr.bf16.mxu0 %v12777_v21  ;;  %v12850_v21 = vld [vmem:[#allocation11 + $0xc80] ss:$16 sps:$4 sm:$0xff]  }
 0x40f   :  { %7460 = vmatpush1.bf16.msra.mxu1 %v12784_v8  ;;  %v12858_v8 = vld [vmem:[#allocation11 + $0xca4] ss:$16 sps:$4 sm:$0xff]  }
 0x410   :  { %7461 = vmatprep.subr.bf16.mxu1 %v12792_v14  ;;  %v12841_v14 = vld [vmem:[#allocation11 + $0xca8] ss:$16 sps:$4 sm:$0xff]  }
 0x411   :  { %7790 = vmatpush1.bf16.msra.mxu0 %v12775_v61  ;;  %v12849_v61 = vld [vmem:[#allocation11 + $0xccc] ss:$16 sps:$4 sm:$0xff]  }
 0x412   :  { %7791 = vmatprep.subr.bf16.mxu0 %v12783_v15  ;;  %v12856_v15 = vld [vmem:[#allocation11 + $0xca0] ss:$16 sps:$4 sm:$0xff]  }
 0x413   :  { %7462 = vmatpush1.bf16.msra.mxu1 %v12790_v27  ;;  %v12864_v27 = vld [vmem:[#allocation11 + $0xcc4] ss:$16 sps:$4 sm:$0xff]  }
 0x414   :  { %7463 = vmatprep.subr.bf16.mxu1 %v12798_v59  ;;  %v12847_v59 = vld [vmem:[#allocation11 + $0xcc8] ss:$16 sps:$4 sm:$0xff]  }
 0x415   :  { %7792 = vmatpush1.bf16.msra.mxu0 %v12781_v37  ;;  %v12855_v37 = vld [vmem:[#allocation11 + $0xcec] ss:$16 sps:$4 sm:$0xff]  }
 0x416   :  { %7793 = vmatprep.subr.bf16.mxu0 %v12789_v25  ;;  %v12862_v25 = vld [vmem:[#allocation11 + $0xcc0] ss:$16 sps:$4 sm:$0xff]  }
 0x417   :  { %7464 = vmatpush1.bf16.msra.mxu1 %v12796_v32  ;;  %v12870_v32 = vld [vmem:[#allocation11 + $0xce4] ss:$16 sps:$4 sm:$0xff]  }
 0x418   :  { %7465 = vmatprep.subr.bf16.mxu1 %v12804_v29  ;;  %v12853_v29 = vld [vmem:[#allocation11 + $0xce8] ss:$16 sps:$4 sm:$0xff]  }
 0x419   :  { %7794 = vmatpush1.bf16.msra.mxu0 %v12787_v28  ;;  %v12861_v28 = vld [vmem:[#allocation11 + $0xd0c] ss:$16 sps:$4 sm:$0xff]  }
 0x41a   :  { %7795 = vmatprep.subr.bf16.mxu0 %v12795_v63  ;;  %v12868_v63 = vld [vmem:[#allocation11 + $0xce0] ss:$16 sps:$4 sm:$0xff]  }
 0x41b   :  { %7466 = vmatpush1.bf16.msra.mxu1 %v12802_v30  ;;  %v12876_v30 = vld [vmem:[#allocation11 + $0xd04] ss:$16 sps:$4 sm:$0xff]  }
 0x41c   :  { %7467 = vmatprep.subr.bf16.mxu1 %v12810_v19  ;;  %v12859_v19 = vld [vmem:[#allocation11 + $0xd08] ss:$16 sps:$4 sm:$0xff]  }
 0x41d   :  { %7796 = vmatpush1.bf16.msra.mxu0 %v12793_v40  ;;  %v12867_v40 = vld [vmem:[#allocation11 + $0xd2c] ss:$16 sps:$4 sm:$0xff]  }
 0x41e   :  { %7797 = vmatprep.subr.bf16.mxu0 %v12801_v24  ;;  %v12874_v24 = vld [vmem:[#allocation11 + $0xd00] ss:$16 sps:$4 sm:$0xff]  }
 0x41f   :  { %7468 = vmatpush1.bf16.msra.mxu1 %v12808_v11  ;;  %v12882_v11 = vld [vmem:[#allocation11 + $0xd24] ss:$16 sps:$4 sm:$0xff]  }
 0x420   :  { %7469 = vmatprep.subr.bf16.mxu1 %v12816_v31  ;;  %v12865_v31 = vld [vmem:[#allocation11 + $0xd28] ss:$16 sps:$4 sm:$0xff]  }
 0x421   :  { %7798 = vmatpush1.bf16.msra.mxu0 %v12799_v33  ;;  %v12873_v33 = vld [vmem:[#allocation11 + $0xd4c] ss:$16 sps:$4 sm:$0xff]  }
 0x422   :  { %7799 = vmatprep.subr.bf16.mxu0 %v12807_v6  ;;  %v12880_v6 = vld [vmem:[#allocation11 + $0xd20] ss:$16 sps:$4 sm:$0xff]  }
 0x423   :  { %7470 = vmatpush1.bf16.msra.mxu1 %v12814_v47  ;;  %v12888_v47 = vld [vmem:[#allocation11 + $0xd44] ss:$16 sps:$4 sm:$0xff]  }
 0x424   :  { %7471 = vmatprep.subr.bf16.mxu1 %v12822_v10  ;;  %v12871_v10 = vld [vmem:[#allocation11 + $0xd48] ss:$16 sps:$4 sm:$0xff]  }
 0x425   :  { %7800 = vmatpush1.bf16.msra.mxu0 %v12805_v50  ;;  %v12879_v50 = vld [vmem:[#allocation11 + $0xd6c] ss:$16 sps:$4 sm:$0xff]  }
 0x426   :  { %7810 = vmatprep.subr.bf16.mxu0 %v12813_v53  ;;  %v12894_v53 = vld [vmem:[#allocation11 + $0xd64] ss:$16 sps:$4 sm:$0xff]  }
 0x427   :  { %7472 = vmatpush1.bf16.msra.mxu1 %v12820_v13  ;;  %v12885_v13 = vld [vmem:[#allocation11 + $0xd8c] ss:$16 sps:$4 sm:$0xff]  }
 0x428   :  { %7802 = vmatmul.mubr.bf16.vlgmr.msra.gmra.mrb[8].mxu0 %v4136_v16  ;;  %7482 = vmatprep.subr.bf16.mxu1 %v12828_v39  ;;  %v12892_v39 = vld [vmem:[#allocation11 + $0xd60] ss:$16 sps:$4 sm:$0xff]  }
 0x429   :  { %7811 = vmatpush1.bf16.msra.mxu0 %v12811_v58  ;;  %7842 = vmatprep.mubr.bf16.mxu0 %v4139_v60  ;;  %v12900_v58 = vld [vmem:[#allocation11 + $0xd84] ss:$16 sps:$4 sm:$0xff]  }
 0x42a   :  { %7812 = vmatprep.subr.bf16.mxu0 %v12819_v57  ;;  %7474 = vmatmul.mubr.bf16.vlgmr.msra.gmra.mrb[20].mxu1 %v4136_v16  ;;  %v12883_v16 = vld [vmem:[#allocation11 + $0xd88] ss:$16 sps:$4 sm:$0xff]   ;;  %v12891_v57 = vld [vmem:[#allocation11 + $0xdac] ss:$16 sps:$4 sm:$0xff]  }
 0x42b   :  { %7483 = vmatpush1.bf16.msra.mxu1 %v12826_v62  ;;  %7514 = vmatprep.mubr.bf16.mxu1 %v4139_v60  ;;  %v12898_v60 = vld [vmem:[#allocation11 + $0xd80] ss:$16 sps:$4 sm:$0xff]   ;;  %v12906_v62 = vld [vmem:[#allocation11 + $0xda4] ss:$16 sps:$4 sm:$0xff]  }
 0x42c   :  { %7484 = vmatprep.subr.bf16.mxu1 %v12834_v2  ;;  %v12889_v2 = vld [vmem:[#allocation11 + $0xda8] ss:$16 sps:$4 sm:$0xff]  }
 0x42d   :  { %7813 = vmatpush1.bf16.msra.mxu0 %v12817_v12  ;;  %v12897_v12 = vld [vmem:[#allocation11 + $0xdcc] ss:$16 sps:$4 sm:$0xff]  }
 0x42e   :  { %7814 = vmatprep.subr.bf16.mxu0 %v12825_v0  ;;  %v12904_v0 = vld [vmem:[#allocation11 + $0xda0] ss:$16 sps:$4 sm:$0xff]  }
 0x42f   :  { %7485 = vmatpush1.bf16.msra.mxu1 %v12832_v23  ;;  %v12912_v23 = vld [vmem:[#allocation11 + $0xdc4] ss:$16 sps:$4 sm:$0xff]  }
 0x430   :  { %7486 = vmatprep.subr.bf16.mxu1 %v12840_v4  ;;  %v12895_v4 = vld [vmem:[#allocation11 + $0xdc8] ss:$16 sps:$4 sm:$0xff]  }
 0x431   :  { %7815 = vmatpush1.bf16.msra.mxu0 %v12823_v35  ;;  %v12903_v35 = vld [vmem:[#allocation11 + $0xdec] ss:$16 sps:$4 sm:$0xff]  }
 0x432   :  { %7816 = vmatprep.subr.bf16.mxu0 %v12831_v41  ;;  %v12910_v41 = vld [vmem:[#allocation11 + $0xdc0] ss:$16 sps:$4 sm:$0xff]  }
 0x433   :  { %7487 = vmatpush1.bf16.msra.mxu1 %v12838_v42  ;;  %v12918_v42 = vld [vmem:[#allocation11 + $0xde4] ss:$16 sps:$4 sm:$0xff]  }
 0x434   :  { %7488 = vmatprep.subr.bf16.mxu1 %v12846_v38  ;;  %v12901_v38 = vld [vmem:[#allocation11 + $0xde8] ss:$16 sps:$4 sm:$0xff]  }
 0x435   :  { %7817 = vmatpush1.bf16.msra.mxu0 %v12829_v1  ;;  %v1297_v1 = vmax.f32 %v14679_v51, 0.0  ;;  %v12913_v51 = vld [vmem:[#allocation11 + $0xe28] ss:$16 sps:$4 sm:$0xff]  }
 0x436   :  { %7818 = vmatprep.subr.bf16.mxu0 %v12837_v22  ;;  %v12909_v22 = vld [vmem:[#allocation11 + $0xe0c] ss:$16 sps:$4 sm:$0xff]  }
 0x437   :  { %7489 = vmatpush1.bf16.msra.mxu1 %v12844_v18  ;;  %v1300_v18 = vmax.f32 %v14691_v9, 0.0  ;;  %v12921_v9 = vld [vmem:[#allocation11 + $0xe4c] ss:$16 sps:$4 sm:$0xff]  }
 0x438   :  { %7490 = vmatprep.subr.bf16.mxu1 %v12852_v46  ;;  %v12916_v46 = vld [vmem:[#allocation11 + $0xde0] ss:$16 sps:$4 sm:$0xff]  }
 0x439   :  { %7819 = vmatpush1.bf16.msra.mxu0 %v12835_v43  ;;  %v12924_v43 = vld [vmem:[#allocation11 + $0xe04] ss:$16 sps:$4 sm:$0xff]  }
 0x43a   :  { %7820 = vmatprep.subr.bf16.mxu0 %v12843_v17  ;;  %v12907_v17 = vld [vmem:[#allocation11 + $0xe08] ss:$16 sps:$4 sm:$0xff]  }
 0x43b   :  { %7491 = vmatpush1.bf16.msra.mxu1 %v12850_v21  ;;  %v4138_v21 = vpack.c.bf16 %v1297_v1, %v1297_v1  ;;  %v12973_v1 = vld [vmem:[#allocation11 + $0xf68] ss:$16 sps:$4 sm:$0xff]  }
 0x43c   :  { %7492 = vmatprep.subr.bf16.mxu1 %v12858_v8  ;;  %v12915_v8 = vld [vmem:[#allocation11 + $0xe2c] ss:$16 sps:$4 sm:$0xff]  }
 0x43d   :  { %7821 = vmatpush1.bf16.msra.mxu0 %v12841_v14  ;;  %v4141_v14 = vpack.c.bf16 %v1300_v18, %v1300_v18  ;;  %v12988_v18 = vld [vmem:[#allocation11 + $0xf60] ss:$16 sps:$4 sm:$0xff]  }
 0x43e   :  { %7822 = vmatprep.subr.bf16.mxu0 %v12849_v61  ;;  %v12922_v61 = vld [vmem:[#allocation11 + $0xe00] ss:$16 sps:$4 sm:$0xff]  }
 0x43f   :  { %7493 = vmatpush1.bf16.msra.mxu1 %v12856_v15  ;;  %v12930_v15 = vld [vmem:[#allocation11 + $0xe24] ss:$16 sps:$4 sm:$0xff]  }
 0x440   :  { %7494 = vmatprep.subr.bf16.mxu1 %v12864_v27  ;;  %v12928_v27 = vld [vmem:[#allocation11 + $0xe20] ss:$16 sps:$4 sm:$0xff]  }
 0x441   :  { %7823 = vmatpush1.bf16.msra.mxu0 %v12847_v59  ;;  %v12936_v59 = vld [vmem:[#allocation11 + $0xe44] ss:$16 sps:$4 sm:$0xff]  }
 0x442   :  { %7824 = vmatprep.subr.bf16.mxu0 %v12855_v37  ;;  %v12919_v37 = vld [vmem:[#allocation11 + $0xe48] ss:$16 sps:$4 sm:$0xff]  }
 0x443   :  { %7495 = vmatpush1.bf16.msra.mxu1 %v12862_v25  ;;  %v12927_v25 = vld [vmem:[#allocation11 + $0xe6c] ss:$16 sps:$4 sm:$0xff]  }
 0x444   :  { %7496 = vmatprep.subr.bf16.mxu1 %v12870_v32  ;;  %v12934_v32 = vld [vmem:[#allocation11 + $0xe40] ss:$16 sps:$4 sm:$0xff]  }
 0x445   :  { %7825 = vmatpush1.bf16.msra.mxu0 %v12853_v29  ;;  %v12942_v29 = vld [vmem:[#allocation11 + $0xe64] ss:$16 sps:$4 sm:$0xff]  }
 0x446   :  { %7826 = vmatprep.subr.bf16.mxu0 %v12861_v28  ;;  %v12925_v28 = vld [vmem:[#allocation11 + $0xe68] ss:$16 sps:$4 sm:$0xff]  }
 0x447   :  { %7497 = vmatpush1.bf16.msra.mxu1 %v12868_v63  ;;  %v12933_v63 = vld [vmem:[#allocation11 + $0xe8c] ss:$16 sps:$4 sm:$0xff]  }
 0x448   :  { %7498 = vmatprep.subr.bf16.mxu1 %v12876_v30  ;;  %v12940_v30 = vld [vmem:[#allocation11 + $0xe60] ss:$16 sps:$4 sm:$0xff]  }
 0x449   :  { %7827 = vmatpush1.bf16.msra.mxu0 %v12859_v19  ;;  %v12948_v19 = vld [vmem:[#allocation11 + $0xe84] ss:$16 sps:$4 sm:$0xff]  }
 0x44a   :  { %7828 = vmatprep.subr.bf16.mxu0 %v12867_v40  ;;  %v12931_v40 = vld [vmem:[#allocation11 + $0xe88] ss:$16 sps:$4 sm:$0xff]  }
 0x44b   :  { %7499 = vmatpush1.bf16.msra.mxu1 %v12874_v24  ;;  %v12939_v24 = vld [vmem:[#allocation11 + $0xeac] ss:$16 sps:$4 sm:$0xff]  }
 0x44c   :  { %7500 = vmatprep.subr.bf16.mxu1 %v12882_v11  ;;  %v12946_v11 = vld [vmem:[#allocation11 + $0xe80] ss:$16 sps:$4 sm:$0xff]  }
 0x44d   :  { %7829 = vmatpush1.bf16.msra.mxu0 %v12865_v31  ;;  %v12954_v31 = vld [vmem:[#allocation11 + $0xea4] ss:$16 sps:$4 sm:$0xff]  }
 0x44e   :  { %7830 = vmatprep.subr.bf16.mxu0 %v12873_v33  ;;  %v12937_v33 = vld [vmem:[#allocation11 + $0xea8] ss:$16 sps:$4 sm:$0xff]  }
 0x44f   :  { %7501 = vmatpush1.bf16.msra.mxu1 %v12880_v6  ;;  %v12945_v6 = vld [vmem:[#allocation11 + $0xecc] ss:$16 sps:$4 sm:$0xff]  }
 0x450   :  { %7502 = vmatprep.subr.bf16.mxu1 %v12888_v47  ;;  %v12952_v47 = vld [vmem:[#allocation11 + $0xea0] ss:$16 sps:$4 sm:$0xff]  }
 0x451   :  { %7831 = vmatpush1.bf16.msra.mxu0 %v12871_v10  ;;  %v12960_v10 = vld [vmem:[#allocation11 + $0xec4] ss:$16 sps:$4 sm:$0xff]  }
 0x452   :  { %7832 = vmatprep.subr.bf16.mxu0 %v12879_v50  ;;  %v12943_v50 = vld [vmem:[#allocation11 + $0xec8] ss:$16 sps:$4 sm:$0xff]  }
 0x453   :  { %7503 = vmatpush1.bf16.msra.mxu1 %v12886_v44  ;;  %v12951_v44 = vld [vmem:[#allocation11 + $0xeec] ss:$16 sps:$4 sm:$0xff]  }
 0x454   :  { %7504 = vmatprep.subr.bf16.mxu1 %v12894_v53  ;;  %v12958_v53 = vld [vmem:[#allocation11 + $0xec0] ss:$16 sps:$4 sm:$0xff]  }
 0x455   :  { %7833 = vmatpush1.bf16.msra.mxu0 %v12877_v54  ;;  %v12966_v54 = vld [vmem:[#allocation11 + $0xee4] ss:$16 sps:$4 sm:$0xff]  }
 0x456   :  { %7834 = vmatprep.subr.bf16.mxu0 %v12885_v13  ;;  %v12949_v13 = vld [vmem:[#allocation11 + $0xee8] ss:$16 sps:$4 sm:$0xff]  }
 0x457   :  { %7505 = vmatpush1.bf16.msra.mxu1 %v12892_v39  ;;  %v12957_v39 = vld [vmem:[#allocation11 + $0xf0c] ss:$16 sps:$4 sm:$0xff]  }
 0x458   :  { %7506 = vmatprep.subr.bf16.mxu1 %v12900_v58  ;;  %v12964_v58 = vld [vmem:[#allocation11 + $0xee0] ss:$16 sps:$4 sm:$0xff]  }
 0x459   :  { %7835 = vmatpush1.bf16.msra.mxu0 %v12883_v16  ;;  %v12972_v16 = vld [vmem:[#allocation11 + $0xf04] ss:$16 sps:$4 sm:$0xff]  }
 0x45a   :  { %7836 = vmatprep.subr.bf16.mxu0 %v12891_v57  ;;  %v12955_v57 = vld [vmem:[#allocation11 + $0xf08] ss:$16 sps:$4 sm:$0xff]  }
 0x45b   :  { %7507 = vmatpush1.bf16.msra.mxu1 %v12898_v60  ;;  %v12963_v60 = vld [vmem:[#allocation11 + $0xf2c] ss:$16 sps:$4 sm:$0xff]  }
 0x45c   :  { %7508 = vmatprep.subr.bf16.mxu1 %v12906_v62  ;;  %v12970_v62 = vld [vmem:[#allocation11 + $0xf00] ss:$16 sps:$4 sm:$0xff]  }
 0x45d   :  { %7837 = vmatpush1.bf16.msra.mxu0 %v12889_v2  ;;  %v12978_v2 = vld [vmem:[#allocation11 + $0xf24] ss:$16 sps:$4 sm:$0xff]  }
 0x45e   :  { %7838 = vmatprep.subr.bf16.mxu0 %v12897_v12  ;;  %v12961_v12 = vld [vmem:[#allocation11 + $0xf28] ss:$16 sps:$4 sm:$0xff]  }
 0x45f   :  { %7509 = vmatpush1.bf16.msra.mxu1 %v12904_v0  ;;  %v12969_v0 = vld [vmem:[#allocation11 + $0xf4c] ss:$16 sps:$4 sm:$0xff]  }
 0x460   :  { %7510 = vmatprep.subr.bf16.mxu1 %v12912_v23  ;;  %v12976_v23 = vld [vmem:[#allocation11 + $0xf20] ss:$16 sps:$4 sm:$0xff]  }
 0x461   :  { %7839 = vmatpush1.bf16.msra.mxu0 %v12895_v4  ;;  %v12984_v4 = vld [vmem:[#allocation11 + $0xf44] ss:$16 sps:$4 sm:$0xff]  }
 0x462   :  { %7840 = vmatprep.subr.bf16.mxu0 %v12903_v35  ;;  %v12967_v35 = vld [vmem:[#allocation11 + $0xf48] ss:$16 sps:$4 sm:$0xff]  }
 0x463   :  { %7511 = vmatpush1.bf16.msra.mxu1 %v12910_v41  ;;  %v12975_v41 = vld [vmem:[#allocation11 + $0xf6c] ss:$16 sps:$4 sm:$0xff]  }
 0x464   :  { %7512 = vmatprep.subr.bf16.mxu1 %v12918_v42  ;;  %v12982_v42 = vld [vmem:[#allocation11 + $0xf40] ss:$16 sps:$4 sm:$0xff]  }
 0x465   :  { %7841 = vmatpush1.bf16.msra.mxu0 %v12901_v38  ;;  %v12990_v38 = vld [vmem:[#allocation11 + $0xf64] ss:$16 sps:$4 sm:$0xff]  }
 0x466   :  { %7851 = vmatprep.subr.bf16.mxu0 %v12909_v22  ;;  %v12981_v22 = vld [vmem:[#allocation11 + $0xf8c] ss:$16 sps:$4 sm:$0xff]  }
 0x467   :  { %7513 = vmatpush1.bf16.msra.mxu1 %v12916_v46  ;;  %v12996_v46 = vld [vmem:[#allocation11 + $0xf84] ss:$16 sps:$4 sm:$0xff]  }
 0x468   :  { %7843 = vmatmul.mubr.bf16.vlgmr.msra.gmra.mrb[8].mxu0 %v4138_v21  ;;  %7523 = vmatprep.subr.bf16.mxu1 %v12924_v43  ;;  %v12979_v43 = vld [vmem:[#allocation11 + $0xf88] ss:$16 sps:$4 sm:$0xff]  }
 0x469   :  { %7852 = vmatpush1.bf16.msra.mxu0 %v12907_v17  ;;  %7883 = vmatprep.mubr.bf16.mxu0 %v4141_v14  ;;  %v12987_v17 = vld [vmem:[#allocation11 + $0xfac] ss:$16 sps:$4 sm:$0xff]  }
 0x46a   :  { %7853 = vmatprep.subr.bf16.mxu0 %v12915_v8  ;;  %7515 = vmatmul.mubr.bf16.vlgmr.msra.gmra.mrb[20].mxu1 %v4138_v21  ;;  %v12994_v21 = vld [vmem:[#allocation11 + $0xf80] ss:$16 sps:$4 sm:$0xff]   ;;  %v13002_v8 = vld [vmem:[#allocation11 + $0xfa4] ss:$16 sps:$4 sm:$0xff]  }
 0x46b   :  { %7524 = vmatpush1.bf16.msra.mxu1 %v12922_v61  ;;  %7555 = vmatprep.mubr.bf16.mxu1 %v4141_v14  ;;  %v12985_v14 = vld [vmem:[#allocation11 + $0xfa8] ss:$16 sps:$4 sm:$0xff]   ;;  %v12993_v61 = vld [vmem:[#allocation11 + $0xfcc] ss:$16 sps:$4 sm:$0xff]  }
 0x46c   :  { %7525 = vmatprep.subr.bf16.mxu1 %v12930_v15  ;;  %v13000_v15 = vld [vmem:[#allocation11 + $0xfa0] ss:$16 sps:$4 sm:$0xff]  }
 0x46d   :  { %7854 = vmatpush1.bf16.msra.mxu0 %v12913_v51  ;;  %v14726_v51 = vld [vmem:[#allocation10] sm:$0x3f] }
 0x46e   :  { %7855 = vmatprep.subr.bf16.mxu0 %v12921_v9  ;;  %v13008_v9 = vld [vmem:[#allocation11 + $0xfc4] ss:$16 sps:$4 sm:$0xff]  }
 0x46f   :  { %7526 = vmatpush1.bf16.msra.mxu1 %v12928_v27  ;;  %v12991_v27 = vld [vmem:[#allocation11 + $0xfc8] ss:$16 sps:$4 sm:$0xff]  }
 0x470   :  { %7527 = vmatprep.subr.bf16.mxu1 %v12936_v59  ;;  %v12999_v59 = vld [vmem:[#allocation11 + $0xfec] ss:$16 sps:$4 sm:$0xff]  }
 0x471   :  { %7856 = vmatpush1.bf16.msra.mxu0 %v12919_v37  ;;  %v2144_v37 = vrot.slane %v14726_v51, %v14618_v55 }
 0x472   :  { %7857 = vmatprep.subr.bf16.mxu0 %v12927_v25  ;;  %v13006_v25 = vld [vmem:[#allocation11 + $0xfc0] ss:$16 sps:$4 sm:$0xff]  }
 0x473   :  { %7528 = vmatpush1.bf16.msra.mxu1 %v12934_v32  ;;  %v13014_v32 = vld [vmem:[#allocation11 + $0xfe4] ss:$16 sps:$4 sm:$0xff]  }
 0x474   :  { %7529 = vmatprep.subr.bf16.mxu1 %v12942_v29  ;;  %v12997_v29 = vld [vmem:[#allocation11 + $0xfe8] ss:$16 sps:$4 sm:$0xff]  }
 0x475   :  { %7858 = vmatpush1.bf16.msra.mxu0 %v12925_v28  ;;  %v1299_v28 = vmax.f32 %v14688_v3, 0.0  ;;  %v13009_v3 = vld [vmem:[#allocation14 + $0x28] ss:$16 sps:$4 sm:$0xff]  }
 0x476   :  { %7859 = vmatprep.subr.bf16.mxu0 %v12933_v63  ;;  %v13005_v63 = vld [vmem:[#allocation14 + $0xc] ss:$16 sps:$4 sm:$0xff]  }
 0x477   :  { %7530 = vmatpush1.bf16.msra.mxu1 %v12940_v30  ;;  %v11666_v30 = vadd.f32 %v14685_v36, %v2144_v37  ;;  %v13017_v36 = vld [vmem:[#allocation14 + $0x4c] ss:$16 sps:$4 sm:$0xff]  }
 0x478   :  { %7531 = vmatprep.subr.bf16.mxu1 %v12948_v19  ;;  %v13012_v19 = vld [vmem:[#allocation11 + $0xfe0] ss:$16 sps:$4 sm:$0xff]  }
 0x479   :  { %7860 = vmatpush1.bf16.msra.mxu0 %v12931_v40  ;;  %v13020_v40 = vld [vmem:[#allocation14 + $0x4] ss:$16 sps:$4 sm:$0xff]   ;;  %v13071_v37 = vld [vmem:[#allocation14 + $0x16c] ss:$16 sps:$4 sm:$0xff]  }
 0x47a   :  { %7861 = vmatprep.subr.bf16.mxu0 %v12939_v24  ;;  %v13003_v24 = vld [vmem:[#allocation14 + $0x8] ss:$16 sps:$4 sm:$0xff]  }
 0x47b   :  { %7532 = vmatpush1.bf16.msra.mxu1 %v12946_v11  ;;  %v4140_v11 = vpack.c.bf16 %v1299_v28, %v1299_v28  ;;  %v13077_v28 = vld [vmem:[#allocation14 + $0x18c] ss:$16 sps:$4 sm:$0xff]  }
 0x47c   :  { %7533 = vmatprep.subr.bf16.mxu1 %v12954_v31  ;;  %v13011_v31 = vld [vmem:[#allocation14 + $0x2c] ss:$16 sps:$4 sm:$0xff]  }
 0x47d   :  { %7862 = vmatpush1.bf16.msra.mxu0 %v12937_v33  ;;  %v7893_v33 = vpack.c.bf16 %v11666_v30, %v11666_v30  ;;  %v13092_v30 = vld [vmem:[#allocation14 + $0x184] ss:$16 sps:$4 sm:$0xff]  }
 0x47e   :  { %7863 = vmatprep.subr.bf16.mxu0 %v12945_v6  ;;  %v13018_v6 = vld [vmem:[#allocation14] ss:$16 sps:$4 sm:$0xff]  }
 0x47f   :  { %7534 = vmatpush1.bf16.msra.mxu1 %v12952_v47  ;;  %v13026_v47 = vld [vmem:[#allocation14 + $0x24] ss:$16 sps:$4 sm:$0xff]  }
 0x480   :  { %7535 = vmatprep.subr.bf16.mxu1 %v12960_v10  ;;  %v13024_v10 = vld [vmem:[#allocation14 + $0x20] ss:$16 sps:$4 sm:$0xff]  }
 0x481   :  { %7864 = vmatpush1.bf16.msra.mxu0 %v12943_v50  ;;  %v13032_v50 = vld [vmem:[#allocation14 + $0x44] ss:$16 sps:$4 sm:$0xff]  }
 0x482   :  { %7865 = vmatprep.subr.bf16.mxu0 %v12951_v44  ;;  %v13015_v44 = vld [vmem:[#allocation14 + $0x48] ss:$16 sps:$4 sm:$0xff]  }
 0x483   :  { %7536 = vmatpush1.bf16.msra.mxu1 %v12958_v53  ;;  %v13023_v53 = vld [vmem:[#allocation14 + $0x6c] ss:$16 sps:$4 sm:$0xff]  }
 0x484   :  { %7537 = vmatprep.subr.bf16.mxu1 %v12966_v54  ;;  %v13030_v54 = vld [vmem:[#allocation14 + $0x40] ss:$16 sps:$4 sm:$0xff]  }
 0x485   :  { %7866 = vmatpush1.bf16.msra.mxu0 %v12949_v13  ;;  %v13038_v13 = vld [vmem:[#allocation14 + $0x64] ss:$16 sps:$4 sm:$0xff]  }
 0x486   :  { %7867 = vmatprep.subr.bf16.mxu0 %v12957_v39  ;;  %v13021_v39 = vld [vmem:[#allocation14 + $0x68] ss:$16 sps:$4 sm:$0xff]  }
 0x487   :  { %7538 = vmatpush1.bf16.msra.mxu1 %v12964_v58  ;;  %v13029_v58 = vld [vmem:[#allocation14 + $0x8c] ss:$16 sps:$4 sm:$0xff]  }
 0x488   :  { %7539 = vmatprep.subr.bf16.mxu1 %v12972_v16  ;;  %v13036_v16 = vld [vmem:[#allocation14 + $0x60] ss:$16 sps:$4 sm:$0xff]  }
 0x489   :  { %7868 = vmatpush1.bf16.msra.mxu0 %v12955_v57  ;;  %v13044_v57 = vld [vmem:[#allocation14 + $0x84] ss:$16 sps:$4 sm:$0xff]  }
 0x48a   :  { %7869 = vmatprep.subr.bf16.mxu0 %v12963_v60  ;;  %v13027_v60 = vld [vmem:[#allocation14 + $0x88] ss:$16 sps:$4 sm:$0xff]  }
 0x48b   :  { %7540 = vmatpush1.bf16.msra.mxu1 %v12970_v62  ;;  %v13035_v62 = vld [vmem:[#allocation14 + $0xac] ss:$16 sps:$4 sm:$0xff]  }
 0x48c   :  { %7541 = vmatprep.subr.bf16.mxu1 %v12978_v2  ;;  %v13042_v2 = vld [vmem:[#allocation14 + $0x80] ss:$16 sps:$4 sm:$0xff]  }
 0x48d   :  { %7870 = vmatpush1.bf16.msra.mxu0 %v12961_v12  ;;  %v13050_v12 = vld [vmem:[#allocation14 + $0xa4] ss:$16 sps:$4 sm:$0xff]  }
 0x48e   :  { %7871 = vmatprep.subr.bf16.mxu0 %v12969_v0  ;;  %v13033_v0 = vld [vmem:[#allocation14 + $0xa8] ss:$16 sps:$4 sm:$0xff]  }
 0x48f   :  { %7542 = vmatpush1.bf16.msra.mxu1 %v12976_v23  ;;  %v13041_v23 = vld [vmem:[#allocation14 + $0xcc] ss:$16 sps:$4 sm:$0xff]  }
 0x490   :  { %7543 = vmatprep.subr.bf16.mxu1 %v12984_v4  ;;  %v13048_v4 = vld [vmem:[#allocation14 + $0xa0] ss:$16 sps:$4 sm:$0xff]  }
 0x491   :  { %7872 = vmatpush1.bf16.msra.mxu0 %v12967_v35  ;;  %v13056_v35 = vld [vmem:[#allocation14 + $0xc4] ss:$16 sps:$4 sm:$0xff]  }
 0x492   :  { %7873 = vmatprep.subr.bf16.mxu0 %v12975_v41  ;;  %v13039_v41 = vld [vmem:[#allocation14 + $0xc8] ss:$16 sps:$4 sm:$0xff]  }
 0x493   :  { %7544 = vmatpush1.bf16.msra.mxu1 %v12982_v42  ;;  %v13047_v42 = vld [vmem:[#allocation14 + $0xec] ss:$16 sps:$4 sm:$0xff]  }
 0x494   :  { %7545 = vmatprep.subr.bf16.mxu1 %v12990_v38  ;;  %v13054_v38 = vld [vmem:[#allocation14 + $0xc0] ss:$16 sps:$4 sm:$0xff]  }
 0x495   :  { %7874 = vmatpush1.bf16.msra.mxu0 %v12973_v1  ;;  %v13062_v1 = vld [vmem:[#allocation14 + $0xe4] ss:$16 sps:$4 sm:$0xff]  }
 0x496   :  { %7875 = vmatprep.subr.bf16.mxu0 %v12981_v22  ;;  %v13045_v22 = vld [vmem:[#allocation14 + $0xe8] ss:$16 sps:$4 sm:$0xff]  }
 0x497   :  { %7546 = vmatpush1.bf16.msra.mxu1 %v12988_v18  ;;  %v13053_v18 = vld [vmem:[#allocation14 + $0x10c] ss:$16 sps:$4 sm:$0xff]  }
 0x498   :  { %7547 = vmatprep.subr.bf16.mxu1 %v12996_v46  ;;  %v13060_v46 = vld [vmem:[#allocation14 + $0xe0] ss:$16 sps:$4 sm:$0xff]  }
 0x499   :  { %7876 = vmatpush1.bf16.msra.mxu0 %v12979_v43  ;;  %v13068_v43 = vld [vmem:[#allocation14 + $0x104] ss:$16 sps:$4 sm:$0xff]  }
 0x49a   :  { %7877 = vmatprep.subr.bf16.mxu0 %v12987_v17  ;;  %v13051_v17 = vld [vmem:[#allocation14 + $0x108] ss:$16 sps:$4 sm:$0xff]  }
 0x49b   :  { %7548 = vmatpush1.bf16.msra.mxu1 %v12994_v21  ;;  %v13059_v21 = vld [vmem:[#allocation14 + $0x12c] ss:$16 sps:$4 sm:$0xff]  }
 0x49c   :  { %7549 = vmatprep.subr.bf16.mxu1 %v13002_v8  ;;  %v13066_v8 = vld [vmem:[#allocation14 + $0x100] ss:$16 sps:$4 sm:$0xff]  }
 0x49d   :  { %7878 = vmatpush1.bf16.msra.mxu0 %v12985_v14  ;;  %v13074_v14 = vld [vmem:[#allocation14 + $0x124] ss:$16 sps:$4 sm:$0xff]  }
 0x49e   :  { %7879 = vmatprep.subr.bf16.mxu0 %v12993_v61  ;;  %v13057_v61 = vld [vmem:[#allocation14 + $0x128] ss:$16 sps:$4 sm:$0xff]  }
 0x49f   :  { %7550 = vmatpush1.bf16.msra.mxu1 %v13000_v15  ;;  %v13065_v15 = vld [vmem:[#allocation14 + $0x14c] ss:$16 sps:$4 sm:$0xff]  }
 0x4a0   :  { %7551 = vmatprep.subr.bf16.mxu1 %v13008_v9  ;;  %v13072_v9 = vld [vmem:[#allocation14 + $0x120] ss:$16 sps:$4 sm:$0xff]  }
 0x4a1   :  { %7880 = vmatpush1.bf16.msra.mxu0 %v12991_v27  ;;  %v13080_v27 = vld [vmem:[#allocation14 + $0x144] ss:$16 sps:$4 sm:$0xff]  }
 0x4a2   :  { %7881 = vmatprep.subr.bf16.mxu0 %v12999_v59  ;;  %v13063_v59 = vld [vmem:[#allocation14 + $0x148] ss:$16 sps:$4 sm:$0xff]  }
 0x4a3   :  { %7552 = vmatpush1.bf16.msra.mxu1 %v13006_v25  ;;  %v13078_v25 = vld [vmem:[#allocation14 + $0x140] ss:$16 sps:$4 sm:$0xff]  }
 0x4a4   :  { %7553 = vmatprep.subr.bf16.mxu1 %v13014_v32  ;;  %v13086_v32 = vld [vmem:[#allocation14 + $0x164] ss:$16 sps:$4 sm:$0xff]  }
 0x4a5   :  { %7882 = vmatpush1.bf16.msra.mxu0 %v12997_v29  ;;  %v13069_v29 = vld [vmem:[#allocation14 + $0x168] ss:$16 sps:$4 sm:$0xff]  }
 0x4a6   :  { %9195 = vmatprep.subr.bf16.mxu0 %v13005_v63  ;;  %v13084_v63 = vld [vmem:[#allocation14 + $0x160] ss:$16 sps:$4 sm:$0xff]  }
 0x4a7   :  { %7554 = vmatpush1.bf16.msra.mxu1 %v13012_v19  ;;  %v13075_v19 = vld [vmem:[#allocation14 + $0x188] ss:$16 sps:$4 sm:$0xff]  }
 0x4a8   :  { %7884 = vmatmul.mubr.bf16.vlgmr.msra.gmra.mrb[8].mxu0 %v4140_v11  ;;  %9072 = vmatprep.subr.bf16.mxu1 %v13020_v40  ;;  %v13083_v40 = vld [vmem:[#allocation14 + $0x1ac] ss:$16 sps:$4 sm:$0xff]  }
 0x4a9   :  { %9196 = vmatpush1.bf16.msra.mxu0 %v13003_v24  ;;  %9227 = vmatprep.mubr.bf16.mxu0 %v7893_v33  ;;  %v13090_v24 = vld [vmem:[#allocation14 + $0x180] ss:$16 sps:$4 sm:$0xff]  }
 0x4aa   :  { %9197 = vmatprep.subr.bf16.mxu0 %v13011_v31  ;;  %7556 = vmatmul.mubr.bf16.vlgmr.msra.gmra.mrb[20].mxu1 %v4140_v11  ;;  %v13098_v11 = vld [vmem:[#allocation14 + $0x1a4] ss:$16 sps:$4 sm:$0xff]   ;;  %v13081_v31 = vld [vmem:[#allocation14 + $0x1a8] ss:$16 sps:$4 sm:$0xff]  }
 0x4ab   :  { %9073 = vmatpush1.bf16.msra.mxu1 %v13018_v6  ;;  %9104 = vmatprep.mubr.bf16.mxu1 %v7893_v33  ;;  %v13089_v33 = vld [vmem:[#allocation14 + $0x1cc] ss:$16 sps:$4 sm:$0xff]   ;;  %v13096_v6 = vld [vmem:[#allocation14 + $0x1a0] ss:$16 sps:$4 sm:$0xff]  }
 0x4ac   :  { %9074 = vmatprep.subr.bf16.mxu1 %v13026_v47  ;;  %v13104_v47 = vld [vmem:[#allocation14 + $0x1c4] ss:$16 sps:$4 sm:$0xff]  }
 0x4ad   :  { %9198 = vmatpush1.bf16.msra.mxu0 %v13009_v3  ;;  %v13087_v3 = vld [vmem:[#allocation14 + $0x1c8] ss:$16 sps:$4 sm:$0xff]  }
 0x4ae   :  { %9199 = vmatprep.subr.bf16.mxu0 %v13017_v36  ;;  %v2140_v36 = vrot.slane %v14726_v51, %v14694_v26 }
 0x4af   :  { %9075 = vmatpush1.bf16.msra.mxu1 %v13024_v10  ;;  %v13095_v10 = vld [vmem:[#allocation14 + $0x1ec] ss:$16 sps:$4 sm:$0xff]  }
 0x4b0   :  { %9076 = vmatprep.subr.bf16.mxu1 %v13032_v50  ;;  %v2152_v50 = vrot.slane %v14726_v51, %v14626_v48 }
 0x4b1   :  { %9200 = vmatpush1.bf16.msra.mxu0 %v13015_v44  ;;  %v13102_v44 = vld [vmem:[#allocation14 + $0x1c0] ss:$16 sps:$4 sm:$0xff]  }
 0x4b2   :  { %9201 = vmatprep.subr.bf16.mxu0 %v13023_v53  ;;  %v13110_v53 = vld [vmem:[#allocation14 + $0x1e4] ss:$16 sps:$4 sm:$0xff]  }
 0x4b3   :  { %9077 = vmatpush1.bf16.msra.mxu1 %v13030_v54  ;;  %v13093_v54 = vld [vmem:[#allocation14 + $0x1e8] ss:$16 sps:$4 sm:$0xff]  }
 0x4b4   :  { %9078 = vmatprep.subr.bf16.mxu1 %v13038_v13  ;;  %v11665_v13 = vadd.f32 %v14681_v56, %v2140_v36  ;;  %v13105_v56 = vld [vmem:[#allocation14 + $0x228] ss:$16 sps:$4 sm:$0xff]   ;;  %v13167_v36 = vld [vmem:[#allocation14 + $0x36c] ss:$16 sps:$4 sm:$0xff]  }
 0x4b5   :  { %9202 = vmatpush1.bf16.msra.mxu0 %v13021_v39  ;;  %v13101_v39 = vld [vmem:[#allocation14 + $0x20c] ss:$16 sps:$4 sm:$0xff]  }
 0x4b6   :  { %9203 = vmatprep.subr.bf16.mxu0 %v13029_v58  ;;  %v11668_v58 = vadd.f32 %v14710_v20, %v2152_v50  ;;  %v13113_v20 = vld [vmem:[#allocation14 + $0x24c] ss:$16 sps:$4 sm:$0xff]   ;;  %v13182_v50 = vld [vmem:[#allocation14 + $0x364] ss:$16 sps:$4 sm:$0xff]  }
 0x4b7   :  { %9079 = vmatpush1.bf16.msra.mxu1 %v13036_v16  ;;  %v13108_v16 = vld [vmem:[#allocation14 + $0x1e0] ss:$16 sps:$4 sm:$0xff]  }
 0x4b8   :  { %9080 = vmatprep.subr.bf16.mxu1 %v13044_v57  ;;  %v13116_v57 = vld [vmem:[#allocation14 + $0x204] ss:$16 sps:$4 sm:$0xff]  }
 0x4b9   :  { %9204 = vmatpush1.bf16.msra.mxu0 %v13027_v60  ;;  %v13099_v60 = vld [vmem:[#allocation14 + $0x208] ss:$16 sps:$4 sm:$0xff]  }
 0x4ba   :  { %9205 = vmatprep.subr.bf16.mxu0 %v13035_v62  ;;  %v7892_v62 = vpack.c.bf16 %v11665_v13, %v11665_v13  ;;  %v13188_v13 = vld [vmem:[#allocation14 + $0x384] ss:$16 sps:$4 sm:$0xff]  }
 0x4bb   :  { %9081 = vmatpush1.bf16.msra.mxu1 %v13042_v2  ;;  %v13107_v2 = vld [vmem:[#allocation14 + $0x22c] ss:$16 sps:$4 sm:$0xff]  }
 0x4bc   :  { %9082 = vmatprep.subr.bf16.mxu1 %v13050_v12  ;;  %v7895_v12 = vpack.c.bf16 %v11668_v58, %v11668_v58  ;;  %v13179_v58 = vld [vmem:[#allocation14 + $0x3ac] ss:$16 sps:$4 sm:$0xff]  }
 0x4bd   :  { %9206 = vmatpush1.bf16.msra.mxu0 %v13033_v0  ;;  %v13114_v0 = vld [vmem:[#allocation14 + $0x200] ss:$16 sps:$4 sm:$0xff]  }
 0x4be   :  { %9207 = vmatprep.subr.bf16.mxu0 %v13041_v23  ;;  %v13122_v23 = vld [vmem:[#allocation14 + $0x224] ss:$16 sps:$4 sm:$0xff]  }
 0x4bf   :  { %9083 = vmatpush1.bf16.msra.mxu1 %v13048_v4  ;;  %v13120_v4 = vld [vmem:[#allocation14 + $0x220] ss:$16 sps:$4 sm:$0xff]  }
 0x4c0   :  { %9084 = vmatprep.subr.bf16.mxu1 %v13056_v35  ;;  %v13128_v35 = vld [vmem:[#allocation14 + $0x244] ss:$16 sps:$4 sm:$0xff]  }
 0x4c1   :  { %9208 = vmatpush1.bf16.msra.mxu0 %v13039_v41  ;;  %v13111_v41 = vld [vmem:[#allocation14 + $0x248] ss:$16 sps:$4 sm:$0xff]  }
 0x4c2   :  { %9209 = vmatprep.subr.bf16.mxu0 %v13047_v42  ;;  %v13119_v42 = vld [vmem:[#allocation14 + $0x26c] ss:$16 sps:$4 sm:$0xff]  }
 0x4c3   :  { %9085 = vmatpush1.bf16.msra.mxu1 %v13054_v38  ;;  %v13126_v38 = vld [vmem:[#allocation14 + $0x240] ss:$16 sps:$4 sm:$0xff]  }
 0x4c4   :  { %9086 = vmatprep.subr.bf16.mxu1 %v13062_v1  ;;  %v13134_v1 = vld [vmem:[#allocation14 + $0x264] ss:$16 sps:$4 sm:$0xff]  }
 0x4c5   :  { %9210 = vmatpush1.bf16.msra.mxu0 %v13045_v22  ;;  %v13117_v22 = vld [vmem:[#allocation14 + $0x268] ss:$16 sps:$4 sm:$0xff]  }
 0x4c6   :  { %9211 = vmatprep.subr.bf16.mxu0 %v13053_v18  ;;  %v13125_v18 = vld [vmem:[#allocation14 + $0x28c] ss:$16 sps:$4 sm:$0xff]  }
 0x4c7   :  { %9087 = vmatpush1.bf16.msra.mxu1 %v13060_v46  ;;  %v13132_v46 = vld [vmem:[#allocation14 + $0x260] ss:$16 sps:$4 sm:$0xff]  }
 0x4c8   :  { %9088 = vmatprep.subr.bf16.mxu1 %v13068_v43  ;;  %v13140_v43 = vld [vmem:[#allocation14 + $0x284] ss:$16 sps:$4 sm:$0xff]  }
 0x4c9   :  { %9212 = vmatpush1.bf16.msra.mxu0 %v13051_v17  ;;  %v13123_v17 = vld [vmem:[#allocation14 + $0x288] ss:$16 sps:$4 sm:$0xff]  }
 0x4ca   :  { %9213 = vmatprep.subr.bf16.mxu0 %v13059_v21  ;;  %v13131_v21 = vld [vmem:[#allocation14 + $0x2ac] ss:$16 sps:$4 sm:$0xff]  }
 0x4cb   :  { %9089 = vmatpush1.bf16.msra.mxu1 %v13066_v8  ;;  %v13138_v8 = vld [vmem:[#allocation14 + $0x280] ss:$16 sps:$4 sm:$0xff]  }
 0x4cc   :  { %9090 = vmatprep.subr.bf16.mxu1 %v13074_v14  ;;  %v13146_v14 = vld [vmem:[#allocation14 + $0x2a4] ss:$16 sps:$4 sm:$0xff]  }
 0x4cd   :  { %9214 = vmatpush1.bf16.msra.mxu0 %v13057_v61  ;;  %v13129_v61 = vld [vmem:[#allocation14 + $0x2a8] ss:$16 sps:$4 sm:$0xff]  }
 0x4ce   :  { %9215 = vmatprep.subr.bf16.mxu0 %v13065_v15  ;;  %v13137_v15 = vld [vmem:[#allocation14 + $0x2cc] ss:$16 sps:$4 sm:$0xff]  }
 0x4cf   :  { %9091 = vmatpush1.bf16.msra.mxu1 %v13072_v9  ;;  %v13144_v9 = vld [vmem:[#allocation14 + $0x2a0] ss:$16 sps:$4 sm:$0xff]  }
 0x4d0   :  { %9092 = vmatprep.subr.bf16.mxu1 %v13080_v27  ;;  %v13152_v27 = vld [vmem:[#allocation14 + $0x2c4] ss:$16 sps:$4 sm:$0xff]  }
 0x4d1   :  { %9216 = vmatpush1.bf16.msra.mxu0 %v13063_v59  ;;  %v13135_v59 = vld [vmem:[#allocation14 + $0x2c8] ss:$16 sps:$4 sm:$0xff]  }
 0x4d2   :  { %9217 = vmatprep.subr.bf16.mxu0 %v13071_v37  ;;  %v13143_v37 = vld [vmem:[#allocation14 + $0x2ec] ss:$16 sps:$4 sm:$0xff]  }
 0x4d3   :  { %9093 = vmatpush1.bf16.msra.mxu1 %v13078_v25  ;;  %v13150_v25 = vld [vmem:[#allocation14 + $0x2c0] ss:$16 sps:$4 sm:$0xff]  }
 0x4d4   :  { %9094 = vmatprep.subr.bf16.mxu1 %v13086_v32  ;;  %v13158_v32 = vld [vmem:[#allocation14 + $0x2e4] ss:$16 sps:$4 sm:$0xff]  }
 0x4d5   :  { %9218 = vmatpush1.bf16.msra.mxu0 %v13069_v29  ;;  %v13141_v29 = vld [vmem:[#allocation14 + $0x2e8] ss:$16 sps:$4 sm:$0xff]  }
 0x4d6   :  { %9219 = vmatprep.subr.bf16.mxu0 %v13077_v28  ;;  %v13149_v28 = vld [vmem:[#allocation14 + $0x30c] ss:$16 sps:$4 sm:$0xff]  }
 0x4d7   :  { %9095 = vmatpush1.bf16.msra.mxu1 %v13084_v63  ;;  %v13156_v63 = vld [vmem:[#allocation14 + $0x2e0] ss:$16 sps:$4 sm:$0xff]  }
 0x4d8   :  { %9096 = vmatprep.subr.bf16.mxu1 %v13092_v30  ;;  %v13164_v30 = vld [vmem:[#allocation14 + $0x304] ss:$16 sps:$4 sm:$0xff]  }
 0x4d9   :  { %9220 = vmatpush1.bf16.msra.mxu0 %v13075_v19  ;;  %v13147_v19 = vld [vmem:[#allocation14 + $0x308] ss:$16 sps:$4 sm:$0xff]  }
 0x4da   :  { %9221 = vmatprep.subr.bf16.mxu0 %v13083_v40  ;;  %v13155_v40 = vld [vmem:[#allocation14 + $0x32c] ss:$16 sps:$4 sm:$0xff]  }
 0x4db   :  { %9097 = vmatpush1.bf16.msra.mxu1 %v13090_v24  ;;  %v13162_v24 = vld [vmem:[#allocation14 + $0x300] ss:$16 sps:$4 sm:$0xff]  }
 0x4dc   :  { %9098 = vmatprep.subr.bf16.mxu1 %v13098_v11  ;;  %v13170_v11 = vld [vmem:[#allocation14 + $0x324] ss:$16 sps:$4 sm:$0xff]  }
 0x4dd   :  { %9222 = vmatpush1.bf16.msra.mxu0 %v13081_v31  ;;  %v13153_v31 = vld [vmem:[#allocation14 + $0x328] ss:$16 sps:$4 sm:$0xff]  }
 0x4de   :  { %9223 = vmatprep.subr.bf16.mxu0 %v13089_v33  ;;  %v13161_v33 = vld [vmem:[#allocation14 + $0x34c] ss:$16 sps:$4 sm:$0xff]  }
 0x4df   :  { %9099 = vmatpush1.bf16.msra.mxu1 %v13096_v6  ;;  %v13168_v6 = vld [vmem:[#allocation14 + $0x320] ss:$16 sps:$4 sm:$0xff]  }
 0x4e0   :  { %9100 = vmatprep.subr.bf16.mxu1 %v13104_v47  ;;  %v13176_v47 = vld [vmem:[#allocation14 + $0x344] ss:$16 sps:$4 sm:$0xff]  }
 0x4e1   :  { %9224 = vmatpush1.bf16.msra.mxu0 %v13087_v3  ;;  %v13159_v3 = vld [vmem:[#allocation14 + $0x348] ss:$16 sps:$4 sm:$0xff]  }
 0x4e2   :  { %9225 = vmatprep.subr.bf16.mxu0 %v13095_v10  ;;  %v13174_v10 = vld [vmem:[#allocation14 + $0x340] ss:$16 sps:$4 sm:$0xff]  }
 0x4e3   :  { %9101 = vmatpush1.bf16.msra.mxu1 %v13102_v44  ;;  %v13165_v44 = vld [vmem:[#allocation14 + $0x368] ss:$16 sps:$4 sm:$0xff]  }
 0x4e4   :  { %9102 = vmatprep.subr.bf16.mxu1 %v13110_v53  ;;  %v13173_v53 = vld [vmem:[#allocation14 + $0x38c] ss:$16 sps:$4 sm:$0xff]  }
 0x4e5   :  { %9226 = vmatpush1.bf16.msra.mxu0 %v13093_v54  ;;  %v13180_v54 = vld [vmem:[#allocation14 + $0x360] ss:$16 sps:$4 sm:$0xff]  }
 0x4e6   :  { %9236 = vmatprep.subr.bf16.mxu0 %v13101_v39  ;;  %v13171_v39 = vld [vmem:[#allocation14 + $0x388] ss:$16 sps:$4 sm:$0xff]  }
 0x4e7   :  { %9103 = vmatpush1.bf16.msra.mxu1 %v13108_v16  ;;  %v13186_v16 = vld [vmem:[#allocation14 + $0x380] ss:$16 sps:$4 sm:$0xff]  }
 0x4e8   :  { %9228 = vmatmul.mubr.bf16.vlgmr.msra.gmra.mrb[12].mxu0 %v7892_v62  ;;  %9113 = vmatprep.subr.bf16.mxu1 %v13116_v57  ;;  %v13194_v57 = vld [vmem:[#allocation14 + $0x3a4] ss:$16 sps:$4 sm:$0xff]  }
 0x4e9   :  { %9237 = vmatpush1.bf16.msra.mxu0 %v13099_v60  ;;  %9268 = vmatprep.mubr.bf16.mxu0 %v7895_v12  ;;  %v13177_v60 = vld [vmem:[#allocation14 + $0x3a8] ss:$16 sps:$4 sm:$0xff]  }
 0x4ea   :  { %9238 = vmatprep.subr.bf16.mxu0 %v13107_v2  ;;  %9105 = vmatmul.mubr.bf16.vlgmr.msra.gmra.mrb[24].mxu1 %v7892_v62  ;;  %v13185_v62 = vld [vmem:[#allocation14 + $0x3cc] ss:$16 sps:$4 sm:$0xff]   ;;  %v13192_v2 = vld [vmem:[#allocation14 + $0x3a0] ss:$16 sps:$4 sm:$0xff]  }
 0x4eb   :  { %9114 = vmatpush1.bf16.msra.mxu1 %v13114_v0  ;;  %9145 = vmatprep.mubr.bf16.mxu1 %v7895_v12  ;;  %v13200_v12 = vld [vmem:[#allocation14 + $0x3c4] ss:$16 sps:$4 sm:$0xff]   ;;  %v13183_v0 = vld [vmem:[#allocation14 + $0x3c8] ss:$16 sps:$4 sm:$0xff]  }
 0x4ec   :  { %9115 = vmatprep.subr.bf16.mxu1 %v13122_v23  ;;  %v2148_v23 = vrot.slane %v14726_v51, %v14621_v5 }
 0x4ed   :  { %9239 = vmatpush1.bf16.msra.mxu0 %v13105_v56  ;;  %v13191_v56 = vld [vmem:[#allocation14 + $0x3ec] ss:$16 sps:$4 sm:$0xff]  }
 0x4ee   :  { %9240 = vmatprep.subr.bf16.mxu0 %v13113_v20  ;;  %v2160_v20 = vrot.slane %v14726_v51, %v14638_v7  ;;  %v13203_v7 = vld [vmem:[#allocation14 + $0x42c] ss:$16 sps:$4 sm:$0xff]  }
 0x4ef   :  { %9116 = vmatpush1.bf16.msra.mxu1 %v13120_v4  ;;  %v13198_v4 = vld [vmem:[#allocation14 + $0x3c0] ss:$16 sps:$4 sm:$0xff]  }
 0x4f0   :  { %9117 = vmatprep.subr.bf16.mxu1 %v13128_v35  ;;  %v13206_v35 = vld [vmem:[#allocation14 + $0x3e4] ss:$16 sps:$4 sm:$0xff]  }
 0x4f1   :  { %9241 = vmatpush1.bf16.msra.mxu0 %v13111_v41  ;;  %v13189_v41 = vld [vmem:[#allocation14 + $0x3e8] ss:$16 sps:$4 sm:$0xff]  }
 0x4f2   :  { %9242 = vmatprep.subr.bf16.mxu0 %v13119_v42  ;;  %v11667_v42 = vadd.f32 %v14708_v52, %v2148_v23  ;;  %v13201_v52 = vld [vmem:[#allocation14 + $0x428] ss:$16 sps:$4 sm:$0xff]  }
 0x4f3   :  { %9118 = vmatpush1.bf16.msra.mxu1 %v13126_v38  ;;  %v13197_v38 = vld [vmem:[#allocation14 + $0x40c] ss:$16 sps:$4 sm:$0xff]   ;;  %v13261_v23 = vld [vmem:[#allocation14 + $0x568] ss:$16 sps:$4 sm:$0xff]  }
 0x4f4   :  { %9119 = vmatprep.subr.bf16.mxu1 %v13134_v1  ;;  %v11670_v1 = vadd.f32 %v14706_v49, %v2160_v20  ;;  %v13209_v49 = vld [vmem:[#allocation14 + $0x44c] ss:$16 sps:$4 sm:$0xff]   ;;  %v13276_v20 = vld [vmem:[#allocation14 + $0x560] ss:$16 sps:$4 sm:$0xff]  }
 0x4f5   :  { %9243 = vmatpush1.bf16.msra.mxu0 %v13117_v22  ;;  %v13204_v22 = vld [vmem:[#allocation14 + $0x3e0] ss:$16 sps:$4 sm:$0xff]  }
 0x4f6   :  { %9244 = vmatprep.subr.bf16.mxu0 %v13125_v18  ;;  %v13212_v18 = vld [vmem:[#allocation14 + $0x404] ss:$16 sps:$4 sm:$0xff]  }
 0x4f7   :  { %9120 = vmatpush1.bf16.msra.mxu1 %v13132_v46  ;;  %v13195_v46 = vld [vmem:[#allocation14 + $0x408] ss:$16 sps:$4 sm:$0xff]  }
 0x4f8   :  { %9121 = vmatprep.subr.bf16.mxu1 %v13140_v43  ;;  %v7894_v43 = vpack.c.bf16 %v11667_v42, %v11667_v42  ;;  %v13282_v42 = vld [vmem:[#allocation14 + $0x580] ss:$16 sps:$4 sm:$0xff]  }
 0x4f9   :  { %9245 = vmatpush1.bf16.msra.mxu0 %v13123_v17  ;;  %v7897_v17 = vpack.c.bf16 %v11670_v1, %v11670_v1  ;;  %v13273_v1 = vld [vmem:[#allocation14 + $0x5a8] ss:$16 sps:$4 sm:$0xff]  }
 0x4fa   :  { %9246 = vmatprep.subr.bf16.mxu0 %v13131_v21  ;;  %v13210_v21 = vld [vmem:[#allocation14 + $0x400] ss:$16 sps:$4 sm:$0xff]  }
 0x4fb   :  { %9122 = vmatpush1.bf16.msra.mxu1 %v13138_v8  ;;  %v13218_v8 = vld [vmem:[#allocation14 + $0x424] ss:$16 sps:$4 sm:$0xff]  }
 0x4fc   :  { %9123 = vmatprep.subr.bf16.mxu1 %v13146_v14  ;;  %v13216_v14 = vld [vmem:[#allocation14 + $0x420] ss:$16 sps:$4 sm:$0xff]  }
 0x4fd   :  { %9247 = vmatpush1.bf16.msra.mxu0 %v13129_v61  ;;  %v13224_v61 = vld [vmem:[#allocation14 + $0x444] ss:$16 sps:$4 sm:$0xff]  }
 0x4fe   :  { %9248 = vmatprep.subr.bf16.mxu0 %v13137_v15  ;;  %v13207_v15 = vld [vmem:[#allocation14 + $0x448] ss:$16 sps:$4 sm:$0xff]  }
 0x4ff   :  { %9124 = vmatpush1.bf16.msra.mxu1 %v13144_v9  ;;  %v13215_v9 = vld [vmem:[#allocation14 + $0x46c] ss:$16 sps:$4 sm:$0xff]  }
 0x500   :  { %9125 = vmatprep.subr.bf16.mxu1 %v13152_v27  ;;  %v13222_v27 = vld [vmem:[#allocation14 + $0x440] ss:$16 sps:$4 sm:$0xff]  }
 0x501   :  { %9249 = vmatpush1.bf16.msra.mxu0 %v13135_v59  ;;  %v13230_v59 = vld [vmem:[#allocation14 + $0x464] ss:$16 sps:$4 sm:$0xff]  }
 0x502   :  { %9250 = vmatprep.subr.bf16.mxu0 %v13143_v37  ;;  %v13213_v37 = vld [vmem:[#allocation14 + $0x468] ss:$16 sps:$4 sm:$0xff]  }
 0x503   :  { %9126 = vmatpush1.bf16.msra.mxu1 %v13150_v25  ;;  %v13221_v25 = vld [vmem:[#allocation14 + $0x48c] ss:$16 sps:$4 sm:$0xff]  }
 0x504   :  { %9127 = vmatprep.subr.bf16.mxu1 %v13158_v32  ;;  %v13228_v32 = vld [vmem:[#allocation14 + $0x460] ss:$16 sps:$4 sm:$0xff]  }
 0x505   :  { %9251 = vmatpush1.bf16.msra.mxu0 %v13141_v29  ;;  %v13236_v29 = vld [vmem:[#allocation14 + $0x484] ss:$16 sps:$4 sm:$0xff]  }
 0x506   :  { %9252 = vmatprep.subr.bf16.mxu0 %v13149_v28  ;;  %v13219_v28 = vld [vmem:[#allocation14 + $0x488] ss:$16 sps:$4 sm:$0xff]  }
 0x507   :  { %9128 = vmatpush1.bf16.msra.mxu1 %v13156_v63  ;;  %v13227_v63 = vld [vmem:[#allocation14 + $0x4ac] ss:$16 sps:$4 sm:$0xff]  }
 0x508   :  { %9129 = vmatprep.subr.bf16.mxu1 %v13164_v30  ;;  %v13234_v30 = vld [vmem:[#allocation14 + $0x480] ss:$16 sps:$4 sm:$0xff]  }
 0x509   :  { %9253 = vmatpush1.bf16.msra.mxu0 %v13147_v19  ;;  %v13242_v19 = vld [vmem:[#allocation14 + $0x4a4] ss:$16 sps:$4 sm:$0xff]  }
 0x50a   :  { %9254 = vmatprep.subr.bf16.mxu0 %v13155_v40  ;;  %v13225_v40 = vld [vmem:[#allocation14 + $0x4a8] ss:$16 sps:$4 sm:$0xff]  }
 0x50b   :  { %9130 = vmatpush1.bf16.msra.mxu1 %v13162_v24  ;;  %v13233_v24 = vld [vmem:[#allocation14 + $0x4cc] ss:$16 sps:$4 sm:$0xff]  }
 0x50c   :  { %9131 = vmatprep.subr.bf16.mxu1 %v13170_v11  ;;  %v13240_v11 = vld [vmem:[#allocation14 + $0x4a0] ss:$16 sps:$4 sm:$0xff]  }
 0x50d   :  { %9255 = vmatpush1.bf16.msra.mxu0 %v13153_v31  ;;  %v13248_v31 = vld [vmem:[#allocation14 + $0x4c4] ss:$16 sps:$4 sm:$0xff]  }
 0x50e   :  { %9256 = vmatprep.subr.bf16.mxu0 %v13161_v33  ;;  %v13231_v33 = vld [vmem:[#allocation14 + $0x4c8] ss:$16 sps:$4 sm:$0xff]  }
 0x50f   :  { %9132 = vmatpush1.bf16.msra.mxu1 %v13168_v6  ;;  %v13239_v6 = vld [vmem:[#allocation14 + $0x4ec] ss:$16 sps:$4 sm:$0xff]  }
 0x510   :  { %9133 = vmatprep.subr.bf16.mxu1 %v13176_v47  ;;  %v13246_v47 = vld [vmem:[#allocation14 + $0x4c0] ss:$16 sps:$4 sm:$0xff]  }
 0x511   :  { %9257 = vmatpush1.bf16.msra.mxu0 %v13159_v3  ;;  %v13254_v3 = vld [vmem:[#allocation14 + $0x4e4] ss:$16 sps:$4 sm:$0xff]  }
 0x512   :  { %9258 = vmatprep.subr.bf16.mxu0 %v13167_v36  ;;  %v13237_v36 = vld [vmem:[#allocation14 + $0x4e8] ss:$16 sps:$4 sm:$0xff]  }
 0x513   :  { %9134 = vmatpush1.bf16.msra.mxu1 %v13174_v10  ;;  %v13245_v10 = vld [vmem:[#allocation14 + $0x50c] ss:$16 sps:$4 sm:$0xff]  }
 0x514   :  { %9135 = vmatprep.subr.bf16.mxu1 %v13182_v50  ;;  %v13252_v50 = vld [vmem:[#allocation14 + $0x4e0] ss:$16 sps:$4 sm:$0xff]  }
 0x515   :  { %9259 = vmatpush1.bf16.msra.mxu0 %v13165_v44  ;;  %v13260_v44 = vld [vmem:[#allocation14 + $0x504] ss:$16 sps:$4 sm:$0xff]  }
 0x516   :  { %9260 = vmatprep.subr.bf16.mxu0 %v13173_v53  ;;  %v13243_v53 = vld [vmem:[#allocation14 + $0x508] ss:$16 sps:$4 sm:$0xff]  }
 0x517   :  { %9136 = vmatpush1.bf16.msra.mxu1 %v13180_v54  ;;  %v13251_v54 = vld [vmem:[#allocation14 + $0x52c] ss:$16 sps:$4 sm:$0xff]  }
 0x518   :  { %9137 = vmatprep.subr.bf16.mxu1 %v13188_v13  ;;  %v13258_v13 = vld [vmem:[#allocation14 + $0x500] ss:$16 sps:$4 sm:$0xff]  }
 0x519   :  { %9261 = vmatpush1.bf16.msra.mxu0 %v13171_v39  ;;  %v13266_v39 = vld [vmem:[#allocation14 + $0x524] ss:$16 sps:$4 sm:$0xff]  }
 0x51a   :  { %9262 = vmatprep.subr.bf16.mxu0 %v13179_v58  ;;  %v13249_v58 = vld [vmem:[#allocation14 + $0x528] ss:$16 sps:$4 sm:$0xff]  }
 0x51b   :  { %9138 = vmatpush1.bf16.msra.mxu1 %v13186_v16  ;;  %v13257_v16 = vld [vmem:[#allocation14 + $0x54c] ss:$16 sps:$4 sm:$0xff]  }
 0x51c   :  { %9139 = vmatprep.subr.bf16.mxu1 %v13194_v57  ;;  %v13264_v57 = vld [vmem:[#allocation14 + $0x520] ss:$16 sps:$4 sm:$0xff]  }
 0x51d   :  { %9263 = vmatpush1.bf16.msra.mxu0 %v13177_v60  ;;  %v13272_v60 = vld [vmem:[#allocation14 + $0x544] ss:$16 sps:$4 sm:$0xff]  }
 0x51e   :  { %9264 = vmatprep.subr.bf16.mxu0 %v13185_v62  ;;  %v13255_v62 = vld [vmem:[#allocation14 + $0x548] ss:$16 sps:$4 sm:$0xff]  }
 0x51f   :  { %9140 = vmatpush1.bf16.msra.mxu1 %v13192_v2  ;;  %v13263_v2 = vld [vmem:[#allocation14 + $0x56c] ss:$16 sps:$4 sm:$0xff]  }
 0x520   :  { %9141 = vmatprep.subr.bf16.mxu1 %v13200_v12  ;;  %v13270_v12 = vld [vmem:[#allocation14 + $0x540] ss:$16 sps:$4 sm:$0xff]  }
 0x521   :  { %9265 = vmatpush1.bf16.msra.mxu0 %v13183_v0  ;;  %v13278_v0 = vld [vmem:[#allocation14 + $0x564] ss:$16 sps:$4 sm:$0xff]  }
 0x522   :  { %9266 = vmatprep.subr.bf16.mxu0 %v13191_v56  ;;  %v13269_v56 = vld [vmem:[#allocation14 + $0x58c] ss:$16 sps:$4 sm:$0xff]  }
 0x523   :  { %9142 = vmatpush1.bf16.msra.mxu1 %v13198_v4  ;;  %v13284_v4 = vld [vmem:[#allocation14 + $0x584] ss:$16 sps:$4 sm:$0xff]  }
 0x524   :  { %9143 = vmatprep.subr.bf16.mxu1 %v13206_v35  ;;  %v13267_v35 = vld [vmem:[#allocation14 + $0x588] ss:$16 sps:$4 sm:$0xff]  }
 0x525   :  { %9267 = vmatpush1.bf16.msra.mxu0 %v13189_v41  ;;  %v13275_v41 = vld [vmem:[#allocation14 + $0x5ac] ss:$16 sps:$4 sm:$0xff]  }
 0x526   :  { %9277 = vmatprep.subr.bf16.mxu0 %v13197_v38  ;;  %v13290_v38 = vld [vmem:[#allocation14 + $0x5a4] ss:$16 sps:$4 sm:$0xff]  }
 0x527   :  { %9144 = vmatpush1.bf16.msra.mxu1 %v13204_v22  ;;  %v13281_v22 = vld [vmem:[#allocation14 + $0x5cc] ss:$16 sps:$4 sm:$0xff]  }
 0x528   :  { %9269 = vmatmul.mubr.bf16.vlgmr.msra.gmra.mrb[12].mxu0 %v7894_v43  ;;  %9154 = vmatprep.subr.bf16.mxu1 %v13212_v18  ;;  %v13288_v18 = vld [vmem:[#allocation14 + $0x5a0] ss:$16 sps:$4 sm:$0xff]  }
 0x529   :  { %9278 = vmatpush1.bf16.msra.mxu0 %v13195_v46  ;;  %9309 = vmatprep.mubr.bf16.mxu0 %v7897_v17  ;;  %v13296_v46 = vld [vmem:[#allocation14 + $0x5c4] ss:$16 sps:$4 sm:$0xff]  }
 0x52a   :  { %9279 = vmatprep.subr.bf16.mxu0 %v13203_v7  ;;  %9146 = vmatmul.mubr.bf16.vlgmr.msra.gmra.mrb[24].mxu1 %v7894_v43  ;;  %v13279_v43 = vld [vmem:[#allocation14 + $0x5c8] ss:$16 sps:$4 sm:$0xff]   ;;  %v2156_v7 = vrot.slane %v14726_v51, %v14633_v45  ;;  %v13345_v51 = vld [vmem:[#allocation19] ss:$8 sps:$4 sm:$0xff]  }
 0x52b   :  { %9155 = vmatpush1.bf16.msra.mxu1 %v13210_v21  ;;  %9186 = vmatprep.mubr.bf16.mxu1 %v7897_v17  ;;  %v13287_v17 = vld [vmem:[#allocation14 + $0x5ec] ss:$16 sps:$4 sm:$0xff]   ;;  %v13294_v21 = vld [vmem:[#allocation14 + $0x5c0] ss:$16 sps:$4 sm:$0xff]  }
 0x52c   :  { %9156 = vmatprep.subr.bf16.mxu1 %v13218_v8  ;;  %v13302_v8 = vld [vmem:[#allocation14 + $0x5e4] ss:$16 sps:$4 sm:$0xff]   ;;  %v13299_v45 = vld [vmem:[#allocation17 + $0x114] ss:$8 sps:$4 sm:$0xff]  }
 0x52d   :  { %9280 = vmatpush1.bf16.msra.mxu0 %v13201_v52  ;;  %v13285_v52 = vld [vmem:[#allocation14 + $0x5e8] ss:$16 sps:$4 sm:$0xff]  }
 0x52e   :  { %9281 = vmatprep.subr.bf16.mxu0 %v13209_v49  ;;  %v11669_v49 = vadd.f32 %v14704_v34, %v2156_v7  ;;  %v13305_v34 = vld [vmem:[#allocation17 + $0x124] ss:$8 sps:$4 sm:$0xff]   ;;  %v13326_v7 = vld [vmem:[#allocation17 + $0x194] ss:$8 sps:$4 sm:$0xff]  }
 0x52f   :  { %9157 = vmatpush1.bf16.msra.mxu1 %v13216_v14  ;;  %v13293_v14 = vld [vmem:[#allocation17 + $0x104] ss:$8 sps:$4 sm:$0xff]  }
 0x530   :  { %9158 = vmatprep.subr.bf16.mxu1 %v13224_v61  ;;  %v13300_v61 = vld [vmem:[#allocation14 + $0x5e0] ss:$16 sps:$4 sm:$0xff]  }
 0x531   :  { %9282 = vmatpush1.bf16.msra.mxu0 %v13207_v15  ;;  %v13347_v15 = vld [vmem:[#allocation19 + $0x4] ss:$8 sps:$4 sm:$0xff]  }
 0x532   :  { %9283 = vmatprep.subr.bf16.mxu0 %v13215_v9  ;;  %v13291_v9 = vld [vmem:[#allocation17 + $0x100] ss:$8 sps:$4 sm:$0xff]  }
 0x533   :  { %9159 = vmatpush1.bf16.msra.mxu1 %v13222_v27  ;;  %v7896_v27 = vpack.c.bf16 %v11669_v49, %v11669_v49  ;;  %v13372_v49 = vld [vmem:[#allocation19 + $0x90] ss:$8 sps:$4 sm:$0xff]  }
 0x534   :  { %9160 = vmatprep.subr.bf16.mxu1 %v13230_v59  ;;  %v13350_v59 = vld [vmem:[#allocation19 + $0x14] ss:$8 sps:$4 sm:$0xff]  }
 0x535   :  { %9284 = vmatpush1.bf16.msra.mxu0 %v13213_v37  ;;  %v13297_v37 = vld [vmem:[#allocation17 + $0x110] ss:$8 sps:$4 sm:$0xff]  }
 0x536   :  { %9285 = vmatprep.subr.bf16.mxu0 %v13221_v25  ;;  %v13348_v25 = vld [vmem:[#allocation19 + $0x10] ss:$8 sps:$4 sm:$0xff]  }
 0x537   :  { %9161 = vmatpush1.bf16.msra.mxu1 %v13228_v32  ;;  %v13353_v32 = vld [vmem:[#allocation19 + $0x24] ss:$8 sps:$4 sm:$0xff]  }
 0x538   :  { %9162 = vmatprep.subr.bf16.mxu1 %v13236_v29  ;;  %v13303_v29 = vld [vmem:[#allocation17 + $0x120] ss:$8 sps:$4 sm:$0xff]  }
 0x539   :  { %9286 = vmatpush1.bf16.msra.mxu0 %v13219_v28  ;;  %v13308_v28 = vld [vmem:[#allocation17 + $0x134] ss:$8 sps:$4 sm:$0xff]  }
 0x53a   :  { %9287 = vmatprep.subr.bf16.mxu0 %v13227_v63  ;;  %v13351_v63 = vld [vmem:[#allocation19 + $0x20] ss:$8 sps:$4 sm:$0xff]  }
 0x53b   :  { %9163 = vmatpush1.bf16.msra.mxu1 %v13234_v30  ;;  %v13356_v30 = vld [vmem:[#allocation19 + $0x34] ss:$8 sps:$4 sm:$0xff]  }
 0x53c   :  { %9164 = vmatprep.subr.bf16.mxu1 %v13242_v19  ;;  %v13306_v19 = vld [vmem:[#allocation17 + $0x130] ss:$8 sps:$4 sm:$0xff]  }
 0x53d   :  { %9288 = vmatpush1.bf16.msra.mxu0 %v13225_v40  ;;  %v13311_v40 = vld [vmem:[#allocation17 + $0x144] ss:$8 sps:$4 sm:$0xff]  }
 0x53e   :  { %9289 = vmatprep.subr.bf16.mxu0 %v13233_v24  ;;  %v13354_v24 = vld [vmem:[#allocation19 + $0x30] ss:$8 sps:$4 sm:$0xff]  }
 0x53f   :  { %9165 = vmatpush1.bf16.msra.mxu1 %v13240_v11  ;;  %v13359_v11 = vld [vmem:[#allocation19 + $0x44] ss:$8 sps:$4 sm:$0xff]  }
 0x540   :  { %9166 = vmatprep.subr.bf16.mxu1 %v13248_v31  ;;  %v13309_v31 = vld [vmem:[#allocation17 + $0x140] ss:$8 sps:$4 sm:$0xff]  }
 0x541   :  { %9290 = vmatpush1.bf16.msra.mxu0 %v13231_v33  ;;  %v14747_v33 = vld [vmem:[#allocation13] sm:$0xf] }
 0x542   :  { %9291 = vmatprep.subr.bf16.mxu0 %v13239_v6  ;;  %v13314_v6 = vld [vmem:[#allocation17 + $0x154] ss:$8 sps:$4 sm:$0xff]  }
 0x543   :  { %9167 = vmatpush1.bf16.msra.mxu1 %v13246_v47  ;;  %v13357_v47 = vld [vmem:[#allocation19 + $0x40] ss:$8 sps:$4 sm:$0xff]  }
 0x544   :  { %9168 = vmatprep.subr.bf16.mxu1 %v13254_v3  ;;  %v13362_v3 = vld [vmem:[#allocation19 + $0x54] ss:$8 sps:$4 sm:$0xff]  }
 0x545   :  { %9292 = vmatpush1.bf16.msra.mxu0 %v13237_v36  ;;  %v4671_v36 = vrot.slane %v14747_v33, %v14626_v48 }
 0x546   :  { %9293 = vmatprep.subr.bf16.mxu0 %v13245_v10  ;;  %v13312_v10 = vld [vmem:[#allocation17 + $0x150] ss:$8 sps:$4 sm:$0xff]  }
 0x547   :  { %9169 = vmatpush1.bf16.msra.mxu1 %v13252_v50  ;;  %v13317_v50 = vld [vmem:[#allocation17 + $0x164] ss:$8 sps:$4 sm:$0xff]  }
 0x548   :  { %9170 = vmatprep.subr.bf16.mxu1 %v13260_v44  ;;  %v4659_v44 = vrot.slane %v14747_v33, %v14694_v26 }
 0x549   :  { %9294 = vmatpush1.bf16.msra.mxu0 %v13243_v53 }
 0x54a   :  { %9295 = vmatprep.subr.bf16.mxu0 %v13251_v54  ;;  %v4663_v54 = vrot.slane %v14747_v33, %v14618_v55 }
 0x54b   :  { %9171 = vmatpush1.bf16.msra.mxu1 %v13258_v13  ;;  %v13360_v13 = vld [vmem:[#allocation19 + $0x50] ss:$8 sps:$4 sm:$0xff]  }
 0x54c   :  { %9172 = vmatprep.subr.bf16.mxu1 %v13266_v39 }
 0x54d   :  { %9296 = vmatpush1.bf16.msra.mxu0 %v13249_v58  ;;  %v13365_v58 = vld [vmem:[#allocation19 + $0x64] ss:$8 sps:$4 sm:$0xff]  }
 0x54e   :  { %9297 = vmatprep.subr.bf16.mxu0 %v13257_v16 }
 0x54f   :  { %9173 = vmatpush1.bf16.msra.mxu1 %v13264_v57 }
 0x550   :  { %9174 = vmatprep.subr.bf16.mxu1 %v13272_v60  ;;  %v13315_v60 = vld [vmem:[#allocation17 + $0x160] ss:$8 sps:$4 sm:$0xff]  }
 0x551   :  { %9298 = vmatpush1.bf16.msra.mxu0 %v13255_v62 }
 0x552   :  { %9299 = vmatprep.subr.bf16.mxu0 %v13263_v2 }
 0x553   :  { %9175 = vmatpush1.bf16.msra.mxu1 %v13270_v12  ;;  %v13320_v12 = vld [vmem:[#allocation17 + $0x174] ss:$8 sps:$4 sm:$0xff]  }
 0x554   :  { %9176 = vmatprep.subr.bf16.mxu1 %v13278_v0 }
 0x555   :  { %9300 = vmatpush1.bf16.msra.mxu0 %v13261_v23 }
 0x556   :  { %9301 = vmatprep.subr.bf16.mxu0 %v13269_v56 }
 0x557   :  { %9177 = vmatpush1.bf16.msra.mxu1 %v13276_v20 }
 0x558   :  { %9178 = vmatprep.subr.bf16.mxu1 %v13284_v4 }
 0x559   :  { %9302 = vmatpush1.bf16.msra.mxu0 %v13267_v35  ;;  %v13363_v35 = vld [vmem:[#allocation19 + $0x60] ss:$8 sps:$4 sm:$0xff]  }
 0x55a   :  { %9303 = vmatprep.subr.bf16.mxu0 %v13275_v41 }
 0x55b   :  { %9179 = vmatpush1.bf16.msra.mxu1 %v13282_v42  ;;  %v13368_v42 = vld [vmem:[#allocation19 + $0x74] ss:$8 sps:$4 sm:$0xff]  }
 0x55c   :  { %9180 = vmatprep.subr.bf16.mxu1 %v13290_v38 }
 0x55d   :  { %9304 = vmatpush1.bf16.msra.mxu0 %v13273_v1  ;;  %v13318_v1 = vld [vmem:[#allocation17 + $0x170] ss:$8 sps:$4 sm:$0xff]  }
 0x55e   :  { %9305 = vmatprep.subr.bf16.mxu0 %v13281_v22  ;;  %v13323_v22 = vld [vmem:[#allocation17 + $0x184] ss:$8 sps:$4 sm:$0xff]  }
 0x55f   :  { %9181 = vmatpush1.bf16.msra.mxu1 %v13288_v18  ;;  %v13366_v18 = vld [vmem:[#allocation19 + $0x70] ss:$8 sps:$4 sm:$0xff]  }
 0x560   :  { %9182 = vmatprep.subr.bf16.mxu1 %v13296_v46  ;;  %v13371_v46 = vld [vmem:[#allocation19 + $0x84] ss:$8 sps:$4 sm:$0xff]  }
 0x561   :  { %9306 = vmatpush1.bf16.msra.mxu0 %v13279_v43  ;;  %v13321_v43 = vld [vmem:[#allocation17 + $0x180] ss:$8 sps:$4 sm:$0xff]  }
 0x562   :  { %9307 = vmatprep.subr.bf16.mxu0 %v13287_v17  ;;  %v13369_v17 = vld [vmem:[#allocation19 + $0x80] ss:$8 sps:$4 sm:$0xff]  }
 0x563   :  { %9183 = vmatpush1.bf16.msra.mxu1 %v13294_v21  ;;  %v13374_v21 = vld [vmem:[#allocation19 + $0x94] ss:$8 sps:$4 sm:$0xff]  }
 0x564   :  { %9184 = vmatprep.subr.bf16.mxu1 %v13302_v8  ;;  %v13324_v8 = vld [vmem:[#allocation17 + $0x190] ss:$8 sps:$4 sm:$0xff]  }
 0x565   :  { %9308 = vmatpush1.bf16.msra.mxu0 %v13285_v52  ;;  %v13329_v52 = vld [vmem:[#allocation17 + $0x1a4] ss:$8 sps:$4 sm:$0xff]  }
 0x566   :  { %10225 = vmatprep.subr.bf16.mxu0 %v13293_v14  ;;  %v13377_v14 = vld [vmem:[#allocation19 + $0xa4] ss:$8 sps:$4 sm:$0xff]  }
 0x567   :  { %9185 = vmatpush1.bf16.msra.mxu1 %v13300_v61  ;;  %v13327_v61 = vld [vmem:[#allocation17 + $0x1a0] ss:$8 sps:$4 sm:$0xff]  }
 0x568   :  { %9310 = vmatmul.mubr.bf16.vlgmr.msra.gmra.mrb[12].mxu0 %v7896_v27  ;;  %9782 = vmatprep.subr.bf16.mxu1 %v13347_v15  ;;  %v13332_v15 = vld [vmem:[#allocation17 + $0x1b4] ss:$8 sps:$4 sm:$0xff]  }
 0x569   :  { %10226 = vmatpush1.bf16.msra.mxu0 %v13291_v9  ;;  %v13375_v9 = vld [vmem:[#allocation19 + $0xa0] ss:$8 sps:$4 sm:$0xff]  }
 0x56a   :  { %10227 = vmatprep.subr.bf16.mxu0 %v13299_v45  ;;  %9187 = vmatmul.mubr.bf16.vlgmr.msra.gmra.mrb[24].mxu1 %v7896_v27  ;;  %v13330_v27 = vld [vmem:[#allocation17 + $0x1b0] ss:$8 sps:$4 sm:$0xff]   ;;  %v13335_v45 = vld [vmem:[#allocation17 + $0x1c4] ss:$8 sps:$4 sm:$0xff]  }
 0x56b   :  { %9783 = vmatpush1.bf16.msra.mxu1 %v13345_v51  ;;  %v13333_v51 = vld [vmem:[#allocation17 + $0x1c0] ss:$8 sps:$4 sm:$0xff]  }
 0x56c   :  { %9784 = vmatprep.subr.bf16.mxu1 %v13350_v59  ;;  %v13338_v59 = vld [vmem:[#allocation17 + $0x1d4] ss:$8 sps:$4 sm:$0xff]  }
 0x56d   :  { %10228 = vmatpush1.bf16.msra.mxu0 %v13297_v37  ;;  %v13336_v37 = vld [vmem:[#allocation17 + $0x1d0] ss:$8 sps:$4 sm:$0xff]  }
 0x56e   :  { %10229 = vmatprep.subr.bf16.mxu0 %v13305_v34  ;;  %v4667_v34 = vrot.slane %v14747_v33, %v14621_v5  ;;  %v13384_v33 = vld [vmem:[#allocation19 + $0xd0] ss:$8 sps:$4 sm:$0xff]  }
 0x56f   :  { %9785 = vmatpush1.bf16.msra.mxu1 %v13348_v25  ;;  %v13341_v25 = vld [vmem:[#allocation17 + $0x1e4] ss:$8 sps:$4 sm:$0xff]  }
 0x570   :  { %9786 = vmatprep.subr.bf16.mxu1 %v13353_v32  ;;  %v13339_v32 = vld [vmem:[#allocation17 + $0x1e0] ss:$8 sps:$4 sm:$0xff]  }
 0x571   :  { %10230 = vmatpush1.bf16.msra.mxu0 %v13303_v29 }
 0x572   :  { %10231 = vmatprep.subr.bf16.mxu0 %v13308_v28  ;;  %v13344_v28 = vld [vmem:[#allocation17 + $0x1f4] ss:$8 sps:$4 sm:$0xff]  }
 0x573   :  { %9787 = vmatpush1.bf16.msra.mxu1 %v13351_v63  ;;  %v13342_v63 = vld [vmem:[#allocation17 + $0x1f0] ss:$8 sps:$4 sm:$0xff]  }
 0x574   :  { %9788 = vmatprep.subr.bf16.mxu1 %v13356_v30 }
 0x575   :  { %10232 = vmatpush1.bf16.msra.mxu0 %v13306_v19 }
 0x576   :  { %10233 = vmatprep.subr.bf16.mxu0 %v13311_v40  ;;  %v13380_v40 = vld [vmem:[#allocation19 + $0xb4] ss:$8 sps:$4 sm:$0xff]  }
 0x577   :  { %9789 = vmatpush1.bf16.msra.mxu1 %v13354_v24  ;;  %v13378_v24 = vld [vmem:[#allocation19 + $0xb0] ss:$8 sps:$4 sm:$0xff]  }
 0x578   :  { %9790 = vmatprep.subr.bf16.mxu1 %v13359_v11  ;;  %v13383_v11 = vld [vmem:[#allocation19 + $0xc4] ss:$8 sps:$4 sm:$0xff]  }
 0x579   :  { %10234 = vmatpush1.bf16.msra.mxu0 %v13309_v31  ;;  %v13381_v31 = vld [vmem:[#allocation19 + $0xc0] ss:$8 sps:$4 sm:$0xff]  }
 0x57a   :  { %10235 = vmatprep.subr.bf16.mxu0 %v13314_v6  ;;  %v13386_v6 = vld [vmem:[#allocation19 + $0xd4] ss:$8 sps:$4 sm:$0xff]  }
 0x57b   :  { %v14753_v53 = vpop.f32.mrb[8].mxu0  ;;  %9791 = vmatpush1.bf16.msra.mxu1 %v13357_v47  ;;  %v13389_v47 = vld [vmem:[#allocation19 + $0xe4] ss:$8 sps:$4 sm:$0xff]  }
 0x57c   :  { %v7887_v39 = vpop.f32.mrb[9].mxu0  ;;  %9792 = vmatprep.subr.bf16.mxu1 %v13362_v3  ;;  %v11673_v29 = vadd.f32 %v14753_v53, %v4667_v34  ;;  %v13387_v3 = vld [vmem:[#allocation19 + $0xe0] ss:$8 sps:$4 sm:$0xff]   ;;  %v13425_v34 = vld [vmem:[#allocation19 + $0x1a4] ss:$8 sps:$4 sm:$0xff]  }
 0x57d   :  { %v11674_v16 = vadd.f32 %v7887_v39, %v4671_v36  ;;  %v7889_v57 = vpop.f32.mrb[10].mxu0  ;;  %10236 = vmatpush1.bf16.msra.mxu0 %v13312_v10  ;;  %v7557_v62 = vpop.f32.mrb[20].mxu1  ;;  %v13392_v36 = vld [vmem:[#allocation19 + $0xf4] ss:$8 sps:$4 sm:$0xff]   ;;  %v13390_v10 = vld [vmem:[#allocation19 + $0xf0] ss:$8 sps:$4 sm:$0xff]  }
 0x57e   :  { %v7890_v2 = vpop.f32.mrb[11].mxu0  ;;  %10237 = vmatprep.subr.bf16.mxu0 %v13317_v50  ;;  %v14757_v0 = vadd.f32 %v7557_v62, %v4659_v44  ;;  %v7559_v23 = vpop.f32.mrb[21].mxu1  ;;  %v9320_v30 = vmax.f32 %v11673_v29, 0.0  ;;  %v13395_v50 = vld [vmem:[#allocation19 + $0x104] ss:$8 sps:$4 sm:$0xff]  }
 0x57f   :  { %v9321_v56 = vmax.f32 %v11674_v16, 0.0  ;;  %v14759_v20 = vadd.f32 %v7559_v23, %v4663_v54  ;;  %v7561_v4 = vpop.f32.mrb[22].mxu1  ;;  %9793 = vmatpush1.bf16.msra.mxu1 %v13360_v13  ;;  %v14764_v44 = vld [vmem:[#allocation16] sm:$0xf]  ;;  %v13426_v29 = vld [vmem:[#allocation19 + $0x1b0] ss:$8 sps:$4 sm:$0xff]  }
 0x580   :  { %v7562_v41 = vpop.f32.mrb[23].mxu1  ;;  %9794 = vmatprep.subr.bf16.mxu1 %v13365_v58  ;;  %v9328_v19 = vpack.c.bf16 %v9320_v30, %v9320_v30  ;;  %v8107_v53 = vrot.slane %v14764_v44, %v14626_v48  ;;  %v8095_v54 = vrot.slane %v14764_v44, %v14694_v26  ;;  %v8099_v39 = vrot.slane %v14764_v44, %v14618_v55  ;;  %v13434_v30 = vld [vmem:[#allocation19 + $0x1d4] ss:$8 sps:$4 sm:$0xff]  }
 0x581   :  { %v9329_v38 = vpack.c.bf16 %v9321_v56, %v9321_v56  ;;  %10238 = vmatpush1.bf16.msra.mxu0 %v13315_v60 }
 0x582   :  { %10239 = vmatprep.subr.bf16.mxu0 %v13320_v12 }
 0x583   :  { %10257 = vmatprep.mubr.bf16.mxu0 %v9329_v38  ;;  %9795 = vmatpush1.bf16.msra.mxu1 %v13363_v35  ;;  %v13393_v38 = vld [vmem:[#allocation19 + $0x100] ss:$8 sps:$4 sm:$0xff]  }
 0x584   :  { %9796 = vmatprep.subr.bf16.mxu1 %v13368_v42 }
 0x585   :  { %10240 = vmatpush1.bf16.msra.mxu0 %v13318_v1 }
 0x586   :  { %10241 = vmatprep.subr.bf16.mxu0 %v13323_v22  ;;  %v13398_v22 = vld [vmem:[#allocation19 + $0x114] ss:$8 sps:$4 sm:$0xff]  }
 0x587   :  { %9797 = vmatpush1.bf16.msra.mxu1 %v13366_v18 }
 0x588   :  { %9798 = vmatprep.subr.bf16.mxu1 %v13371_v46  ;;  %v13396_v46 = vld [vmem:[#allocation19 + $0x110] ss:$8 sps:$4 sm:$0xff]  }
 0x589   :  { %10242 = vmatpush1.bf16.msra.mxu0 %v13321_v43  ;;  %v13401_v43 = vld [vmem:[#allocation19 + $0x124] ss:$8 sps:$4 sm:$0xff]  }
 0x58a   :  { %10243 = vmatprep.subr.bf16.mxu0 %v13326_v7  ;;  %v13399_v7 = vld [vmem:[#allocation19 + $0x120] ss:$8 sps:$4 sm:$0xff]  }
 0x58b   :  { %9799 = vmatpush1.bf16.msra.mxu1 %v13369_v17  ;;  %v13404_v17 = vld [vmem:[#allocation19 + $0x134] ss:$8 sps:$4 sm:$0xff]  }
 0x58c   :  { %9800 = vmatprep.subr.bf16.mxu1 %v13374_v21  ;;  %v13402_v21 = vld [vmem:[#allocation19 + $0x130] ss:$8 sps:$4 sm:$0xff]  }
 0x58d   :  { %10244 = vmatpush1.bf16.msra.mxu0 %v13324_v8  ;;  %v13407_v8 = vld [vmem:[#allocation19 + $0x144] ss:$8 sps:$4 sm:$0xff]  }
 0x58e   :  { %10245 = vmatprep.subr.bf16.mxu0 %v13329_v52  ;;  %v13405_v52 = vld [vmem:[#allocation19 + $0x140] ss:$8 sps:$4 sm:$0xff]  }
 0x58f   :  { %9801 = vmatpush1.bf16.msra.mxu1 %v13372_v49  ;;  %v13410_v49 = vld [vmem:[#allocation19 + $0x154] ss:$8 sps:$4 sm:$0xff]  }
 0x590   :  { %9802 = vmatprep.subr.bf16.mxu1 %v13377_v14  ;;  %v13408_v14 = vld [vmem:[#allocation19 + $0x150] ss:$8 sps:$4 sm:$0xff]  }
 0x591   :  { %10246 = vmatpush1.bf16.msra.mxu0 %v13327_v61  ;;  %v13413_v61 = vld [vmem:[#allocation19 + $0x164] ss:$8 sps:$4 sm:$0xff]  }
 0x592   :  { %10247 = vmatprep.subr.bf16.mxu0 %v13332_v15  ;;  %v13411_v15 = vld [vmem:[#allocation19 + $0x160] ss:$8 sps:$4 sm:$0xff]  }
 0x593   :  { %9803 = vmatpush1.bf16.msra.mxu1 %v13375_v9  ;;  %v13416_v9 = vld [vmem:[#allocation19 + $0x174] ss:$8 sps:$4 sm:$0xff]  }
 0x594   :  { %9804 = vmatprep.subr.bf16.mxu1 %v13380_v40  ;;  %v8103_v40 = vrot.slane %v14764_v44, %v14621_v5  ;;  %v9319_v5 = vmax.f32 %v14759_v20, 0.0  ;;  %v13441_v44 = vld [vmem:[#allocation17] ss:$8 sps:$4 sm:$0xff]   ;;  %v13455_v20 = vld [vmem:[#allocation17 + $0x44] ss:$8 sps:$4 sm:$0xff]  }
 0x595   :  { %10248 = vmatpush1.bf16.msra.mxu0 %v13330_v27  ;;  %v13414_v27 = vld [vmem:[#allocation19 + $0x170] ss:$8 sps:$4 sm:$0xff]  }
 0x596   :  { %10249 = vmatprep.subr.bf16.mxu0 %v13335_v45  ;;  %v13419_v45 = vld [vmem:[#allocation19 + $0x184] ss:$8 sps:$4 sm:$0xff]  }
 0x597   :  { %9805 = vmatpush1.bf16.msra.mxu1 %v13378_v24  ;;  %v13437_v24 = vld [vmem:[#allocation19 + $0x1e4] ss:$8 sps:$4 sm:$0xff]  }
 0x598   :  { %9806 = vmatprep.subr.bf16.mxu1 %v13383_v11 }
 0x599   :  { %10250 = vmatpush1.bf16.msra.mxu0 %v13333_v51  ;;  %v13417_v51 = vld [vmem:[#allocation19 + $0x180] ss:$8 sps:$4 sm:$0xff]  }
 0x59a   :  { %10251 = vmatprep.subr.bf16.mxu0 %v13338_v59  ;;  %v13422_v59 = vld [vmem:[#allocation19 + $0x194] ss:$8 sps:$4 sm:$0xff]  }
 0x59b   :  { %9807 = vmatpush1.bf16.msra.mxu1 %v13381_v31  ;;  %v13435_v31 = vld [vmem:[#allocation19 + $0x1e0] ss:$8 sps:$4 sm:$0xff]  }
 0x59c   :  { %9808 = vmatprep.subr.bf16.mxu1 %v13386_v6 }
 0x59d   :  { %10252 = vmatpush1.bf16.msra.mxu0 %v13336_v37  ;;  %v13420_v37 = vld [vmem:[#allocation19 + $0x190] ss:$8 sps:$4 sm:$0xff]  }
 0x59e   :  { %10253 = vmatprep.subr.bf16.mxu0 %v13341_v25  ;;  %v13423_v25 = vld [vmem:[#allocation19 + $0x1a0] ss:$8 sps:$4 sm:$0xff]  }
 0x59f   :  { %9809 = vmatpush1.bf16.msra.mxu1 %v13384_v33 }
 0x5a0   :  { %9810 = vmatprep.subr.bf16.mxu1 %v13389_v47  ;;  %v13440_v47 = vld [vmem:[#allocation19 + $0x1f4] ss:$8 sps:$4 sm:$0xff]  }
 0x5a1   :  { %10254 = vmatpush1.bf16.msra.mxu0 %v13339_v32  ;;  %v13428_v32 = vld [vmem:[#allocation19 + $0x1b4] ss:$8 sps:$4 sm:$0xff]  }
 0x5a2   :  { %10255 = vmatprep.subr.bf16.mxu0 %v13344_v28  ;;  %v13431_v28 = vld [vmem:[#allocation19 + $0x1c4] ss:$8 sps:$4 sm:$0xff]  }
 0x5a3   :  { %9811 = vmatpush1.bf16.msra.mxu1 %v13387_v3 }
 0x5a4   :  { %9812 = vmatprep.subr.bf16.mxu1 %v13392_v36 }
 0x5a5   :  { %10256 = vmatpush1.bf16.msra.mxu0 %v13342_v63  ;;  %v13429_v63 = vld [vmem:[#allocation19 + $0x1c0] ss:$8 sps:$4 sm:$0xff]  }
 0x5a7   :  { %9813 = vmatpush1.bf16.msra.mxu1 %v13390_v10  ;;  %v13438_v10 = vld [vmem:[#allocation19 + $0x1f0] ss:$8 sps:$4 sm:$0xff]  }
 0x5a8   :  { %10258 = vmatmul.mubr.bf16.vlgmr.msra.gmra.mrb[16].mxu0 %v9328_v19  ;;  %9823 = vmatprep.subr.bf16.mxu1 %v13395_v50  ;;  %v13432_v19 = vld [vmem:[#allocation19 + $0x1d0] ss:$8 sps:$4 sm:$0xff]  }
 0x63b   :  { %v14770_v13 = vpop.f32.mrb[12].mxu0 }
 0x63c   :  { %v9313_v58 = vpop.f32.mrb[13].mxu0  ;;  %v11677_v33 = vadd.f32 %v14770_v13, %v8103_v40  ;;  %v13444_v13 = vld [vmem:[#allocation17 + $0x10] ss:$8 sps:$4 sm:$0xff]  }
 0x63d   :  { %v11678_v16 = vadd.f32 %v9313_v58, %v8107_v53  ;;  %v9315_v57 = vpop.f32.mrb[14].mxu0  ;;  %v9188_v60 = vpop.f32.mrb[24].mxu1  ;;  %v13443_v53 = vld [vmem:[#allocation17 + $0x4] ss:$8 sps:$4 sm:$0xff]   ;;  %v9327_v58 = vpack.c.bf16 %v9319_v5, %v9319_v5 }
 0x63e   :  { %v9316_v62 = vpop.f32.mrb[15].mxu0  ;;  %v11675_v2 = vadd.f32 %v9188_v60, %v8095_v54  ;;  %v9190_v12 = vpop.f32.mrb[25].mxu1  ;;  %v9324_v50 = vmax.f32 %v11677_v33, 0.0  ;;  %v13447_v57 = vld [vmem:[#allocation17 + $0x20] ss:$8 sps:$4 sm:$0xff]   ;;  %v13502_v33 = vld [vmem:[#allocation22 + $0x30] sm:$0xff]  }
 0x63f   :  { %v11676_v23 = vadd.f32 %v9190_v12, %v8099_v39  ;;  %v9192_v56 = vpop.f32.mrb[26].mxu1  ;;  %v9325_v48 = vmax.f32 %v11678_v16, 0.0  ;;  %v13446_v39 = vld [vmem:[#allocation17 + $0x14] ss:$8 sps:$4 sm:$0xff]   ;;  %v13449_v16 = vld [vmem:[#allocation17 + $0x24] ss:$8 sps:$4 sm:$0xff]  }
 0x640   :  { %v9322_v4 = vmax.f32 %v11675_v2, 0.0  ;;  %v9193_v35 = vpop.f32.mrb[27].mxu1  ;;  %v9396_v54 = vpack.c.bf16 %v9324_v50, %v9324_v50  ;;  %v13452_v60 = vld [vmem:[#allocation17 + $0x34] ss:$8 sps:$4 sm:$0xff]   ;;  %v13450_v62 = vld [vmem:[#allocation17 + $0x30] ss:$8 sps:$4 sm:$0xff]  }
 0x641   :  { %v9323_v41 = vmax.f32 %v11676_v23, 0.0  ;;  %v9397_v18 = vpack.c.bf16 %v9325_v48, %v9325_v48  ;;  %v13453_v2 = vld [vmem:[#allocation17 + $0x40] ss:$8 sps:$4 sm:$0xff]   ;;  %v13458_v12 = vld [vmem:[#allocation17 + $0x54] ss:$8 sps:$4 sm:$0xff]  }
 0x642   :  { %v9394_v1 = vpack.c.bf16 %v9322_v4, %v9322_v4  ;;  %v13456_v23 = vld [vmem:[#allocation17 + $0x50] ss:$8 sps:$4 sm:$0xff]   ;;  %v13461_v56 = vld [vmem:[#allocation17 + $0x64] ss:$8 sps:$4 sm:$0xff]   ;;  %v13459_v4 = vld [vmem:[#allocation17 + $0x60] ss:$8 sps:$4 sm:$0xff]  }
 0x643   :  { %v9395_v42 = vpack.c.bf16 %v9323_v41, %v9323_v41  ;;  %v13464_v35 = vld [vmem:[#allocation17 + $0x74] ss:$8 sps:$4 sm:$0xff]   ;;  %v13462_v48 = vld [vmem:[#allocation17 + $0x70] ss:$8 sps:$4 sm:$0xff]   ;;  %v13467_v41 = vld [vmem:[#allocation17 + $0x84] ss:$8 sps:$4 sm:$0xff]  }
 0x644   :  { %v13499_v40 = vld [vmem:[#allocation22 + $0x68] sm:$0xff]  }
 0x645   :  { %9814 = vmatprep.mubr.bf16.mxu1 %v9395_v42  ;;  %v13465_v42 = vld [vmem:[#allocation17 + $0x80] ss:$8 sps:$4 sm:$0xff]  }
 0x646   :  { %9815 = vmatmul.mubr.bf16.vlgmr.msra.gmra.mrb[28].mxu1 %v9394_v1  ;;  %v13468_v1 = vld [vmem:[#allocation17 + $0x90] ss:$8 sps:$4 sm:$0xff]  }
 0x647   :  { %9824 = vmatpush1.bf16.msra.mxu1 %v13393_v38  ;;  %9855 = vmatprep.mubr.bf16.mxu1 %v9397_v18  ;;  %v13470_v38 = vld [vmem:[#allocation17 + $0x94] ss:$8 sps:$4 sm:$0xff]   ;;  %v13471_v18 = vld [vmem:[#allocation17 + $0xa0] ss:$8 sps:$4 sm:$0xff]  }
 0x648   :  { %9825 = vmatprep.subr.bf16.mxu1 %v13398_v22  ;;  %v13473_v22 = vld [vmem:[#allocation17 + $0xa4] ss:$8 sps:$4 sm:$0xff]  }
 0x64b   :  { %9826 = vmatpush1.bf16.msra.mxu1 %v13396_v46  ;;  %v13476_v46 = vld [vmem:[#allocation17 + $0xb4] ss:$8 sps:$4 sm:$0xff]  }
 0x64c   :  { %9827 = vmatprep.subr.bf16.mxu1 %v13401_v43  ;;  %v13474_v43 = vld [vmem:[#allocation17 + $0xb0] ss:$8 sps:$4 sm:$0xff]  }
 0x64f   :  { %9828 = vmatpush1.bf16.msra.mxu1 %v13399_v7  ;;  %v13479_v7 = vld [vmem:[#allocation17 + $0xc4] ss:$8 sps:$4 sm:$0xff]  }
 0x650   :  { %9829 = vmatprep.subr.bf16.mxu1 %v13404_v17  ;;  %v13477_v17 = vld [vmem:[#allocation17 + $0xc0] ss:$8 sps:$4 sm:$0xff]  }
 0x653   :  { %9830 = vmatpush1.bf16.msra.mxu1 %v13402_v21  ;;  %v13482_v21 = vld [vmem:[#allocation17 + $0xd4] ss:$8 sps:$4 sm:$0xff]  }
 0x654   :  { %9831 = vmatprep.subr.bf16.mxu1 %v13407_v8  ;;  %v13480_v8 = vld [vmem:[#allocation17 + $0xd0] ss:$8 sps:$4 sm:$0xff]  }
 0x657   :  { %9832 = vmatpush1.bf16.msra.mxu1 %v13405_v52  ;;  %v13485_v52 = vld [vmem:[#allocation17 + $0xe4] ss:$8 sps:$4 sm:$0xff]  }
 0x658   :  { %9833 = vmatprep.subr.bf16.mxu1 %v13410_v49  ;;  %v13483_v49 = vld [vmem:[#allocation17 + $0xe0] ss:$8 sps:$4 sm:$0xff]  }
 0x65b   :  { %9834 = vmatpush1.bf16.msra.mxu1 %v13408_v14  ;;  %v13488_v14 = vld [vmem:[#allocation17 + $0xf4] ss:$8 sps:$4 sm:$0xff]  }
 0x65c   :  { %9835 = vmatprep.subr.bf16.mxu1 %v13413_v61  ;;  %v13486_v61 = vld [vmem:[#allocation17 + $0xf0] ss:$8 sps:$4 sm:$0xff]  }
 0x65f   :  { %9836 = vmatpush1.bf16.msra.mxu1 %v13411_v15  ;;  %v9318_v15 = vmax.f32 %v14757_v0, 0.0  ;;  %v13497_v0 = vld [vmem:[#allocation22 + $0x60] sm:$0xff]  }
 0x660   :  { %9837 = vmatprep.subr.bf16.mxu1 %v13416_v9 }
 0x661   :  { %v9326_v9 = vpack.c.bf16 %v9318_v15, %v9318_v15 }
 0x663   :  { %9838 = vmatpush1.bf16.msra.mxu1 %v13414_v27  ;;  %v13489_v27 = vld [vmem:[#allocation22 + $0x40] sm:$0xff]  }
 0x664   :  { %9839 = vmatprep.subr.bf16.mxu1 %v13419_v45  ;;  %v13490_v45 = vld [vmem:[#allocation22] sm:$0xff]  }
 0x667   :  { %9840 = vmatpush1.bf16.msra.mxu1 %v13417_v51  ;;  %v13491_v51 = vld [vmem:[#allocation22 + $0x48] sm:$0xff]  }
 0x668   :  { %9841 = vmatprep.subr.bf16.mxu1 %v13422_v59  ;;  %v13492_v59 = vld [vmem:[#allocation22 + $0x8] sm:$0xff]  }
 0x66b   :  { %9842 = vmatpush1.bf16.msra.mxu1 %v13420_v37  ;;  %v13493_v37 = vld [vmem:[#allocation22 + $0x50] sm:$0xff]  }
 0x66c   :  { %9843 = vmatprep.subr.bf16.mxu1 %v13425_v34  ;;  %v13494_v34 = vld [vmem:[#allocation22 + $0x10] sm:$0xff]  }
 0x66f   :  { %9844 = vmatpush1.bf16.msra.mxu1 %v13423_v25  ;;  %v13495_v25 = vld [vmem:[#allocation22 + $0x58] sm:$0xff]  }
 0x670   :  { %9845 = vmatprep.subr.bf16.mxu1 %v13428_v32  ;;  %v13496_v32 = vld [vmem:[#allocation22 + $0x18] sm:$0xff]  }
 0x673   :  { %9846 = vmatpush1.bf16.msra.mxu1 %v13426_v29  ;;  %v13498_v29 = vld [vmem:[#allocation22 + $0x20] sm:$0xff]  }
 0x674   :  { %9847 = vmatprep.subr.bf16.mxu1 %v13431_v28 }
 0x677   :  { %9848 = vmatpush1.bf16.msra.mxu1 %v13429_v63 }
 0x678   :  { %9849 = vmatprep.subr.bf16.mxu1 %v13434_v30 }
 0x67b   :  { %v14776_v11 = vpop.f32.mrb[16].mxu0  ;;  %9850 = vmatpush1.bf16.msra.mxu1 %v13432_v19 }
 0x67c   :  { %v14779_v6 = vpop.f32.mrb[17].mxu0  ;;  %9851 = vmatprep.subr.bf16.mxu1 %v13437_v24  ;;  %v13500_v24 = vld [vmem:[#allocation22 + $0x28] sm:$0xff]  }
 0x67d   :  { %v10263_v3 = vpop.f32.mrb[18].mxu0 }
 0x67e   :  { %v10264_v36 = vpop.f32.mrb[19].mxu0  ;;  %v13504_v3 = vld [vmem:[#allocation22 + $0x38] sm:$0xff]  }
 0x67f   :  { %9852 = vmatpush1.bf16.msra.mxu1 %v13435_v31  ;;  %v13501_v31 = vld [vmem:[#allocation22 + $0x70] sm:$0xff]  }
 0x680   :  { %9853 = vmatprep.subr.bf16.mxu1 %v13440_v47  ;;  %v13503_v47 = vld [vmem:[#allocation22 + $0x78] sm:$0xff]  }
 0x683   :  { %9854 = vmatpush1.bf16.msra.mxu1 %v13438_v10 }
 0x684   :  { %10184 = vmatprep.subr.bf16.mxu1 %v13443_v53 }
 0x686   :  { %9856 = vmatmul.mubr.bf16.vlgmr.msra.gmra.mrb[32].mxu1 %v9396_v54  ;;  %v10266_v54 = vld [vmem:[#allocation20] sm:$0x3] }
 0x687   :  { %10185 = vmatpush1.bf16.msra.mxu1 %v13441_v44  ;;  %10216 = vmatprep.mubr.bf16.mxu1 %v9327_v58 }
 0x688   :  { %10186 = vmatprep.subr.bf16.mxu1 %v13446_v39 }
 0x68b   :  { %10187 = vmatpush1.bf16.msra.mxu1 %v13444_v13  ;;  %v10271_v13 = vrot.slane %v10266_v54, %v14694_v26  ;;  %v11626_v26 = vld [vmem:[#allocation23] ss:$0 sm:$0xff] }
 0x68c   :  { %10188 = vmatprep.subr.bf16.mxu1 %v13449_v16 }
 0x68f   :  { %10189 = vmatpush1.bf16.msra.mxu1 %v13447_v57 }
 0x690   :  { %10190 = vmatprep.subr.bf16.mxu1 %v13452_v60  ;;  %v10275_v60 = vrot.slane %v10266_v54, %v14618_v55 }
 0x693   :  { %10191 = vmatpush1.bf16.msra.mxu1 %v13450_v62 }
 0x694   :  { %10192 = vmatprep.subr.bf16.mxu1 %v13455_v20 }
 0x697   :  { %10193 = vmatpush1.bf16.msra.mxu1 %v13453_v2 }
 0x698   :  { %10194 = vmatprep.subr.bf16.mxu1 %v13458_v12 }
 0x69b   :  { %10195 = vmatpush1.bf16.msra.mxu1 %v13456_v23 }
 0x69c   :  { %10196 = vmatprep.subr.bf16.mxu1 %v13461_v56 }
 0x69f   :  { %10197 = vmatpush1.bf16.msra.mxu1 %v13459_v4 }
 0x6a0   :  { %10198 = vmatprep.subr.bf16.mxu1 %v13464_v35 }
 0x6a3   :  { %10199 = vmatpush1.bf16.msra.mxu1 %v13462_v48 }
 0x6a4   :  { %10200 = vmatprep.subr.bf16.mxu1 %v13467_v41 }
 0x6a7   :  { %10201 = vmatpush1.bf16.msra.mxu1 %v13465_v42 }
 0x6a8   :  { %10202 = vmatprep.subr.bf16.mxu1 %v13470_v38 }
 0x6ab   :  { %10203 = vmatpush1.bf16.msra.mxu1 %v13468_v1 }
 0x6ac   :  { %10204 = vmatprep.subr.bf16.mxu1 %v13473_v22 }
 0x6af   :  { %10205 = vmatpush1.bf16.msra.mxu1 %v13471_v18 }
 0x6b0   :  { %10206 = vmatprep.subr.bf16.mxu1 %v13476_v46 }
 0x6b3   :  { %10207 = vmatpush1.bf16.msra.mxu1 %v13474_v43 }
 0x6b4   :  { %10208 = vmatprep.subr.bf16.mxu1 %v13479_v7 }
 0x6b7   :  { %10209 = vmatpush1.bf16.msra.mxu1 %v13477_v17 }
 0x6b8   :  { %10210 = vmatprep.subr.bf16.mxu1 %v13482_v21 }
 0x6bb   :  { %10211 = vmatpush1.bf16.msra.mxu1 %v13480_v8 }
 0x6bc   :  { %10212 = vmatprep.subr.bf16.mxu1 %v13485_v52 }
 0x6bf   :  { %10213 = vmatpush1.bf16.msra.mxu1 %v13483_v49 }
 0x6c0   :  { %10214 = vmatprep.subr.bf16.mxu1 %v13488_v14 }
 0x6c3   :  { %10215 = vmatpush1.bf16.msra.mxu1 %v13486_v61 }
 0x6c4   :  { %11643 = vmatprep.subr.bf16.mxu1 %v13489_v27 }
 0x6c6   :  { %10217 = vmatmul.mubr.bf16.vlgmr.msra.gmra.mrb[36].mxu1 %v9326_v9 }
 0x6c7   :  { %11644 = vmatpush3.bf16.msra.mxu1 %v13490_v45 }
 0x6c8   :  { %11645 = vmatprep.subr.bf16.mxu1 %v13491_v51 }
 0x6cb   :  { %11646 = vmatpush3.bf16.msra.mxu1 %v13492_v59 }
 0x6cc   :  { %11647 = vmatprep.subr.bf16.mxu1 %v13493_v37 }
 0x6cf   :  { %11648 = vmatpush3.bf16.msra.mxu1 %v13494_v34 }
 0x6d0   :  { %11649 = vmatprep.subr.bf16.mxu1 %v13495_v25 }
 0x6d3   :  { %11650 = vmatpush3.bf16.msra.mxu1 %v13496_v32 }
 0x6d4   :  { %11651 = vmatprep.subr.bf16.mxu1 %v13497_v0 }
 0x6d7   :  { %11652 = vmatpush3.bf16.msra.mxu1 %v13498_v29 }
 0x6d8   :  { %11653 = vmatprep.subr.bf16.mxu1 %v13499_v40 }
 0x6db   :  { %11654 = vmatpush3.bf16.msra.mxu1 %v13500_v24 }
 0x6dc   :  { %11655 = vmatprep.subr.bf16.mxu1 %v13501_v31 }
 0x6df   :  { %11656 = vmatpush3.bf16.msra.mxu1 %v13502_v33 }
 0x6e0   :  { %11657 = vmatprep.subr.bf16.mxu1 %v13503_v47 }
 0x6e3   :  { %11658 = vmatpush3.bf16.msra.mxu1 %v13504_v3 }
 0x719   :  { %v9816_v28 = vpop.f32.mrb[28].mxu1 }
 0x71a   :  { %v9818_v63 = vpop.f32.mrb[29].mxu1 }
 0x71b   :  { %v9820_v30 = vpop.f32.mrb[30].mxu1 }
 0x71c   :  { %v9821_v19 = vpop.f32.mrb[31].mxu1 }
 0x759   :  { %v9857_v36 = vpop.f32.mrb[32].mxu1 }
 0x75a   :  { %v9858_v10 = vadd.f32 %v9857_v36, %v9816_v28  ;;  %v9859_v50 = vpop.f32.mrb[33].mxu1 }
 0x75b   :  { %v9860_v53 = vadd.f32 %v9859_v50, %v9818_v63  ;;  %v9861_v5 = vpop.f32.mrb[34].mxu1 }
 0x75c   :  { %v9862_v44 = vpop.f32.mrb[35].mxu1 }
 0x799   :  { %v10218_v39 = vpop.f32.mrb[36].mxu1 }
 0x79a   :  { %v10219_v58 = vadd.f32 %v10218_v39, %v9858_v10  ;;  %v10220_v16 = vpop.f32.mrb[37].mxu1 }
 0x79b   :  { %v10221_v57 = vadd.f32 %v10220_v16, %v9860_v53  ;;  %v10222_v62 = vpop.f32.mrb[38].mxu1 }
 0x79c   :  { %v10260_v20 = vadd.f32 %v14776_v11, %v10219_v58  ;;  %v10223_v2 = vpop.f32.mrb[39].mxu1 }
 0x79d   :  { %v10262_v12 = vadd.f32 %v14779_v6, %v10221_v57 }
 0x79e   :  { %v10278_v23 = vadd.f32 %v10271_v13, %v10260_v20 }
 0x79f   :  { %v10279_v56 = vadd.f32 %v10275_v60, %v10262_v12 }
 0x7a0   :  { %v10280_v4 = vmax.f32 %v10278_v23, 0.0 }
 0x7a1   :  { %v10281_v35 = vmax.f32 %v10279_v56, 0.0 }
 0x7a2   :  { %v10282_v41 = vpack.c.bf16 %v10280_v4, %v10280_v4 }
 0x7a3   :  { %v10283_v48 = vpack.c.bf16 %v10281_v35, %v10281_v35 }
 0x7a5   :  { %10451 = vmatprep.mubr.bf16.mxu1 %v10283_v48 }
 0x7a6   :  { %10452 = vmatmul.mubr.bf16.vlgmr.msra.gmra.mrb[40].mxu1 %v10282_v41 }
 0x879   :  { %v11659_v42 = vpop.f32.mrb[40].mxu1 }
 0x87a   :  { %v11660_v38 = vpop.f32.mrb[41].mxu1 }
 0x87b   :  { %v11661_v55 = vadd.f32 %v11660_v38, %v11659_v42  ;;  %v11662_v1 = vpop.f32.mrb[42].mxu1 }
 0x87c   :  { %v11663_v22 = vpop.f32.mrb[43].mxu1 }
 0x87d   :  { %v10454_v11 = vadd.f32 %v11661_v55, %v11626_v26 }
 0x87f   :  { %10459 = vst [vmem:[#allocation25] sm:$0xff] %v10454_v11 }
 0x880   :  { %13826 = shalt.err (!%p13823_p4)
}
 0x881   :  { %s13827_s2 = scalar_lea.hbm %s14814_s15, 128 }
 0x882   :  { %p13828_p5 = scmp.ne.s32.totalorder %s14814_s15, %s13827_s2  ;;  %p13831_p6 = scmp.lt.u32.totalorder %s13827_s2, %s14814_s15 }
 0x884   :  { %p13833_p7 = pnand %p13831_p6, %p13828_p5 }
 0x886   :  { %13836 = shalt.err (!%p13833_p7)
}
 0x887   :  { %10469 = dma.vmem_to_hbm [thread:$0]  %s10467_s25, 128, %s14814_s15, [#allocation4]  }
 0x888   :  { %13853 = dma.done.wait [#allocation4], 128  }
 0x889   :  { %13854 = vsyncadd [#allocation4], 4294967168 }
 0x88a   :  { %10473 = vsyncpa [#allocation3], 1 }
 0x88b   :  { %10474 = vsyncpa [#allocation6], 1 }
 0x88c   :  { %10475 = vsyncpa [#allocation9], 1 }
 0x88d   :  { %10476 = vsyncpa [#allocation12], 1 }
 0x88e   :  { %10477 = vsyncpa [#allocation15], 1 }
 0x88f   :  { %10478 = vsyncpa [#allocation18], 1 }
 0x890   :  { %10479 = vsyncpa [#allocation21], 1 }
 0x891   :  { %10480 = vsyncpa [#allocation24], 1 }
 0x892   :  { %10481 = vsyncpa [#allocation4], 1 }

</bundles_post_ra>
